<compile_context>
chip_gen: v6e
topology: v6e:2x2x1
jax: 0.10.0
libtpu: 0.0.40
codegen_flags: <defaults>
</compile_context>

<pallas_src>
import functools
import math

import jax
import jax.numpy as jnp
import numpy as np
from jax.experimental import pallas as pl
from jax.experimental.pallas import tpu as pltpu

D_MODEL = 64
NUM_HEADS = 8
D_K = D_MODEL // NUM_HEADS
D_FF = 4 * D_MODEL
LN_EPS = 1e-5  # PyTorch LayerNorm default

# Set to jnp.bfloat16 on v6e/v7x if ~1e-2 output tolerance is acceptable (accumulation
# stays f32 via preferred_element_type).  Kept f32 here to hold the 2e-3 check.
MATMUL_DTYPE = jnp.float32


# ----------------------------- fused Pallas kernel -----------------------------

def _layernorm(t, g, b):
    mu = jnp.mean(t, axis=-1, keepdims=True)
    tc = t - mu
    var = jnp.mean(tc * tc, axis=-1, keepdims=True)
    return tc * jax.lax.rsqrt(var + LN_EPS) * g + b


def _mm(a, b):
    return jnp.dot(a.astype(MATMUL_DTYPE), b.astype(MATMUL_DTYPE),
                   preferred_element_type=jnp.float32)


def _fused_layer_kernel(x_ref, wqkv_ref, bqkv_ref, msum_ref,
                        wout_ref, bout_ref, w1_ref, b1_ref, w2_ref, b2_ref,
                        ln1g_ref, ln1b_ref, ln2g_ref, ln2b_ref,
                        o_ref, *, n_batch, n_nodes, x_chunk):
    """One full layer on a block of rows = (batch, node_x, node_y) flattened."""
    n = n_nodes
    d = x_ref.shape[-1]                                # d_model
    x = x_ref[...]                                     # (n_batch*n*n, d)

    # ---- pre-LN + fused QKV projection (single (d, 3d) MXU matmul, M = rows) ----
    h1 = _layernorm(x, ln1g_ref[...], ln1b_ref[...])
    qkv = _mm(h1, wqkv_ref[...]) + bqkv_ref[...]
    lk = qkv[:, 0 * d:1 * d]                           # rows (x, a); 1/sqrt(d_k) pre-folded
    rk = qkv[:, 1 * d:2 * d]                           # rows (a, y)
    lv = qkv[:, 2 * d:3 * d]                           # rows (x, a)
    msum = msum_ref[...]                               # (d, d) 0/1 block-diagonal head-sum

    # ---- edge attention, chunked over x-rows so each score matmul has M = x_chunk*n*n ----
    attn_chunks = []
    for b in range(n_batch):                           # n_batch is 1 or 2 (static)
        base = b * n * n
        rk_b = rk[base:base + n * n, :].reshape(n, n, d)          # (a, y, h*d_k)
        for c0 in range(0, n, x_chunk):                # n // x_chunk iterations (static)
            r0 = base + c0 * n
            lk_c = lk[r0:r0 + x_chunk * n, :].reshape(x_chunk, n, d)   # (xc, a, h*d_k)
            lv_c = lv[r0:r0 + x_chunk * n, :].reshape(x_chunk, n, d)
            prod = lk_c[:, :, None, :] * rk_b[None, :, :, :]           # (xc, a, y, h*d_k)
            # prod @ msum sums over d_k within each head and replicates the score across
            # that head's d_k lanes -> lane-dense scores, per-head reduction on the MXU.
            sc = _mm(prod.reshape(x_chunk * n * n, d), msum)
            sc = sc.reshape(x_chunk, n, n, d)                          # (xc, a, y, h*d_k)
            m = jnp.max(sc, axis=1, keepdims=True)     # softmax over a, per (x, y, h)
            e = jnp.exp(sc - m)
            denom = jnp.sum(e, axis=1)                                 # (xc, y, h*d_k)
            num = jnp.sum(e * lv_c[:, :, None, :], axis=1)             # (xc, y, h*d_k)
            attn_chunks.append((num * pl.reciprocal(denom, approx=True))
                               .reshape(x_chunk * n, d))
    attn = jnp.concatenate(attn_chunks, axis=0)        # (rows, d), heads already merged

    # ---- output projection (linears[-1]) + residual (dropout1 == identity) ----
    x1 = x + _mm(attn, wout_ref[...]) + bout_ref[...]

    # ---- pre-LN + FFN + residual (dropout2/3 == identity) ----
    h2 = _layernorm(x1, ln2g_ref[...], ln2b_ref[...])
    f = jnp.maximum(_mm(h2, w1_ref[...]) + b1_ref[...], 0.0)           # relu
    o_ref[...] = x1 + _mm(f, w2_ref[...]) + b2_ref[...]


# ----------------------------- layer wrapper ------------------------------

def edge_transformer_layer(x, params, *, fold_batch=True, x_chunk=4):
    """fold_batch=True : grid=(1,), rows = B*N*N (best on 1-TC v5e/v6e, fine everywhere).
       fold_batch=False: grid=(B,) marked "parallel" (shard batch across the 2 v7x TCs).
       x_chunk: 4 -> M=256 score matmuls (v6e/v7x MXU); use 2 on v5e (M=128)."""
    B, N, N2, D = x.shape
    assert N == N2 and D == D_MODEL and N % x_chunk == 0
    NN = N * N
    x2 = x.reshape(B * NN, D)

    # Fuse the three projection weights into one (D, 3D) matrix; fold the 1/sqrt(d_k)
    # attention scale into the left-key projection (exact, done once on the host).
    scale = 1.0 / math.sqrt(D_K)
    w_qkv = jnp.concatenate([params["w_lk"] * scale, params["w_rk"], params["w_lv"]], axis=1)
    b_qkv = jnp.concatenate([params["b_lk"] * scale, params["b_rk"], params["b_lv"]]).reshape(1, 3 * D)

    # Pure 0/1 block-diagonal head-sum matrix, built on the host (no per-step iota/select).
    hid = np.arange(D) // D_K
    msum = jnp.asarray((hid[:, None] == hid[None, :]).astype(np.float32))

    def row(v):
        return v.reshape(1, -1)

    def full(shape):
        r = len(shape)
        return pl.BlockSpec(shape, lambda *ids, _r=r: (0,) * _r)

    if fold_batch:
        grid = (1,)
        n_batch = B
        x_spec = pl.BlockSpec((B * NN, D), lambda i: (0, 0))
        sem = ("arbitrary",)
    else:
        grid = (B,)
        n_batch = 1
        x_spec = pl.BlockSpec((NN, D), lambda b: (b, 0))
        sem = ("parallel",)   # lets the two v7x TensorCores each take one batch element

    kernel = functools.partial(_fused_layer_kernel,
                               n_batch=n_batch, n_nodes=N, x_chunk=x_chunk)
    out = pl.pallas_call(
        kernel,
        out_shape=jax.ShapeDtypeStruct((B * NN, D), jnp.float32),
        grid=grid,
        in_specs=[
            x_spec,                                            # x rows
            full((D, 3 * D)), full((1, 3 * D)),                # fused QKV
            full((D, D)),                                      # head-sum matrix
            full((D, D)), full((1, D)),                        # output projection
            full((D, D_FF)), full((1, D_FF)),                  # FFN linear1
            full((D_FF, D)), full((1, D)),                     # FFN linear2
            full((1, D)), full((1, D)),                        # LN1 gamma/beta
            full((1, D)), full((1, D)),                        # LN2 gamma/beta
        ],
        out_specs=x_spec,
        compiler_params=pltpu.CompilerParams(dimension_semantics=sem),
    )(
        x2, w_qkv, b_qkv, msum,
        params["w_out"], row(params["b_out"]),
        params["w1"], row(params["b1"]),
        params["w2"], row(params["b2"]),
        row(params["ln1_g"]), row(params["ln1_b"]),
        row(params["ln2_g"]), row(params["ln2_b"]),
    )
    return out.reshape(B, N, N, D)


# --------------------------- pure-JAX reference ----------------------------

def reference_layer(x, params):
    B, N, _, D = x.shape

    def ln(t, g, b):
        mu = jnp.mean(t, axis=-1, keepdims=True)
        var = jnp.mean((t - mu) ** 2, axis=-1, keepdims=True)
        return (t - mu) / jnp.sqrt(var + LN_EPS) * g + b

    def lin(t, w, b):
        return jnp.einsum("...d,de->...e", t, w) + b

    h1 = ln(x, params["ln1_g"], params["ln1_b"])
    lk = lin(h1, params["w_lk"], params["b_lk"]).reshape(B, N, N, NUM_HEADS, D_K)
    rk = lin(h1, params["w_rk"], params["b_rk"]).reshape(B, N, N, NUM_HEADS, D_K)
    lv = lin(h1, params["w_lv"], params["b_lv"]).reshape(B, N, N, NUM_HEADS, D_K)
    scores = jnp.einsum("bxahd,bayhd->bxayh", lk, rk) / math.sqrt(D_K)
    att = jax.nn.softmax(scores, axis=2)
    o = jnp.einsum("bxayh,bxahd->bxyhd", att, lv).reshape(B, N, N, D)
    x = x + lin(o, params["w_out"], params["b_out"])
    h2 = ln(x, params["ln2_g"], params["ln2_b"])
    ff = lin(jax.nn.relu(lin(h2, params["w1"], params["b1"])),
             params["w2"], params["b2"])
    return x + ff


# --------------------------------- setup -----------------------------------

def init_params(key):
    D, Dff = D_MODEL, D_FF
    keys = jax.random.split(key, 16)

    def lin_init(kw, kb, din, dout):
        bound = 1.0 / math.sqrt(din)
        w = jax.random.uniform(kw, (din, dout), jnp.float32, -bound, bound)
        b = jax.random.uniform(kb, (dout,), jnp.float32, -bound, bound)
        return w, b

    p = {}
    p["w_lk"], p["b_lk"] = lin_init(keys[0], keys[1], D, D)
    p["w_rk"], p["b_rk"] = lin_init(keys[2], keys[3], D, D)
    p["w_lv"], p["b_lv"] = lin_init(keys[4], keys[5], D, D)
    p["w_out"], p["b_out"] = lin_init(keys[6], keys[7], D, D)
    p["w1"], p["b1"] = lin_init(keys[8], keys[9], D, Dff)
    p["w2"], p["b2"] = lin_init(keys[10], keys[11], Dff, D)
    p["ln1_g"] = 1.0 + 0.1 * jax.random.normal(keys[12], (D,), jnp.float32)
    p["ln1_b"] = 0.1 * jax.random.normal(keys[13], (D,), jnp.float32)
    p["ln2_g"] = 1.0 + 0.1 * jax.random.normal(keys[14], (D,), jnp.float32)
    p["ln2_b"] = 0.1 * jax.random.normal(keys[15], (D,), jnp.float32)
    return p


if __name__ == "__main__":
    B, N = 2, 8  # batch, num_nodes; d_model = 64, heads = 8, d_k = 8
    key = jax.random.PRNGKey(0)
    kx, kp = jax.random.split(key)
    x = jax.random.normal(kx, (B, N, N, D_MODEL), dtype=jnp.float32)
    params = init_params(kp)

    ref = jax.block_until_ready(reference_layer(x, params))

    # Default path: batch folded into rows, single grid step (best on v5e/v6e).
    layer = jax.jit(functools.partial(edge_transformer_layer, fold_batch=True, x_chunk=4))
    out = jax.block_until_ready(layer(x, params))
    assert out.shape == (B, N, N, D_MODEL)
    np.testing.assert_allclose(np.asarray(out), np.asarray(ref), rtol=2e-3, atol=2e-3)

    # Per-batch grid path (grid=(B,), "parallel") for sharding across the 2 v7x TCs.
    layer_mc = jax.jit(functools.partial(edge_transformer_layer, fold_batch=False, x_chunk=4))
    out_mc = jax.block_until_ready(layer_mc(x, params))
    np.testing.assert_allclose(np.asarray(out_mc), np.asarray(ref), rtol=2e-3, atol=2e-3)

    print("KERNEL_OK")
</pallas_src>

<mosaic_0001>
module attributes {stable_mosaic.version = 11 : i64} {
  func.func @_fused_layer_kernel(%arg0: i32, %arg1: memref<128x64xf32, #tpu.memory_space<vmem>>, %arg2: memref<64x192xf32, #tpu.memory_space<vmem>>, %arg3: memref<1x192xf32, #tpu.memory_space<vmem>>, %arg4: memref<64x64xf32, #tpu.memory_space<vmem>>, %arg5: memref<64x64xf32, #tpu.memory_space<vmem>>, %arg6: memref<1x64xf32, #tpu.memory_space<vmem>>, %arg7: memref<64x256xf32, #tpu.memory_space<vmem>>, %arg8: memref<1x256xf32, #tpu.memory_space<vmem>>, %arg9: memref<256x64xf32, #tpu.memory_space<vmem>>, %arg10: memref<1x64xf32, #tpu.memory_space<vmem>>, %arg11: memref<1x64xf32, #tpu.memory_space<vmem>>, %arg12: memref<1x64xf32, #tpu.memory_space<vmem>>, %arg13: memref<1x64xf32, #tpu.memory_space<vmem>>, %arg14: memref<1x64xf32, #tpu.memory_space<vmem>>, %arg15: memref<128x64xf32, #tpu.memory_space<vmem>>) attributes {dimension_semantics = [#tpu.dimension_semantics<arbitrary>], iteration_bounds = array<i64: 1>, scalar_prefetch = 0 : i64, scratch_operands = 0 : i64, tpu.core_type = #tpu.core_type<tc>, window_params = [{pipeline_mode = #tpu.pipeline_mode<synchronous>, transform_indices = @transform_0, window_bounds = array<i64: 128, 64>}, {pipeline_mode = #tpu.pipeline_mode<synchronous>, transform_indices = @transform_1, window_bounds = array<i64: 64, 192>}, {pipeline_mode = #tpu.pipeline_mode<synchronous>, transform_indices = @transform_2, window_bounds = array<i64: 1, 192>}, {pipeline_mode = #tpu.pipeline_mode<synchronous>, transform_indices = @transform_3, window_bounds = array<i64: 64, 64>}, {pipeline_mode = #tpu.pipeline_mode<synchronous>, transform_indices = @transform_4, window_bounds = array<i64: 64, 64>}, {pipeline_mode = #tpu.pipeline_mode<synchronous>, transform_indices = @transform_5, window_bounds = array<i64: 1, 64>}, {pipeline_mode = #tpu.pipeline_mode<synchronous>, transform_indices = @transform_6, window_bounds = array<i64: 64, 256>}, {pipeline_mode = #tpu.pipeline_mode<synchronous>, transform_indices = @transform_7, window_bounds = array<i64: 1, 256>}, {pipeline_mode = #tpu.pipeline_mode<synchronous>, transform_indices = @transform_8, window_bounds = array<i64: 256, 64>}, {pipeline_mode = #tpu.pipeline_mode<synchronous>, transform_indices = @transform_9, window_bounds = array<i64: 1, 64>}, {pipeline_mode = #tpu.pipeline_mode<synchronous>, transform_indices = @transform_10, window_bounds = array<i64: 1, 64>}, {pipeline_mode = #tpu.pipeline_mode<synchronous>, transform_indices = @transform_11, window_bounds = array<i64: 1, 64>}, {pipeline_mode = #tpu.pipeline_mode<synchronous>, transform_indices = @transform_12, window_bounds = array<i64: 1, 64>}, {pipeline_mode = #tpu.pipeline_mode<synchronous>, transform_indices = @transform_13, window_bounds = array<i64: 1, 64>}, {pipeline_mode = #tpu.pipeline_mode<synchronous>, transform_indices = @transform_14, window_bounds = array<i64: 128, 64>}]} {
    %c0 = arith.constant 0 : index
    %c0_0 = arith.constant 0 : index
    %0 = vector.load %arg1[%c0, %c0_0] : memref<128x64xf32, #tpu.memory_space<vmem>>, vector<128x64xf32>
    %c0_1 = arith.constant 0 : index
    %c0_2 = arith.constant 0 : index
    %1 = vector.load %arg11[%c0_1, %c0_2] : memref<1x64xf32, #tpu.memory_space<vmem>>, vector<1x64xf32>
    %c0_3 = arith.constant 0 : index
    %c0_4 = arith.constant 0 : index
    %2 = vector.load %arg12[%c0_3, %c0_4] : memref<1x64xf32, #tpu.memory_space<vmem>>, vector<1x64xf32>
    %cst = arith.constant dense<0.000000e+00> : vector<128xf32>
    %3 = vector.multi_reduction <add>, %0, %cst [1] : vector<128x64xf32> to vector<128xf32>
    %4 = vector.shape_cast %3 : vector<128xf32> to vector<128x1xf32>
    %cst_5 = arith.constant 6.400000e+01 : f32
    %5 = vector.broadcast %cst_5 : f32 to vector<128x1xf32>
    %6 = arith.divf %4, %5 : vector<128x1xf32>
    %7 = vector.broadcast %6 : vector<128x1xf32> to vector<128x64xf32>
    %8 = arith.subf %0, %7 : vector<128x64xf32>
    %9 = arith.mulf %8, %8 : vector<128x64xf32>
    %cst_6 = arith.constant dense<0.000000e+00> : vector<128xf32>
    %10 = vector.multi_reduction <add>, %9, %cst_6 [1] : vector<128x64xf32> to vector<128xf32>
    %11 = vector.shape_cast %10 : vector<128xf32> to vector<128x1xf32>
    %cst_7 = arith.constant 6.400000e+01 : f32
    %12 = vector.broadcast %cst_7 : f32 to vector<128x1xf32>
    %13 = arith.divf %11, %12 : vector<128x1xf32>
    %cst_8 = arith.constant 9.99999974E-6 : f32
    %14 = vector.broadcast %cst_8 : f32 to vector<128x1xf32>
    %15 = arith.addf %13, %14 : vector<128x1xf32>
    %16 = math.rsqrt %15 : vector<128x1xf32>
    %17 = vector.broadcast %16 : vector<128x1xf32> to vector<128x64xf32>
    %18 = arith.mulf %8, %17 : vector<128x64xf32>
    %19 = vector.broadcast %1 : vector<1x64xf32> to vector<128x64xf32>
    %20 = arith.mulf %18, %19 : vector<128x64xf32>
    %21 = vector.broadcast %2 : vector<1x64xf32> to vector<128x64xf32>
    %22 = arith.addf %20, %21 : vector<128x64xf32>
    %c0_9 = arith.constant 0 : index
    %c0_10 = arith.constant 0 : index
    %23 = vector.load %arg2[%c0_9, %c0_10] : memref<64x192xf32, #tpu.memory_space<vmem>>, vector<64x192xf32>
    %cst_11 = arith.constant dense<0.000000e+00> : vector<128x192xf32>
    %24 = tpu.matmul %22, %23, %cst_11 {dimension_numbers = #tpu.dot_dimension_numbers<[1], [0], [0], [1], [0, 0, 1, 1], [], []>} : vector<128x64xf32>, vector<64x192xf32>, vector<128x192xf32> -> vector<128x192xf32>
    %c0_12 = arith.constant 0 : index
    %c0_13 = arith.constant 0 : index
    %25 = vector.load %arg3[%c0_12, %c0_13] : memref<1x192xf32, #tpu.memory_space<vmem>>, vector<1x192xf32>
    %26 = vector.broadcast %25 : vector<1x192xf32> to vector<128x192xf32>
    %27 = arith.addf %24, %26 : vector<128x192xf32>
    %28 = vector.extract_strided_slice %27 {offsets = [0, 0], sizes = [128, 64], strides = [1, 1]} : vector<128x192xf32> to vector<128x64xf32>
    %29 = vector.extract_strided_slice %27 {offsets = [0, 64], sizes = [128, 64], strides = [1, 1]} : vector<128x192xf32> to vector<128x64xf32>
    %30 = vector.extract_strided_slice %27 {offsets = [0, 128], sizes = [128, 64], strides = [1, 1]} : vector<128x192xf32> to vector<128x64xf32>
    %c0_14 = arith.constant 0 : index
    %c0_15 = arith.constant 0 : index
    %31 = vector.load %arg4[%c0_14, %c0_15] : memref<64x64xf32, #tpu.memory_space<vmem>>, vector<64x64xf32>
    %32 = vector.extract_strided_slice %29 {offsets = [0, 0], sizes = [64, 64], strides = [1, 1]} : vector<128x64xf32> to vector<64x64xf32>
    %33 = vector.shape_cast %32 : vector<64x64xf32> to vector<8x8x64xf32>
    %34 = vector.extract_strided_slice %28 {offsets = [0, 0], sizes = [32, 64], strides = [1, 1]} : vector<128x64xf32> to vector<32x64xf32>
    %35 = vector.shape_cast %34 : vector<32x64xf32> to vector<4x8x64xf32>
    %36 = vector.extract_strided_slice %30 {offsets = [0, 0], sizes = [32, 64], strides = [1, 1]} : vector<128x64xf32> to vector<32x64xf32>
    %37 = vector.shape_cast %36 : vector<32x64xf32> to vector<4x8x64xf32>
    %38 = vector.shape_cast %35 : vector<4x8x64xf32> to vector<4x8x1x64xf32>
    %39 = vector.shape_cast %33 : vector<8x8x64xf32> to vector<1x8x8x64xf32>
    %40 = vector.broadcast %38 : vector<4x8x1x64xf32> to vector<4x8x8x64xf32>
    %41 = vector.broadcast %39 : vector<1x8x8x64xf32> to vector<4x8x8x64xf32>
    %42 = arith.mulf %40, %41 : vector<4x8x8x64xf32>
    %43 = vector.shape_cast %42 : vector<4x8x8x64xf32> to vector<256x64xf32>
    %cst_16 = arith.constant dense<0.000000e+00> : vector<256x64xf32>
    %44 = tpu.matmul %43, %31, %cst_16 {dimension_numbers = #tpu.dot_dimension_numbers<[1], [0], [0], [1], [0, 0, 1, 1], [], []>} : vector<256x64xf32>, vector<64x64xf32>, vector<256x64xf32> -> vector<256x64xf32>
    %45 = vector.shape_cast %44 : vector<256x64xf32> to vector<4x8x8x64xf32>
    %cst_17 = arith.constant dense<0xFF800000> : vector<4x8x64xf32>
    %46 = vector.multi_reduction <maximumf>, %45, %cst_17 [1] : vector<4x8x8x64xf32> to vector<4x8x64xf32>
    %47 = vector.shape_cast %46 : vector<4x8x64xf32> to vector<4x1x8x64xf32>
    %48 = vector.broadcast %47 : vector<4x1x8x64xf32> to vector<4x8x8x64xf32>
    %49 = arith.subf %45, %48 : vector<4x8x8x64xf32>
    %50 = math.exp %49 : vector<4x8x8x64xf32>
    %cst_18 = arith.constant dense<0.000000e+00> : vector<4x8x64xf32>
    %51 = vector.multi_reduction <add>, %50, %cst_18 [1] : vector<4x8x8x64xf32> to vector<4x8x64xf32>
    %52 = vector.shape_cast %37 : vector<4x8x64xf32> to vector<4x8x1x64xf32>
    %53 = vector.broadcast %52 : vector<4x8x1x64xf32> to vector<4x8x8x64xf32>
    %54 = arith.mulf %50, %53 : vector<4x8x8x64xf32>
    %cst_19 = arith.constant dense<0.000000e+00> : vector<4x8x64xf32>
    %55 = vector.multi_reduction <add>, %54, %cst_19 [1] : vector<4x8x8x64xf32> to vector<4x8x64xf32>
    %56 = tpu.reciprocal %51 {approx = true} : vector<4x8x64xf32> -> vector<4x8x64xf32>
    %57 = arith.mulf %55, %56 : vector<4x8x64xf32>
    %58 = vector.shape_cast %57 : vector<4x8x64xf32> to vector<32x64xf32>
    %59 = vector.extract_strided_slice %28 {offsets = [32, 0], sizes = [32, 64], strides = [1, 1]} : vector<128x64xf32> to vector<32x64xf32>
    %60 = vector.shape_cast %59 : vector<32x64xf32> to vector<4x8x64xf32>
    %61 = vector.extract_strided_slice %30 {offsets = [32, 0], sizes = [32, 64], strides = [1, 1]} : vector<128x64xf32> to vector<32x64xf32>
    %62 = vector.shape_cast %61 : vector<32x64xf32> to vector<4x8x64xf32>
    %63 = vector.shape_cast %60 : vector<4x8x64xf32> to vector<4x8x1x64xf32>
    %64 = vector.shape_cast %33 : vector<8x8x64xf32> to vector<1x8x8x64xf32>
    %65 = vector.broadcast %63 : vector<4x8x1x64xf32> to vector<4x8x8x64xf32>
    %66 = vector.broadcast %64 : vector<1x8x8x64xf32> to vector<4x8x8x64xf32>
    %67 = arith.mulf %65, %66 : vector<4x8x8x64xf32>
    %68 = vector.shape_cast %67 : vector<4x8x8x64xf32> to vector<256x64xf32>
    %cst_20 = arith.constant dense<0.000000e+00> : vector<256x64xf32>
    %69 = tpu.matmul %68, %31, %cst_20 {dimension_numbers = #tpu.dot_dimension_numbers<[1], [0], [0], [1], [0, 0, 1, 1], [], []>} : vector<256x64xf32>, vector<64x64xf32>, vector<256x64xf32> -> vector<256x64xf32>
    %70 = vector.shape_cast %69 : vector<256x64xf32> to vector<4x8x8x64xf32>
    %cst_21 = arith.constant dense<0xFF800000> : vector<4x8x64xf32>
    %71 = vector.multi_reduction <maximumf>, %70, %cst_21 [1] : vector<4x8x8x64xf32> to vector<4x8x64xf32>
    %72 = vector.shape_cast %71 : vector<4x8x64xf32> to vector<4x1x8x64xf32>
    %73 = vector.broadcast %72 : vector<4x1x8x64xf32> to vector<4x8x8x64xf32>
    %74 = arith.subf %70, %73 : vector<4x8x8x64xf32>
    %75 = math.exp %74 : vector<4x8x8x64xf32>
    %cst_22 = arith.constant dense<0.000000e+00> : vector<4x8x64xf32>
    %76 = vector.multi_reduction <add>, %75, %cst_22 [1] : vector<4x8x8x64xf32> to vector<4x8x64xf32>
    %77 = vector.shape_cast %62 : vector<4x8x64xf32> to vector<4x8x1x64xf32>
    %78 = vector.broadcast %77 : vector<4x8x1x64xf32> to vector<4x8x8x64xf32>
    %79 = arith.mulf %75, %78 : vector<4x8x8x64xf32>
    %cst_23 = arith.constant dense<0.000000e+00> : vector<4x8x64xf32>
    %80 = vector.multi_reduction <add>, %79, %cst_23 [1] : vector<4x8x8x64xf32> to vector<4x8x64xf32>
    %81 = tpu.reciprocal %76 {approx = true} : vector<4x8x64xf32> -> vector<4x8x64xf32>
    %82 = arith.mulf %80, %81 : vector<4x8x64xf32>
    %83 = vector.shape_cast %82 : vector<4x8x64xf32> to vector<32x64xf32>
    %84 = vector.extract_strided_slice %29 {offsets = [64, 0], sizes = [64, 64], strides = [1, 1]} : vector<128x64xf32> to vector<64x64xf32>
    %85 = vector.shape_cast %84 : vector<64x64xf32> to vector<8x8x64xf32>
    %86 = vector.extract_strided_slice %28 {offsets = [64, 0], sizes = [32, 64], strides = [1, 1]} : vector<128x64xf32> to vector<32x64xf32>
    %87 = vector.shape_cast %86 : vector<32x64xf32> to vector<4x8x64xf32>
    %88 = vector.extract_strided_slice %30 {offsets = [64, 0], sizes = [32, 64], strides = [1, 1]} : vector<128x64xf32> to vector<32x64xf32>
    %89 = vector.shape_cast %88 : vector<32x64xf32> to vector<4x8x64xf32>
    %90 = vector.shape_cast %87 : vector<4x8x64xf32> to vector<4x8x1x64xf32>
    %91 = vector.shape_cast %85 : vector<8x8x64xf32> to vector<1x8x8x64xf32>
    %92 = vector.broadcast %90 : vector<4x8x1x64xf32> to vector<4x8x8x64xf32>
    %93 = vector.broadcast %91 : vector<1x8x8x64xf32> to vector<4x8x8x64xf32>
    %94 = arith.mulf %92, %93 : vector<4x8x8x64xf32>
    %95 = vector.shape_cast %94 : vector<4x8x8x64xf32> to vector<256x64xf32>
    %cst_24 = arith.constant dense<0.000000e+00> : vector<256x64xf32>
    %96 = tpu.matmul %95, %31, %cst_24 {dimension_numbers = #tpu.dot_dimension_numbers<[1], [0], [0], [1], [0, 0, 1, 1], [], []>} : vector<256x64xf32>, vector<64x64xf32>, vector<256x64xf32> -> vector<256x64xf32>
    %97 = vector.shape_cast %96 : vector<256x64xf32> to vector<4x8x8x64xf32>
    %cst_25 = arith.constant dense<0xFF800000> : vector<4x8x64xf32>
    %98 = vector.multi_reduction <maximumf>, %97, %cst_25 [1] : vector<4x8x8x64xf32> to vector<4x8x64xf32>
    %99 = vector.shape_cast %98 : vector<4x8x64xf32> to vector<4x1x8x64xf32>
    %100 = vector.broadcast %99 : vector<4x1x8x64xf32> to vector<4x8x8x64xf32>
    %101 = arith.subf %97, %100 : vector<4x8x8x64xf32>
    %102 = math.exp %101 : vector<4x8x8x64xf32>
    %cst_26 = arith.constant dense<0.000000e+00> : vector<4x8x64xf32>
    %103 = vector.multi_reduction <add>, %102, %cst_26 [1] : vector<4x8x8x64xf32> to vector<4x8x64xf32>
    %104 = vector.shape_cast %89 : vector<4x8x64xf32> to vector<4x8x1x64xf32>
    %105 = vector.broadcast %104 : vector<4x8x1x64xf32> to vector<4x8x8x64xf32>
    %106 = arith.mulf %102, %105 : vector<4x8x8x64xf32>
    %cst_27 = arith.constant dense<0.000000e+00> : vector<4x8x64xf32>
    %107 = vector.multi_reduction <add>, %106, %cst_27 [1] : vector<4x8x8x64xf32> to vector<4x8x64xf32>
    %108 = tpu.reciprocal %103 {approx = true} : vector<4x8x64xf32> -> vector<4x8x64xf32>
    %109 = arith.mulf %107, %108 : vector<4x8x64xf32>
    %110 = vector.shape_cast %109 : vector<4x8x64xf32> to vector<32x64xf32>
    %111 = vector.extract_strided_slice %28 {offsets = [96, 0], sizes = [32, 64], strides = [1, 1]} : vector<128x64xf32> to vector<32x64xf32>
    %112 = vector.shape_cast %111 : vector<32x64xf32> to vector<4x8x64xf32>
    %113 = vector.extract_strided_slice %30 {offsets = [96, 0], sizes = [32, 64], strides = [1, 1]} : vector<128x64xf32> to vector<32x64xf32>
    %114 = vector.shape_cast %113 : vector<32x64xf32> to vector<4x8x64xf32>
    %115 = vector.shape_cast %112 : vector<4x8x64xf32> to vector<4x8x1x64xf32>
    %116 = vector.shape_cast %85 : vector<8x8x64xf32> to vector<1x8x8x64xf32>
    %117 = vector.broadcast %115 : vector<4x8x1x64xf32> to vector<4x8x8x64xf32>
    %118 = vector.broadcast %116 : vector<1x8x8x64xf32> to vector<4x8x8x64xf32>
    %119 = arith.mulf %117, %118 : vector<4x8x8x64xf32>
    %120 = vector.shape_cast %119 : vector<4x8x8x64xf32> to vector<256x64xf32>
    %cst_28 = arith.constant dense<0.000000e+00> : vector<256x64xf32>
    %121 = tpu.matmul %120, %31, %cst_28 {dimension_numbers = #tpu.dot_dimension_numbers<[1], [0], [0], [1], [0, 0, 1, 1], [], []>} : vector<256x64xf32>, vector<64x64xf32>, vector<256x64xf32> -> vector<256x64xf32>
    %122 = vector.shape_cast %121 : vector<256x64xf32> to vector<4x8x8x64xf32>
    %cst_29 = arith.constant dense<0xFF800000> : vector<4x8x64xf32>
    %123 = vector.multi_reduction <maximumf>, %122, %cst_29 [1] : vector<4x8x8x64xf32> to vector<4x8x64xf32>
    %124 = vector.shape_cast %123 : vector<4x8x64xf32> to vector<4x1x8x64xf32>
    %125 = vector.broadcast %124 : vector<4x1x8x64xf32> to vector<4x8x8x64xf32>
    %126 = arith.subf %122, %125 : vector<4x8x8x64xf32>
    %127 = math.exp %126 : vector<4x8x8x64xf32>
    %cst_30 = arith.constant dense<0.000000e+00> : vector<4x8x64xf32>
    %128 = vector.multi_reduction <add>, %127, %cst_30 [1] : vector<4x8x8x64xf32> to vector<4x8x64xf32>
    %129 = vector.shape_cast %114 : vector<4x8x64xf32> to vector<4x8x1x64xf32>
    %130 = vector.broadcast %129 : vector<4x8x1x64xf32> to vector<4x8x8x64xf32>
    %131 = arith.mulf %127, %130 : vector<4x8x8x64xf32>
    %cst_31 = arith.constant dense<0.000000e+00> : vector<4x8x64xf32>
    %132 = vector.multi_reduction <add>, %131, %cst_31 [1] : vector<4x8x8x64xf32> to vector<4x8x64xf32>
    %133 = tpu.reciprocal %128 {approx = true} : vector<4x8x64xf32> -> vector<4x8x64xf32>
    %134 = arith.mulf %132, %133 : vector<4x8x64xf32>
    %135 = vector.shape_cast %134 : vector<4x8x64xf32> to vector<32x64xf32>
    %136 = tpu.concatenate %58, %83, %110, %135 in 0 : vector<32x64xf32>, vector<32x64xf32>, vector<32x64xf32>, vector<32x64xf32> -> vector<128x64xf32>
    %c0_32 = arith.constant 0 : index
    %c0_33 = arith.constant 0 : index
    %137 = vector.load %arg5[%c0_32, %c0_33] : memref<64x64xf32, #tpu.memory_space<vmem>>, vector<64x64xf32>
    %cst_34 = arith.constant dense<0.000000e+00> : vector<128x64xf32>
    %138 = tpu.matmul %136, %137, %cst_34 {dimension_numbers = #tpu.dot_dimension_numbers<[1], [0], [0], [1], [0, 0, 1, 1], [], []>} : vector<128x64xf32>, vector<64x64xf32>, vector<128x64xf32> -> vector<128x64xf32>
    %139 = arith.addf %0, %138 : vector<128x64xf32>
    %c0_35 = arith.constant 0 : index
    %c0_36 = arith.constant 0 : index
    %140 = vector.load %arg6[%c0_35, %c0_36] : memref<1x64xf32, #tpu.memory_space<vmem>>, vector<1x64xf32>
    %141 = vector.broadcast %140 : vector<1x64xf32> to vector<128x64xf32>
    %142 = arith.addf %139, %141 : vector<128x64xf32>
    %c0_37 = arith.constant 0 : index
    %c0_38 = arith.constant 0 : index
    %143 = vector.load %arg13[%c0_37, %c0_38] : memref<1x64xf32, #tpu.memory_space<vmem>>, vector<1x64xf32>
    %c0_39 = arith.constant 0 : index
    %c0_40 = arith.constant 0 : index
    %144 = vector.load %arg14[%c0_39, %c0_40] : memref<1x64xf32, #tpu.memory_space<vmem>>, vector<1x64xf32>
    %cst_41 = arith.constant dense<0.000000e+00> : vector<128xf32>
    %145 = vector.multi_reduction <add>, %142, %cst_41 [1] : vector<128x64xf32> to vector<128xf32>
    %146 = vector.shape_cast %145 : vector<128xf32> to vector<128x1xf32>
    %cst_42 = arith.constant 6.400000e+01 : f32
    %147 = vector.broadcast %cst_42 : f32 to vector<128x1xf32>
    %148 = arith.divf %146, %147 : vector<128x1xf32>
    %149 = vector.broadcast %148 : vector<128x1xf32> to vector<128x64xf32>
    %150 = arith.subf %142, %149 : vector<128x64xf32>
    %151 = arith.mulf %150, %150 : vector<128x64xf32>
    %cst_43 = arith.constant dense<0.000000e+00> : vector<128xf32>
    %152 = vector.multi_reduction <add>, %151, %cst_43 [1] : vector<128x64xf32> to vector<128xf32>
    %153 = vector.shape_cast %152 : vector<128xf32> to vector<128x1xf32>
    %cst_44 = arith.constant 6.400000e+01 : f32
    %154 = vector.broadcast %cst_44 : f32 to vector<128x1xf32>
    %155 = arith.divf %153, %154 : vector<128x1xf32>
    %cst_45 = arith.constant 9.99999974E-6 : f32
    %156 = vector.broadcast %cst_45 : f32 to vector<128x1xf32>
    %157 = arith.addf %155, %156 : vector<128x1xf32>
    %158 = math.rsqrt %157 : vector<128x1xf32>
    %159 = vector.broadcast %158 : vector<128x1xf32> to vector<128x64xf32>
    %160 = arith.mulf %150, %159 : vector<128x64xf32>
    %161 = vector.broadcast %143 : vector<1x64xf32> to vector<128x64xf32>
    %162 = arith.mulf %160, %161 : vector<128x64xf32>
    %163 = vector.broadcast %144 : vector<1x64xf32> to vector<128x64xf32>
    %164 = arith.addf %162, %163 : vector<128x64xf32>
    %c0_46 = arith.constant 0 : index
    %c0_47 = arith.constant 0 : index
    %165 = vector.load %arg7[%c0_46, %c0_47] : memref<64x256xf32, #tpu.memory_space<vmem>>, vector<64x256xf32>
    %cst_48 = arith.constant dense<0.000000e+00> : vector<128x256xf32>
    %166 = tpu.matmul %164, %165, %cst_48 {dimension_numbers = #tpu.dot_dimension_numbers<[1], [0], [0], [1], [0, 0, 1, 1], [], []>} : vector<128x64xf32>, vector<64x256xf32>, vector<128x256xf32> -> vector<128x256xf32>
    %c0_49 = arith.constant 0 : index
    %c0_50 = arith.constant 0 : index
    %167 = vector.load %arg8[%c0_49, %c0_50] : memref<1x256xf32, #tpu.memory_space<vmem>>, vector<1x256xf32>
    %168 = vector.broadcast %167 : vector<1x256xf32> to vector<128x256xf32>
    %169 = arith.addf %166, %168 : vector<128x256xf32>
    %cst_51 = arith.constant 0.000000e+00 : f32
    %170 = vector.broadcast %cst_51 : f32 to vector<128x256xf32>
    %171 = arith.maximumf %169, %170 : vector<128x256xf32>
    %c0_52 = arith.constant 0 : index
    %c0_53 = arith.constant 0 : index
    %172 = vector.load %arg9[%c0_52, %c0_53] : memref<256x64xf32, #tpu.memory_space<vmem>>, vector<256x64xf32>
    %cst_54 = arith.constant dense<0.000000e+00> : vector<128x64xf32>
    %173 = tpu.matmul %171, %172, %cst_54 {dimension_numbers = #tpu.dot_dimension_numbers<[1], [0], [0], [1], [0, 0, 1, 1], [], []>} : vector<128x256xf32>, vector<256x64xf32>, vector<128x64xf32> -> vector<128x64xf32>
    %174 = arith.addf %142, %173 : vector<128x64xf32>
    %c0_55 = arith.constant 0 : index
    %c0_56 = arith.constant 0 : index
    %175 = vector.load %arg10[%c0_55, %c0_56] : memref<1x64xf32, #tpu.memory_space<vmem>>, vector<1x64xf32>
    %176 = vector.broadcast %175 : vector<1x64xf32> to vector<128x64xf32>
    %177 = arith.addf %174, %176 : vector<128x64xf32>
    %c0_57 = arith.constant 0 : index
    %c0_58 = arith.constant 0 : index
    %178 = vector.load %arg15[%c0_57, %c0_58] : memref<128x64xf32, #tpu.memory_space<vmem>>, vector<128x64xf32>
    tpu.vector_store %arg15[%c0_57, %c0_58], %177 {strides = array<i32>} : memref<128x64xf32, #tpu.memory_space<vmem>>, vector<128x64xf32>,
    return
  }
  func.func @transform_0(%arg0: i32) -> (i32, i32) {
    %c0_i32 = arith.constant 0 : i32
    %c0_i32_0 = arith.constant 0 : i32
    %c0_i32_1 = arith.constant 0 : i32
    return %c0_i32, %c0_i32_0 : i32, i32
  }
  func.func @transform_1(%arg0: i32) -> (i32, i32) {
    %c0_i32 = arith.constant 0 : i32
    %c0_i32_0 = arith.constant 0 : i32
    %c0_i32_1 = arith.constant 0 : i32
    return %c0_i32, %c0_i32_0 : i32, i32
  }
  func.func @transform_2(%arg0: i32) -> (i32, i32) {
    %c0_i32 = arith.constant 0 : i32
    %c0_i32_0 = arith.constant 0 : i32
    %c0_i32_1 = arith.constant 0 : i32
    return %c0_i32, %c0_i32_0 : i32, i32
  }
  func.func @transform_3(%arg0: i32) -> (i32, i32) {
    %c0_i32 = arith.constant 0 : i32
    %c0_i32_0 = arith.constant 0 : i32
    %c0_i32_1 = arith.constant 0 : i32
    return %c0_i32, %c0_i32_0 : i32, i32
  }
  func.func @transform_4(%arg0: i32) -> (i32, i32) {
    %c0_i32 = arith.constant 0 : i32
    %c0_i32_0 = arith.constant 0 : i32
    %c0_i32_1 = arith.constant 0 : i32
    return %c0_i32, %c0_i32_0 : i32, i32
  }
  func.func @transform_5(%arg0: i32) -> (i32, i32) {
    %c0_i32 = arith.constant 0 : i32
    %c0_i32_0 = arith.constant 0 : i32
    %c0_i32_1 = arith.constant 0 : i32
    return %c0_i32, %c0_i32_0 : i32, i32
  }
  func.func @transform_6(%arg0: i32) -> (i32, i32) {
    %c0_i32 = arith.constant 0 : i32
    %c0_i32_0 = arith.constant 0 : i32
    %c0_i32_1 = arith.constant 0 : i32
    return %c0_i32, %c0_i32_0 : i32, i32
  }
  func.func @transform_7(%arg0: i32) -> (i32, i32) {
    %c0_i32 = arith.constant 0 : i32
    %c0_i32_0 = arith.constant 0 : i32
    %c0_i32_1 = arith.constant 0 : i32
    return %c0_i32, %c0_i32_0 : i32, i32
  }
  func.func @transform_8(%arg0: i32) -> (i32, i32) {
    %c0_i32 = arith.constant 0 : i32
    %c0_i32_0 = arith.constant 0 : i32
    %c0_i32_1 = arith.constant 0 : i32
    return %c0_i32, %c0_i32_0 : i32, i32
  }
  func.func @transform_9(%arg0: i32) -> (i32, i32) {
    %c0_i32 = arith.constant 0 : i32
    %c0_i32_0 = arith.constant 0 : i32
    %c0_i32_1 = arith.constant 0 : i32
    return %c0_i32, %c0_i32_0 : i32, i32
  }
  func.func @transform_10(%arg0: i32) -> (i32, i32) {
    %c0_i32 = arith.constant 0 : i32
    %c0_i32_0 = arith.constant 0 : i32
    %c0_i32_1 = arith.constant 0 : i32
    return %c0_i32, %c0_i32_0 : i32, i32
  }
  func.func @transform_11(%arg0: i32) -> (i32, i32) {
    %c0_i32 = arith.constant 0 : i32
    %c0_i32_0 = arith.constant 0 : i32
    %c0_i32_1 = arith.constant 0 : i32
    return %c0_i32, %c0_i32_0 : i32, i32
  }
  func.func @transform_12(%arg0: i32) -> (i32, i32) {
    %c0_i32 = arith.constant 0 : i32
    %c0_i32_0 = arith.constant 0 : i32
    %c0_i32_1 = arith.constant 0 : i32
    return %c0_i32, %c0_i32_0 : i32, i32
  }
  func.func @transform_13(%arg0: i32) -> (i32, i32) {
    %c0_i32 = arith.constant 0 : i32
    %c0_i32_0 = arith.constant 0 : i32
    %c0_i32_1 = arith.constant 0 : i32
    return %c0_i32, %c0_i32_0 : i32, i32
  }
  func.func @transform_14(%arg0: i32) -> (i32, i32) {
    %c0_i32 = arith.constant 0 : i32
    %c0_i32_0 = arith.constant 0 : i32
    %c0_i32_1 = arith.constant 0 : i32
    return %c0_i32, %c0_i32_0 : i32, i32
  }
}

</mosaic_0001>

<bundles_post_ra>
// kernel: edge_transformer_layer.1
= control target key start
LH: loop header
LB: loop body
LE: loop exit
PB: predicated region body
PF: predicated region fallthrough
CT: control target
= control target key end

     0   :  { %vm66_vm0 = vcmask 523264   ;;  %s13031_s0 = inlined_call_operand.vmem [shape: f32[128,64], index: 0, kind: input, shape index: {}]   ;;  %s13032_s1 = inlined_call_operand.vmem [shape: f32[64,192], index: 1, kind: input, shape index: {}]   ;;  %s13033_s2 = inlined_call_operand.vmem [shape: f32[1,192], index: 2, kind: input, shape index: {}]   ;;  %s13034_s3 = inlined_call_operand.vmem [shape: f32[64,64], index: 3, kind: input, shape index: {}]   ;;  %s13035_s4 = inlined_call_operand.vmem [shape: f32[64,64], index: 4, kind: input, shape index: {}]   ;;  %s13036_s5 = inlined_call_operand.vmem [shape: f32[1,64], index: 5, kind: input, shape index: {}]   ;;  %s13037_s6 = inlined_call_operand.vmem [shape: f32[64,256], index: 6, kind: input, shape index: {}]   ;;  %s13038_s7 = inlined_call_operand.vmem [shape: f32[1,256], index: 7, kind: input, shape index: {}]   ;;  %s13039_s8 = inlined_call_operand.vmem [shape: f32[256,64], index: 8, kind: input, shape index: {}]   ;;  %s13040_s9 = inlined_call_operand.vmem [shape: f32[1,64], index: 9, kind: input, shape index: {}]   ;;  %s13041_s10 = inlined_call_operand.vmem [shape: f32[1,64], index: 10, kind: input, shape index: {}]   ;;  %s13042_s11 = inlined_call_operand.vmem [shape: f32[1,64], index: 11, kind: input, shape index: {}]   ;;  %s13043_s12 = inlined_call_operand.vmem [shape: f32[1,64], index: 12, kind: input, shape index: {}]   ;;  %s13044_s13 = inlined_call_operand.vmem [shape: f32[1,64], index: 13, kind: input, shape index: {}]   ;;  %s13045_s14 = inlined_call_operand.hbm [shape: f32[128,64], index: 14, kind: output, shape index: {}]  }
   0x1   :  { %v48_v0 = vld [vmem:[%s13031_s0] sm:$0xff]  ;;  %v49_v1 = vld [vmem:[%s13031_s0 + $0x8] sm:$0xff]  ;;  %v50_v2 = vld [vmem:[%s13031_s0 + $0x10] sm:$0xff] }
   0x2   :  { %v67_v3 = vsel %vm66_vm0, %v48_v0, 0.0  ;;  %v73_v4 = vsel %vm66_vm0, %v50_v2, 0.0  ;;  %v51_v5 = vld [vmem:[%s13031_s0 + $0x18] sm:$0xff]  ;;  %v70_v6 = vsel %vm66_vm0, %v49_v1, 0.0  ;;  %v53_v8 = vld [vmem:[%s13031_s0 + $0x28] sm:$0xff]  ;;  %v52_v9 = vld [vmem:[%s13031_s0 + $0x20] sm:$0xff] }
   0x3   :  { %68 = vadd.xlane.f32.xlu0 %v67_v3  ;;  %74 = vadd.xlane.f32.xlu1 %v73_v4  ;;  %v76_v7 = vsel %vm66_vm0, %v51_v5, 0.0 }
   0x4   :  { %19 = vsyncpa [#allocation3], 0  ;;  %v82_v10 = vsel %vm66_vm0, %v53_v8, 0.0  ;;  %v79_v11 = vsel %vm66_vm0, %v52_v9, 0.0  ;;  %v8442_v12 = vld [vmem:[%s13031_s0 + $0x38] sm:$0xff]  ;;  %v54_v13 = vld [vmem:[%s13031_s0 + $0x30] sm:$0xff] }
   0x5   :  { %v88_v14 = vsel %vm66_vm0, %v8442_v12, 0.0  ;;  %v85_v15 = vsel %vm66_vm0, %v54_v13, 0.0  ;;  %v8453_v16 = vld [vmem:[%s13031_s0 + $0x48] sm:$0xff]  ;;  %v8458_v17 = vld [vmem:[%s13031_s0 + $0x40] sm:$0xff]  ;;  %v8467_v20 = vld [vmem:[%s13031_s0 + $0x50] sm:$0xff]  ;;  %s8335_s30 = smov 64  }
   0x6   :  { %v94_v18 = vsel %vm66_vm0, %v8453_v16, 0.0  ;;  %v91_v19 = vsel %vm66_vm0, %v8458_v17, 0.0  ;;  %v8472_v21 = vld [vmem:[%s13031_s0 + $0x60] sm:$0xff]  ;;  %v97_v22 = vsel %vm66_vm0, %v8467_v20, 0.0  ;;  %v8487_v35 = vld [vmem:[%s13031_s0 + $0x58] sm:$0xff]  ;;  %v8503_v44 = vld [vmem:[%s13031_s0 + $0x68] sm:$0xff] }
   0x7   :  { %71 = vadd.xlane.f32.xlu0 %v70_v6  ;;  %77 = vadd.xlane.f32.xlu1 %v76_v7  ;;  %v103_v23 = vsel %vm66_vm0, %v8472_v21, 0.0  ;;  %v100_v38 = vsel %vm66_vm0, %v8487_v35, 0.0  ;;  %v106_v48 = vsel %vm66_vm0, %v8503_v44, 0.0  ;;  %v8516_v54 = vld [vmem:[%s13031_s0 + $0x70] sm:$0xff]  ;;  %v8528_v63 = vld [vmem:[%s13031_s0 + $0x78] sm:$0xff] }
   0x8   :  { %v109_v58 = vsel %vm66_vm0, %v8516_v54, 0.0  ;;  %v112_v4 = vsel %vm66_vm0, %v8528_v63, 0.0 }
   0xb   :  { %83 = vadd.xlane.f32.xlu1 %v82_v10  ;;  %80 = vadd.xlane.f32.xlu0 %v79_v11 }
   0xf   :  { %89 = vadd.xlane.f32.xlu1 %v88_v14  ;;  %86 = vadd.xlane.f32.xlu0 %v85_v15 }
  0x13   :  { %95 = vadd.xlane.f32.xlu1 %v94_v18  ;;  %92 = vadd.xlane.f32.xlu0 %v91_v19 }
  0x17   :  { %98 = vadd.xlane.f32.xlu1 %v97_v22  ;;  %104 = vadd.xlane.f32.xlu0 %v103_v23  ;;  %v334_v22 = vld [vmem:[%s13032_s1 + $0x70] sm:$0xff] }
  0x8c   :  { %v69_v24 = vpop.xlane.xlu0 %68  ;;  %v75_v25 = vpop.xlane.xlu1 %74 }
  0x8d   :  { %v116_v26 = vmul.f32 0.015625, %v69_v24  ;;  %v118_v27 = vmul.f32 0.015625, %v75_v25  ;;  %v332_v24 = vld [vmem:[%s13032_s1 + $0x60] sm:$0xff] }
  0x8f   :  { %v8478_v28 = vsub.f32 %v48_v0, %v116_v26  ;;  %v8480_v32 = vsub.f32 %v50_v2, %v118_v27 }
  0x90   :  { %v72_v29 = vpop.xlane.xlu0 %71  ;;  %v78_v30 = vpop.xlane.xlu1 %77 }
  0x91   :  { %v117_v31 = vmul.f32 0.015625, %v72_v29  ;;  %v148_v33 = vmul.f32 %v8478_v28, %v8478_v28  ;;  %v119_v34 = vmul.f32 0.015625, %v78_v30  ;;  %v150_v43 = vmul.f32 %v8480_v32, %v8480_v32  ;;  %v331_v30 = vld [vmem:[%s13032_s1 + $0x58] sm:$0xff] }
  0x93   :  { %v8489_v36 = vsub.f32 %v49_v1, %v117_v31  ;;  %v164_v37 = vsel %vm66_vm0, %v148_v33, 0.0  ;;  %v8494_v41 = vsub.f32 %v51_v5, %v119_v34  ;;  %v170_v51 = vsel %vm66_vm0, %v150_v43, 0.0  ;;  %v330_v31 = vld [vmem:[%s13032_s1 + $0x50] sm:$0xff]  ;;  %v328_v33 = vld [vmem:[%s13032_s1 + $0x40] sm:$0xff] }
  0x94   :  { %165 = vadd.xlane.f32.xlu0 %v164_v37  ;;  %v84_v39 = vpop.xlane.xlu1 %83  ;;  %v81_v40 = vpop.xlane.xlu0 %80 }
  0x95   :  { %v149_v42 = vmul.f32 %v8489_v36, %v8489_v36  ;;  %v120_v45 = vmul.f32 0.015625, %v81_v40  ;;  %v121_v47 = vmul.f32 0.015625, %v84_v39  ;;  %v151_v53 = vmul.f32 %v8494_v41, %v8494_v41  ;;  %v327_v39 = vld [vmem:[%s13032_s1 + $0x38] sm:$0xff]  ;;  %v326_v40 = vld [vmem:[%s13032_s1 + $0x30] sm:$0xff] }
  0x97   :  { %v167_v46 = vsel %vm66_vm0, %v149_v42, 0.0  ;;  %v8509_v52 = vsub.f32 %v52_v9, %v120_v45  ;;  %v8518_v56 = vsub.f32 %v53_v8, %v121_v47  ;;  %v173_v61 = vsel %vm66_vm0, %v151_v53, 0.0  ;;  %v325_v42 = vld [vmem:[%s13032_s1 + $0x28] sm:$0xff]  ;;  %v324_v45 = vld [vmem:[%s13032_s1 + $0x20] sm:$0xff]  ;;  %v322_v47 = vld [vmem:[%s13032_s1 + $0x10] sm:$0xff] }
  0x98   :  { %101 = vadd.xlane.f32.xlu0 %v100_v38  ;;  %168 = vadd.xlane.f32.xlu1 %v167_v46  ;;  %v90_v49 = vpop.xlane.xlu1 %89  ;;  %v87_v50 = vpop.xlane.xlu0 %86  ;;  %v323_v46 = vld [vmem:[%s13032_s1 + $0x18] sm:$0xff] }
  0x99   :  { %v122_v55 = vmul.f32 0.015625, %v87_v50  ;;  %v123_v57 = vmul.f32 0.015625, %v90_v49  ;;  %v152_v0 = vmul.f32 %v8509_v52, %v8509_v52  ;;  %v153_v6 = vmul.f32 %v8518_v56, %v8518_v56  ;;  %v320_v49 = vld [vmem:[%s13032_s1] sm:$0xff] }
  0x9a   :  { %v13046_v50 = vmov 0.0  }
  0x9b   :  { %v8523_v62 = vsub.f32 %v54_v13, %v122_v55  ;;  %v8533_v2 = vsub.f32 %v8442_v12, %v123_v57  ;;  %v176_v7 = vsel %vm66_vm0, %v152_v0, 0.0  ;;  %v179_v13 = vsel %vm66_vm0, %v153_v6, 0.0  ;;  %460 = vmatprep.mubr.f32.mxu0 %v13046_v50  ;;  %532 = vmatprep.mubr.f32.mxu1 %v13046_v50 }
  0x9c   :  { %171 = vadd.xlane.f32.xlu0 %v170_v51  ;;  %107 = vadd.xlane.f32.xlu1 %v106_v48  ;;  %v96_v59 = vpop.xlane.xlu1 %95  ;;  %v93_v60 = vpop.xlane.xlu0 %92  ;;  %v321_v48 = vld [vmem:[%s13032_s1 + $0x8] sm:$0xff] }
  0x9d   :  { %v124_v1 = vmul.f32 0.015625, %v93_v60  ;;  %v125_v3 = vmul.f32 0.015625, %v96_v59  ;;  %v154_v10 = vmul.f32 %v8523_v62, %v8523_v62  ;;  %v155_v14 = vmul.f32 %v8533_v2, %v8533_v2 }
  0x9f   :  { %v8541_v8 = vsub.f32 %v8458_v17, %v124_v1  ;;  %v8546_v12 = vsub.f32 %v8453_v16, %v125_v3  ;;  %v182_v17 = vsel %vm66_vm0, %v154_v10, 0.0  ;;  %v335_v16 = vld [vmem:[%s13032_s1 + $0x78] sm:$0xff]  ;;  %v185_v23 = vsel %vm66_vm0, %v155_v14, 0.0 }
  0xa0   :  { %174 = vadd.xlane.f32.xlu0 %v173_v61  ;;  %110 = vadd.xlane.f32.xlu1 %v109_v58  ;;  %v99_v5 = vpop.xlane.xlu1 %98  ;;  %v105_v11 = vpop.xlane.xlu0 %104 }
  0xa1   :  { %v126_v9 = vmul.f32 0.015625, %v99_v5  ;;  %v156_v18 = vmul.f32 %v8541_v8, %v8541_v8  ;;  %v128_v19 = vmul.f32 0.015625, %v105_v11  ;;  %412 = vmatprep.subr.mxu0 %v335_v16  ;;  %7922 = vmatprep.subr.mxu1 %v335_v16  ;;  %v157_v27 = vmul.f32 %v8546_v12, %v8546_v12 }
  0xa2   :  { %413 = vmatpush1.msra.mxu0 %v334_v22  ;;  %7930 = vmatpush1.msra.mxu1 %v334_v22 }
  0xa3   :  { %v8552_v15 = vsub.f32 %v8467_v20, %v126_v9  ;;  %v333_v20 = vld [vmem:[%s13032_s1 + $0x68] sm:$0xff]  ;;  %v188_v25 = vsel %vm66_vm0, %v156_v18, 0.0  ;;  %v8572_v26 = vsub.f32 %v8472_v21, %v128_v19  ;;  %v191_v34 = vsel %vm66_vm0, %v157_v27, 0.0 }
  0xa4   :  { %113 = vadd.xlane.f32.xlu1 %v112_v4  ;;  %177 = vadd.xlane.f32.xlu0 %v176_v7  ;;  %v329_v21 = vld [vmem:[%s13032_s1 + $0x48] sm:$0xff] }
  0xa5   :  { %v158_v29 = vmul.f32 %v8552_v15, %v8552_v15  ;;  %414 = vmatprep.subr.mxu0 %v333_v20  ;;  %7923 = vmatprep.subr.mxu1 %v333_v20  ;;  %v160_v38 = vmul.f32 %v8572_v26, %v8572_v26 }
  0xa6   :  { %415 = vmatpush1.msra.mxu0 %v332_v24  ;;  %7931 = vmatpush1.msra.mxu1 %v332_v24 }
  0xa7   :  { %416 = vmatprep.subr.mxu0 %v331_v30  ;;  %7924 = vmatprep.subr.mxu1 %v331_v30  ;;  %v194_v37 = vsel %vm66_vm0, %v158_v29, 0.0  ;;  %v200_v43 = vsel %vm66_vm0, %v160_v38, 0.0  ;;  %v8645_v30 = vld [vmem:[%s13041_s10] ss:$0 sm:$0xff] }
  0xa8   :  { %180 = vadd.xlane.f32.xlu1 %v179_v13  ;;  %183 = vadd.xlane.f32.xlu0 %v182_v17  ;;  %v8653_v38 = vld [vmem:[%s13042_s11] ss:$0 sm:$0xff] }
  0xa9   :  { %417 = vmatpush1.msra.mxu0 %v330_v31  ;;  %7932 = vmatpush1.msra.mxu1 %v330_v31 }
  0xaa   :  { %418 = vmatprep.subr.mxu0 %v329_v21  ;;  %7925 = vmatprep.subr.mxu1 %v329_v21 }
  0xab   :  { %419 = vmatpush1.msra.mxu0 %v328_v33  ;;  %7933 = vmatpush1.msra.mxu1 %v328_v33 }
  0xac   :  { %186 = vadd.xlane.f32.xlu1 %v185_v23  ;;  %189 = vadd.xlane.f32.xlu0 %v188_v25 }
  0xad   :  { %420 = vmatprep.subr.mxu0 %v327_v39  ;;  %7926 = vmatprep.subr.mxu1 %v327_v39 }
  0xae   :  { %421 = vmatpush1.msra.mxu0 %v326_v40  ;;  %7934 = vmatpush1.msra.mxu1 %v326_v40 }
  0xaf   :  { %422 = vmatprep.subr.mxu0 %v325_v42  ;;  %7927 = vmatprep.subr.mxu1 %v325_v42 }
  0xb0   :  { %192 = vadd.xlane.f32.xlu1 %v191_v34  ;;  %195 = vadd.xlane.f32.xlu0 %v194_v37 }
  0xb1   :  { %423 = vmatpush1.msra.mxu0 %v324_v45  ;;  %7935 = vmatpush1.msra.mxu1 %v324_v45 }
  0xb2   :  { %424 = vmatprep.subr.mxu0 %v323_v46  ;;  %7928 = vmatprep.subr.mxu1 %v323_v46 }
  0xb3   :  { %425 = vmatpush1.msra.mxu0 %v322_v47  ;;  %7936 = vmatpush1.msra.mxu1 %v322_v47 }
  0xb4   :  { %201 = vadd.xlane.f32.xlu1 %v200_v43  ;;  %426 = vmatprep.subr.mxu0 %v321_v48 }
  0xb5   :  { %427 = vmatpush1.msra.mxu0 %v320_v49  ;;  %7929 = vmatprep.subr.mxu1 %v321_v48 }
  0xb6   :  { %7937 = vmatpush1.msra.mxu1 %v320_v49 }
 0x11d   :  { %v166_v51 = vpop.xlane.xlu0 %165 }
 0x11e   :  { %v212_v53 = vmul.f32 0.015625, %v166_v51 }
 0x120   :  { %v228_v55 = vadd.f32 1e-05, %v212_v53 }
 0x121   :  { %v169_v57 = vpop.xlane.xlu1 %168  ;;  %v102_v58 = vpop.xlane.xlu0 %101 }
 0x122   :  { %7944 = vrsqrt.f32 %v228_v55  ;;  %v213_v59 = vmul.f32 0.015625, %v169_v57  ;;  %v127_v60 = vmul.f32 0.015625, %v102_v58 }
 0x124   :  { %v229_v61 = vadd.f32 1e-05, %v213_v59  ;;  %v8622_v0 = vsub.f32 %v8487_v35, %v127_v60 }
 0x125   :  { %v108_v1 = vpop.xlane.xlu1 %107  ;;  %v172_v3 = vpop.xlane.xlu0 %171 }
 0x126   :  { %7946 = vrsqrt.f32 %v229_v61  ;;  %v129_v4 = vmul.f32 0.015625, %v108_v1  ;;  %v214_v5 = vmul.f32 0.015625, %v172_v3  ;;  %v159_v6 = vmul.f32 %v8622_v0, %v8622_v0 }
 0x128   :  { %v8627_v7 = vsub.f32 %v8503_v44, %v129_v4  ;;  %v230_v9 = vadd.f32 1e-05, %v214_v5  ;;  %v197_v10 = vsel %vm66_vm0, %v159_v6, 0.0 }
 0x129   :  { %v111_v11 = vpop.xlane.xlu1 %110  ;;  %198 = vadd.xlane.f32.xlu0 %v197_v10  ;;  %v175_v13 = vpop.xlane.xlu0 %174 }
 0x12a   :  { %7948 = vrsqrt.f32 %v230_v9  ;;  %v130_v35 = vmul.f32 0.015625, %v111_v11  ;;  %v215_v14 = vmul.f32 0.015625, %v175_v13  ;;  %v161_v17 = vmul.f32 %v8627_v7, %v8627_v7 }
 0x12c   :  { %v8633_v18 = vsub.f32 %v8516_v54, %v130_v35  ;;  %v231_v19 = vadd.f32 1e-05, %v215_v14  ;;  %v203_v16 = vsel %vm66_vm0, %v161_v17, 0.0 }
 0x12d   :  { %v114_v44 = vpop.xlane.xlu1 %113  ;;  %204 = vadd.xlane.f32.xlu1 %v203_v16  ;;  %v178_v22 = vpop.xlane.xlu0 %177 }
 0x12e   :  { %7950 = vrsqrt.f32 %v231_v19  ;;  %v131_v20 = vmul.f32 0.015625, %v114_v44  ;;  %v216_v23 = vmul.f32 0.015625, %v178_v22  ;;  %v162_v24 = vmul.f32 %v8633_v18, %v8633_v18 }
 0x12f   :  { %v7945_v25 = vpop.eup %7944 }
 0x130   :  { %v8639_v27 = vsub.f32 %v8528_v63, %v131_v20  ;;  %v232_v29 = vadd.f32 1e-05, %v216_v23  ;;  %v206_v54 = vsel %vm66_vm0, %v162_v24, 0.0  ;;  %v260_v31 = vmul.f32 %v7945_v25, %v8478_v28 }
 0x131   :  { %v181_v21 = vpop.xlane.xlu1 %180  ;;  %207 = vadd.xlane.f32.xlu0 %v206_v54  ;;  %v184_v33 = vpop.xlane.xlu0 %183 }
 0x132   :  { %7952 = vrsqrt.f32 %v232_v29  ;;  %v217_v34 = vmul.f32 0.015625, %v181_v21  ;;  %v218_v37 = vmul.f32 0.015625, %v184_v33  ;;  %v163_v63 = vmul.f32 %v8639_v27, %v8639_v27 }
 0x133   :  { %v7947_v39 = vpop.eup %7946  ;;  %v282_v40 = vmul.f32 %v8645_v30, %v260_v31 }
 0x134   :  { %v233_v42 = vadd.f32 1e-05, %v217_v34  ;;  %v234_v43 = vadd.f32 1e-05, %v218_v37  ;;  %v209_v28 = vsel %vm66_vm0, %v163_v63, 0.0  ;;  %v261_v45 = vmul.f32 %v7947_v39, %v8489_v36 }
 0x135   :  { %v187_v46 = vpop.xlane.xlu1 %186  ;;  %210 = vadd.xlane.f32.xlu1 %v209_v28  ;;  %v190_v47 = vpop.xlane.xlu0 %189  ;;  %v304_v48 = vadd.f32 %v8653_v38, %v282_v40 }
 0x136   :  { %7954 = vrsqrt.f32 %v233_v42  ;;  %v219_v49 = vmul.f32 0.015625, %v187_v46  ;;  %v220_v51 = vmul.f32 0.015625, %v190_v47  ;;  %v283_v53 = vmul.f32 %v8645_v30, %v261_v45 }
 0x137   :  { %v7949_v55 = vpop.eup %7948  ;;  %7956 = vrsqrt.f32 %v234_v43  ;;  %7182 = vmatmul.mubr.msk.f32.vlgmr.msra.gmra.mxu0 %vm66_vm0, %v304_v48 }
 0x138   :  { %v235_v57 = vadd.f32 1e-05, %v219_v49  ;;  %466 = vmatprep.mubr.f32.mxu0 %v13046_v50  ;;  %v305_v58 = vadd.f32 %v8653_v38, %v283_v53  ;;  %v262_v36 = vmul.f32 %v7949_v55, %v8480_v32  ;;  %v236_v59 = vadd.f32 1e-05, %v220_v51 }
 0x139   :  { %v193_v60 = vpop.xlane.xlu1 %192  ;;  %v196_v1 = vpop.xlane.xlu0 %195 }
 0x13a   :  { %7958 = vrsqrt.f32 %v235_v57  ;;  %v221_v61 = vmul.f32 0.015625, %v193_v60  ;;  %v284_v3 = vmul.f32 %v8645_v30, %v262_v36  ;;  %v222_v10 = vmul.f32 0.015625, %v196_v1 }
 0x13b   :  { %v7951_v4 = vpop.eup %7950  ;;  %7183 = vmatmul.mubr.msk.f32.gmra.mxu0 %vm66_vm0, %v305_v58  ;;  %7960 = vrsqrt.f32 %v236_v59 }
 0x13c   :  { %472 = vmatprep.mubr.f32.mxu0 %v13046_v50  ;;  %v306_v5 = vadd.f32 %v8653_v38, %v284_v3  ;;  %v263_v6 = vmul.f32 %v7951_v4, %v8494_v41  ;;  %v237_v9 = vadd.f32 1e-05, %v221_v61  ;;  %v238_v16 = vadd.f32 1e-05, %v222_v10 }
 0x13d   :  { %v202_v32 = vpop.xlane.xlu1 %201 }
 0x13e   :  { %v224_v11 = vmul.f32 0.015625, %v202_v32  ;;  %v285_v13 = vmul.f32 %v8645_v30, %v263_v6  ;;  %7962 = vrsqrt.f32 %v237_v9 }
 0x13f   :  { %v7953_v35 = vpop.eup %7952  ;;  %7184 = vmatmul.mubr.msk.f32.gmra.mxu0 %vm66_vm0, %v306_v5 }
 0x140   :  { %v240_v14 = vadd.f32 1e-05, %v224_v11  ;;  %478 = vmatprep.mubr.f32.mxu0 %v13046_v50  ;;  %v307_v17 = vadd.f32 %v8653_v38, %v285_v13  ;;  %v264_v19 = vmul.f32 %v7953_v35, %v8509_v52 }
 0x142   :  { %7964 = vrsqrt.f32 %v240_v14  ;;  %v286_v41 = vmul.f32 %v8645_v30, %v264_v19 }
 0x143   :  { %v7955_v44 = vpop.eup %7954  ;;  %7185 = vmatmul.mubr.msk.f32.gmra.mxu0 %vm66_vm0, %v307_v17  ;;  %7966 = vrsqrt.f32 %v238_v16  ;;  %v8736_v16 = vld [vmem:[%s13034_s3 + $0x38] sm:$0xff] }
 0x144   :  { %v7957_v22 = vpop.eup %7956  ;;  %484 = vmatprep.mubr.f32.mxu0 %v13046_v50  ;;  %v308_v20 = vadd.f32 %v8653_v38, %v286_v41  ;;  %v265_v23 = vmul.f32 %v7955_v44, %v8518_v56  ;;  %7626 = vmatprep.subr.mxu1 %v8736_v16 }
 0x145   :  { %v266_v24 = vmul.f32 %v7957_v22, %v8523_v62  ;;  %7690 = vmatprep.subr.mxu0 %v8736_v16  ;;  %v8771_v22 = vld [vmem:[%s13033_s2] sm:$0x3] }
 0x146   :  { %v287_v52 = vmul.f32 %v8645_v30, %v265_v23  ;;  %7691 = vmatpush3.msra.mxu0 %v8736_v16  ;;  %v8787_v23 = vld [vmem:[%s13034_s3 + $0x10] sm:$0xff] }
 0x147   :  { %v7959_v25 = vpop.eup %7958  ;;  %7186 = vmatmul.mubr.msk.f32.gmra.mxu0 %vm66_vm0, %v308_v20  ;;  %v288_v54 = vmul.f32 %v8645_v30, %v266_v24  ;;  %v8778_v20 = vld [vmem:[%s13034_s3 + $0x18] sm:$0xff] }
 0x148   :  { %490 = vmatprep.mubr.f32.mxu0 %v13046_v50  ;;  %v309_v29 = vadd.f32 %v8653_v38, %v287_v52  ;;  %v267_v31 = vmul.f32 %v7959_v25, %v8533_v2  ;;  %v7961_v21 = vpop.eup %7960  ;;  %v8800_v52 = vld [vmem:[%s13034_s3 + $0x8] sm:$0xff] }
 0x149   :  { %v310_v56 = vadd.f32 %v8653_v38, %v288_v54  ;;  %v268_v33 = vmul.f32 %v7961_v21, %v8541_v8 }
 0x14a   :  { %v289_v62 = vmul.f32 %v8645_v30, %v267_v31 }
 0x14b   :  { %7187 = vmatmul.mubr.msk.f32.gmra.mxu0 %vm66_vm0, %v309_v29  ;;  %v7963_v34 = vpop.eup %7962  ;;  %v290_v39 = vmul.f32 %v8645_v30, %v268_v33  ;;  %v8809_v29 = vld [vmem:[%s13034_s3] sm:$0xff] }
 0x14c   :  { %496 = vmatprep.mubr.f32.mxu0 %v13046_v50  ;;  %v311_v2 = vadd.f32 %v8653_v38, %v289_v62  ;;  %v269_v40 = vmul.f32 %v7963_v34, %v8546_v12 }
 0x14d   :  { %v312_v28 = vadd.f32 %v8653_v38, %v290_v39 }
 0x14e   :  { %v291_v45 = vmul.f32 %v8645_v30, %v269_v40 }
 0x14f   :  { %v7965_v37 = vpop.eup %7964  ;;  %7188 = vmatmul.mubr.msk.f32.gmra.mxu0 %vm66_vm0, %v310_v56 }
 0x150   :  { %502 = vmatprep.mubr.f32.mxu0 %v13046_v50  ;;  %v272_v63 = vmul.f32 %v7965_v37, %v8572_v26  ;;  %v7967_v42 = vpop.eup %7966  ;;  %v313_v12 = vadd.f32 %v8653_v38, %v291_v45 }
 0x151   :  { %v270_v26 = vmul.f32 %v7967_v42, %v8552_v15 }
 0x152   :  { %v294_v43 = vmul.f32 %v8645_v30, %v272_v63 }
 0x153   :  { %7189 = vmatmul.mubr.msk.f32.gmra.mxu0 %vm66_vm0, %v311_v2  ;;  %v292_v46 = vmul.f32 %v8645_v30, %v270_v26 }
 0x154   :  { %508 = vmatprep.mubr.f32.mxu0 %v13046_v50  ;;  %v316_v8 = vadd.f32 %v8653_v38, %v294_v43 }
 0x155   :  { %v314_v47 = vadd.f32 %v8653_v38, %v292_v46 }
 0x156   :  { %7194 = vmatmul.mubr.msk.f32.vlgmr.msra.gmra.mxu1 %vm66_vm0, %v316_v8 }
 0x157   :  { %7190 = vmatmul.mubr.msk.f32.gmra.mxu0 %vm66_vm0, %v312_v28  ;;  %538 = vmatprep.mubr.f32.mxu1 %v13046_v50 }
 0x158   :  { %514 = vmatprep.mubr.f32.mxu0 %v13046_v50  ;;  %7627 = vmatpush3.msra.mxu1 %v8736_v16 }
 0x15b   :  { %7191 = vmatmul.mubr.msk.f32.gmra.mxu0 %vm66_vm0, %v313_v12 }
 0x15c   :  { %520 = vmatprep.mubr.f32.mxu0 %v13046_v50 }
 0x15f   :  { %7192 = vmatmul.mubr.msk.f32.gmra.mxu0 %vm66_vm0, %v314_v47 }
 0x160   :  { %526 = vmatprep.mubr.f32.mxu0 %v13046_v50 }
 0x1b2   :  { %v199_v15 = vpop.xlane.xlu0 %198 }
 0x1b3   :  { %v223_v48 = vmul.f32 0.015625, %v199_v15 }
 0x1b5   :  { %v239_v49 = vadd.f32 1e-05, %v223_v48 }
 0x1b6   :  { %v205_v51 = vpop.xlane.xlu1 %204 }
 0x1b7   :  { %7968 = vrsqrt.f32 %v239_v49  ;;  %v225_v53 = vmul.f32 0.015625, %v205_v51 }
 0x1b9   :  { %v241_v55 = vadd.f32 1e-05, %v225_v53 }
 0x1ba   :  { %v208_v57 = vpop.xlane.xlu0 %207 }
 0x1bb   :  { %7970 = vrsqrt.f32 %v241_v55  ;;  %v226_v58 = vmul.f32 0.015625, %v208_v57 }
 0x1bd   :  { %v242_v36 = vadd.f32 1e-05, %v226_v58 }
 0x1be   :  { %v211_v59 = vpop.xlane.xlu1 %210 }
 0x1bf   :  { %7972 = vrsqrt.f32 %v242_v36  ;;  %v227_v60 = vmul.f32 0.015625, %v211_v59  ;;  %v8336_v59 = vmov 1966171168  }
 0x1c1   :  { %v243_v61 = vadd.f32 1e-05, %v227_v60  ;;  %v571_v60 = vunpack.c.l.s4 %v8336_v59 }
 0x1c3   :  { %7974 = vrsqrt.f32 %v243_v61 }
 0x1c4   :  { %v7969_v1 = vpop.eup %7968 }
 0x1c5   :  { %v271_v3 = vmul.f32 %v7969_v1, %v8622_v0 }
 0x1c7   :  { %v293_v4 = vmul.f32 %v8645_v30, %v271_v3  ;;  %v572_v3 = vunpack.c.0.s8 %v571_v60 }
 0x1c8   :  { %v7971_v5 = vpop.eup %7970 }
 0x1c9   :  { %v315_v6 = vadd.f32 %v8653_v38, %v293_v4  ;;  %v273_v9 = vmul.f32 %v7971_v5, %v8627_v7 }
 0x1cb   :  { %7193 = vmatmul.mubr.msk.f32.gmra.mxu0 %vm66_vm0, %v315_v6  ;;  %v295_v10 = vmul.f32 %v8645_v30, %v273_v9 }
 0x1cc   :  { %v7973_v32 = vpop.eup %7972 }
 0x1cd   :  { %v317_v11 = vadd.f32 %v8653_v38, %v295_v10  ;;  %v274_v13 = vmul.f32 %v7973_v32, %v8633_v18  ;;  %v338_v18 = vlaneseq }
 0x1cf   :  { %7195 = vmatmul.mubr.msk.f32.gmra.mxu1 %vm66_vm0, %v317_v11  ;;  %v296_v0 = vmul.f32 %v8645_v30, %v274_v13  ;;  %v8743_v41 = vshrl.u32 %v338_v18, 7 }
 0x1d0   :  { %v7975_v35 = vpop.eup %7974  ;;  %544 = vmatprep.mubr.f32.mxu1 %v13046_v50 }
 0x1d1   :  { %v318_v14 = vadd.f32 %v8653_v38, %v296_v0  ;;  %v275_v7 = vmul.f32 %v7975_v35, %v8639_v27  ;;  %v8741_v27 = vld [vmem:[%s13034_s3 + $0x30] sm:$0xff]  ;;  %13151 = vst [vmem:[#allocation5_spill] sm:$0xff] %v8743_v41  ;;  %v8764_v44 = vsub.s32 0, %v8743_v41  ;;  %v8900_v5 = vsub.s32 %v572_v3, %v8743_v41 }
 0x1d2   :  { %7628 = vmatprep.subr.mxu1 %v8741_v27  ;;  %7692 = vmatprep.subr.mxu0 %v8741_v27 }
 0x1d3   :  { %7196 = vmatmul.mubr.msk.f32.gmra.mxu1 %vm66_vm0, %v318_v14  ;;  %v297_v17 = vmul.f32 %v8645_v30, %v275_v7  ;;  %v8752_v30 = vld [vmem:[%s13034_s3 + $0x28] sm:$0xff]  ;;  %7693 = vmatpush3.msra.mxu0 %v8741_v27  ;;  %v8791_v24 = vrot.slane %v8771_v22, %v8764_v44 }
 0x1d4   :  { %550 = vmatprep.mubr.f32.mxu1 %v13046_v50  ;;  %7629 = vmatpush3.msra.mxu1 %v8741_v27 }
 0x1d5   :  { %v319_v19 = vadd.f32 %v8653_v38, %v297_v17  ;;  %v8761_v38 = vld [vmem:[%s13034_s3 + $0x20] sm:$0xff]  ;;  %7630 = vmatprep.subr.mxu1 %v8752_v30  ;;  %7694 = vmatprep.subr.mxu0 %v8752_v30 }
 0x1d6   :  { %7631 = vmatpush3.msra.mxu1 %v8752_v30  ;;  %7695 = vmatpush3.msra.mxu0 %v8752_v30 }
 0x1d7   :  { %7197 = vmatmul.mubr.msk.f32.gmra.mxu1 %vm66_vm0, %v319_v19  ;;  %7632 = vmatprep.subr.mxu1 %v8761_v38 }
 0x1d8   :  { %7696 = vmatprep.subr.mxu0 %v8761_v38  ;;  %7633 = vmatpush3.msra.mxu1 %v8761_v38 }
 0x1d9   :  { %7697 = vmatpush3.msra.mxu0 %v8761_v38  ;;  %7634 = vmatprep.subr.mxu1 %v8778_v20 }
 0x1da   :  { %7698 = vmatprep.subr.mxu0 %v8778_v20  ;;  %7635 = vmatpush3.msra.mxu1 %v8778_v20 }
 0x1db   :  { %7699 = vmatpush3.msra.mxu0 %v8778_v20  ;;  %7636 = vmatprep.subr.mxu1 %v8787_v23 }
 0x1dc   :  { %7700 = vmatprep.subr.mxu0 %v8787_v23  ;;  %7637 = vmatpush3.msra.mxu1 %v8787_v23 }
 0x1dd   :  { %7701 = vmatpush3.msra.mxu0 %v8787_v23  ;;  %7638 = vmatprep.subr.mxu1 %v8800_v52 }
 0x1de   :  { %7702 = vmatprep.subr.mxu0 %v8800_v52  ;;  %7639 = vmatpush3.msra.mxu1 %v8800_v52 }
 0x1df   :  { %7703 = vmatpush3.msra.mxu0 %v8800_v52  ;;  %7640 = vmatprep.subr.mxu1 %v8809_v29 }
 0x1e0   :  { %7704 = vmatprep.subr.mxu0 %v8809_v29  ;;  %7641 = vmatpush3.msra.mxu1 %v8809_v29 }
 0x1e1   :  { %7705 = vmatpush3.msra.mxu0 %v8809_v29  ;;  %7754 = vmatprep.subr.mxu1 %v8736_v16 }
 0x1e2   :  { %7818 = vmatprep.subr.mxu0 %v8736_v16 }
 0x1f7   :  { %v462_v25 = vpop.f32.mrf.mxu0 }
 0x1f8   :  { %v8812_v54 = vadd.f32 %v462_v25, %v8791_v24 }
 0x1f9   :  { %v8816_v31 = vpop.f32.mrf.mxu0 }
 0x1fa   :  { %929 = vrot.lane.b32.xlu0 %v8812_v54, %s8335_s30  ;;  %v576_v6 = vrot.slane %v8812_v54, %v8900_v5 }
 0x1fb   :  { %v468_v21 = vpop.f32.mrf.mxu0 }
 0x1fc   :  { %v8827_v56 = vadd.f32 %v468_v21, %v8791_v24  ;;  %v8913_v11 = vrot.slane %v576_v6, %v8900_v5  ;;  %v584_v0 = vcombine.high %v576_v6, %v576_v6 }
 0x1fd   :  { %v8829_v62 = vpop.f32.mrf.mxu0 }
 0x1fe   :  { %13152 = vst [vmem:[#allocation6_spill] sm:$0xff] %v8829_v62  ;;  %931 = vrot.lane.b32.xlu1 %v8827_v56, %s8335_s30  ;;  %v768_v17 = vrot.slane %v8913_v11, %v8764_v44 }
 0x1ff   :  { %v474_v33 = vpop.f32.mrf.mxu0 }
 0x200   :  { %v8840_v2 = vadd.f32 %v474_v33, %v8791_v24 }
 0x201   :  { %v8835_v34 = vpop.f32.mrf.mxu0 }
 0x202   :  { %13153 = vst [vmem:[#allocation7_spill] sm:$0xff] %v8835_v34  ;;  %933 = vrot.lane.b32.xlu1 %v8840_v2, %s8335_s30  ;;  %v674_v10 = vrot.slane %v8840_v2, %v8900_v5 }
 0x203   :  { %v480_v37 = vpop.f32.mrf.mxu0 }
 0x204   :  { %v8845_v39 = vadd.f32 %v480_v37, %v8791_v24  ;;  %v682_v14 = vcombine.high %v674_v10, %v674_v10  ;;  %v8921_v19 = vrot.slane %v674_v10, %v8900_v5  ;;  %v8933_v37 = vrot.slane %v584_v0, %v8900_v5 }
 0x205   :  { %v8837_v63 = vpop.f32.mrf.mxu0 }
 0x206   :  { %13154 = vst [vmem:[#allocation8_spill] sm:$0xff] %v8837_v63  ;;  %935 = vrot.lane.b32.xlu1 %v8845_v39, %s8335_s30  ;;  %v723_v18 = vrot.slane %v8845_v39, %v8900_v5  ;;  %v772_v3 = vrot.slane %v8933_v37, %v8764_v44 }
 0x207   :  { %v486_v40 = vpop.f32.mrf.mxu0 }
 0x208   :  { %v8852_v8 = vadd.f32 %v486_v40, %v8791_v24  ;;  %v731_v59 = vcombine.high %v723_v18, %v723_v18  ;;  %v739_v6 = vrot.slane %v723_v18, %v8900_v5 }
 0x209   :  { %v8849_v42 = vpop.f32.mrf.mxu0 }
 0x20a   :  { %13155 = vst [vmem:[#allocation9_spill] sm:$0xff] %v8849_v42  ;;  %937 = vrot.lane.b32.xlu0 %v8852_v8, %s8335_s30  ;;  %v1989_v9 = vrot.slane %v8852_v8, %v8900_v5 }
 0x20b   :  { %v492_v43 = vpop.f32.mrf.mxu0 }
 0x20c   :  { %v8859_v26 = vadd.f32 %v492_v43, %v8791_v24  ;;  %v8916_v13 = vrot.slane %v1989_v9, %v8900_v5  ;;  %v1997_v35 = vcombine.high %v1989_v9, %v1989_v9 }
 0x20d   :  { %v8856_v28 = vpop.f32.mrf.mxu0 }
 0x20e   :  { %13156 = vst [vmem:[#allocation10_spill] sm:$0xff] %v8856_v28  ;;  %939 = vrot.lane.b32.xlu1 %v8859_v26, %s8335_s30  ;;  %v2181_v25 = vrot.slane %v8916_v13, %v8764_v44  ;;  %v8936_v40 = vrot.slane %v1997_v35, %v8900_v5 }
 0x20f   :  { %v498_v45 = vpop.f32.mrf.mxu0 }
 0x210   :  { %v8866_v47 = vadd.f32 %v498_v45, %v8791_v24  ;;  %v8941_v45 = vrot.slane %v682_v14, %v8900_v5  ;;  %v2185_v9 = vrot.slane %v8936_v40, %v8764_v44 }
 0x211   :  { %v8863_v12 = vpop.f32.mrf.mxu0 }
 0x212   :  { %13157 = vst [vmem:[#allocation11_spill] sm:$0xff] %v8863_v12  ;;  %941 = vrot.lane.b32.xlu0 %v8866_v47, %s8335_s30  ;;  %v2087_v32 = vrot.slane %v8866_v47, %v8900_v5  ;;  %v836_v14 = vrot.slane %v8941_v45, %v8764_v44 }
 0x213   :  { %v504_v46 = vpop.f32.mrf.mxu0 }
 0x214   :  { %v8869_v15 = vadd.f32 %v504_v46, %v8791_v24  ;;  %v2095_v7 = vcombine.high %v2087_v32, %v2087_v32  ;;  %v8928_v21 = vrot.slane %v2087_v32, %v8900_v5 }
 0x215   :  { %v8875_v48 = vpop.f32.mrf.mxu0 }
 0x216   :  { %943 = vrot.lane.b32.xlu1 %v8869_v15, %s8335_s30  ;;  %13158 = vst [vmem:[#allocation12_spill] sm:$0xff] %v8875_v48  ;;  %v534_v1 = vpop.f32.mrf.mxu1  ;;  %v2136_v33 = vrot.slane %v8869_v15, %v8900_v5  ;;  %v8944_v46 = vrot.slane %v2095_v7, %v8900_v5  ;;  %v2245_v60 = vrot.slane %v8928_v21, %v8764_v44 }
 0x217   :  { %v510_v49 = vpop.f32.mrf.mxu0  ;;  %v8897_v4 = vadd.f32 %v534_v1, %v8791_v24 }
 0x218   :  { %v8878_v51 = vadd.f32 %v510_v49, %v8791_v24  ;;  %v2144_v1 = vcombine.high %v2136_v33, %v2136_v33  ;;  %v2152_v32 = vrot.slane %v2136_v33, %v8900_v5  ;;  %v2249_v7 = vrot.slane %v8944_v46, %v8764_v44 }
 0x219   :  { %v8882_v53 = vpop.f32.mrf.mxu0 }
 0x21a   :  { %3731 = vrot.lane.b32.xlu0 %v8878_v51, %s8335_s30  ;;  %13159 = vst [vmem:[#allocation13_spill] sm:$0xff] %v8882_v53 }
 0x21b   :  { %v516_v55 = vpop.f32.mrf.mxu0 }
 0x21c   :  { %v8885_v57 = vadd.f32 %v516_v55, %v8791_v24 }
 0x21d   :  { %v8889_v58 = vpop.f32.mrf.mxu0 }
 0x21e   :  { %3733 = vrot.lane.b32.xlu1 %v8885_v57, %s8335_s30  ;;  %13160 = vst [vmem:[#allocation14_spill] sm:$0xff] %v8889_v58 }
 0x21f   :  { %v522_v36 = vpop.f32.mrf.mxu0 }
 0x220   :  { %v8892_v61 = vadd.f32 %v522_v36, %v8791_v24  ;;  %v832_v36 = vrot.slane %v8921_v19, %v8764_v44 }
 0x222   :  { %3735 = vrot.lane.b32.xlu0 %v8892_v61, %s8335_s30 }
 0x226   :  { %3739 = vrot.lane.b32.xlu0 %v8897_v4, %s8335_s30 }
 0x26c   :  { %v8938_v43 = vpop.permute.xlu0 %929 }
 0x26d   :  { %v953_v49 = vmul.f32 %v8938_v43, %v768_v17  ;;  %v2338_v55 = vmul.f32 %v2181_v25, %v8938_v43  ;;  %v8960_v10 = vmul.f32 %v8938_v43, %v832_v36  ;;  %v8966_v35 = vmul.f32 %v2245_v60, %v8938_v43 }
 0x26e   :  { %v753_v25 = vrot.slane %v731_v59, %v8900_v5  ;;  %v569_v36 = vcombine.high %v8812_v54, %v8812_v54  ;;  %v864_v60 = vrot.slane %v739_v6, %v8764_v44  ;;  %v614_v59 = vcombine.high %v8913_v11, %v8913_v11 }
 0x26f   :  { %7642 = vmatprep.mubr.msk.f32.mxu1 %vm66_vm0, %v953_v49  ;;  %7706 = vmatprep.mubr.msk.f32.mxu0 %vm66_vm0, %v2338_v55  ;;  %v2166_v49 = vrot.slane %v2144_v1, %v8900_v5  ;;  %v761_v1 = vcombine.high %v739_v6, %v739_v6  ;;  %v616_v11 = vcombine.high %v8933_v37, %v8933_v37 }
 0x270   :  { %v8963_v0 = vpop.permute.xlu1 %931  ;;  %v763_v6 = vcombine.high %v753_v25, %v753_v25 }
 0x271   :  { %v954_v17 = vmul.f32 %v8963_v0, %v772_v3  ;;  %v2339_v18 = vmul.f32 %v2185_v9, %v8963_v0  ;;  %v8977_v33 = vmul.f32 %v8963_v0, %v836_v14  ;;  %v8980_v55 = vmul.f32 %v2249_v7, %v8963_v0 }
 0x272   :  { %v2277_v3 = vrot.slane %v2152_v32, %v8764_v44  ;;  %v2027_v9 = vcombine.high %v8916_v13, %v8916_v13  ;;  %v2174_v14 = vcombine.high %v2152_v32, %v2152_v32  ;;  %v8995_v7 = vmul.f32 %v8938_v43, %v864_v60 }
 0x273   :  { %7643 = vmatmul.mubr.msk.f32.vlgmr.msra.gmra.mxu1 %vm66_vm0, %v954_v17  ;;  %7707 = vmatmul.mubr.msk.f32.vlgmr.msra.gmra.mxu0 %vm66_vm0, %v2339_v18  ;;  %v868_v17 = vrot.slane %v753_v25, %v8764_v44  ;;  %v2281_v18 = vrot.slane %v2166_v49, %v8764_v44  ;;  %v716_v13 = vcombine.high %v8845_v39, %v8845_v39 }
 0x274   :  { %7755 = vmatpush3.msra.mxu1 %v8736_v16  ;;  %7819 = vmatpush3.msra.mxu0 %v8736_v16  ;;  %v8998_v54 = vmul.f32 %v2277_v3, %v8938_v43  ;;  %v1982_v16 = vcombine.high %v8852_v8, %v8852_v8  ;;  %v2029_v32 = vcombine.high %v8936_v40, %v8936_v40  ;;  %v9026_v25 = vpop.permute.xlu1 %933 }
 0x275   :  { %7756 = vmatprep.subr.mxu1 %v8741_v27  ;;  %7820 = vmatprep.subr.mxu0 %v8741_v27  ;;  %v9013_v60 = vmul.f32 %v8963_v0, %v868_v17  ;;  %v9016_v3 = vmul.f32 %v2281_v18, %v8963_v0  ;;  %v2129_v39 = vcombine.high %v8869_v15, %v8869_v15 }
 0x276   :  { %7757 = vmatpush3.msra.mxu1 %v8741_v27  ;;  %7821 = vmatpush3.msra.mxu0 %v8741_v27  ;;  %v776_v8 = vrot.slane %v614_v59, %v8764_v44  ;;  %v2189_v37 = vrot.slane %v2027_v9, %v8764_v44  ;;  %v2176_v40 = vcombine.high %v2166_v49, %v2166_v49 }
 0x277   :  { %7758 = vmatprep.subr.mxu1 %v8752_v30  ;;  %7822 = vmatprep.subr.mxu0 %v8752_v30  ;;  %v872_v17 = vrot.slane %v761_v1, %v8764_v44  ;;  %v2285_v18 = vrot.slane %v2174_v14, %v8764_v44  ;;  %v583_v59 = vrot.slane %v569_v36, %v8900_v5 }
 0x278   :  { %7759 = vmatpush3.msra.mxu1 %v8752_v30  ;;  %7823 = vmatpush3.msra.mxu0 %v8752_v30  ;;  %v955_v27 = vmul.f32 %v9026_v25, %v776_v8  ;;  %v2340_v15 = vmul.f32 %v2189_v37, %v9026_v25  ;;  %v9037_v49 = vrot.slane %v716_v13, %v8900_v5  ;;  %v9054_v8 = vpop.permute.xlu1 %935 }
 0x279   :  { %7760 = vmatprep.subr.mxu1 %v8761_v38  ;;  %v9040_v9 = vmul.f32 %v9026_v25, %v872_v17  ;;  %v9043_v1 = vmul.f32 %v2285_v18, %v9026_v25  ;;  %7824 = vmatprep.subr.mxu0 %v8761_v38  ;;  %v1996_v30 = vrot.slane %v1982_v16, %v8900_v5 }
 0x27a   :  { %7645 = vmatprep.mubr.msk.f32.mxu1 %vm66_vm0, %v955_v27  ;;  %7709 = vmatprep.mubr.msk.f32.mxu0 %vm66_vm0, %v2340_v15  ;;  %v780_v14 = vrot.slane %v616_v11, %v8764_v44  ;;  %v2193_v36 = vrot.slane %v2029_v32, %v8764_v44  ;;  %v9052_v13 = vrot.slane %v2129_v39, %v8900_v5 }
 0x27b   :  { %v876_v37 = vrot.slane %v763_v6, %v8764_v44  ;;  %v2289_v17 = vrot.slane %v2176_v40, %v8764_v44  ;;  %7761 = vmatpush3.msra.mxu1 %v8761_v38  ;;  %7825 = vmatpush3.msra.mxu0 %v8761_v38  ;;  %v9071_v6 = vrot.slane %v583_v59, %v8900_v5 }
 0x27c   :  { %v956_v16 = vmul.f32 %v9054_v8, %v780_v14  ;;  %v2341_v18 = vmul.f32 %v2193_v36, %v9054_v8  ;;  %7762 = vmatprep.subr.mxu1 %v8778_v20  ;;  %7826 = vmatprep.subr.mxu0 %v8778_v20  ;;  %v9074_v39 = vrot.slane %v1996_v30, %v8900_v5  ;;  %v9098_v36 = vpop.permute.xlu0 %937 }
 0x27d   :  { %v9064_v11 = vmul.f32 %v9054_v8, %v876_v37  ;;  %v9067_v32 = vmul.f32 %v2289_v17, %v9054_v8  ;;  %v9080_v38 = vrot.slane %v9037_v49, %v8900_v5  ;;  %v9084_v40 = vrot.slane %v9052_v13, %v8900_v5  ;;  %7763 = vmatpush3.msra.mxu1 %v8778_v20 }
 0x27e   :  { %7646 = vmatmul.mubr.msk.f32.gmra.mxu1 %vm66_vm0, %v956_v16  ;;  %7710 = vmatmul.mubr.msk.f32.gmra.mxu0 %vm66_vm0, %v2341_v18  ;;  %v585_v27 = vcombine.high %v583_v59, %v583_v59  ;;  %v784_v15 = vrot.slane %v9071_v6, %v8764_v44  ;;  %v2197_v14 = vrot.slane %v9074_v39, %v8764_v44  ;;  %v9109_v16 = vpop.f32.mrf.mxu0 }
 0x27f   :  { %13161 = vst [vmem:[#allocation15_spill] sm:$0xff] %v9067_v32  ;;  %7827 = vmatpush3.msra.mxu0 %v8778_v20  ;;  %7764 = vmatprep.subr.mxu1 %v8787_v23  ;;  %v1998_v20 = vcombine.high %v1996_v30, %v1996_v30  ;;  %v880_v37 = vrot.slane %v9080_v38, %v8764_v44  ;;  %13162 = vst [vmem:[#allocation16_spill] sm:$0xff] %v9109_v16 }
 0x280   :  { %7828 = vmatprep.subr.mxu0 %v8787_v23  ;;  %7765 = vmatpush3.msra.mxu1 %v8787_v23  ;;  %v957_v59 = vmul.f32 %v9098_v36, %v784_v15  ;;  %v2342_v17 = vmul.f32 %v2197_v14, %v9098_v36  ;;  %v615_v48 = vcombine.high %v9071_v6, %v9071_v6 }
 0x281   :  { %7829 = vmatpush3.msra.mxu0 %v8787_v23  ;;  %7766 = vmatprep.subr.mxu1 %v8800_v52  ;;  %v2293_v23 = vrot.slane %v9084_v40, %v8764_v44  ;;  %v9112_v30 = vmul.f32 %v9098_v36, %v880_v37  ;;  %v2026_v15 = vrot.slane %v1998_v20, %v8900_v5 }
 0x282   :  { %7830 = vmatprep.subr.mxu0 %v8800_v52  ;;  %7767 = vmatpush3.msra.mxu1 %v8800_v52 }
 0x283   :  { %7831 = vmatpush3.msra.mxu0 %v8800_v52  ;;  %7768 = vmatprep.subr.mxu1 %v8809_v29  ;;  %13163 = vst [vmem:[#allocation17_spill] sm:$0xff] %v9112_v30  ;;  %v9115_v18 = vmul.f32 %v2293_v23, %v9098_v36  ;;  %v613_v52 = vrot.slane %v585_v27, %v8900_v5  ;;  %v9127_v23 = vpop.f32.mrf.mxu1 }
 0x284   :  { %7832 = vmatprep.subr.mxu0 %v8809_v29  ;;  %7648 = vmatprep.mubr.msk.f32.mxu1 %vm66_vm0, %v957_v59  ;;  %13165 = vst [vmem:[#allocation19_spill] sm:$0xff] %v9127_v23  ;;  %v618_v59 = vcombine.high %v8827_v56, %v8827_v56  ;;  %v625_v27 = vrot.slane %v8827_v56, %v8900_v5 }
 0x285   :  { %13164 = vst [vmem:[#allocation18_spill] sm:$0xff] %v9115_v18  ;;  %7712 = vmatprep.mubr.msk.f32.mxu0 %vm66_vm0, %v2342_v17  ;;  %7769 = vmatpush3.msra.mxu1 %v8809_v29  ;;  %v788_v20 = vrot.slane %v613_v52, %v8764_v44  ;;  %v2201_v17 = vrot.slane %v2026_v15, %v8764_v44 }
 0x286   :  { %7833 = vmatpush3.msra.mxu0 %v8809_v29  ;;  %v9137_v29 = vpop.permute.xlu1 %939  ;;  %v632_v53 = vrot.slane %v618_v59, %v8900_v5  ;;  %v633_v56 = vcombine.high %v625_v27, %v625_v27  ;;  %v641_v12 = vrot.slane %v625_v27, %v8900_v5  ;;  %v617_v59 = vcombine.high %v613_v52, %v613_v52  ;;  %v9167_v52 = vpop.permute.xlu0 %941 }
 0x287   :  { %v958_v16 = vmul.f32 %v9137_v29, %v788_v20  ;;  %v2343_v58 = vmul.f32 %v2201_v17, %v9137_v29  ;;  %v2028_v20 = vcombine.high %v9074_v39, %v9074_v39  ;;  %v2031_v17 = vcombine.high %v8859_v26, %v8859_v26 }
 0x288   :  { %v2030_v28 = vcombine.high %v2026_v15, %v2026_v15  ;;  %v655_v42 = vrot.slane %v633_v56, %v8900_v5  ;;  %v663_v27 = vcombine.high %v641_v12, %v641_v12  ;;  %v792_v39 = vrot.slane %v615_v48, %v8764_v44 }
 0x289   :  { %7649 = vmatmul.mubr.msk.f32.gmra.mxu1 %vm66_vm0, %v958_v16  ;;  %7713 = vmatmul.mubr.msk.f32.gmra.mxu0 %vm66_vm0, %v2343_v58  ;;  %v634_v58 = vcombine.high %v632_v53, %v632_v53  ;;  %v2045_v63 = vrot.slane %v2031_v17, %v8900_v5  ;;  %v800_v34 = vrot.slane %v641_v12, %v8764_v44 }
 0x28a   :  { %v796_v15 = vrot.slane %v617_v59, %v8764_v44  ;;  %v959_v18 = vmul.f32 %v9167_v52, %v792_v39  ;;  %v9174_v48 = vpop.permute.xlu1 %943  ;;  %v665_v12 = vcombine.high %v655_v42, %v655_v42 }
 0x28b   :  { %v528_v14 = vpop.f32.mrf.mxu0  ;;  %v2047_v59 = vcombine.high %v2045_v63, %v2045_v63 }
 0x28c   :  { %v9125_v37 = vadd.f32 %v528_v14, %v8791_v24  ;;  %v2038_v14 = vrot.slane %v8859_v26, %v8900_v5  ;;  %v2205_v26 = vrot.slane %v2028_v20, %v8764_v44  ;;  %v648_v20 = vrot.slane %v632_v53, %v8900_v5  ;;  %7651 = vmatprep.mubr.msk.f32.mxu1 %vm66_vm0, %v959_v18 }
 0x28d   :  { %v804_v53 = vrot.slane %v655_v42, %v8764_v44  ;;  %v808_v18 = vrot.slane %v663_v27, %v8764_v44  ;;  %v662_v27 = vrot.slane %v634_v58, %v8900_v5 }
 0x28e   :  { %3737 = vrot.lane.b32.xlu1 %v9125_v37, %s8335_s30  ;;  %v2054_v16 = vrot.slane %v2038_v14, %v8900_v5  ;;  %v2344_v17 = vmul.f32 %v2205_v26, %v9167_v52 }
 0x28f   :  { %v540_v50 = vpop.f32.mrf.mxu1  ;;  %v963_v42 = vmul.f32 %v9026_v25, %v808_v18  ;;  %v667_v18 = vcombine.high %v8840_v2, %v8840_v2 }
 0x290   :  { %v9144_v23 = vadd.f32 %v540_v50, %v8791_v24  ;;  %v2046_v50 = vcombine.high %v2038_v14, %v2038_v14  ;;  %v2209_v14 = vrot.slane %v2030_v28, %v8764_v44  ;;  %v2076_v56 = vcombine.high %v2054_v16, %v2054_v16  ;;  %7715 = vmatprep.mubr.msk.f32.mxu0 %vm66_vm0, %v2344_v17 }
 0x291   :  { %v9160_v6 = vpop.f32.mrf.mxu1  ;;  %v961_v28 = vmul.f32 %v8938_v43, %v800_v34 }
 0x292   :  { %3741 = vrot.lane.b32.xlu1 %v9144_v23, %s8335_s30  ;;  %13166 = vst [vmem:[#allocation20_spill] sm:$0xff] %v9160_v6  ;;  %v2068_v62 = vrot.slane %v2046_v50, %v8900_v5  ;;  %v2213_v6 = vrot.slane %v2054_v16, %v8764_v44  ;;  %v960_v50 = vmul.f32 %v9174_v48, %v796_v15 }
 0x293   :  { %v2345_v32 = vmul.f32 %v2209_v14, %v9174_v48  ;;  %v546_v30 = vpop.f32.mrf.mxu1  ;;  %v2221_v15 = vrot.slane %v2076_v56, %v8764_v44  ;;  %v2075_v14 = vrot.slane %v2047_v59, %v8900_v5 }
 0x294   :  { %v2346_v16 = vmul.f32 %v2213_v6, %v8938_v43  ;;  %v2078_v39 = vcombine.high %v2068_v62, %v2068_v62  ;;  %7652 = vmatmul.mubr.msk.f32.gmra.mxu1 %vm66_vm0, %v960_v50  ;;  %v2217_v26 = vrot.slane %v2068_v62, %v8764_v44  ;;  %v9192_v34 = vadd.f32 %v546_v30, %v8791_v24 }
 0x295   :  { %7716 = vmatmul.mubr.msk.f32.gmra.mxu0 %vm66_vm0, %v2345_v32  ;;  %7654 = vmatprep.mubr.msk.f32.mxu1 %vm66_vm0, %v961_v28  ;;  %v2061_v43 = vrot.slane %v2045_v63, %v8900_v5  ;;  %v962_v6 = vmul.f32 %v8963_v0, %v804_v53  ;;  %v2348_v62 = vmul.f32 %v2221_v15, %v9026_v25  ;;  %v9213_v50 = vpop.f32.mrf.mxu1 }
 0x296   :  { %7718 = vmatprep.mubr.msk.f32.mxu0 %vm66_vm0, %v2346_v16  ;;  %v2347_v32 = vmul.f32 %v2217_v26, %v8963_v0  ;;  %3743 = vrot.lane.b32.xlu0 %v9192_v34, %s8335_s30  ;;  %v812_v30 = vrot.slane %v665_v12, %v8764_v44  ;;  %v2225_v63 = vrot.slane %v2078_v39, %v8764_v44 }
 0x297   :  { %v816_v0 = vrot.slane %v648_v20, %v8764_v44  ;;  %v2229_v17 = vrot.slane %v2061_v43, %v8764_v44  ;;  %v664_v28 = vcombine.high %v648_v20, %v648_v20  ;;  %v2077_v16 = vcombine.high %v2061_v43, %v2061_v43  ;;  %v552_v20 = vpop.f32.mrf.mxu1 }
 0x298   :  { %7655 = vmatmul.mubr.msk.f32.gmra.mxu1 %vm66_vm0, %v962_v6  ;;  %v964_v56 = vmul.f32 %v9054_v8, %v812_v30  ;;  %v2349_v58 = vmul.f32 %v2225_v63, %v9054_v8  ;;  %v820_v39 = vrot.slane %v662_v27, %v8764_v44  ;;  %v2233_v53 = vrot.slane %v2075_v14, %v8764_v44 }
 0x299   :  { %7719 = vmatmul.mubr.msk.f32.gmra.mxu0 %vm66_vm0, %v2347_v32  ;;  %7657 = vmatprep.mubr.msk.f32.mxu1 %vm66_vm0, %v963_v42  ;;  %v965_v12 = vmul.f32 %v9098_v36, %v816_v0  ;;  %v2350_v59 = vmul.f32 %v2229_v17, %v9098_v36  ;;  %v824_v43 = vrot.slane %v664_v28, %v8764_v44 }
 0x29a   :  { %7721 = vmatprep.mubr.msk.f32.mxu0 %vm66_vm0, %v2348_v62  ;;  %v966_v26 = vmul.f32 %v9137_v29, %v820_v39  ;;  %v2351_v15 = vmul.f32 %v2233_v53, %v9137_v29  ;;  %v2237_v6 = vrot.slane %v2077_v16, %v8764_v44  ;;  %v2080_v32 = vcombine.high %v8866_v47, %v8866_v47 }
 0x29b   :  { %v9234_v42 = vadd.f32 %v552_v20, %v8791_v24  ;;  %v967_v62 = vmul.f32 %v9167_v52, %v824_v43  ;;  %v666_v30 = vcombine.high %v662_v27, %v662_v27  ;;  %v681_v63 = vrot.slane %v667_v18, %v8900_v5 }
 0x29c   :  { %7658 = vmatmul.mubr.msk.f32.gmra.mxu1 %vm66_vm0, %v964_v56  ;;  %v2352_v2 = vmul.f32 %v2237_v6, %v9167_v52  ;;  %v2079_v0 = vcombine.high %v2075_v14, %v2075_v14  ;;  %v2094_v56 = vrot.slane %v2080_v32, %v8900_v5  ;;  %v712_v47 = vcombine.high %v8921_v19, %v8921_v19 }
 0x29d   :  { %7722 = vmatmul.mubr.msk.f32.gmra.mxu0 %vm66_vm0, %v2349_v58  ;;  %7660 = vmatprep.mubr.msk.f32.mxu1 %vm66_vm0, %v965_v12  ;;  %v828_v24 = vrot.slane %v666_v30, %v8764_v44  ;;  %v9249_v27 = vrot.slane %v8885_v57, %v8900_v5  ;;  %v9253_v58 = vrot.slane %v9144_v23, %v8900_v5 }
 0x29e   :  { %7724 = vmatprep.mubr.msk.f32.mxu0 %vm66_vm0, %v2350_v59  ;;  %3745 = vrot.lane.b32.xlu1 %v9234_v42, %s8335_s30  ;;  %v683_v14 = vcombine.high %v681_v63, %v681_v63  ;;  %v9257_v17 = vrot.slane %v8892_v61, %v8900_v5  ;;  %v2241_v12 = vrot.slane %v2079_v0, %v8764_v44 }
 0x29f   :  { %v968_v28 = vmul.f32 %v9174_v48, %v828_v24  ;;  %v697_v16 = vrot.slane %v681_v63, %v8900_v5  ;;  %v2125_v19 = vcombine.high %v8928_v21, %v8928_v21  ;;  %v9266_v59 = vrot.slane %v9192_v34, %v8900_v5 }
 0x2a0   :  { %7661 = vmatmul.mubr.msk.f32.gmra.mxu1 %vm66_vm0, %v966_v26  ;;  %v714_v39 = vcombine.high %v8941_v45, %v8941_v45  ;;  %v2096_v53 = vcombine.high %v2094_v56, %v2094_v56  ;;  %v2110_v26 = vrot.slane %v2094_v56, %v8900_v5  ;;  %v2353_v20 = vmul.f32 %v2241_v12, %v9174_v48  ;;  %v9325_v12 = vpop.permute.xlu0 %3731 }
 0x2a1   :  { %7725 = vmatmul.mubr.msk.f32.gmra.mxu0 %vm66_vm0, %v2351_v15  ;;  %7663 = vmatprep.mubr.msk.f32.mxu1 %vm66_vm0, %v967_v62  ;;  %v9275_v18 = vrot.slane %v9249_v27, %v8900_v5  ;;  %v9279_v21 = vrot.slane %v9253_v58, %v8900_v5  ;;  %v840_v45 = vrot.slane %v712_v47, %v8764_v44 }
 0x2a2   :  { %7727 = vmatprep.mubr.msk.f32.mxu0 %vm66_vm0, %v2352_v2  ;;  %v711_v15 = vrot.slane %v683_v14, %v8900_v5  ;;  %v2127_v43 = vcombine.high %v8944_v46, %v8944_v46  ;;  %v9289_v6 = vrot.slane %v9257_v17, %v8900_v5  ;;  %v9293_v32 = vrot.slane %v9125_v37, %v8900_v5 }
 0x2a3   :  { %v9302_v62 = vrot.slane %v9234_v42, %v8900_v5  ;;  %v971_v46 = vmul.f32 %v9026_v25, %v840_v45  ;;  %v2253_v30 = vrot.slane %v2125_v19, %v8764_v44  ;;  %v713_v2 = vcombine.high %v697_v16, %v697_v16 }
 0x2a4   :  { %7664 = vmatmul.mubr.msk.f32.gmra.mxu1 %vm66_vm0, %v968_v28  ;;  %v2124_v63 = vrot.slane %v2096_v53, %v8900_v5  ;;  %v2126_v0 = vcombine.high %v2110_v26, %v2110_v26  ;;  %v844_v56 = vrot.slane %v714_v39, %v8764_v44  ;;  %v3602_v24 = vrot.slane %v9275_v18, %v8764_v44 }
 0x2a5   :  { %7666 = vmatprep.mubr.msk.f32.mxu1 %vm66_vm0, %v8960_v10  ;;  %7728 = vmatmul.mubr.msk.f32.gmra.mxu0 %vm66_vm0, %v2353_v20  ;;  %v9298_v10 = vrot.slane %v9266_v59, %v8900_v5  ;;  %v5015_v47 = vrot.slane %v9279_v21, %v8764_v44  ;;  %v848_v14 = vrot.slane %v697_v16, %v8764_v44 }
 0x2a6   :  { %7730 = vmatprep.mubr.msk.f32.mxu0 %vm66_vm0, %v8966_v35  ;;  %v2356_v35 = vmul.f32 %v2253_v30, %v9026_v25  ;;  %v3634_v28 = vrot.slane %v9289_v6, %v8764_v44  ;;  %v972_v19 = vmul.f32 %v9054_v8, %v844_v56  ;;  %v2257_v39 = vrot.slane %v2127_v43, %v8764_v44 }
 0x2a7   :  { %v5047_v25 = vrot.slane %v9298_v10, %v8764_v44  ;;  %v9335_v16 = vrot.slane %v9302_v62, %v8900_v5  ;;  %v973_v53 = vmul.f32 %v9098_v36, %v848_v14  ;;  %v2261_v20 = vrot.slane %v2110_v26, %v8764_v44 }
 0x2a8   :  { %7667 = vmatmul.mubr.msk.f32.gmra.mxu1 %vm66_vm0, %v8977_v33  ;;  %v9323_v33 = vrot.slane %v9293_v32, %v8900_v5  ;;  %v852_v45 = vrot.slane %v711_v15, %v8764_v44  ;;  %v2265_v43 = vrot.slane %v2124_v63, %v8764_v44  ;;  %v856_v56 = vrot.slane %v713_v2, %v8764_v44 }
 0x2a9   :  { %7669 = vmatprep.mubr.msk.f32.mxu1 %vm66_vm0, %v971_v46  ;;  %7731 = vmatmul.mubr.msk.f32.gmra.mxu0 %vm66_vm0, %v8980_v55  ;;  %v2357_v55 = vmul.f32 %v2257_v39, %v9054_v8  ;;  %v715_v46 = vcombine.high %v711_v15, %v711_v15  ;;  %v2358_v30 = vmul.f32 %v2261_v20, %v9098_v36 }
 0x2aa   :  { %7733 = vmatprep.mubr.msk.f32.mxu0 %vm66_vm0, %v2356_v35  ;;  %v9348_v35 = vmul.f32 %v9325_v12, %v3602_v24  ;;  %v9351_v26 = vmul.f32 %v5015_v47, %v9325_v12  ;;  %v3666_v8 = vrot.slane %v9323_v33, %v8764_v44  ;;  %v974_v14 = vmul.f32 %v9137_v29, %v852_v45 }
 0x2ab   :  { %v2269_v15 = vrot.slane %v2126_v0, %v8764_v44  ;;  %v5079_v36 = vrot.slane %v9335_v16, %v8764_v44  ;;  %v975_v2 = vmul.f32 %v9167_v52, %v856_v56  ;;  %v9363_v24 = vmul.f32 %v9325_v12, %v3634_v28 }
 0x2ac   :  { %7670 = vmatmul.mubr.msk.f32.gmra.mxu1 %vm66_vm0, %v972_v19  ;;  %v2128_v19 = vcombine.high %v2124_v63, %v2124_v63  ;;  %v9366_v47 = vmul.f32 %v5047_v25, %v9325_v12  ;;  %v2359_v39 = vmul.f32 %v2265_v43, %v9137_v29  ;;  %v860_v0 = vrot.slane %v715_v46, %v8764_v44 }
 0x2ad   :  { %7672 = vmatprep.mubr.msk.f32.mxu1 %vm66_vm0, %v973_v53  ;;  %7734 = vmatmul.mubr.msk.f32.gmra.mxu0 %vm66_vm0, %v2357_v55  ;;  %v2360_v63 = vmul.f32 %v2269_v15, %v9167_v52  ;;  %v13048_v53 = vsub.s32 1, %v8743_v41  ;;  %v732_v20 = vcombine.high %v9037_v49, %v9037_v49  ;;  %v3378_v55 = vrot.slane %v8878_v51, %v8900_v5 }
 0x2ae   :  { %7736 = vmatprep.mubr.msk.f32.mxu0 %vm66_vm0, %v2358_v30  ;;  %v976_v28 = vmul.f32 %v9174_v48, %v860_v0  ;;  %v2273_v25 = vrot.slane %v2128_v19, %v8764_v44  ;;  %v9383_v45 = vmul.f32 %v9325_v12, %v3666_v8  ;;  %v9386_v43 = vmul.f32 %v5079_v36, %v9325_v12 }
 0x2af   :  { %v2145_v46 = vcombine.high %v9052_v13, %v9052_v13  ;;  %v9397_v30 = vrot.slane %v8771_v22, %v13048_v53  ;;  %v760_v56 = vrot.slane %v732_v20, %v8900_v5  ;;  %v3386_v8 = vcombine.high %v3378_v55, %v3378_v55 }
 0x2b0   :  { %7673 = vmatmul.mubr.msk.f32.gmra.mxu1 %vm66_vm0, %v974_v14  ;;  %v2361_v49 = vmul.f32 %v2273_v25, %v9174_v48  ;;  %v4791_v14 = vrot.slane %v8897_v4, %v8900_v5  ;;  %v4878_v15 = vcombine.high %v9279_v21, %v9279_v21  ;;  %v4927_v22 = vcombine.high %v9298_v10, %v9298_v10 }
 0x2b1   :  { %7675 = vmatprep.mubr.msk.f32.mxu1 %vm66_vm0, %v975_v2  ;;  %7737 = vmatmul.mubr.msk.f32.gmra.mxu0 %vm66_vm0, %v2359_v39  ;;  %v4976_v13 = vcombine.high %v9335_v16, %v9335_v16  ;;  %v762_v19 = vcombine.high %v9080_v38, %v9080_v38  ;;  %v2173_v21 = vrot.slane %v2145_v46, %v8900_v5  ;;  %v13167_v39 = vld [vmem:[#allocation17_spill] sm:$0xff] }
 0x2b2   :  { %7739 = vmatprep.mubr.msk.f32.mxu0 %vm66_vm0, %v2360_v63  ;;  %v465_v10 = vadd.f32 %v8816_v31, %v9397_v30  ;;  %v3394_v16 = vrot.slane %v3378_v55, %v8900_v5  ;;  %v764_v38 = vcombine.high %v760_v56, %v760_v56  ;;  %v4799_v36 = vcombine.high %v4791_v14, %v4791_v14 }
 0x2b3   :  { %v5023_v31 = vrot.slane %v4878_v15, %v8764_v44  ;;  %v5087_v2 = vrot.slane %v4976_v13, %v8764_v44  ;;  %v2297_v0 = vrot.slane %v2173_v21, %v8764_v44 }
 0x2b4   :  { %7676 = vmatmul.mubr.msk.f32.gmra.mxu1 %vm66_vm0, %v976_v28  ;;  %v13168_v28 = vld [vmem:[#allocation15_spill] sm:$0xff]  ;;  %v892_v55 = vrot.slane %v764_v38, %v8764_v44  ;;  %v13170_v38 = vld [vmem:[#allocation6_spill] sm:$0xff] }
 0x2b5   :  { %7678 = vmatprep.mubr.msk.f32.mxu1 %vm66_vm0, %v8995_v7  ;;  %7740 = vmatmul.mubr.msk.f32.gmra.mxu0 %vm66_vm0, %v2361_v49  ;;  %v3563_v7 = vcombine.high %v9323_v33, %v9323_v33  ;;  %v3465_v33 = vcombine.high %v9275_v18, %v9275_v18  ;;  %v4807_v18 = vrot.slane %v4791_v14, %v8900_v5 }
 0x2b6   :  { %7742 = vmatprep.mubr.msk.f32.mxu0 %vm66_vm0, %v8998_v54  ;;  %v2175_v54 = vcombine.high %v9084_v40, %v9084_v40  ;;  %v9432_v40 = vrot.slane %v3386_v8, %v8900_v5  ;;  %v2177_v49 = vcombine.high %v2173_v21, %v2173_v21  ;;  %v2367_v8 = vmul.f32 %v2297_v0, %v9137_v29  ;;  %v9485_v0 = vpop.permute.xlu1 %3733 }
 0x2b7   :  { %v3610_v20 = vrot.slane %v3465_v33, %v8764_v44  ;;  %v3416_v33 = vcombine.high %v3394_v16, %v3394_v16 }
 0x2b8   :  { %7679 = vmatmul.mubr.msk.f32.gmra.mxu1 %vm66_vm0, %v9013_v60  ;;  %v3514_v60 = vcombine.high %v9289_v6, %v9289_v6  ;;  %v5055_v6 = vrot.slane %v4927_v22, %v8764_v44  ;;  %v2301_v63 = vrot.slane %v2175_v54, %v8764_v44  ;;  %v1526_v54 = vcombine.high %v465_v10, %v465_v10 }
 0x2b9   :  { %7681 = vmatprep.mubr.msk.f32.mxu1 %vm66_vm0, %v9040_v9  ;;  %7743 = vmatmul.mubr.msk.f32.gmra.mxu0 %vm66_vm0, %v9016_v3  ;;  %v884_v9 = vrot.slane %v760_v56, %v8764_v44  ;;  %v3674_v3 = vrot.slane %v3563_v7, %v8764_v44  ;;  %v13169_v56 = vld [vmem:[#allocation18_spill] sm:$0xff] }
 0x2ba   :  { %7745 = vmatprep.mubr.msk.f32.mxu0 %vm66_vm0, %v9043_v1  ;;  %v888_v1 = vrot.slane %v762_v19, %v8764_v44  ;;  %v3642_v46 = vrot.slane %v3514_v60, %v8764_v44  ;;  %v2368_v60 = vmul.f32 %v2301_v63, %v9167_v52  ;;  %v1540_v63 = vrot.slane %v1526_v54, %v8900_v5 }
 0x2bb   :  { %v982_v25 = vmul.f32 %v9137_v29, %v884_v9  ;;  %v3570_v29 = vrot.slane %v3394_v16, %v8764_v44  ;;  %v9478_v9 = vrot.slane %v4799_v36, %v8900_v5  ;;  %v4983_v16 = vrot.slane %v4807_v18, %v8764_v44 }
 0x2bc   :  { %7682 = vmatmul.mubr.msk.f32.gmra.mxu1 %vm66_vm0, %v9064_v11  ;;  %v3736_v11 = vpop.permute.xlu0 %3735  ;;  %v983_v14 = vmul.f32 %v9167_v52, %v888_v1  ;;  %v3574_v36 = vrot.slane %v9432_v40, %v8764_v44 }
 0x2bd   :  { %7684 = vmatprep.mubr.msk.f32.mxu1 %vm66_vm0, %v13167_v39  ;;  %7746 = vmatmul.mubr.msk.f32.gmra.mxu0 %vm66_vm0, %v13168_v28  ;;  %v9459_v15 = vmul.f32 %v3736_v11, %v3610_v20  ;;  %v9461_v7 = vmul.f32 %v5023_v31, %v3736_v11  ;;  %v9464_v22 = vmul.f32 %v3736_v11, %v3642_v46 }
 0x2be   :  { %7748 = vmatprep.mubr.msk.f32.mxu0 %vm66_vm0, %v13169_v56  ;;  %v9466_v13 = vmul.f32 %v5055_v6, %v3736_v11  ;;  %v9468_v19 = vmul.f32 %v3736_v11, %v3674_v3  ;;  %v9470_v21 = vmul.f32 %v5087_v2, %v3736_v11  ;;  %v471_v31 = vadd.f32 %v13170_v38, %v9397_v30  ;;  %v13174_v38 = vld [vmem:[#allocation8_spill] sm:$0xff] }
 0x2bf   :  { %v984_v6 = vmul.f32 %v9174_v48, %v892_v55  ;;  %v2305_v3 = vrot.slane %v2177_v49, %v8764_v44  ;;  %v1533_v2 = vrot.slane %v465_v10, %v8900_v5  ;;  %v4829_v39 = vcombine.high %v4807_v18, %v4807_v18 }
 0x2c0   :  { %7685 = vmatmul.mubr.msk.f32.gmra.mxu1 %vm66_vm0, %v982_v25  ;;  %v3755_v52 = vmul.f32 %v9325_v12, %v3570_v29  ;;  %v5140_v10 = vmul.f32 %v4983_v16, %v9325_v12  ;;  %v3578_v18 = vrot.slane %v3416_v33, %v8764_v44  ;;  %v1575_v20 = vcombine.high %v471_v31, %v471_v31  ;;  %v13171_v12 = vld [vmem:[#allocation7_spill] sm:$0xff] }
 0x2c1   :  { %7687 = vmatprep.mubr.msk.f32.mxu1 %vm66_vm0, %v983_v14  ;;  %7749 = vmatmul.mubr.msk.f32.gmra.mxu0 %vm66_vm0, %v2367_v8  ;;  %v2369_v1 = vmul.f32 %v2305_v3, %v9174_v48  ;;  %v4987_v28 = vrot.slane %v9478_v9, %v8764_v44  ;;  %v3756_v25 = vmul.f32 %v9485_v0, %v3574_v36 }
 0x2c2   :  { %7751 = vmatprep.mubr.msk.f32.mxu0 %vm66_vm0, %v2368_v60  ;;  %v1541_v55 = vcombine.high %v1533_v2, %v1533_v2  ;;  %v3757_v48 = vmul.f32 %v3736_v11, %v3578_v18  ;;  %v4991_v49 = vrot.slane %v4829_v39, %v8764_v44  ;;  %v1582_v46 = vrot.slane %v471_v31, %v8900_v5 }
 0x2c3   :  { %v477_v56 = vadd.f32 %v13171_v12, %v9397_v30  ;;  %v5141_v8 = vmul.f32 %v4987_v28, %v9485_v0  ;;  %v1542_v14 = vcombine.high %v1540_v63, %v1540_v63  ;;  %v9510_v33 = vrot.slane %v1533_v2, %v8900_v5 }
 0x2c4   :  { %7688 = vmatmul.mubr.msk.f32.gmra.mxu1 %vm66_vm0, %v984_v6  ;;  %v5142_v54 = vmul.f32 %v4991_v49, %v3736_v11  ;;  %v1589_v29 = vrot.slane %v1575_v20, %v8900_v5  ;;  %v9515_v60 = vrot.slane %v1541_v55, %v8900_v5  ;;  %v483_v31 = vadd.f32 %v13174_v38, %v9397_v30  ;;  %v13179_v49 = vld [vmem:[#allocation9_spill] sm:$0xff] }
 0x2c5   :  { %7770 = vmatprep.mubr.msk.f32.mxu1 %vm66_vm0, %v3755_v52  ;;  %7752 = vmatmul.mubr.msk.f32.gmra.mxu0 %vm66_vm0, %v2369_v1  ;;  %13172 = vst [vmem:[#allocation17_spill] sm:$0xff] %v9510_v33  ;;  %v9521_v6 = vrot.slane %v1540_v63, %v8900_v5  ;;  %v1590_v3 = vcombine.high %v1582_v46, %v1582_v46 }
 0x2c6   :  { %7834 = vmatprep.mubr.msk.f32.mxu0 %vm66_vm0, %v5140_v10  ;;  %13173 = vst [vmem:[#allocation15_spill] sm:$0xff] %v9515_v60  ;;  %v1624_v11 = vcombine.high %v477_v56, %v477_v56  ;;  %v9524_v2 = vrot.slane %v1542_v14, %v8900_v5  ;;  %v1631_v39 = vrot.slane %v477_v56, %v8900_v5 }
 0x2c7   :  { %13175 = vst [vmem:[#allocation18_spill] sm:$0xff] %v9521_v6  ;;  %v1571_v16 = vcombine.high %v9510_v33, %v9510_v33  ;;  %v1591_v52 = vcombine.high %v1589_v29, %v1589_v29  ;;  %v1573_v36 = vcombine.high %v9515_v60, %v9515_v60  ;;  %v9532_v1 = vrot.slane %v1582_v46, %v8900_v5 }
 0x2c8   :  { %7771 = vmatmul.mubr.msk.f32.vlgmr.msra.gmra.mxu1 %vm66_vm0, %v3756_v25  ;;  %13176 = vst [vmem:[#allocation6_spill] sm:$0xff] %v9524_v2  ;;  %v1673_v10 = vcombine.high %v483_v31, %v483_v31  ;;  %v1572_v63 = vcombine.high %v9521_v6, %v9521_v6  ;;  %v9539_v20 = vrot.slane %v1590_v3, %v8900_v5 }
 0x2c9   :  { %7773 = vmatprep.mubr.msk.f32.mxu1 %vm66_vm0, %v3757_v48  ;;  %7835 = vmatmul.mubr.msk.f32.vlgmr.msra.gmra.mxu0 %vm66_vm0, %v5141_v8  ;;  %13177 = vst [vmem:[#allocation7_spill] sm:$0xff] %v9532_v1  ;;  %v1638_v28 = vrot.slane %v1624_v11, %v8900_v5  ;;  %v1574_v25 = vcombine.high %v9524_v2, %v9524_v2 }
 0x2ca   :  { %7837 = vmatprep.mubr.msk.f32.mxu0 %vm66_vm0, %v5142_v54  ;;  %13178 = vst [vmem:[#allocation8_spill] sm:$0xff] %v9539_v20  ;;  %v1639_v48 = vcombine.high %v1631_v39, %v1631_v39  ;;  %v489_v46 = vadd.f32 %v13179_v49, %v9397_v30  ;;  %v9549_v12 = vrot.slane %v1571_v16, %v8764_v44 }
 0x2cb   :  { %v9554_v8 = vrot.slane %v1589_v29, %v8900_v5  ;;  %v9557_v14 = vrot.slane %v1591_v52, %v8900_v5  ;;  %v9560_v54 = vrot.slane %v1573_v36, %v8764_v44  ;;  %v1620_v38 = vcombine.high %v9532_v1, %v9532_v1 }
 0x2cc   :  { %13180 = vst [vmem:[#allocation9_spill] sm:$0xff] %v9549_v12  ;;  %v1680_v3 = vrot.slane %v483_v31, %v8900_v5  ;;  %v1687_v11 = vrot.slane %v1673_v10, %v8900_v5  ;;  %v9569_v49 = vrot.slane %v1572_v63, %v8764_v44  ;;  %v1622_v29 = vcombine.high %v9539_v20, %v9539_v20 }
 0x2cd   :  { %13181 = vst [vmem:[#allocation21_spill] sm:$0xff] %v9554_v8  ;;  %13182 = vst [vmem:[#allocation22_spill] sm:$0xff] %v9557_v14  ;;  %v1640_v52 = vcombine.high %v1638_v28, %v1638_v28  ;;  %v9574_v36 = vrot.slane %v1574_v25, %v8764_v44  ;;  %v9577_v53 = vrot.slane %v1631_v39, %v8900_v5 }
 0x2ce   :  { %13183 = vst [vmem:[#allocation23_spill] sm:$0xff] %v9560_v54  ;;  %13184 = vst [vmem:[#allocation24_spill] sm:$0xff] %v9569_v49  ;;  %v9580_v31 = vrot.slane %v1639_v48, %v8900_v5  ;;  %v2911_v10 = vcombine.high %v489_v46, %v489_v46  ;;  %v1621_v16 = vcombine.high %v9554_v8, %v9554_v8 }
 0x2cf   :  { %13185 = vst [vmem:[#allocation25_spill] sm:$0xff] %v9574_v36  ;;  %13186 = vst [vmem:[#allocation26_spill] sm:$0xff] %v9577_v53  ;;  %v1623_v63 = vcombine.high %v9557_v14, %v9557_v14  ;;  %v9591_v55 = vrot.slane %v1620_v38, %v8764_v44  ;;  %v9594_v39 = vrot.slane %v1638_v28, %v8900_v5 }
 0x2d0   :  { %13187 = vst [vmem:[#allocation27_spill] sm:$0xff] %v9580_v31  ;;  %v1688_v48 = vcombine.high %v1680_v3, %v1680_v3  ;;  %v1689_v18 = vcombine.high %v1687_v11, %v1687_v11  ;;  %v9597_v41 = vrot.slane %v1622_v29, %v8764_v44  ;;  %v9602_v49 = vrot.slane %v1640_v52, %v8900_v5 }
 0x2d1   :  { %13188 = vst [vmem:[#allocation28_spill] sm:$0xff] %v9591_v55  ;;  %13189 = vst [vmem:[#allocation29_spill] sm:$0xff] %v9594_v39  ;;  %v2918_v56 = vrot.slane %v489_v46, %v8900_v5  ;;  %v1669_v28 = vcombine.high %v9577_v53, %v9577_v53  ;;  %v1671_v25 = vcombine.high %v9580_v31, %v9580_v31 }
 0x2d2   :  { %13190 = vst [vmem:[#allocation30_spill] sm:$0xff] %v9597_v41  ;;  %13191 = vst [vmem:[#allocation31_spill] sm:$0xff] %v9602_v49  ;;  %v2925_v29 = vrot.slane %v2911_v10, %v8900_v5  ;;  %v9613_v2 = vrot.slane %v1621_v16, %v8764_v44  ;;  %v9616_v36 = vrot.slane %v1623_v63, %v8764_v44  ;;  %v13198_v16 = vld [vmem:[#allocation10_spill] sm:$0xff] }
 0x2d3   :  { %v9619_v52 = vrot.slane %v1680_v3, %v8900_v5  ;;  %v9622_v46 = vrot.slane %v1687_v11, %v8900_v5  ;;  %v1670_v38 = vcombine.high %v9594_v39, %v9594_v39  ;;  %v9627_v6 = vrot.slane %v1688_v48, %v8900_v5 }
 0x2d4   :  { %13192 = vst [vmem:[#allocation32_spill] sm:$0xff] %v9613_v2  ;;  %13193 = vst [vmem:[#allocation33_spill] sm:$0xff] %v9616_v36  ;;  %v9630_v10 = vrot.slane %v1689_v18, %v8900_v5  ;;  %v495_v54 = vadd.f32 %v13198_v16, %v9397_v30  ;;  %v1672_v63 = vcombine.high %v9602_v49, %v9602_v49 }
 0x2d5   :  { %13194 = vst [vmem:[#allocation34_spill] sm:$0xff] %v9619_v52  ;;  %13195 = vst [vmem:[#allocation35_spill] sm:$0xff] %v9622_v46  ;;  %v2926_v36 = vcombine.high %v2918_v56, %v2918_v56  ;;  %v9641_v12 = vrot.slane %v1669_v28, %v8764_v44  ;;  %v9644_v48 = vrot.slane %v1671_v25, %v8764_v44 }
 0x2d6   :  { %13196 = vst [vmem:[#allocation36_spill] sm:$0xff] %v9627_v6  ;;  %13197 = vst [vmem:[#allocation37_spill] sm:$0xff] %v9630_v10  ;;  %v2927_v16 = vcombine.high %v2925_v29, %v2925_v29  ;;  %v1718_v3 = vcombine.high %v9619_v52, %v9619_v52  ;;  %v1719_v11 = vcombine.high %v9622_v46, %v9622_v46 }
 0x2d7   :  { %13199 = vst [vmem:[#allocation10_spill] sm:$0xff] %v9641_v12  ;;  %13200 = vst [vmem:[#allocation38_spill] sm:$0xff] %v9644_v48  ;;  %v9655_v31 = vrot.slane %v2918_v56, %v8900_v5  ;;  %v9658_v28 = vrot.slane %v1670_v38, %v8764_v44  ;;  %v1720_v25 = vcombine.high %v9627_v6, %v9627_v6 }
 0x2d8   :  { %v1721_v18 = vcombine.high %v9630_v10, %v9630_v10  ;;  %v2960_v39 = vcombine.high %v495_v54, %v495_v54  ;;  %v9665_v60 = vrot.slane %v1672_v63, %v8764_v44  ;;  %v9668_v49 = vrot.slane %v2925_v29, %v8900_v5 }
 0x2d9   :  { %13201 = vst [vmem:[#allocation39_spill] sm:$0xff] %v9655_v31  ;;  %13202 = vst [vmem:[#allocation40_spill] sm:$0xff] %v9658_v28  ;;  %v9671_v48 = vrot.slane %v2926_v36, %v8900_v5  ;;  %v2967_v56 = vrot.slane %v495_v54, %v8900_v5  ;;  %v9681_v63 = vrot.slane %v2927_v16, %v8900_v5 }
 0x2da   :  { %13203 = vst [vmem:[#allocation41_spill] sm:$0xff] %v9665_v60  ;;  %13204 = vst [vmem:[#allocation42_spill] sm:$0xff] %v9668_v49  ;;  %v9684_v29 = vrot.slane %v1718_v3, %v8764_v44  ;;  %v9689_v54 = vrot.slane %v1719_v11, %v8764_v44  ;;  %v2956_v38 = vcombine.high %v9655_v31, %v9655_v31  ;;  %v13211_v3 = vld [vmem:[#allocation11_spill] sm:$0xff] }
 0x2db   :  { %13205 = vst [vmem:[#allocation43_spill] sm:$0xff] %v9671_v48  ;;  %13206 = vst [vmem:[#allocation44_spill] sm:$0xff] %v9681_v63  ;;  %v9694_v28 = vrot.slane %v1720_v25, %v8764_v44  ;;  %v9697_v12 = vrot.slane %v1721_v18, %v8764_v44  ;;  %v2974_v16 = vrot.slane %v2960_v39, %v8900_v5 }
 0x2dc   :  { %13207 = vst [vmem:[#allocation45_spill] sm:$0xff] %v9684_v29  ;;  %13208 = vst [vmem:[#allocation46_spill] sm:$0xff] %v9689_v54  ;;  %v501_v46 = vadd.f32 %v13211_v3, %v9397_v30  ;;  %v2957_v36 = vcombine.high %v9668_v49, %v9668_v49  ;;  %v2958_v11 = vcombine.high %v9671_v48, %v9671_v48 }
 0x2dd   :  { %13209 = vst [vmem:[#allocation47_spill] sm:$0xff] %v9694_v28  ;;  %13210 = vst [vmem:[#allocation48_spill] sm:$0xff] %v9697_v12  ;;  %v2975_v10 = vcombine.high %v2967_v56, %v2967_v56  ;;  %v2959_v25 = vcombine.high %v9681_v63, %v9681_v63  ;;  %v3371_v39 = vcombine.high %v8878_v51, %v8878_v51 }
 0x2de   :  { %v4784_v3 = vcombine.high %v8897_v4, %v8897_v4  ;;  %v9717_v12 = vrot.slane %v2956_v38, %v8764_v44  ;;  %v9720_v28 = vrot.slane %v2967_v56, %v8900_v5  ;;  %v3533_v54 = vcombine.high %v9293_v32, %v9293_v32 }
 0x2df   :  { %v4946_v31 = vcombine.high %v9302_v62, %v9302_v62  ;;  %v2976_v48 = vcombine.high %v2974_v16, %v2974_v16  ;;  %v3518_v51 = vcombine.high %v9125_v37, %v9125_v37  ;;  %v4931_v4 = vcombine.high %v9234_v42, %v9234_v42 }
 0x2e0   :  { %13212 = vst [vmem:[#allocation11_spill] sm:$0xff] %v9717_v12  ;;  %13213 = vst [vmem:[#allocation49_spill] sm:$0xff] %v9720_v28  ;;  %v9733_v38 = vrot.slane %v2958_v11, %v8764_v44  ;;  %v9738_v32 = vrot.slane %v2974_v16, %v8900_v5  ;;  %v9741_v62 = vrot.slane %v2975_v10, %v8900_v5 }
 0x2e1   :  { %v9744_v18 = vrot.slane %v2957_v36, %v8764_v44  ;;  %v9747_v37 = vrot.slane %v2959_v25, %v8764_v44  ;;  %v3385_v42 = vrot.slane %v3371_v39, %v8900_v5  ;;  %v4798_v11 = vrot.slane %v4784_v3, %v8900_v5 }
 0x2e2   :  { %13214 = vst [vmem:[#allocation50_spill] sm:$0xff] %v9733_v38  ;;  %13215 = vst [vmem:[#allocation51_spill] sm:$0xff] %v9738_v32  ;;  %v3005_v49 = vcombine.high %v9720_v28, %v9720_v28  ;;  %v3009_v56 = vcombine.high %v501_v46, %v501_v46  ;;  %v9754_v16 = vrot.slane %v3533_v54, %v8900_v5 }
 0x2e3   :  { %13216 = vst [vmem:[#allocation52_spill] sm:$0xff] %v9741_v62  ;;  %13217 = vst [vmem:[#allocation53_spill] sm:$0xff] %v9744_v18  ;;  %v9757_v10 = vrot.slane %v4946_v31, %v8900_v5  ;;  %v9760_v36 = vrot.slane %v2976_v48, %v8900_v5  ;;  %v9765_v39 = vrot.slane %v3518_v51, %v8900_v5  ;;  %v13220_v48 = vld [vmem:[#allocation12_spill] sm:$0xff] }
 0x2e4   :  { %13218 = vst [vmem:[#allocation54_spill] sm:$0xff] %v9747_v37  ;;  %v9768_v3 = vrot.slane %v4931_v4, %v8900_v5  ;;  %v3006_v37 = vcombine.high %v9738_v32, %v9738_v32  ;;  %v3007_v54 = vcombine.high %v9741_v62, %v9741_v62  ;;  %v507_v18 = vadd.f32 %v13220_v48, %v9397_v30  ;;  %v9811_v32 = vpop.permute.xlu0 %3739 }
 0x2e5   :  { %13219 = vst [vmem:[#allocation55_spill] sm:$0xff] %v9760_v36  ;;  %v3387_v63 = vcombine.high %v3385_v42, %v3385_v42  ;;  %v3418_v51 = vcombine.high %v9432_v40, %v9432_v40  ;;  %v4800_v25 = vcombine.high %v4798_v11, %v4798_v11  ;;  %v4831_v4 = vcombine.high %v9478_v9, %v9478_v9 }
 0x2e6   :  { %v9783_v28 = vrot.slane %v3385_v42, %v8900_v5  ;;  %v9786_v38 = vrot.slane %v4798_v11, %v8900_v5  ;;  %v3565_v31 = vcombine.high %v9754_v16, %v9754_v16  ;;  %v4978_v48 = vcombine.high %v9757_v10, %v9757_v10 }
 0x2e7   :  { %v9795_v40 = vrot.slane %v3005_v49, %v8764_v44  ;;  %v3534_v9 = vcombine.high %v9765_v39, %v9765_v39  ;;  %v4947_v42 = vcombine.high %v9768_v3, %v9768_v3  ;;  %v3008_v11 = vcombine.high %v9760_v36, %v9760_v36 }
 0x2e8   :  { %v3016_v12 = vrot.slane %v501_v46, %v8900_v5  ;;  %v3023_v29 = vrot.slane %v3009_v56, %v8900_v5  ;;  %v3058_v6 = vcombine.high %v507_v18, %v507_v18  ;;  %v9806_v52 = vrot.slane %v3387_v63, %v8900_v5 }
 0x2e9   :  { %13221 = vst [vmem:[#allocation12_spill] sm:$0xff] %v9795_v40  ;;  %v9809_v49 = vrot.slane %v4800_v25, %v8900_v5  ;;  %v3582_v40 = vrot.slane %v3418_v51, %v8764_v44  ;;  %v4995_v62 = vrot.slane %v4831_v4, %v8764_v44  ;;  %v3586_v46 = vrot.slane %v9783_v28, %v8764_v44 }
 0x2ea   :  { %v4999_v56 = vrot.slane %v9786_v38, %v8764_v44  ;;  %v3678_v63 = vrot.slane %v3565_v31, %v8764_v44  ;;  %v5091_v53 = vrot.slane %v4978_v48, %v8764_v44  ;;  %v9824_v25 = vrot.slane %v3534_v9, %v8900_v5 }
 0x2eb   :  { %v9827_v2 = vrot.slane %v4947_v42, %v8900_v5  ;;  %v3759_v14 = vmul.f32 %v9811_v32, %v3586_v46  ;;  %v3024_v9 = vcombine.high %v3016_v12, %v3016_v12  ;;  %v3025_v42 = vcombine.high %v3023_v29, %v3023_v29  ;;  %v13224_v46 = vld [vmem:[#allocation13_spill] sm:$0xff] }
 0x2ec   :  { %v5144_v8 = vmul.f32 %v4999_v56, %v9811_v32  ;;  %v513_v56 = vadd.f32 %v13224_v46, %v9397_v30 }
 0x300   :  { %v9815_v60 = vpop.permute.xlu1 %3737 }
 0x301   :  { %v3758_v51 = vmul.f32 %v9815_v60, %v3582_v40  ;;  %v5143_v4 = vmul.f32 %v4995_v62, %v9815_v60  ;;  %v9834_v41 = vmul.f32 %v9815_v60, %v3678_v63  ;;  %v9837_v31 = vmul.f32 %v5091_v53, %v9815_v60 }
 0x302   :  { %v9844_v62 = vrot.slane %v3007_v54, %v8764_v44  ;;  %v9847_v40 = vrot.slane %v3006_v37, %v8764_v44  ;;  %v9854_v53 = vrot.slane %v3016_v12, %v8900_v5  ;;  %v9857_v63 = vrot.slane %v3023_v29, %v8900_v5 }
 0x303   :  { %7774 = vmatmul.mubr.msk.f32.gmra.mxu1 %vm66_vm0, %v3758_v51  ;;  %7838 = vmatmul.mubr.msk.f32.gmra.mxu0 %vm66_vm0, %v5143_v4  ;;  %v3590_v54 = vrot.slane %v9806_v52, %v8764_v44  ;;  %v5003_v37 = vrot.slane %v9809_v49, %v8764_v44  ;;  %v3065_v51 = vrot.slane %v507_v18, %v8900_v5 }
 0x304   :  { %13222 = vst [vmem:[#allocation56_spill] sm:$0xff] %v9844_v62  ;;  %13223 = vst [vmem:[#allocation57_spill] sm:$0xff] %v9847_v40  ;;  %7776 = vmatprep.mubr.msk.f32.mxu1 %vm66_vm0, %v3759_v14  ;;  %7840 = vmatprep.mubr.msk.f32.mxu0 %vm66_vm0, %v5144_v8  ;;  %v3072_v4 = vrot.slane %v3058_v6, %v8900_v5  ;;  %v9865_v46 = vpop.permute.xlu1 %3741  ;;  %v3686_v8 = vrot.slane %v9824_v25, %v8764_v44  ;;  %v13229_v6 = vld [vmem:[#allocation19_spill] sm:$0xff] }
 0x305   :  { %13225 = vst [vmem:[#allocation13_spill] sm:$0xff] %v9854_v53  ;;  %13226 = vst [vmem:[#allocation58_spill] sm:$0xff] %v9857_v63  ;;  %v5099_v12 = vrot.slane %v9827_v2, %v8764_v44  ;;  %v9872_v14 = vrot.slane %v3024_v9, %v8900_v5  ;;  %v9875_v29 = vrot.slane %v3025_v42, %v8900_v5 }
 0x306   :  { %v3760_v48 = vmul.f32 %v9865_v46, %v3590_v54  ;;  %v5145_v18 = vmul.f32 %v5003_v37, %v9865_v46  ;;  %v4328_v40 = vcombine.high %v513_v56, %v513_v56  ;;  %v537_v36 = vadd.f32 %v13229_v6, %v9397_v30 }
 0x307   :  { %13227 = vst [vmem:[#allocation59_spill] sm:$0xff] %v9872_v14  ;;  %13228 = vst [vmem:[#allocation60_spill] sm:$0xff] %v9875_v29  ;;  %v9882_v62 = vmul.f32 %v9865_v46, %v3686_v8  ;;  %v9885_v55 = vmul.f32 %v5099_v12, %v9865_v46  ;;  %v9888_v9 = vrot.slane %v3008_v11, %v8764_v44 }
 0x308   :  { %v3054_v42 = vcombine.high %v9854_v53, %v9854_v53  ;;  %7777 = vmatmul.mubr.msk.f32.gmra.mxu1 %vm66_vm0, %v3760_v48  ;;  %7841 = vmatmul.mubr.msk.f32.gmra.mxu0 %vm66_vm0, %v5145_v18  ;;  %v3055_v37 = vcombine.high %v9857_v63, %v9857_v63  ;;  %v3073_v8 = vcombine.high %v3065_v51, %v3065_v51 }
 0x309   :  { %13230 = vst [vmem:[#allocation19_spill] sm:$0xff] %v9888_v9  ;;  %v3074_v6 = vcombine.high %v3072_v4, %v3072_v4  ;;  %v4335_v12 = vrot.slane %v513_v56, %v8900_v5  ;;  %v3056_v11 = vcombine.high %v9872_v14, %v9872_v14  ;;  %v3057_v9 = vcombine.high %v9875_v29, %v9875_v29 }
 0x30a   :  { %v9906_v48 = vrot.slane %v3065_v51, %v8900_v5  ;;  %v9911_v53 = vrot.slane %v3072_v4, %v8900_v5  ;;  %v4342_v56 = vrot.slane %v4328_v40, %v8900_v5  ;;  %v5713_v20 = vcombine.high %v537_v36, %v537_v36 }
 0x30b   :  { %v9915_v1 = vrot.slane %v3054_v42, %v8764_v44  ;;  %v3417_v54 = vcombine.high %v9783_v28, %v9783_v28  ;;  %v4830_v51 = vcombine.high %v9786_v38, %v9786_v38  ;;  %v9924_v18 = vrot.slane %v3055_v37, %v8764_v44 }
 0x30c   :  { %13231 = vst [vmem:[#allocation61_spill] sm:$0xff] %v9906_v48  ;;  %13232 = vst [vmem:[#allocation62_spill] sm:$0xff] %v9911_v53  ;;  %v9927_v4 = vrot.slane %v3073_v8, %v8900_v5  ;;  %v9930_v40 = vrot.slane %v3074_v6, %v8900_v5  ;;  %v4343_v42 = vcombine.high %v4335_v12, %v4335_v12 }
 0x30d   :  { %13233 = vst [vmem:[#allocation63_spill] sm:$0xff] %v9915_v1  ;;  %13234 = vst [vmem:[#allocation64_spill] sm:$0xff] %v9924_v18  ;;  %v9933_v63 = vrot.slane %v3056_v11, %v8764_v44  ;;  %v9936_v33 = vrot.slane %v3057_v9, %v8764_v44  ;;  %v3103_v28 = vcombine.high %v9906_v48, %v9906_v48 }
 0x30e   :  { %13235 = vst [vmem:[#allocation65_spill] sm:$0xff] %v9927_v4  ;;  %13236 = vst [vmem:[#allocation66_spill] sm:$0xff] %v9930_v40  ;;  %v5720_v38 = vrot.slane %v537_v36, %v8900_v5  ;;  %v3104_v37 = vcombine.high %v9911_v53, %v9911_v53  ;;  %v4344_v6 = vcombine.high %v4342_v56, %v4342_v56 }
 0x30f   :  { %13237 = vst [vmem:[#allocation67_spill] sm:$0xff] %v9933_v63  ;;  %13238 = vst [vmem:[#allocation68_spill] sm:$0xff] %v9936_v33  ;;  %v5727_v18 = vrot.slane %v5713_v20, %v8900_v5  ;;  %v9947_v11 = vrot.slane %v4335_v12, %v8900_v5  ;;  %v9950_v9 = vrot.slane %v4342_v56, %v8900_v5  ;;  %v9963_v12 = vpop.permute.xlu0 %3743 }
 0x310   :  { %v3594_v33 = vrot.slane %v3417_v54, %v8764_v44  ;;  %v5007_v29 = vrot.slane %v4830_v51, %v8764_v44  ;;  %v3105_v36 = vcombine.high %v9927_v4, %v9927_v4  ;;  %v3106_v63 = vcombine.high %v9930_v40, %v9930_v40 }
 0x311   :  { %13239 = vst [vmem:[#allocation69_spill] sm:$0xff] %v9947_v11  ;;  %13240 = vst [vmem:[#allocation70_spill] sm:$0xff] %v9950_v9  ;;  %v9961_v20 = vrot.slane %v4343_v42, %v8900_v5  ;;  %v5728_v54 = vcombine.high %v5720_v38, %v5720_v38  ;;  %v9970_v1 = vrot.slane %v3103_v28, %v8764_v44 }
 0x312   :  { %v3761_v51 = vmul.f32 %v9963_v12, %v3594_v33  ;;  %v5146_v48 = vmul.f32 %v5007_v29, %v9963_v12  ;;  %v9975_v8 = vrot.slane %v4344_v6, %v8900_v5  ;;  %v5729_v42 = vcombine.high %v5727_v18, %v5727_v18 }
 0x313   :  { %13241 = vst [vmem:[#allocation71_spill] sm:$0xff] %v9961_v20  ;;  %13242 = vst [vmem:[#allocation72_spill] sm:$0xff] %v9970_v1  ;;  %v9978_v53 = vrot.slane %v3104_v37, %v8764_v44  ;;  %v4373_v56 = vcombine.high %v9947_v11, %v9947_v11  ;;  %v4374_v33 = vcombine.high %v9950_v9, %v9950_v9 }
 0x314   :  { %13243 = vst [vmem:[#allocation73_spill] sm:$0xff] %v9975_v8  ;;  %7779 = vmatprep.mubr.msk.f32.mxu1 %vm66_vm0, %v3761_v51  ;;  %7843 = vmatprep.mubr.msk.f32.mxu0 %vm66_vm0, %v5146_v48  ;;  %v9987_v29 = vrot.slane %v3105_v36, %v8764_v44  ;;  %v9990_v28 = vrot.slane %v3106_v63, %v8764_v44 }
 0x315   :  { %13244 = vst [vmem:[#allocation74_spill] sm:$0xff] %v9978_v53  ;;  %v4375_v37 = vcombine.high %v9961_v20, %v9961_v20  ;;  %v9995_v6 = vrot.slane %v5720_v38, %v8900_v5  ;;  %v10002_v48 = vrot.slane %v5727_v18, %v8900_v5  ;;  %v10005_v36 = vrot.slane %v5728_v54, %v8900_v5 }
 0x316   :  { %13245 = vst [vmem:[#allocation75_spill] sm:$0xff] %v9987_v29  ;;  %13246 = vst [vmem:[#allocation76_spill] sm:$0xff] %v9990_v28  ;;  %v4376_v63 = vcombine.high %v9975_v8, %v9975_v8  ;;  %v10012_v38 = vrot.slane %v5729_v42, %v8900_v5  ;;  %v3420_v14 = vcombine.high %v8885_v57, %v8885_v57  ;;  %v13255_v8 = vld [vmem:[#allocation14_spill] sm:$0xff] }
 0x317   :  { %13247 = vst [vmem:[#allocation77_spill] sm:$0xff] %v9995_v6  ;;  %13248 = vst [vmem:[#allocation78_spill] sm:$0xff] %v10002_v48  ;;  %v10017_v51 = vrot.slane %v4373_v56, %v8764_v44  ;;  %v10022_v54 = vrot.slane %v4374_v33, %v8764_v44  ;;  %v4848_v9 = vcombine.high %v9253_v58, %v9253_v58  ;;  %v13321_v29 = vld [vmem:[#allocation30_spill] sm:$0xff] }
 0x318   :  { %13249 = vst [vmem:[#allocation79_spill] sm:$0xff] %v10005_v36  ;;  %13250 = vst [vmem:[#allocation80_spill] sm:$0xff] %v10012_v38  ;;  %v10027_v28 = vrot.slane %v4375_v37, %v8764_v44  ;;  %v5758_v42 = vcombine.high %v9995_v6, %v9995_v6  ;;  %v3435_v57 = vcombine.high %v9249_v27, %v9249_v27 }
 0x319   :  { %13251 = vst [vmem:[#allocation81_spill] sm:$0xff] %v10017_v51  ;;  %13252 = vst [vmem:[#allocation82_spill] sm:$0xff] %v10022_v54  ;;  %v4833_v56 = vcombine.high %v9144_v23, %v9144_v23  ;;  %v5759_v18 = vcombine.high %v10002_v48, %v10002_v48  ;;  %v5760_v33 = vcombine.high %v10005_v36, %v10005_v36 }
 0x31a   :  { %13253 = vst [vmem:[#allocation83_spill] sm:$0xff] %v10027_v28  ;;  %v3419_v58 = vcombine.high %v9806_v52, %v9806_v52  ;;  %v4832_v37 = vcombine.high %v9809_v49, %v9809_v49  ;;  %v10044_v54 = vrot.slane %v4376_v63, %v8764_v44  ;;  %v5761_v27 = vcombine.high %v10012_v38, %v10012_v38 }
 0x31b   :  { %v3434_v23 = vrot.slane %v3420_v14, %v8900_v5  ;;  %v519_v28 = vadd.f32 %v13255_v8, %v9397_v30  ;;  %v4870_v63 = vrot.slane %v4848_v9, %v8900_v5  ;;  %v3457_v20 = vrot.slane %v3435_v57, %v8900_v5  ;;  %v10077_v57 = vpop.permute.xlu1 %3745 }
 0x31c   :  { %13254 = vst [vmem:[#allocation84_spill] sm:$0xff] %v10044_v54  ;;  %v10059_v54 = vrot.slane %v5758_v42, %v8764_v44  ;;  %v4847_v8 = vrot.slane %v4833_v56, %v8900_v5  ;;  %v10066_v51 = vrot.slane %v5760_v33, %v8764_v44  ;;  %v10069_v52 = vrot.slane %v5759_v18, %v8764_v44 }
 0x31d   :  { %v3598_v49 = vrot.slane %v3419_v58, %v8764_v44  ;;  %v5011_v9 = vrot.slane %v4832_v37, %v8764_v44  ;;  %v10074_v42 = vrot.slane %v5761_v27, %v8764_v44  ;;  %v3436_v48 = vcombine.high %v3434_v23, %v3434_v23  ;;  %v13260_v27 = vld [vmem:[#allocation16_spill] sm:$0xff] }
 0x31e   :  { %13256 = vst [vmem:[#allocation14_spill] sm:$0xff] %v10059_v54  ;;  %13257 = vst [vmem:[#allocation85_spill] sm:$0xff] %v10066_v51  ;;  %v3450_v14 = vrot.slane %v3434_v23, %v8900_v5  ;;  %v4377_v38 = vcombine.high %v519_v28, %v519_v28  ;;  %v4384_v56 = vrot.slane %v519_v28, %v8900_v5 }
 0x31f   :  { %13258 = vst [vmem:[#allocation86_spill] sm:$0xff] %v10069_v52  ;;  %13259 = vst [vmem:[#allocation87_spill] sm:$0xff] %v10074_v42  ;;  %v3762_v33 = vmul.f32 %v10077_v57, %v3598_v49  ;;  %v5147_v18 = vmul.f32 %v5011_v9, %v10077_v57  ;;  %v5019_v52 = vrot.slane %v4870_v63, %v8764_v44 }
 0x320   :  { %v3467_v58 = vcombine.high %v3457_v20, %v3457_v20  ;;  %v3469_v37 = vcombine.high %v8892_v61, %v8892_v61  ;;  %v10087_v42 = vadd.f32 %v13260_v27, %v9397_v30  ;;  %v4863_v23 = vrot.slane %v4847_v8, %v8900_v5 }
 0x321   :  { %v4849_v51 = vcombine.high %v4847_v8, %v4847_v8  ;;  %v4880_v54 = vcombine.high %v4870_v63, %v4870_v63  ;;  %7780 = vmatmul.mubr.msk.f32.gmra.mxu1 %vm66_vm0, %v3762_v33  ;;  %7844 = vmatmul.mubr.msk.f32.gmra.mxu0 %vm66_vm0, %v5147_v18  ;;  %v3606_v28 = vrot.slane %v3457_v20, %v8764_v44 }
 0x322   :  { %v3464_v49 = vrot.slane %v3436_v48, %v8900_v5  ;;  %v3466_v9 = vcombine.high %v3450_v14, %v3450_v14  ;;  %v4391_v36 = vrot.slane %v4377_v38, %v8900_v5  ;;  %7782 = vmatprep.mubr.msk.f32.mxu1 %vm66_vm0, %v9348_v35  ;;  %7846 = vmatprep.mubr.msk.f32.mxu0 %vm66_vm0, %v9351_v26 }
 0x323   :  { %v4392_v61 = vcombine.high %v4384_v56, %v4384_v56  ;;  %v10100_v63 = vrot.slane %v4384_v56, %v8900_v5  ;;  %v3764_v8 = vmul.f32 %v9485_v0, %v3606_v28  ;;  %v5149_v33 = vmul.f32 %v5019_v52, %v9485_v0 }
 0x324   :  { %v10105_v20 = vrot.slane %v3469_v37, %v8900_v5  ;;  %v3484_v48 = vcombine.high %v9257_v17, %v9257_v17  ;;  %v4426_v35 = vcombine.high %v10087_v42, %v10087_v42  ;;  %v5031_v38 = vrot.slane %v4863_v23, %v8764_v44 }
 0x325   :  { %13261 = vst [vmem:[#allocation16_spill] sm:$0xff] %v10100_v63  ;;  %v4877_v26 = vrot.slane %v4849_v51, %v8900_v5  ;;  %7783 = vmatmul.mubr.msk.f32.gmra.mxu1 %vm66_vm0, %v3764_v8  ;;  %7847 = vmatmul.mubr.msk.f32.gmra.mxu0 %vm66_vm0, %v5149_v33  ;;  %v3614_v56 = vrot.slane %v3467_v58, %v8764_v44 }
 0x326   :  { %v5027_v52 = vrot.slane %v4880_v54, %v8764_v44  ;;  %v10119_v18 = vrot.slane %v10087_v42, %v8900_v5  ;;  %v4879_v17 = vcombine.high %v4863_v23, %v4863_v23  ;;  %7785 = vmatprep.mubr.msk.f32.mxu1 %vm66_vm0, %v9459_v15  ;;  %7849 = vmatprep.mubr.msk.f32.mxu0 %vm66_vm0, %v9461_v7 }
 0x327   :  { %v3618_v51 = vrot.slane %v3450_v14, %v8764_v44  ;;  %v4393_v37 = vcombine.high %v4391_v36, %v4391_v36  ;;  %v4897_v27 = vcombine.high %v9266_v59, %v9266_v59  ;;  %v3766_v58 = vmul.f32 %v9815_v60, %v3614_v56 }
 0x328   :  { %v5151_v54 = vmul.f32 %v5027_v52, %v9815_v60  ;;  %v4882_v28 = vcombine.high %v9192_v34, %v9192_v34  ;;  %v5152_v15 = vmul.f32 %v5031_v38, %v9811_v32  ;;  %v3622_v8 = vrot.slane %v3464_v49, %v8764_v44 }
 0x329   :  { %v3767_v23 = vmul.f32 %v9811_v32, %v3618_v51  ;;  %7786 = vmatmul.mubr.msk.f32.gmra.mxu1 %vm66_vm0, %v3766_v58  ;;  %v5035_v7 = vrot.slane %v4877_v26, %v8764_v44  ;;  %v3468_v59 = vcombine.high %v3464_v49, %v3464_v49  ;;  %v4881_v14 = vcombine.high %v4877_v26, %v4877_v26 }
 0x32a   :  { %7850 = vmatmul.mubr.msk.f32.gmra.mxu0 %vm66_vm0, %v5151_v54  ;;  %v10139_v33 = vrot.slane %v4391_v36, %v8900_v5  ;;  %v3626_v34 = vrot.slane %v3466_v9, %v8764_v44  ;;  %v5039_v38 = vrot.slane %v4879_v17, %v8764_v44  ;;  %v10146_v56 = vrot.slane %v4392_v61, %v8900_v5 }
 0x32b   :  { %7788 = vmatprep.mubr.msk.f32.mxu1 %vm66_vm0, %v3767_v23  ;;  %7852 = vmatprep.mubr.msk.f32.mxu0 %vm66_vm0, %v5152_v15  ;;  %v4919_v52 = vrot.slane %v4897_v27, %v8900_v5  ;;  %v3768_v51 = vmul.f32 %v9865_v46, %v3622_v8  ;;  %v5153_v49 = vmul.f32 %v5035_v7, %v9865_v46 }
 0x32c   :  { %13262 = vst [vmem:[#allocation88_spill] sm:$0xff] %v10139_v33  ;;  %13263 = vst [vmem:[#allocation89_spill] sm:$0xff] %v10146_v56  ;;  %v3506_v36 = vrot.slane %v3484_v48, %v8900_v5  ;;  %v4896_v26 = vrot.slane %v4882_v28, %v8900_v5  ;;  %v3769_v58 = vmul.f32 %v9963_v12, %v3626_v34 }
 0x32d   :  { %v5154_v54 = vmul.f32 %v5039_v38, %v9963_v12  ;;  %v4422_v9 = vcombine.high %v10100_v63, %v10100_v63  ;;  %7789 = vmatmul.mubr.msk.f32.gmra.mxu1 %vm66_vm0, %v3768_v51  ;;  %v3630_v61 = vrot.slane %v3468_v59, %v8764_v44  ;;  %v5043_v17 = vrot.slane %v4881_v14, %v8764_v44 }
 0x32e   :  { %7853 = vmatmul.mubr.msk.f32.gmra.mxu0 %vm66_vm0, %v5153_v49  ;;  %v3485_v27 = vcombine.high %v10105_v20, %v10105_v20  ;;  %v3499_v28 = vrot.slane %v10105_v20, %v8900_v5  ;;  %7791 = vmatprep.mubr.msk.f32.mxu1 %vm66_vm0, %v3769_v58  ;;  %v10170_v23 = vrot.slane %v4393_v37, %v8900_v5 }
 0x32f   :  { %7855 = vmatprep.mubr.msk.f32.mxu0 %vm66_vm0, %v5154_v54  ;;  %v3770_v15 = vmul.f32 %v10077_v57, %v3630_v61  ;;  %v5155_v8 = vmul.f32 %v5043_v17, %v10077_v57  ;;  %v5051_v7 = vrot.slane %v4919_v52, %v8764_v44  ;;  %v4423_v59 = vcombine.high %v10139_v33, %v10139_v33 }
 0x330   :  { %13264 = vst [vmem:[#allocation90_spill] sm:$0xff] %v10170_v23  ;;  %v4424_v14 = vcombine.high %v10146_v56, %v10146_v56  ;;  %v3516_v20 = vcombine.high %v3506_v36, %v3506_v36  ;;  %v4912_v34 = vrot.slane %v4896_v26, %v8900_v5  ;;  %v4898_v38 = vcombine.high %v4896_v26, %v4896_v26 }
 0x331   :  { %v4929_v51 = vcombine.high %v4919_v52, %v4919_v52  ;;  %7792 = vmatmul.mubr.msk.f32.gmra.mxu1 %vm66_vm0, %v3770_v15  ;;  %v3638_v37 = vrot.slane %v3506_v36, %v8764_v44  ;;  %v10186_v58 = vrot.slane %v4422_v9, %v8764_v44  ;;  %v4425_v52 = vcombine.high %v10170_v23, %v10170_v23 }
 0x332   :  { %7856 = vmatmul.mubr.msk.f32.gmra.mxu0 %vm66_vm0, %v5155_v8  ;;  %7794 = vmatprep.mubr.msk.f32.mxu1 %vm66_vm0, %v9363_v24  ;;  %v3513_v36 = vrot.slane %v3485_v27, %v8900_v5  ;;  %v5157_v61 = vmul.f32 %v5051_v7, %v9485_v0  ;;  %v10200_v9 = vrot.slane %v4424_v14, %v8764_v44  ;;  %v530_v8 = vpop.f32.mrf.mxu0 }
 0x333   :  { %13265 = vst [vmem:[#allocation91_spill] sm:$0xff] %v10186_v58  ;;  %7858 = vmatprep.mubr.msk.f32.mxu0 %vm66_vm0, %v9366_v47  ;;  %v3772_v26 = vmul.f32 %v9485_v0, %v3638_v37  ;;  %v3515_v15 = vcombine.high %v3499_v28, %v3499_v28  ;;  %v5063_v24 = vrot.slane %v4912_v34, %v8764_v44 }
 0x334   :  { %13266 = vst [vmem:[#allocation92_spill] sm:$0xff] %v10200_v9  ;;  %v4926_v47 = vrot.slane %v4898_v38, %v8900_v5  ;;  %v3646_v27 = vrot.slane %v3516_v20, %v8764_v44  ;;  %v5059_v7 = vrot.slane %v4929_v51, %v8764_v44  ;;  %v4440_v14 = vrot.slane %v4426_v35, %v8900_v5 }
 0x335   :  { %7795 = vmatmul.mubr.msk.f32.gmra.mxu1 %vm66_vm0, %v3772_v26  ;;  %v4928_v37 = vcombine.high %v4912_v34, %v4912_v34  ;;  %v3650_v38 = vrot.slane %v3499_v28, %v8764_v44  ;;  %v4441_v26 = vcombine.high %v10119_v18, %v10119_v18  ;;  %v10223_v20 = vrot.slane %v10119_v18, %v8900_v5 }
 0x336   :  { %7859 = vmatmul.mubr.msk.f32.gmra.mxu0 %vm66_vm0, %v5157_v61  ;;  %7797 = vmatprep.mubr.msk.f32.mxu1 %vm66_vm0, %v9464_v22  ;;  %v3774_v51 = vmul.f32 %v9815_v60, %v3646_v27  ;;  %v5159_v42 = vmul.f32 %v5059_v7, %v9815_v60  ;;  %v531_v35 = vadd.f32 %v530_v8, %v9397_v30 }
 0x337   :  { %7861 = vmatprep.mubr.msk.f32.mxu0 %vm66_vm0, %v9466_v13  ;;  %13267 = vst [vmem:[#allocation93_spill] sm:$0xff] %v10223_v20  ;;  %v3775_v22 = vmul.f32 %v9811_v32, %v3650_v38  ;;  %v5160_v34 = vmul.f32 %v5063_v24, %v9811_v32  ;;  %v3654_v13 = vrot.slane %v3513_v36, %v8764_v44 }
 0x338   :  { %v5067_v28 = vrot.slane %v4926_v47, %v8764_v44  ;;  %v3517_v18 = vcombine.high %v3513_v36, %v3513_v36  ;;  %v4930_v61 = vcombine.high %v4926_v47, %v4926_v47  ;;  %v4442_v17 = vcombine.high %v4440_v14, %v4440_v14 }
 0x339   :  { %7798 = vmatmul.mubr.msk.f32.gmra.mxu1 %vm66_vm0, %v3774_v51  ;;  %v3658_v60 = vrot.slane %v3515_v15, %v8764_v44  ;;  %v5071_v8 = vrot.slane %v4928_v37, %v8764_v44  ;;  %v10239_v24 = vrot.slane %v4423_v59, %v8764_v44  ;;  %v10242_v27 = vrot.slane %v4425_v52, %v8764_v44 }
 0x33a   :  { %7862 = vmatmul.mubr.msk.f32.gmra.mxu0 %vm66_vm0, %v5159_v42  ;;  %7800 = vmatprep.mubr.msk.f32.mxu1 %vm66_vm0, %v3775_v22  ;;  %v3776_v7 = vmul.f32 %v9865_v46, %v3654_v13  ;;  %v5161_v36 = vmul.f32 %v5067_v28, %v9865_v46  ;;  %v10247_v47 = vrot.slane %v4440_v14, %v8900_v5 }
 0x33b   :  { %7864 = vmatprep.mubr.msk.f32.mxu0 %vm66_vm0, %v5160_v34  ;;  %13268 = vst [vmem:[#allocation94_spill] sm:$0xff] %v10239_v24  ;;  %13269 = vst [vmem:[#allocation95_spill] sm:$0xff] %v10242_v27  ;;  %v4475_v38 = vcombine.high %v531_v35, %v531_v35  ;;  %v3777_v51 = vmul.f32 %v9963_v12, %v3658_v60  ;;  %v5162_v15 = vmul.f32 %v5071_v8, %v9963_v12  ;;  %v10285_v60 = vpop.f32.mrf.mxu1 }
 0x33c   :  { %13270 = vst [vmem:[#allocation96_spill] sm:$0xff] %v10247_v47  ;;  %v10252_v37 = vrot.slane %v4441_v26, %v8900_v5  ;;  %v3662_v59 = vrot.slane %v3517_v18, %v8764_v44  ;;  %v5075_v52 = vrot.slane %v4930_v61, %v8764_v44  ;;  %v10259_v46 = vrot.slane %v4442_v17, %v8900_v5 }
 0x33d   :  { %7801 = vmatmul.mubr.msk.f32.gmra.mxu1 %vm66_vm0, %v3776_v7  ;;  %v4471_v14 = vcombine.high %v10223_v20, %v10223_v20  ;;  %v4482_v42 = vrot.slane %v531_v35, %v8900_v5  ;;  %v3670_v34 = vrot.slane %v9754_v16, %v8764_v44  ;;  %v5083_v17 = vrot.slane %v9757_v10, %v8764_v44  ;;  %v13274_v7 = vld [vmem:[#allocation20_spill] sm:$0xff] }
 0x33e   :  { %13271 = vst [vmem:[#allocation97_spill] sm:$0xff] %v10252_v37  ;;  %7865 = vmatmul.mubr.msk.f32.gmra.mxu0 %vm66_vm0, %v5161_v36  ;;  %13272 = vst [vmem:[#allocation98_spill] sm:$0xff] %v10259_v46  ;;  %7803 = vmatprep.mubr.msk.f32.mxu1 %vm66_vm0, %v3777_v51  ;;  %v3778_v26 = vmul.f32 %v10077_v57, %v3662_v59  ;;  %v5163_v22 = vmul.f32 %v5075_v52, %v10077_v57  ;;  %v10302_v51 = vpop.f32.mrf.mxu1 }
 0x33f   :  { %7867 = vmatprep.mubr.msk.f32.mxu0 %vm66_vm0, %v5162_v15  ;;  %v4472_v13 = vcombine.high %v10247_v47, %v10247_v47  ;;  %v4489_v28 = vrot.slane %v4475_v38, %v8900_v5  ;;  %v4961_v18 = vrot.slane %v9768_v3, %v8900_v5  ;;  %v4473_v61 = vcombine.high %v10252_v37, %v10252_v37  ;;  %v10304_v15 = vpop.f32.mrf.mxu0 }
 0x340   :  { %v3548_v10 = vrot.slane %v9765_v39, %v8900_v5  ;;  %v10292_v3 = vrot.slane %v4471_v14, %v8764_v44  ;;  %v543_v36 = vadd.f32 %v13274_v7, %v9397_v30  ;;  %v4474_v39 = vcombine.high %v10259_v46, %v10259_v46 }
 0x341   :  { %7804 = vmatmul.mubr.msk.f32.gmra.mxu1 %vm66_vm0, %v3778_v26  ;;  %v4490_v38 = vcombine.high %v4482_v42, %v4482_v42  ;;  %v3780_v59 = vmul.f32 %v9485_v0, %v3670_v34  ;;  %v5165_v52 = vmul.f32 %v5083_v17, %v9485_v0  ;;  %v4491_v26 = vcombine.high %v4489_v28, %v4489_v28 }
 0x342   :  { %7868 = vmatmul.mubr.msk.f32.gmra.mxu0 %vm66_vm0, %v5163_v22  ;;  %13273 = vst [vmem:[#allocation99_spill] sm:$0xff] %v10292_v3  ;;  %7806 = vmatprep.mubr.msk.f32.mxu1 %vm66_vm0, %v9383_v45  ;;  %v10311_v45 = vrot.slane %v4482_v42, %v8900_v5  ;;  %v10315_v22 = vrot.slane %v4473_v61, %v8764_v44  ;;  %v2692_v54 = vsel %vm66_vm0, %v10304_v15, -inf }
 0x343   :  { %7870 = vmatprep.mubr.msk.f32.mxu0 %vm66_vm0, %v9386_v43  ;;  %v5095_v43 = vrot.slane %v4961_v18, %v8764_v44  ;;  %v10318_v7 = vrot.slane %v4472_v13, %v8764_v44  ;;  %v3564_v16 = vcombine.high %v3548_v10, %v3548_v10  ;;  %v5762_v0 = vcombine.high %v543_v36, %v543_v36 }
 0x344   :  { %13275 = vst [vmem:[#allocation20_spill] sm:$0xff] %v10311_v45  ;;  %13276 = vst [vmem:[#allocation100_spill] sm:$0xff] %v10315_v22  ;;  %v4977_v34 = vcombine.high %v4961_v18, %v4961_v18  ;;  %v3682_v42 = vrot.slane %v3548_v10, %v8764_v44  ;;  %v10328_v17 = vrot.slane %v4474_v39, %v8764_v44  ;;  %v10337_v18 = vpop.f32.mrf.mxu1 }
 0x345   :  { %13277 = vst [vmem:[#allocation101_spill] sm:$0xff] %v10318_v7  ;;  %7807 = vmatmul.mubr.msk.f32.gmra.mxu1 %vm66_vm0, %v3780_v59  ;;  %v10331_v13 = vrot.slane %v4489_v28, %v8900_v5  ;;  %v10334_v61 = vrot.slane %v4490_v38, %v8900_v5  ;;  %v5769_v59 = vrot.slane %v543_v36, %v8900_v5 }
 0x346   :  { %7871 = vmatmul.mubr.msk.f32.gmra.mxu0 %vm66_vm0, %v5165_v52  ;;  %7809 = vmatprep.mubr.msk.f32.mxu1 %vm66_vm0, %v9468_v19  ;;  %13278 = vst [vmem:[#allocation102_spill] sm:$0xff] %v10328_v17  ;;  %v10339_v52 = vpop.f32.mrf.mxu0  ;;  %v10342_v19 = vrot.slane %v4491_v26, %v8900_v5  ;;  %v3783_v10 = vmul.f32 %v9811_v32, %v3682_v42  ;;  %v10354_v36 = vpop.f32.mrf.mxu1 }
 0x347   :  { %7873 = vmatprep.mubr.msk.f32.mxu0 %vm66_vm0, %v9470_v21  ;;  %13279 = vst [vmem:[#allocation103_spill] sm:$0xff] %v10331_v13  ;;  %13280 = vst [vmem:[#allocation104_spill] sm:$0xff] %v10334_v61  ;;  %v4520_v21 = vcombine.high %v10311_v45, %v10311_v45  ;;  %v5168_v28 = vmul.f32 %v5095_v43, %v9811_v32  ;;  %v549_v39 = vadd.f32 %v9213_v50, %v9397_v30 }
 0x348   :  { %13281 = vst [vmem:[#allocation105_spill] sm:$0xff] %v10342_v19  ;;  %v10356_v38 = vpop.f32.mrf.mxu0  ;;  %v3566_v26 = vcombine.high %v9824_v25, %v9824_v25  ;;  %v4979_v42 = vcombine.high %v9827_v2, %v9827_v2  ;;  %v5776_v32 = vrot.slane %v5762_v0, %v8900_v5  ;;  %v5103_v50 = vrot.slane %v4977_v34, %v8764_v44  ;;  %v10384_v14 = vpop.f32.mrf.mxu1 }
 0x349   :  { %7810 = vmatmul.mubr.msk.f32.gmra.mxu1 %vm66_vm0, %v9834_v41  ;;  %v3690_v41 = vrot.slane %v3564_v16, %v8764_v44  ;;  %v4522_v43 = vcombine.high %v10334_v61, %v10334_v61  ;;  %v5777_v2 = vcombine.high %v5769_v59, %v5769_v59  ;;  %v4523_v0 = vcombine.high %v10342_v19, %v10342_v19 }
 0x34a   :  { %7874 = vmatmul.mubr.msk.f32.gmra.mxu0 %vm66_vm0, %v9837_v31  ;;  %7812 = vmatprep.mubr.msk.f32.mxu1 %vm66_vm0, %v3783_v10  ;;  %v4521_v31 = vcombine.high %v10331_v13, %v10331_v13  ;;  %v10376_v10 = vrot.slane %v5769_v59, %v8900_v5  ;;  %v5170_v34 = vmul.f32 %v5103_v50, %v9963_v12  ;;  %v10386_v25 = vpop.f32.mrf.mxu0  ;;  %v1307_v50 = vsel %vm66_vm0, %v10302_v51, -inf }
 0x34b   :  { %7876 = vmatprep.mubr.msk.f32.mxu0 %vm66_vm0, %v5168_v28  ;;  %v3785_v16 = vmul.f32 %v9963_v12, %v3690_v41  ;;  %v5811_v28 = vcombine.high %v549_v39, %v549_v39  ;;  %v3694_v8 = vrot.slane %v3566_v26, %v8764_v44  ;;  %v5107_v59 = vrot.slane %v4979_v42, %v8764_v44 }
 0x34c   :  { %13282 = vst [vmem:[#allocation106_spill] sm:$0xff] %v10376_v10  ;;  %v5778_v35 = vcombine.high %v5776_v32, %v5776_v32  ;;  %v10391_v41 = vrot.slane %v5776_v32, %v8900_v5  ;;  %v1306_v12 = vsel %vm66_vm0, %v10337_v18, -inf  ;;  %v5818_v26 = vrot.slane %v549_v39, %v8900_v5 }
 0x34d   :  { %7813 = vmatmul.mubr.msk.f32.gmra.mxu1 %vm66_vm0, %v9882_v62  ;;  %v2691_v62 = vsel %vm66_vm0, %v10339_v52, -inf  ;;  %v3786_v42 = vmul.f32 %v10077_v57, %v3694_v8  ;;  %v5171_v32 = vmul.f32 %v5107_v59, %v10077_v57  ;;  %v1308_v49 = vmax.f32 %v1306_v12, %v1307_v50  ;;  %v10416_v57 = vpop.f32.mrf.mxu1  ;;  %v10418_v8 = vpop.f32.mrf.mxu0 }
 0x34e   :  { %7877 = vmatmul.mubr.msk.f32.gmra.mxu0 %vm66_vm0, %v9885_v55  ;;  %13283 = vst [vmem:[#allocation107_spill] sm:$0xff] %v10391_v41  ;;  %7815 = vmatprep.mubr.msk.f32.mxu1 %vm66_vm0, %v3785_v16  ;;  %v10400_v55 = vrot.slane %v5777_v2, %v8900_v5  ;;  %v1309_v16 = vsel %vm66_vm0, %v10384_v14, -inf  ;;  %v5825_v2 = vrot.slane %v5811_v28, %v8900_v5 }
 0x34f   :  { %7879 = vmatprep.mubr.msk.f32.mxu0 %vm66_vm0, %v5170_v34  ;;  %v2694_v34 = vsel %vm66_vm0, %v10386_v25, -inf  ;;  %v2693_v39 = vmax.f32 %v2691_v62, %v2692_v54  ;;  %v10423_v48 = vrot.slane %v4520_v21, %v8764_v44  ;;  %v10426_v6 = vrot.slane %v4522_v43, %v8764_v44  ;;  %v10437_v50 = vpop.f32.mrf.mxu0 }
 0x350   :  { %13284 = vst [vmem:[#allocation108_spill] sm:$0xff] %v10400_v55  ;;  %v10433_v12 = vrot.slane %v5778_v35, %v8900_v5  ;;  %v1310_v62 = vmax.f32 %v1308_v49, %v1309_v16  ;;  %v10440_v21 = vrot.slane %v4521_v31, %v8764_v44  ;;  %v10443_v43 = vrot.slane %v4523_v0, %v8764_v44 }
 0x351   :  { %7816 = vmatmul.mubr.msk.f32.gmra.mxu1 %vm66_vm0, %v3786_v42  ;;  %13285 = vst [vmem:[#allocation109_spill] sm:$0xff] %v10423_v48  ;;  %13286 = vst [vmem:[#allocation110_spill] sm:$0xff] %v10426_v6  ;;  %v2695_v42 = vmax.f32 %v2693_v39, %v2694_v34  ;;  %v5807_v54 = vcombine.high %v10376_v10, %v10376_v10  ;;  %v5808_v28 = vcombine.high %v10391_v41, %v10391_v41 }
 0x352   :  { %7880 = vmatmul.mubr.msk.f32.gmra.mxu0 %vm66_vm0, %v5171_v32  ;;  %13287 = vst [vmem:[#allocation111_spill] sm:$0xff] %v10433_v12  ;;  %v10435_v32 = vpop.f32.mrf.mxu1  ;;  %13288 = vst [vmem:[#allocation112_spill] sm:$0xff] %v10440_v21  ;;  %v5809_v49 = vcombine.high %v10400_v55, %v10400_v55  ;;  %v5826_v35 = vcombine.high %v5818_v26, %v5818_v26  ;;  %v5827_v16 = vcombine.high %v5825_v2, %v5825_v2 }
 0x353   :  { %13289 = vst [vmem:[#allocation113_spill] sm:$0xff] %v10443_v43  ;;  %v555_v34 = vadd.f32 %v10285_v60, %v9397_v30  ;;  %v1311_v31 = vsel %vm66_vm0, %v10354_v36, -inf  ;;  %v2696_v0 = vsel %vm66_vm0, %v10356_v38, -inf  ;;  %v1313_v39 = vsel %vm66_vm0, %v10435_v32, -inf }
 0x354   :  { %v2698_v59 = vsel %vm66_vm0, %v10437_v50, -inf  ;;  %v5810_v43 = vcombine.high %v10433_v12, %v10433_v12  ;;  %v10464_v21 = vrot.slane %v5818_v26, %v8900_v5  ;;  %v1312_v19 = vmax.f32 %v1310_v62, %v1311_v31 }
 0x355   :  { %v2697_v30 = vmax.f32 %v2695_v42, %v2696_v0  ;;  %v10473_v17 = vrot.slane %v5825_v2, %v8900_v5  ;;  %v10476_v48 = vrot.slane %v5807_v54, %v8764_v44  ;;  %v10479_v26 = vrot.slane %v5826_v35, %v8900_v5  ;;  %v10499_v35 = vpop.f32.mrf.mxu1 }
 0x356   :  { %13290 = vst [vmem:[#allocation114_spill] sm:$0xff] %v10464_v21  ;;  %v1314_v62 = vmax.f32 %v1312_v19, %v1313_v39  ;;  %v10484_v0 = vrot.slane %v5808_v28, %v8764_v44  ;;  %v10487_v13 = vrot.slane %v5827_v16, %v8900_v5  ;;  %v5860_v6 = vcombine.high %v555_v34, %v555_v34  ;;  %v10501_v28 = vpop.f32.mrf.mxu0 }
 0x357   :  { %13291 = vst [vmem:[#allocation115_spill] sm:$0xff] %v10473_v17  ;;  %13292 = vst [vmem:[#allocation116_spill] sm:$0xff] %v10476_v48  ;;  %v2699_v42 = vmax.f32 %v2697_v30, %v2698_v59  ;;  %v10490_v2 = vrot.slane %v5809_v49, %v8764_v44  ;;  %v10493_v54 = vrot.slane %v5810_v43, %v8764_v44  ;;  %v1315_v49 = vsel %vm66_vm0, %v10416_v57, -inf  ;;  %v1177_v31 = vpop.f32.mrf.mxu1 }
 0x358   :  { %13293 = vst [vmem:[#allocation117_spill] sm:$0xff] %v10479_v26  ;;  %13294 = vst [vmem:[#allocation118_spill] sm:$0xff] %v10484_v0  ;;  %v5856_v19 = vcombine.high %v10464_v21, %v10464_v21  ;;  %v5857_v16 = vcombine.high %v10473_v17, %v10473_v17  ;;  %v5867_v39 = vrot.slane %v555_v34, %v8900_v5  ;;  %v2700_v43 = vsel %vm66_vm0, %v10418_v8, -inf }
 0x359   :  { %13295 = vst [vmem:[#allocation119_spill] sm:$0xff] %v10487_v13  ;;  %13296 = vst [vmem:[#allocation120_spill] sm:$0xff] %v10490_v2  ;;  %v5858_v30 = vcombine.high %v10479_v26, %v10479_v26  ;;  %v1316_v60 = vmax.f32 %v1314_v62, %v1315_v49  ;;  %v2701_v0 = vmax.f32 %v2699_v42, %v2700_v43  ;;  %v1317_v12 = vsel %vm66_vm0, %v1177_v31, -inf  ;;  %v10529_v42 = vpop.f32.mrf.mxu1 }
 0x35a   :  { %13297 = vst [vmem:[#allocation121_spill] sm:$0xff] %v10493_v54  ;;  %v10514_v54 = vpop.f32.mrf.mxu0  ;;  %v5859_v34 = vcombine.high %v10487_v13, %v10487_v13  ;;  %v10519_v21 = vrot.slane %v5860_v6, %v8900_v5  ;;  %v10527_v59 = vrot.slane %v5856_v19, %v8764_v44  ;;  %v5875_v17 = vcombine.high %v5867_v39, %v5867_v39 }
 0x35b   :  { %v2702_v41 = vsel %vm66_vm0, %v10514_v54, -inf  ;;  %v1318_v62 = vmax.f32 %v1316_v60, %v1317_v12  ;;  %v10536_v48 = vrot.slane %v5867_v39, %v8900_v5  ;;  %v1319_v55 = vsel %vm66_vm0, %v10499_v35, -inf }
 0x35c   :  { %13298 = vst [vmem:[#allocation122_spill] sm:$0xff] %v10527_v59  ;;  %v2703_v49 = vmax.f32 %v2701_v0, %v2702_v41  ;;  %v10531_v43 = vpop.f32.mrf.mxu0  ;;  %v10541_v2 = vrot.slane %v5858_v30, %v8764_v44  ;;  %v10544_v12 = vrot.slane %v5857_v16, %v8764_v44  ;;  %v2704_v41 = vsel %vm66_vm0, %v10501_v28, -inf  ;;  %v10548_v0 = vpop.f32.mrf.mxu1 }
 0x35d   :  { %13299 = vst [vmem:[#allocation123_spill] sm:$0xff] %v10536_v48  ;;  %v1320_v60 = vmax.f32 %v1318_v62, %v1319_v55  ;;  %v10553_v39 = vrot.slane %v5859_v34, %v8764_v44  ;;  %v10559_v30 = vrot.slane %v10519_v21, %v8900_v5  ;;  %v10572_v6 = vrot.slane %v5875_v17, %v8900_v5 }
 0x35e   :  { %13300 = vst [vmem:[#allocation124_spill] sm:$0xff] %v10541_v2  ;;  %13301 = vst [vmem:[#allocation125_spill] sm:$0xff] %v10544_v12  ;;  %v10550_v19 = vpop.f32.mrf.mxu0  ;;  %v10561_v16 = vmax.f32 %v2703_v49, %v2704_v41  ;;  %v10567_v2 = vpop.f32.mrf.mxu1  ;;  %v1322_v17 = vsel %vm66_vm0, %v10529_v42, -inf }
 0x35f   :  { %13302 = vst [vmem:[#allocation126_spill] sm:$0xff] %v10553_v39  ;;  %13303 = vst [vmem:[#allocation127_spill] sm:$0xff] %v10559_v30  ;;  %v1366_v12 = vsub.f32 %v10337_v18, %v1320_v60  ;;  %v1367_v55 = vsub.f32 %v10302_v51, %v1320_v60  ;;  %v1368_v62 = vsub.f32 %v10384_v14, %v1320_v60  ;;  %v2707_v39 = vsel %vm66_vm0, %v10531_v43, -inf }
 0x360   :  { %v1369_v13 = vsub.f32 %v10354_v36, %v1320_v60  ;;  %v10569_v34 = vpop.f32.mrf.mxu0  ;;  %13304 = vst [vmem:[#allocation128_spill] sm:$0xff] %v10572_v6  ;;  %v1370_v49 = vsub.f32 %v10435_v32, %v1320_v60  ;;  %v1371_v18 = vsub.f32 %v10416_v57, %v1320_v60  ;;  %v1372_v41 = vsub.f32 %v1177_v31, %v1320_v60  ;;  %v10578_v26 = vpop.f32.mrf.mxu1 }
 0x361   :  { %v1398_v51 = vmul.f32 1.442695, %v1366_v12  ;;  %v1400_v59 = vmul.f32 1.442695, %v1367_v55  ;;  %v1402_v14 = vmul.f32 1.442695, %v1368_v62  ;;  %v1373_v10 = vsub.f32 %v10499_v35, %v1320_v60 }
 0x362   :  { %v10580_v36 = vpop.f32.mrf.mxu0  ;;  %v1404_v61 = vmul.f32 1.442695, %v1369_v13  ;;  %v1406_v32 = vmul.f32 1.442695, %v1370_v49  ;;  %v2751_v57 = vsub.f32 %v10339_v52, %v10561_v16  ;;  %v1321_v31 = vsel %vm66_vm0, %v10548_v0, -inf  ;;  %v6176_v12 = vld [vmem:[%s13035_s4 + $0x38] sm:$0xff]  ;;  %v10601_v52 = vpop.f32.mrf.mxu1 }
 0x363   :  { %7976 = vpow2.f32 %v1398_v51  ;;  %v6175_v13 = vld [vmem:[%s13035_s4 + $0x30] sm:$0xff]  ;;  %v1408_v35 = vmul.f32 1.442695, %v1371_v18  ;;  %v2752_v60 = vsub.f32 %v10304_v15, %v10561_v16  ;;  %v2753_v55 = vsub.f32 %v10386_v25, %v10561_v16  ;;  %7882 = vmatprep.subr.mxu1 %v6176_v12  ;;  %v6174_v15 = vld [vmem:[%s13035_s4 + $0x28] sm:$0xff] }
 0x364   :  { %7978 = vpow2.f32 %v1400_v59  ;;  %v1410_v62 = vmul.f32 1.442695, %v1372_v41  ;;  %v2754_v49 = vsub.f32 %v10356_v38, %v10561_v16  ;;  %v2706_v51 = vsel %vm66_vm0, %v10550_v19, -inf  ;;  %v10607_v45 = vpop.f32.mrf.mxu0  ;;  %7883 = vmatpush3.msra.mxu1 %v6176_v12  ;;  %v10623_v7 = vpop.f32.mrf.mxu1 }
 0x365   :  { %7980 = vpow2.f32 %v1402_v14  ;;  %v1412_v25 = vmul.f32 1.442695, %v1373_v10  ;;  %v2755_v59 = vsub.f32 %v10437_v50, %v10561_v16  ;;  %v2756_v18 = vsub.f32 %v10418_v8, %v10561_v16  ;;  %7884 = vmatprep.subr.mxu1 %v6175_v13 }
 0x366   :  { %7982 = vpow2.f32 %v1404_v61  ;;  %v2757_v38 = vsub.f32 %v10514_v54, %v10561_v16  ;;  %v2758_v41 = vsub.f32 %v10501_v28, %v10561_v16  ;;  %v2783_v14 = vmul.f32 1.442695, %v2751_v57  ;;  %7885 = vmatpush3.msra.mxu1 %v6175_v13  ;;  %v6173_v61 = vld [vmem:[%s13035_s4 + $0x20] sm:$0xff]  ;;  %v10627_v28 = vpop.f32.mrf.mxu0  ;;  %v6172_v16 = vld [vmem:[%s13035_s4 + $0x18] sm:$0xff] }
 0x367   :  { %7984 = vpow2.f32 %v1406_v32  ;;  %v2785_v10 = vmul.f32 1.442695, %v2752_v60  ;;  %v2787_v50 = vmul.f32 1.442695, %v2753_v55  ;;  %v1323_v12 = vmax.f32 %v1321_v31, %v1322_v17  ;;  %7886 = vmatprep.subr.mxu1 %v6174_v15  ;;  %v6171_v60 = vld [vmem:[%s13035_s4 + $0x10] sm:$0xff] }
 0x368   :  { %7986 = vpow2.f32 %v1408_v35  ;;  %v2789_v8 = vmul.f32 1.442695, %v2754_v49  ;;  %v2708_v32 = vmax.f32 %v2706_v51, %v2707_v39  ;;  %v1324_v54 = vsel %vm66_vm0, %v10578_v26, -inf  ;;  %7887 = vmatpush3.msra.mxu1 %v6174_v15  ;;  %v10645_v51 = vpop.f32.mrf.mxu1 }
 0x369   :  { %7988 = vpow2.f32 %v1410_v62  ;;  %v2791_v57 = vmul.f32 1.442695, %v2755_v59  ;;  %v1325_v13 = vmax.f32 %v1323_v12, %v1324_v54  ;;  %v2709_v17 = vsel %vm66_vm0, %v10580_v36, -inf  ;;  %7888 = vmatprep.subr.mxu1 %v6173_v61  ;;  %v10658_v54 = vpop.f32.mrf.mxu0 }
 0x36a   :  { %7990 = vpow2.f32 %v1412_v25  ;;  %v1326_v39 = vsel %vm66_vm0, %v10567_v2, -inf  ;;  %v2710_v31 = vmax.f32 %v2708_v32, %v2709_v17  ;;  %v1328_v35 = vsel %vm66_vm0, %v10623_v7, -inf  ;;  %7889 = vmatpush3.msra.mxu1 %v6173_v61 }
 0x36b   :  { %7992 = vpow2.f32 %v2783_v14  ;;  %v2711_v55 = vsel %vm66_vm0, %v10569_v34, -inf  ;;  %v1327_v62 = vmax.f32 %v1325_v13, %v1326_v39  ;;  %v2713_v49 = vsel %vm66_vm0, %v10627_v28, -inf  ;;  %7890 = vmatprep.subr.mxu1 %v6172_v16  ;;  %v6170_v14 = vld [vmem:[%s13035_s4 + $0x8] sm:$0xff]  ;;  %v10660_v13 = vpop.f32.mrf.mxu1  ;;  %v10675_v39 = vpop.f32.mrf.mxu0 }
 0x36c   :  { %7994 = vpow2.f32 %v2785_v10  ;;  %v2793_v25 = vmul.f32 1.442695, %v2756_v18  ;;  %v2712_v59 = vmax.f32 %v2710_v31, %v2711_v55  ;;  %7891 = vmatpush3.msra.mxu1 %v6172_v16  ;;  %v13305_v61 = vcombine.high %v10519_v21, %v10519_v21 }
 0x36d   :  { %7996 = vpow2.f32 %v2787_v50  ;;  %v2795_v12 = vmul.f32 1.442695, %v2757_v38  ;;  %v1329_v32 = vmax.f32 %v1327_v62, %v1328_v35  ;;  %7892 = vmatprep.subr.mxu1 %v6171_v60  ;;  %v1330_v18 = vsel %vm66_vm0, %v10601_v52, -inf  ;;  %v10677_v31 = vpop.f32.mrf.mxu1 }
 0x36e   :  { %v10656_v10 = vrot.slane %v13305_v61, %v8900_v5  ;;  %7998 = vpow2.f32 %v2789_v8  ;;  %v2714_v50 = vmax.f32 %v2712_v59, %v2713_v49  ;;  %v1332_v16 = vsel %vm66_vm0, %v10660_v13, -inf  ;;  %7893 = vmatpush3.msra.mxu1 %v6171_v60  ;;  %v6169_v5 = vld [vmem:[%s13035_s4] sm:$0xff] }
 0x36f   :  { %8000 = vpow2.f32 %v2791_v57  ;;  %v2797_v8 = vmul.f32 1.442695, %v2758_v41  ;;  %v2715_v57 = vsel %vm66_vm0, %v10607_v45, -inf  ;;  %v1331_v17 = vmax.f32 %v1329_v32, %v1330_v18  ;;  %7894 = vmatprep.subr.mxu1 %v6170_v14  ;;  %v10691_v32 = vpop.f32.mrf.mxu0  ;;  %v10693_v18 = vpop.f32.mrf.mxu1 }
 0x370   :  { %13306 = vst [vmem:[#allocation129_spill] sm:$0xff] %v10656_v10  ;;  %v10669_v21 = vpop.eup %7976  ;;  %8002 = vpow2.f32 %v2793_v25  ;;  %v2716_v55 = vmax.f32 %v2714_v50, %v2715_v57  ;;  %v2717_v62 = vsel %vm66_vm0, %v10675_v39, -inf  ;;  %7895 = vmatpush3.msra.mxu1 %v6170_v14  ;;  %v1334_v57 = vsel %vm66_vm0, %v10645_v51, -inf }
 0x371   :  { %v10679_v35 = vpop.eup %7978  ;;  %v1462_v60 = vsel %vm66_vm0, %v10669_v21, 0.0  ;;  %8004 = vpow2.f32 %v2795_v12  ;;  %v1333_v61 = vmax.f32 %v1331_v17, %v1332_v16  ;;  %7896 = vmatprep.subr.mxu1 %v6169_v5  ;;  %v13307_v12 = vcombine.high %v10536_v48, %v10536_v48 }
 0x372   :  { %v10685_v41 = vpop.eup %7980  ;;  %v1463_v59 = vsel %vm66_vm0, %v10679_v35, 0.0  ;;  %v2718_v38 = vmax.f32 %v2716_v55, %v2717_v62  ;;  %7897 = vmatpush3.msra.mxu1 %v6169_v5  ;;  %v2719_v14 = vsel %vm66_vm0, %v10658_v54, -inf  ;;  %v10717_v55 = vpop.f32.mrf.mxu1  ;;  %8006 = vpow2.f32 %v2797_v8 }
 0x373   :  { %v10695_v25 = vpop.eup %7982  ;;  %v1464_v50 = vadd.f32 %v1463_v59, %v1462_v60  ;;  %v10707_v16 = vrot.slane %v13307_v12, %v8764_v44  ;;  %v1465_v17 = vsel %vm66_vm0, %v10685_v41, 0.0  ;;  %v10713_v60 = vmax.f32 %v1333_v61, %v1334_v57  ;;  %v10715_v59 = vpop.f32.mrf.mxu0 }
 0x374   :  { %v10701_v15 = vpop.eup %7984  ;;  %v1467_v49 = vsel %vm66_vm0, %v10695_v25, 0.0  ;;  %v10725_v12 = vsel %vm66_vm0, %v10677_v31, -inf  ;;  %v10749_v22 = vmax.f32 %v2718_v38, %v2719_v14 }
 0x375   :  { %13308 = vst [vmem:[#allocation130_spill] sm:$0xff] %v10707_v16  ;;  %v10719_v5 = vpop.eup %7986  ;;  %v1466_v62 = vadd.f32 %v1465_v17, %v1464_v50  ;;  %v1374_v61 = vsub.f32 %v10548_v0, %v10713_v60  ;;  %v1375_v57 = vsub.f32 %v10529_v42, %v10713_v60  ;;  %v1376_v48 = vsub.f32 %v10578_v26, %v10713_v60  ;;  %v10739_v8 = vpop.f32.mrf.mxu0 }
 0x376   :  { %v10727_v16 = vpop.eup %7988  ;;  %v10737_v50 = vsel %vm66_vm0, %v10693_v18, -inf  ;;  %v10741_v17 = vpop.f32.mrf.mxu1  ;;  %v1469_v0 = vsel %vm66_vm0, %v10701_v15, 0.0  ;;  %v1377_v42 = vsub.f32 %v10567_v2, %v10713_v60  ;;  %v1471_v3 = vsel %vm66_vm0, %v10719_v5, 0.0 }
 0x377   :  { %v10743_v46 = vpop.eup %7990  ;;  %v1468_v47 = vadd.f32 %v1467_v49, %v1466_v62  ;;  %v1473_v27 = vsel %vm66_vm0, %v10727_v16, 0.0  ;;  %v1378_v37 = vsub.f32 %v10623_v7, %v10713_v60  ;;  %v1379_v49 = vsub.f32 %v10601_v52, %v10713_v60  ;;  %v10761_v62 = vpop.f32.mrf.mxu0 }
 0x378   :  { %v10751_v26 = vpop.eup %7992  ;;  %v10763_v24 = vpop.f32.mrf.mxu1  ;;  %v1414_v20 = vmul.f32 1.442695, %v1374_v61  ;;  %v1416_v23 = vmul.f32 1.442695, %v1375_v57  ;;  %v1380_v52 = vsub.f32 %v10660_v13, %v10713_v60  ;;  %v1418_v9 = vmul.f32 1.442695, %v1376_v48 }
 0x379   :  { %v10765_v2 = vpop.eup %7994  ;;  %v1470_v38 = vadd.f32 %v1469_v0, %v1468_v47  ;;  %v2847_v14 = vsel %vm66_vm0, %v10751_v26, 0.0  ;;  %v1420_v58 = vmul.f32 1.442695, %v1377_v42  ;;  %v10775_v56 = vpop.f32.mrf.mxu0  ;;  %v1381_v61 = vsub.f32 %v10645_v51, %v10713_v60 }
 0x37a   :  { %v10769_v33 = vpop.eup %7996  ;;  %v2848_v7 = vsel %vm66_vm0, %v10765_v2, 0.0  ;;  %8008 = vpow2.f32 %v1414_v20  ;;  %v1422_v6 = vmul.f32 1.442695, %v1378_v37  ;;  %v1424_v13 = vmul.f32 1.442695, %v1379_v49  ;;  %v10785_v48 = vpop.f32.mrf.mxu1 }
 0x37b   :  { %v10777_v63 = vpop.eup %7998  ;;  %v1472_v47 = vadd.f32 %v1471_v3, %v1470_v38  ;;  %v2849_v0 = vadd.f32 %v2848_v7, %v2847_v14  ;;  %v2850_v11 = vsel %vm66_vm0, %v10769_v33, 0.0  ;;  %8010 = vpow2.f32 %v1416_v23  ;;  %v10789_v38 = vpop.f32.mrf.mxu0 }
 0x37c   :  { %13309 = vst [vmem:[#allocation131_spill] sm:$0xff] %v10777_v63  ;;  %v10781_v57 = vpop.eup %8000  ;;  %v1475_v10 = vsel %vm66_vm0, %v10743_v46, 0.0  ;;  %8012 = vpow2.f32 %v1418_v9  ;;  %v2852_v20 = vsel %vm66_vm0, %v10777_v63, 0.0  ;;  %v1426_v60 = vmul.f32 1.442695, %v1380_v52  ;;  %v10805_v7 = vpop.f32.mrf.mxu1 }
 0x37d   :  { %13310 = vst [vmem:[#allocation132_spill] sm:$0xff] %v10781_v57  ;;  %v1474_v42 = vadd.f32 %v1473_v27, %v1472_v47  ;;  %v2851_v3 = vadd.f32 %v2850_v11, %v2849_v0  ;;  %v10791_v51 = vpop.eup %8002  ;;  %8014 = vpow2.f32 %v1420_v58  ;;  %v2759_v23 = vsub.f32 %v10550_v19, %v10749_v22  ;;  %v10811_v47 = vpop.f32.mrf.mxu0 }
 0x37e   :  { %13311 = vst [vmem:[#allocation133_spill] sm:$0xff] %v10791_v51  ;;  %v10797_v37 = vpop.eup %8004  ;;  %v2854_v11 = vsel %vm66_vm0, %v10781_v57, 0.0  ;;  %8016 = vpow2.f32 %v1422_v6  ;;  %v1428_v9 = vmul.f32 1.442695, %v1381_v61  ;;  %v2760_v14 = vsub.f32 %v10531_v43, %v10749_v22 }
 0x37f   :  { %13312 = vst [vmem:[#allocation134_spill] sm:$0xff] %v10797_v37  ;;  %v1476_v27 = vadd.f32 %v1475_v10, %v1474_v42  ;;  %v2853_v49 = vadd.f32 %v2852_v20, %v2851_v3  ;;  %8018 = vpow2.f32 %v1424_v13  ;;  %v2761_v58 = vsub.f32 %v10580_v36, %v10749_v22  ;;  %v10813_v6 = vpop.eup %8006 }
 0x380   :  { %v2856_v10 = vsel %vm66_vm0, %v10791_v51, 0.0  ;;  %v2762_v52 = vsub.f32 %v10569_v34, %v10749_v22  ;;  %13313 = vst [vmem:[#allocation135_spill] sm:$0xff] %v10813_v6  ;;  %v2858_v43 = vsel %vm66_vm0, %v10797_v37, 0.0  ;;  %v2763_v36 = vsub.f32 %v10627_v28, %v10749_v22 }
 0x381   :  { %8020 = vrcp.f32 %v1476_v27  ;;  %v2855_v19 = vadd.f32 %v2854_v11, %v2853_v49  ;;  %v2764_v0 = vsub.f32 %v10607_v45, %v10749_v22  ;;  %v2765_v13 = vsub.f32 %v10675_v39, %v10749_v22  ;;  %v10825_v49 = vpop.f32.mrf.mxu1  ;;  %v10829_v45 = vpop.f32.mrf.mxu0  ;;  %v13314_v11 = vld [vmem:[#allocation17_spill] sm:$0xff] }
 0x382   :  { %8022 = vpow2.f32 %v1426_v60  ;;  %v2799_v42 = vmul.f32 1.442695, %v2759_v23  ;;  %v2801_v34 = vmul.f32 1.442695, %v2760_v14  ;;  %v2766_v3 = vsub.f32 %v10658_v54, %v10749_v22 }
 0x383   :  { %v2857_v61 = vadd.f32 %v2856_v10, %v2855_v19  ;;  %8024 = vpow2.f32 %v1428_v9  ;;  %v2803_v20 = vmul.f32 1.442695, %v2761_v58  ;;  %v2805_v27 = vmul.f32 1.442695, %v2762_v52 }
 0x384   :  { %8026 = vpow2.f32 %v2799_v42  ;;  %v2722_v28 = vsel %vm66_vm0, %v10691_v32, -inf  ;;  %v13315_v39 = vrot.slane %v13314_v11, %v8764_v44  ;;  %v2807_v9 = vmul.f32 1.442695, %v2763_v36  ;;  %v10849_v36 = vpop.f32.mrf.mxu1 }
 0x385   :  { %v2859_v60 = vadd.f32 %v2858_v43, %v2857_v61  ;;  %8028 = vpow2.f32 %v2801_v34  ;;  %v1338_v22 = vmax.f32 %v10737_v50, %v10725_v12  ;;  %v2721_v54 = vsel %vm66_vm0, %v10715_v59, -inf  ;;  %v13316_v61 = vld [vmem:[#allocation7_spill] sm:$0xff] }
 0x386   :  { %v10835_v23 = vmul.f32 %v10669_v21, %v13315_v39  ;;  %v2860_v14 = vsel %vm66_vm0, %v10813_v6, 0.0  ;;  %8030 = vpow2.f32 %v2803_v20  ;;  %v2809_v58 = vmul.f32 1.442695, %v2764_v0  ;;  %v10857_v20 = vpop.f32.mrf.mxu0 }
 0x387   :  { %v2811_v19 = vmul.f32 1.442695, %v2765_v13  ;;  %v8009_v10 = vpop.eup %8008  ;;  %v10843_v52 = vadd.f32 %v2860_v14, %v2859_v60  ;;  %8032 = vpow2.f32 %v2805_v27  ;;  %v2813_v21 = vmul.f32 1.442695, %v2766_v3  ;;  %v13318_v60 = vld [vmem:[#allocation8_spill] sm:$0xff] }
 0x388   :  { %v10847_v43 = vsel %vm66_vm0, %v10717_v55, -inf  ;;  %v8011_v12 = vpop.eup %8010  ;;  %v1477_v50 = vsel %vm66_vm0, %v8009_v10, 0.0  ;;  %v13317_v42 = vrot.slane %v13316_v61, %v8764_v44  ;;  %v2723_v0 = vmax.f32 %v2721_v54, %v2722_v28  ;;  %v10879_v6 = vpop.f32.mrf.mxu0 }
 0x389   :  { %v2726_v13 = vsel %vm66_vm0, %v10739_v8, -inf  ;;  %v8013_v3 = vpop.eup %8012  ;;  %v1478_v27 = vsel %vm66_vm0, %v8011_v12, 0.0  ;;  %v13319_v11 = vrot.slane %v13318_v60, %v8764_v44  ;;  %8034 = vpow2.f32 %v2807_v9  ;;  %v10872_v9 = vpop.f32.mrf.mxu1 }
 0x38a   :  { %v1890_v34 = vmul.f32 %v8009_v10, %v13317_v42  ;;  %v1339_v14 = vsel %vm66_vm0, %v10741_v17, -inf  ;;  %v8015_v30 = vpop.eup %8014  ;;  %v1479_v61 = vadd.f32 %v1478_v27, %v1477_v50  ;;  %v13320_v10 = vld [vmem:[#allocation28_spill] sm:$0xff]  ;;  %v2724_v42 = vsel %vm66_vm0, %v10761_v62, -inf  ;;  %v13322_v50 = vld [vmem:[#allocation21_spill] sm:$0xff] }
 0x38b   :  { %v1891_v39 = vmul.f32 %v8011_v12, %v13319_v11  ;;  %v1892_v28 = vmul.f32 %v8013_v3, %v13320_v10  ;;  %v8017_v53 = vpop.eup %8016  ;;  %v1480_v40 = vsel %vm66_vm0, %v8013_v3, 0.0  ;;  %v1893_v1 = vmul.f32 %v8015_v30, %v13321_v29 }
 0x38c   :  { %v1929_v54 = vsel %vm66_vm0, %v1890_v34, 0.0  ;;  %8036 = vpow2.f32 %v2809_v58  ;;  %v8019_v60 = vpop.eup %8018  ;;  %v1481_v11 = vadd.f32 %v1480_v40, %v1479_v61  ;;  %v13323_v27 = vrot.slane %v13322_v50, %v8764_v44 }
 0x38d   :  { %v1930_v12 = vsel %vm66_vm0, %v1891_v39, 0.0  ;;  %v1345_v4 = vsel %vm66_vm0, %v10763_v24, -inf  ;;  %v1482_v29 = vsel %vm66_vm0, %v8015_v30, 0.0  ;;  %v1932_v58 = vsel %vm66_vm0, %v1892_v28, 0.0  ;;  %v10891_v30 = vpop.f32.mrf.mxu1 }
 0x38e   :  { %v1894_v10 = vmul.f32 %v8017_v53, %v13323_v27  ;;  %v1931_v34 = vadd.f32 %v1930_v12, %v1929_v54  ;;  %v10881_v3 = vpop.eup %8020  ;;  %v1340_v39 = vmax.f32 %v1338_v22, %v1339_v14  ;;  %v2725_v37 = vmax.f32 %v2723_v0, %v2724_v42  ;;  %v13324_v12 = vld [vmem:[#allocation22_spill] sm:$0xff] }
 0x38f   :  { %v8023_v51 = vpop.eup %8022  ;;  %v1483_v40 = vadd.f32 %v1482_v29, %v1481_v11  ;;  %v1484_v61 = vsel %vm66_vm0, %v8017_v53, 0.0  ;;  %8038 = vpow2.f32 %v2811_v19  ;;  %v1486_v54 = vsel %vm66_vm0, %v8019_v60, 0.0  ;;  %v10897_v19 = vpop.f32.mrf.mxu0  ;;  %v13326_v11 = vld [vmem:[#allocation32_spill] sm:$0xff] }
 0x390   :  { %v1933_v50 = vadd.f32 %v1932_v58, %v1931_v34  ;;  %v13325_v27 = vrot.slane %v13324_v12, %v8764_v44  ;;  %v1934_v63 = vsel %vm66_vm0, %v1893_v1, 0.0  ;;  %8040 = vpow2.f32 %v2813_v21  ;;  %v10893_v28 = vpop.eup %8024 }
 0x391   :  { %v1485_v22 = vadd.f32 %v1484_v61, %v1483_v40  ;;  %v1488_v0 = vsel %vm66_vm0, %v8023_v51, 0.0  ;;  %v1936_v53 = vsel %vm66_vm0, %v1894_v10, 0.0  ;;  %v10899_v42 = vpop.eup %8026  ;;  %v1896_v34 = vmul.f32 %v8023_v51, %v13326_v11 }
 0x392   :  { %v1895_v57 = vmul.f32 %v8019_v60, %v13325_v27  ;;  %v1935_v14 = vadd.f32 %v1934_v63, %v1933_v50  ;;  %v1342_v60 = vmax.f32 %v1340_v39, %v10847_v43  ;;  %v1343_v1 = vsel %vm66_vm0, %v10785_v48, -inf  ;;  %v10905_v29 = vpop.eup %8028 }
 0x393   :  { %v2727_v21 = vmax.f32 %v2725_v37, %v2726_v13  ;;  %v1487_v58 = vadd.f32 %v1486_v54, %v1485_v22  ;;  %v2862_v63 = vsel %vm66_vm0, %v10899_v42, 0.0  ;;  %v2728_v10 = vsel %vm66_vm0, %v10789_v38, -inf  ;;  %v10911_v61 = vpop.eup %8030  ;;  %v10916_v37 = vpop.f32.mrf.mxu1 }
 0x394   :  { %v1937_v40 = vadd.f32 %v1936_v53, %v1935_v14  ;;  %13327 = vst [vmem:[#allocation17_spill] sm:$0xff] %v10911_v61  ;;  %v1938_v51 = vsel %vm66_vm0, %v1895_v57, 0.0  ;;  %v2863_v43 = vsel %vm66_vm0, %v10905_v29, 0.0  ;;  %v1344_v39 = vmax.f32 %v1342_v60, %v1343_v1  ;;  %v10918_v13 = vpop.eup %8032  ;;  %v10924_v14 = vpop.f32.mrf.mxu0 }
 0x395   :  { %v2729_v50 = vmax.f32 %v2727_v21, %v2728_v10  ;;  %13328 = vst [vmem:[#allocation7_spill] sm:$0xff] %v10918_v13  ;;  %v1489_v54 = vadd.f32 %v1488_v0, %v1487_v58  ;;  %v1490_v12 = vsel %vm66_vm0, %v10893_v28, 0.0  ;;  %v2864_v27 = vadd.f32 %v2863_v43, %v2862_v63  ;;  %v13330_v10 = vld [vmem:[#allocation15_spill] sm:$0xff] }
 0x396   :  { %v2730_v22 = vsel %vm66_vm0, %v10775_v56, -inf  ;;  %v1939_v57 = vadd.f32 %v1938_v51, %v1937_v40  ;;  %v2865_v53 = vsel %vm66_vm0, %v10911_v61, 0.0  ;;  %v1346_v11 = vmax.f32 %v1344_v39, %v1345_v4  ;;  %v10930_v1 = vpop.eup %8034  ;;  %v10943_v39 = vpop.f32.mrf.mxu1 }
 0x397   :  { %v1347_v60 = vsel %vm66_vm0, %v10825_v49, -inf  ;;  %13329 = vst [vmem:[#allocation8_spill] sm:$0xff] %v10930_v1  ;;  %v1491_v0 = vadd.f32 %v1490_v12, %v1489_v54  ;;  %v2866_v21 = vadd.f32 %v2865_v53, %v2864_v27  ;;  %v2731_v58 = vmax.f32 %v2729_v50, %v2730_v22  ;;  %v10950_v22 = vpop.f32.mrf.mxu0 }
 0x398   :  { %v13331_v63 = vrot.slane %v13330_v10, %v8764_v44  ;;  %8042 = vrcp.f32 %v10843_v52  ;;  %v2867_v40 = vsel %vm66_vm0, %v10918_v13, 0.0  ;;  %v1348_v4 = vmax.f32 %v1346_v11, %v1347_v60 }
 0x399   :  { %v2732_v51 = vsel %vm66_vm0, %v10829_v45, -inf  ;;  %v10945_v54 = vpop.eup %8036  ;;  %v1940_v50 = vsel %vm66_vm0, %v1896_v34, 0.0  ;;  %v2868_v12 = vadd.f32 %v2867_v40, %v2866_v21  ;;  %v2869_v53 = vsel %vm66_vm0, %v10930_v1, 0.0 }
 0x39a   :  { %v10936_v43 = vmul.f32 %v10679_v35, %v13331_v63  ;;  %13332 = vst [vmem:[#allocation28_spill] sm:$0xff] %v10945_v54  ;;  %v1349_v35 = vsel %vm66_vm0, %v10805_v7, -inf  ;;  %v2733_v27 = vmax.f32 %v2731_v58, %v2732_v51  ;;  %v10952_v52 = vadd.f32 %v1940_v50, %v1939_v57  ;;  %v10968_v50 = vpop.f32.mrf.mxu1 }
 0x39b   :  { %v2734_v11 = vsel %vm66_vm0, %v10811_v47, -inf  ;;  %v1350_v60 = vmax.f32 %v1348_v4, %v1349_v35  ;;  %8044 = vrcp.f32 %v1491_v0  ;;  %v2870_v10 = vadd.f32 %v2869_v53, %v2868_v12 }
 0x39c   :  { %v2871_v34 = vsel %vm66_vm0, %v10945_v54, 0.0  ;;  %v1352_v21 = vsel %vm66_vm0, %v10849_v36, -inf  ;;  %v10962_v58 = vpop.eup %8038  ;;  %v10973_v35 = vmax.f32 %v2733_v27, %v2734_v11  ;;  %v2737_v53 = vsel %vm66_vm0, %v10857_v20, -inf  ;;  %v10977_v54 = vpop.f32.mrf.mxu0 }
 0x39d   :  { %13333 = vst [vmem:[#allocation30_spill] sm:$0xff] %v10962_v58  ;;  %v1382_v57 = vsub.f32 %v10693_v18, %v1350_v60  ;;  %v1383_v63 = vsub.f32 %v10677_v31, %v1350_v60  ;;  %v1384_v40 = vsub.f32 %v10741_v17, %v1350_v60  ;;  %v1385_v51 = vsub.f32 %v10717_v55, %v1350_v60  ;;  %v10970_v0 = vpop.eup %8040  ;;  %v10988_v61 = vpop.f32.mrf.mxu1 }
 0x39e   :  { %v2872_v4 = vadd.f32 %v2871_v34, %v2870_v10  ;;  %v1386_v12 = vsub.f32 %v10785_v48, %v1350_v60  ;;  %v2873_v31 = vsel %vm66_vm0, %v10962_v58, 0.0  ;;  %v1387_v18 = vsub.f32 %v10763_v24, %v1350_v60 }
 0x39f   :  { %v1430_v55 = vmul.f32 1.442695, %v1382_v57  ;;  %v1351_v17 = vsel %vm66_vm0, %v10872_v9, -inf  ;;  %v1388_v10 = vsub.f32 %v10825_v49, %v1350_v60  ;;  %v1432_v48 = vmul.f32 1.442695, %v1383_v63 }
 0x3a0   :  { %v2874_v1 = vadd.f32 %v2873_v31, %v2872_v4  ;;  %v1434_v27 = vmul.f32 1.442695, %v1384_v40  ;;  %v2875_v11 = vsel %vm66_vm0, %v10970_v0, 0.0  ;;  %v1389_v34 = vsub.f32 %v10805_v7, %v1350_v60  ;;  %v10992_v4 = vpop.f32.mrf.mxu0  ;;  %v11004_v31 = vpop.f32.mrf.mxu1 }
 0x3a1   :  { %8046 = vpow2.f32 %v1430_v55  ;;  %v1436_v13 = vmul.f32 1.442695, %v1385_v51  ;;  %v1438_v24 = vmul.f32 1.442695, %v1386_v12  ;;  %v2767_v57 = vsub.f32 %v10715_v59, %v10973_v35 }
 0x3a2   :  { %v2876_v58 = vadd.f32 %v2875_v11, %v2874_v1  ;;  %8048 = vpow2.f32 %v1432_v48  ;;  %v1440_v49 = vmul.f32 1.442695, %v1387_v18  ;;  %v2768_v63 = vsub.f32 %v10691_v32, %v10973_v35  ;;  %v11022_v11 = vpop.f32.mrf.mxu1 }
 0x3a3   :  { %8050 = vpow2.f32 %v1434_v27  ;;  %v2736_v7 = vsel %vm66_vm0, %v10879_v6, -inf  ;;  %v1442_v60 = vmul.f32 1.442695, %v1388_v10  ;;  %v2769_v1 = vsub.f32 %v10761_v62, %v10973_v35  ;;  %v11010_v62 = vpop.f32.mrf.mxu0  ;;  %13334 = vst [vmem:[#allocation21_spill] sm:$0xff] %v11022_v11 }
 0x3a4   :  { %8052 = vrcp.f32 %v2876_v58  ;;  %v2770_v40 = vsub.f32 %v10739_v8, %v10973_v35  ;;  %v1444_v59 = vmul.f32 1.442695, %v1389_v34  ;;  %v2771_v51 = vsub.f32 %v10789_v38, %v10973_v35 }
 0x3a5   :  { %8054 = vpow2.f32 %v1436_v13  ;;  %v1353_v12 = vmax.f32 %v1351_v17, %v1352_v21  ;;  %v11006_v32 = vpop.eup %8042  ;;  %v2772_v58 = vsub.f32 %v10775_v56, %v10973_v35  ;;  %v2815_v18 = vmul.f32 1.442695, %v2767_v57  ;;  %v11028_v34 = vpop.f32.mrf.mxu0 }
 0x3a6   :  { %8056 = vpow2.f32 %v1438_v24  ;;  %v2738_v55 = vmax.f32 %v2736_v7, %v2737_v53  ;;  %v2773_v8 = vsub.f32 %v10829_v45, %v10973_v35  ;;  %v2774_v38 = vsub.f32 %v10811_v47, %v10973_v35  ;;  %13335 = vst [vmem:[#allocation22_spill] sm:$0xff] %v11028_v34 }
 0x3a7   :  { %8058 = vpow2.f32 %v1440_v49  ;;  %v2817_v13 = vmul.f32 1.442695, %v2768_v63  ;;  %v2819_v21 = vmul.f32 1.442695, %v2769_v1  ;;  %v2821_v17 = vmul.f32 1.442695, %v2770_v40 }
 0x3a8   :  { %8060 = vpow2.f32 %v1442_v60  ;;  %v1354_v10 = vsel %vm66_vm0, %v10916_v37, -inf  ;;  %v11018_v48 = vpop.eup %8044  ;;  %v2823_v56 = vmul.f32 1.442695, %v2771_v51  ;;  %v2739_v27 = vsel %vm66_vm0, %v10924_v14, -inf  ;;  %v11036_v51 = vpop.f32.mrf.mxu1 }
 0x3a9   :  { %8062 = vpow2.f32 %v1444_v59  ;;  %v1355_v53 = vmax.f32 %v1353_v12, %v1354_v10  ;;  %v1356_v47 = vsel %vm66_vm0, %v10891_v30, -inf  ;;  %v2740_v45 = vmax.f32 %v2738_v55, %v2739_v27  ;;  %13336 = vst [vmem:[#allocation32_spill] sm:$0xff] %v11036_v51 }
 0x3aa   :  { %8064 = vpow2.f32 %v2815_v18  ;;  %v1358_v35 = vsel %vm66_vm0, %v10968_v50, -inf  ;;  %v2741_v24 = vsel %vm66_vm0, %v10897_v19, -inf  ;;  %v2743_v49 = vsel %vm66_vm0, %v10977_v54, -inf }
 0x3ab   :  { %8066 = vpow2.f32 %v2817_v13  ;;  %v1357_v57 = vmax.f32 %v1355_v53, %v1356_v47  ;;  %v2825_v63 = vmul.f32 1.442695, %v2772_v58  ;;  %v2827_v7 = vmul.f32 1.442695, %v2773_v8  ;;  %v11044_v8 = vpop.f32.mrf.mxu0 }
 0x3ac   :  { %8068 = vpow2.f32 %v2819_v21  ;;  %v2742_v60 = vmax.f32 %v2740_v45, %v2741_v24  ;;  %v2829_v1 = vmul.f32 1.442695, %v2774_v38  ;;  %v1360_v40 = vsel %vm66_vm0, %v10943_v39, -inf  ;;  %13337 = vst [vmem:[#allocation15_spill] sm:$0xff] %v11044_v8 }
 0x3ad   :  { %8070 = vpow2.f32 %v2821_v17  ;;  %v1359_v59 = vmax.f32 %v1357_v57, %v1358_v35  ;;  %v2745_v18 = vsel %vm66_vm0, %v10950_v22, -inf  ;;  %v1362_v58 = vsel %vm66_vm0, %v11004_v31, -inf }
 0x3ae   :  { %v11038_v12 = vpop.eup %8046  ;;  %8072 = vpow2.f32 %v2823_v56  ;;  %v2744_v55 = vmax.f32 %v2742_v60, %v2743_v49  ;;  %v1364_v21 = vsel %vm66_vm0, %v10988_v61, -inf  ;;  %v2747_v10 = vsel %vm66_vm0, %v11010_v62, -inf }
 0x3af   :  { %v11046_v13 = vpop.eup %8048  ;;  %v1492_v38 = vsel %vm66_vm0, %v11038_v12, 0.0  ;;  %v1361_v17 = vmax.f32 %v1359_v59, %v1360_v40  ;;  %8074 = vpow2.f32 %v2825_v63  ;;  %v11060_v47 = vsel %vm66_vm0, %v11036_v51, -inf }
 0x3b0   :  { %v11054_v56 = vpop.eup %8050  ;;  %v1493_v53 = vsel %vm66_vm0, %v11046_v13, 0.0  ;;  %v2746_v27 = vmax.f32 %v2744_v55, %v2745_v18  ;;  %13338 = vst [vmem:[#allocation136_spill] sm:$0xff] %v11060_v47  ;;  %8076 = vpow2.f32 %v2827_v7  ;;  %v11066_v57 = vsel %vm66_vm0, %v11044_v8, -inf  ;;  %v13343_v8 = vld [vmem:[#allocation9_spill] sm:$0xff] }
 0x3b1   :  { %v11062_v45 = vpop.eup %8052  ;;  %v1494_v35 = vadd.f32 %v1493_v53, %v1492_v38  ;;  %v1363_v24 = vmax.f32 %v1361_v17, %v1362_v58  ;;  %13340 = vst [vmem:[#allocation138_spill] sm:$0xff] %v11066_v57  ;;  %v1495_v60 = vsel %vm66_vm0, %v11054_v56, 0.0  ;;  %8078 = vpow2.f32 %v2829_v1 }
 0x3b2   :  { %13339 = vst [vmem:[#allocation137_spill] sm:$0xff] %v11062_v45  ;;  %v11068_v49 = vpop.eup %8054  ;;  %v2749_v63 = vsel %vm66_vm0, %v10992_v4, -inf  ;;  %v11076_v40 = vsel %vm66_vm0, %v11022_v11, -inf  ;;  %v2748_v55 = vmax.f32 %v2746_v27, %v2747_v10  ;;  %v11082_v58 = vsel %vm66_vm0, %v11028_v34, -inf }
 0x3b3   :  { %13341 = vst [vmem:[#allocation139_spill] sm:$0xff] %v11076_v40  ;;  %v11078_v59 = vpop.eup %8056  ;;  %v1496_v7 = vadd.f32 %v1495_v60, %v1494_v35  ;;  %v1365_v18 = vmax.f32 %v1363_v24, %v1364_v21  ;;  %13342 = vst [vmem:[#allocation140_spill] sm:$0xff] %v11082_v58  ;;  %v1497_v1 = vsel %vm66_vm0, %v11068_v49, 0.0  ;;  %v11094_v35 = vmul.f32 %v10685_v41, %v13343_v8  ;;  %v13344_v60 = vld [vmem:[#allocation23_spill] sm:$0xff] }
 0x3b4   :  { %v11084_v38 = vpop.eup %8058  ;;  %v11102_v34 = vmul.f32 %v10695_v25, %v13344_v60  ;;  %v1499_v53 = vsel %vm66_vm0, %v11078_v59, 0.0 }
 0x3b5   :  { %v11096_v21 = vpop.eup %8060  ;;  %v1498_v10 = vadd.f32 %v1497_v1, %v1496_v7  ;;  %v1390_v27 = vsub.f32 %v10872_v9, %v1365_v18  ;;  %v1391_v24 = vsub.f32 %v10849_v36, %v1365_v18  ;;  %v1392_v17 = vsub.f32 %v10916_v37, %v1365_v18 }
 0x3b6   :  { %v11104_v11 = vpop.eup %8062  ;;  %v1393_v41 = vsub.f32 %v10891_v30, %v1365_v18  ;;  %v1394_v8 = vsub.f32 %v10968_v50, %v1365_v18  ;;  %v1501_v36 = vsel %vm66_vm0, %v11084_v38, 0.0  ;;  %v1395_v25 = vsub.f32 %v10943_v39, %v1365_v18 }
 0x3b7   :  { %v11111_v7 = vpop.eup %8064  ;;  %v1500_v9 = vadd.f32 %v1499_v53, %v1498_v10  ;;  %v11116_v1 = vmax.f32 %v2748_v55, %v2749_v63  ;;  %v1396_v37 = vsub.f32 %v11004_v31, %v1365_v18  ;;  %v1446_v30 = vmul.f32 1.442695, %v1390_v27 }
 0x3b8   :  { %v11118_v60 = vpop.eup %8066  ;;  %v2877_v51 = vsel %vm66_vm0, %v11111_v7, 0.0  ;;  %v1448_v58 = vmul.f32 1.442695, %v1391_v24  ;;  %v1450_v10 = vmul.f32 1.442695, %v1392_v17  ;;  %v1503_v63 = vsel %vm66_vm0, %v11096_v21, 0.0 }
 0x3b9   :  { %v11123_v50 = vpop.eup %8068  ;;  %v1502_v57 = vadd.f32 %v1501_v36, %v1500_v9  ;;  %v2878_v53 = vsel %vm66_vm0, %v11118_v60, 0.0  ;;  %v1452_v40 = vmul.f32 1.442695, %v1393_v41  ;;  %8080 = vpow2.f32 %v1446_v30 }
 0x3ba   :  { %v11127_v39 = vpop.eup %8070  ;;  %v2879_v55 = vadd.f32 %v2878_v53, %v2877_v51  ;;  %v1454_v47 = vmul.f32 1.442695, %v1394_v8  ;;  %v2880_v27 = vsel %vm66_vm0, %v11123_v50, 0.0  ;;  %v1397_v24 = vsub.f32 %v10988_v61, %v1365_v18 }
 0x3bb   :  { %v11131_v45 = vpop.eup %8072  ;;  %v1504_v31 = vadd.f32 %v1503_v63, %v1502_v57  ;;  %8082 = vpow2.f32 %v1448_v58  ;;  %v1505_v17 = vsel %vm66_vm0, %v11104_v11, 0.0  ;;  %v1456_v9 = vmul.f32 1.442695, %v1395_v25 }
 0x3bc   :  { %v2881_v41 = vadd.f32 %v2880_v27, %v2879_v55  ;;  %8084 = vpow2.f32 %v1450_v10  ;;  %v11138_v36 = vpop.eup %8074  ;;  %v2882_v8 = vsel %vm66_vm0, %v11127_v39, 0.0  ;;  %v1458_v57 = vmul.f32 1.442695, %v1396_v37  ;;  %v13345_v55 = vld [vmem:[#allocation18_spill] sm:$0xff] }
 0x3bd   :  { %v1506_v51 = vadd.f32 %v1505_v17, %v1504_v31  ;;  %8086 = vpow2.f32 %v1452_v40  ;;  %v11142_v30 = vpop.eup %8076  ;;  %v2884_v61 = vsel %vm66_vm0, %v11131_v45, 0.0  ;;  %v2775_v18 = vsub.f32 %v10879_v6, %v11116_v1 }
 0x3be   :  { %v2883_v53 = vadd.f32 %v2882_v8, %v2881_v41  ;;  %8088 = vpow2.f32 %v1454_v47  ;;  %v11148_v58 = vpop.eup %8078  ;;  %v1460_v25 = vmul.f32 1.442695, %v1397_v24  ;;  %v2776_v10 = vsub.f32 %v10857_v20, %v11116_v1 }
 0x3bf   :  { %8090 = vrcp.f32 %v1506_v51  ;;  %v2777_v40 = vsub.f32 %v10924_v14, %v11116_v1  ;;  %v2778_v63 = vsub.f32 %v10897_v19, %v11116_v1  ;;  %v13346_v47 = vrot.slane %v13345_v55, %v8764_v44 }
 0x3c0   :  { %v2885_v37 = vadd.f32 %v2884_v61, %v2883_v53  ;;  %8092 = vpow2.f32 %v1456_v9  ;;  %v2886_v31 = vsel %vm66_vm0, %v11138_v36, 0.0  ;;  %v2888_v27 = vsel %vm66_vm0, %v11142_v30, 0.0 }
 0x3c1   :  { %v1886_v6 = vmul.f32 %v10701_v15, %v13346_v47  ;;  %8094 = vpow2.f32 %v1458_v57  ;;  %v2779_v20 = vsub.f32 %v10977_v54, %v11116_v1  ;;  %v2890_v24 = vsel %vm66_vm0, %v11148_v58, 0.0  ;;  %v13350_v47 = vld [vmem:[#allocation25_spill] sm:$0xff] }
 0x3c2   :  { %v2887_v14 = vadd.f32 %v2886_v31, %v2885_v37  ;;  %v2831_v19 = vmul.f32 1.442695, %v2775_v18  ;;  %v2833_v17 = vmul.f32 1.442695, %v2776_v10  ;;  %8096 = vpow2.f32 %v1460_v25 }
 0x3c3   :  { %v2780_v15 = vsub.f32 %v10950_v22, %v11116_v1  ;;  %v2835_v41 = vmul.f32 1.442695, %v2777_v40  ;;  %v2837_v9 = vmul.f32 1.442695, %v2778_v63  ;;  %v2781_v8 = vsub.f32 %v11010_v62, %v11116_v1  ;;  %v13347_v22 = vld [vmem:[#allocation6_spill] sm:$0xff] }
 0x3c4   :  { %v2889_v51 = vadd.f32 %v2888_v27, %v2887_v14  ;;  %v2782_v57 = vsub.f32 %v10992_v4, %v11116_v1  ;;  %8098 = vpow2.f32 %v2831_v19  ;;  %v2839_v54 = vmul.f32 1.442695, %v2779_v20  ;;  %v13349_v1 = vld [vmem:[#allocation24_spill] sm:$0xff] }
 0x3c5   :  { %8100 = vpow2.f32 %v2833_v17  ;;  %v1914_v53 = vsel %vm66_vm0, %v10835_v23, 0.0  ;;  %v1915_v61 = vsel %vm66_vm0, %v10936_v43, 0.0  ;;  %v13348_v25 = vrot.slane %v13347_v22, %v8764_v44  ;;  %v13351_v17 = vld [vmem:[#allocation33_spill] sm:$0xff] }
 0x3c6   :  { %v2891_v18 = vadd.f32 %v2890_v24, %v2889_v51  ;;  %8102 = vpow2.f32 %v2835_v41  ;;  %v1916_v62 = vadd.f32 %v1915_v61, %v1914_v53  ;;  %v11182_v40 = vpop.eup %8080  ;;  %v2841_v4 = vmul.f32 1.442695, %v2780_v15 }
 0x3c7   :  { %v1887_v10 = vmul.f32 %v10719_v5, %v13348_v25  ;;  %8104 = vpow2.f32 %v2837_v9  ;;  %v1888_v37 = vmul.f32 %v10727_v16, %v13349_v1  ;;  %v1917_v23 = vsel %vm66_vm0, %v11094_v35, 0.0  ;;  %v13354_v25 = vld [vmem:[#allocation27_spill] sm:$0xff] }
 0x3c8   :  { %v11188_v63 = vpop.eup %8082  ;;  %v1507_v43 = vsel %vm66_vm0, %v11182_v40, 0.0  ;;  %v2843_v55 = vmul.f32 1.442695, %v2781_v8  ;;  %v1889_v5 = vmul.f32 %v10743_v46, %v13350_v47  ;;  %v1918_v31 = vadd.f32 %v1917_v23, %v1916_v62  ;;  %v13356_v47 = vld [vmem:[#allocation10_spill] sm:$0xff] }
 0x3c9   :  { %v11194_v27 = vpop.eup %8084  ;;  %v1508_v20 = vsel %vm66_vm0, %v11188_v63, 0.0  ;;  %8106 = vpow2.f32 %v2839_v54  ;;  %v2845_v16 = vmul.f32 1.442695, %v2782_v57  ;;  %v1919_v35 = vsel %vm66_vm0, %v11102_v34, 0.0 }
 0x3ca   :  { %v11200_v14 = vpop.eup %8086  ;;  %8108 = vrcp.f32 %v2891_v18  ;;  %v1509_v24 = vadd.f32 %v1508_v20, %v1507_v43  ;;  %v1920_v19 = vadd.f32 %v1919_v35, %v1918_v31  ;;  %v1897_v15 = vmul.f32 %v10893_v28, %v13351_v17  ;;  %v13352_v18 = vld [vmem:[#allocation26_spill] sm:$0xff] }
 0x3cb   :  { %v11204_v46 = vpop.eup %8088  ;;  %v1510_v41 = vsel %vm66_vm0, %v11194_v27, 0.0  ;;  %8110 = vpow2.f32 %v2841_v4  ;;  %v1921_v9 = vsel %vm66_vm0, %v1886_v6, 0.0  ;;  %v1923_v51 = vsel %vm66_vm0, %v1887_v10, 0.0 }
 0x3cc   :  { %v11210_v8 = vpop.eup %8090  ;;  %v1511_v34 = vadd.f32 %v1510_v41, %v1509_v24  ;;  %8112 = vpow2.f32 %v2843_v55  ;;  %v1922_v57 = vadd.f32 %v1921_v9, %v1920_v19  ;;  %v1925_v54 = vsel %vm66_vm0, %v1888_v37, 0.0  ;;  %v13358_v24 = vld [vmem:[#allocation29_spill] sm:$0xff] }
 0x3cd   :  { %v11213_v53 = vpop.eup %8092  ;;  %v1512_v28 = vsel %vm66_vm0, %v11200_v14, 0.0  ;;  %v1927_v61 = vsel %vm66_vm0, %v1889_v5, 0.0  ;;  %v13353_v22 = vrot.slane %v13352_v18, %v8764_v44  ;;  %v13355_v10 = vrot.slane %v13354_v25, %v8764_v44  ;;  %v13357_v5 = vld [vmem:[#allocation38_spill] sm:$0xff] }
 0x3ce   :  { %v11226_v4 = vpop.eup %8094  ;;  %v1513_v1 = vadd.f32 %v1512_v28, %v1511_v34  ;;  %8114 = vpow2.f32 %v2845_v16  ;;  %v1924_v37 = vadd.f32 %v1923_v51, %v1922_v57  ;;  %v1942_v23 = vsel %vm66_vm0, %v1897_v15, 0.0  ;;  %v11257_v28 = vpop.f32.mrf.mxu0 }
 0x3cf   :  { %v1898_v6 = vmul.f32 %v11038_v12, %v13353_v22  ;;  %v1899_v62 = vmul.f32 %v11046_v13, %v13355_v10  ;;  %v1514_v43 = vsel %vm66_vm0, %v11204_v46, 0.0  ;;  %v1943_v55 = vadd.f32 %v1942_v23, %v10952_v52  ;;  %v11236_v20 = vpop.eup %8096  ;;  %v13360_v22 = vld [vmem:[#allocation31_spill] sm:$0xff]  ;;  %v13362_v10 = vld [vmem:[#allocation40_spill] sm:$0xff] }
 0x3d0   :  { %v1900_v12 = vmul.f32 %v11054_v56, %v13356_v47  ;;  %v1901_v31 = vmul.f32 %v11068_v49, %v13357_v5  ;;  %v1515_v13 = vadd.f32 %v1514_v43, %v1513_v1  ;;  %v1516_v16 = vsel %vm66_vm0, %v11213_v53, 0.0  ;;  %v13363_v1 = vld [vmem:[#allocation41_spill] sm:$0xff] }
 0x3d1   :  { %v1926_v35 = vadd.f32 %v1925_v54, %v1924_v37  ;;  %v13359_v19 = vrot.slane %v13358_v24, %v8764_v44  ;;  %v11244_v15 = vpop.eup %8098  ;;  %v1518_v52 = vsel %vm66_vm0, %v11226_v4, 0.0  ;;  %v1979_v56 = vmul.f32 %v11018_v48, %v1943_v55  ;;  %v13364_v24 = vld [vmem:[#allocation34_spill] sm:$0xff] }
 0x3d2   :  { %v1944_v49 = vsel %vm66_vm0, %v1898_v6, 0.0  ;;  %v1945_v41 = vsel %vm66_vm0, %v1899_v62, 0.0  ;;  %v11251_v9 = vpop.eup %8100  ;;  %v1517_v51 = vadd.f32 %v1516_v16, %v1515_v13  ;;  %v2892_v34 = vsel %vm66_vm0, %v11244_v15, 0.0 }
 0x3d3   :  { %v1902_v17 = vmul.f32 %v11078_v59, %v13359_v19  ;;  %v1928_v57 = vadd.f32 %v1927_v61, %v1926_v35  ;;  %v1946_v54 = vadd.f32 %v1945_v41, %v1944_v49  ;;  %v11255_v59 = vpop.f32.mrf.mxu1  ;;  %v11259_v18 = vpop.eup %8102  ;;  %v2893_v48 = vsel %vm66_vm0, %v11251_v9, 0.0  ;;  %v13366_v19 = vld [vmem:[#allocation36_spill] sm:$0xff] }
 0x3d4   :  { %v13361_v6 = vrot.slane %v13360_v22, %v8764_v44  ;;  %v1904_v62 = vmul.f32 %v11096_v21, %v13362_v10  ;;  %v1905_v61 = vmul.f32 %v11104_v11, %v13363_v1  ;;  %v11271_v37 = vpop.eup %8104  ;;  %v1519_v23 = vadd.f32 %v1518_v52, %v1517_v51  ;;  %v11293_v51 = vpop.f32.mrf.mxu0  ;;  %v13368_v10 = vld [vmem:[#allocation45_spill] sm:$0xff] }
 0x3d5   :  { %v2894_v43 = vadd.f32 %v2893_v48, %v2892_v34  ;;  %v1978_v55 = vmul.f32 %v10881_v3, %v1928_v57  ;;  %v1947_v47 = vsel %vm66_vm0, %v1900_v12, 0.0  ;;  %v1520_v5 = vsel %vm66_vm0, %v11236_v20, 0.0  ;;  %v11291_v41 = vpop.f32.mrf.mxu1 }
 0x3d6   :  { %v1903_v25 = vmul.f32 %v11084_v38, %v13361_v6  ;;  %v2895_v38 = vsel %vm66_vm0, %v11259_v18, 0.0  ;;  %v1948_v13 = vadd.f32 %v1947_v47, %v1946_v54  ;;  %v1949_v21 = vsel %vm66_vm0, %v1901_v31, 0.0  ;;  %v11280_v16 = vpop.eup %8106  ;;  %v13370_v47 = vld [vmem:[#allocation35_spill] sm:$0xff] }
 0x3d7   :  { %v1521_v11 = vadd.f32 %v1520_v5, %v1519_v23  ;;  %v2896_v35 = vadd.f32 %v2895_v38, %v2894_v43  ;;  %7898 = vmatprep.mubr.msk.f32.mxu1 %vm66_vm0, %v1978_v55  ;;  %v13365_v3 = vrot.slane %v13364_v24, %v8764_v44  ;;  %v13367_v52 = vrot.slane %v13366_v19, %v8764_v44  ;;  %v11295_v31 = vpop.eup %8108  ;;  %v11320_v38 = vpop.f32.mrf.mxu1 }
 0x3d8   :  { %v2897_v34 = vsel %vm66_vm0, %v11271_v37, 0.0  ;;  %7899 = vmatmul.mubr.msk.f32.vlgmr.msra.gmra.mxu1 %vm66_vm0, %v1979_v56  ;;  %v1950_v57 = vadd.f32 %v1949_v21, %v1948_v13  ;;  %v1951_v54 = vsel %vm66_vm0, %v1902_v17, 0.0  ;;  %v11302_v48 = vpop.eup %8110  ;;  %v1957_v6 = vsel %vm66_vm0, %v1905_v61, 0.0  ;;  %v13369_v17 = vld [vmem:[#allocation47_spill] sm:$0xff]  ;;  %v11322_v13 = vpop.f32.mrf.mxu0 }
 0x3d9   :  { %v1906_v12 = vmul.f32 %v11182_v40, %v13365_v3  ;;  %v1907_v49 = vmul.f32 %v11188_v63, %v13367_v52  ;;  %v1953_v40 = vsel %vm66_vm0, %v1903_v25, 0.0  ;;  %v2898_v22 = vadd.f32 %v2897_v34, %v2896_v35  ;;  %v11308_v23 = vpop.eup %8112  ;;  %v13372_v35 = vld [vmem:[#allocation37_spill] sm:$0xff]  ;;  %v13374_v52 = vld [vmem:[#allocation46_spill] sm:$0xff] }
 0x3da   :  { %v1955_v63 = vsel %vm66_vm0, %v1904_v62, 0.0  ;;  %v1908_v1 = vmul.f32 %v11194_v27, %v13368_v10  ;;  %8116 = vrcp.f32 %v1521_v11  ;;  %v2899_v56 = vsel %vm66_vm0, %v11280_v16, 0.0  ;;  %v13376_v10 = vld [vmem:[#allocation39_spill] sm:$0xff] }
 0x3db   :  { %v1952_v43 = vadd.f32 %v1951_v54, %v1950_v57  ;;  %v1909_v25 = vmul.f32 %v11200_v14, %v13369_v17  ;;  %v2900_v55 = vadd.f32 %v2899_v56, %v2898_v22  ;;  %v13371_v5 = vrot.slane %v13370_v47, %v8764_v44  ;;  %v11324_v21 = vpop.eup %8114  ;;  %v13375_v54 = vld [vmem:[#allocation48_spill] sm:$0xff]  ;;  %v13378_v47 = vld [vmem:[#allocation43_spill] sm:$0xff] }
 0x3dc   :  { %v1959_v61 = vsel %vm66_vm0, %v1906_v12, 0.0  ;;  %v1960_v27 = vsel %vm66_vm0, %v1907_v49, 0.0  ;;  %v2901_v11 = vsel %vm66_vm0, %v11302_v48, 0.0  ;;  %v13373_v24 = vrot.slane %v13372_v35, %v8764_v44 }
 0x3dd   :  { %v1910_v62 = vmul.f32 %v11204_v46, %v13371_v5  ;;  %v1954_v14 = vadd.f32 %v1953_v40, %v1952_v43  ;;  %v1961_v46 = vadd.f32 %v1960_v27, %v1959_v61  ;;  %v2902_v19 = vadd.f32 %v2901_v11, %v2900_v55 }
 0x3de   :  { %v1911_v3 = vmul.f32 %v11213_v53, %v13373_v24  ;;  %v2903_v12 = vsel %vm66_vm0, %v11308_v23, 0.0  ;;  %v1912_v49 = vmul.f32 %v11226_v4, %v13374_v52  ;;  %v1962_v34 = vsel %vm66_vm0, %v1908_v1, 0.0  ;;  %v11350_v1 = vpop.f32.mrf.mxu1  ;;  %v13382_v24 = vld [vmem:[#allocation131_spill] sm:$0xff] }
 0x3df   :  { %v1956_v57 = vadd.f32 %v1955_v63, %v1954_v14  ;;  %v1913_v22 = vmul.f32 %v11236_v20, %v13375_v54  ;;  %v1963_v40 = vadd.f32 %v1962_v34, %v1961_v46  ;;  %v13377_v56 = vrot.slane %v13376_v10, %v8764_v44  ;;  %v11352_v20 = vpop.f32.mrf.mxu0  ;;  %v13383_v34 = vld [vmem:[#allocation42_spill] sm:$0xff]  ;;  %v13386_v10 = vld [vmem:[#allocation44_spill] sm:$0xff] }
 0x3e0   :  { %v2904_v43 = vadd.f32 %v2903_v12, %v2902_v19  ;;  %v2905_v17 = vsel %vm66_vm0, %v11324_v21, 0.0  ;;  %v1964_v55 = vsel %vm66_vm0, %v1909_v25, 0.0  ;;  %v13379_v4 = vrot.slane %v13378_v47, %v8764_v44  ;;  %v13381_v25 = vld [vmem:[#allocation50_spill] sm:$0xff] }
 0x3e1   :  { %v3267_v53 = vmul.f32 %v10751_v26, %v13377_v56  ;;  %v1958_v5 = vadd.f32 %v1957_v6, %v1956_v57  ;;  %v1965_v61 = vadd.f32 %v1964_v55, %v1963_v40  ;;  %v1966_v27 = vsel %vm66_vm0, %v1910_v62, 0.0  ;;  %v13380_v26 = vld [vmem:[#allocation11_spill] sm:$0xff]  ;;  %v11363_v12 = vpop.f32.mrf.mxu0  ;;  %v13385_v57 = vld [vmem:[#allocation132_spill] sm:$0xff]  ;;  %v13389_v55 = vld [vmem:[#allocation53_spill] sm:$0xff] }
 0x3e2   :  { %v3268_v63 = vmul.f32 %v10765_v2, %v13379_v4  ;;  %v3269_v11 = vmul.f32 %v10769_v33, %v13380_v26  ;;  %v2906_v14 = vadd.f32 %v2905_v17, %v2904_v43  ;;  %v1968_v35 = vsel %vm66_vm0, %v1911_v3, 0.0  ;;  %v11361_v2 = vpop.f32.mrf.mxu1  ;;  %v13390_v47 = vld [vmem:[#allocation134_spill] sm:$0xff] }
 0x3e3   :  { %v3270_v46 = vmul.f32 %v13382_v24, %v13381_v25  ;;  %v3299_v19 = vsel %vm66_vm0, %v3267_v53, 0.0  ;;  %v1980_v6 = vmul.f32 %v11210_v8, %v1958_v5  ;;  %v1967_v52 = vadd.f32 %v1966_v27, %v1965_v61  ;;  %v13388_v53 = vld [vmem:[#allocation133_spill] sm:$0xff]  ;;  %v13391_v5 = vld [vmem:[#allocation54_spill] sm:$0xff]  ;;  %v13392_v61 = vld [vmem:[#allocation135_spill] sm:$0xff] }
 0x3e4   :  { %v13384_v62 = vrot.slane %v13383_v34, %v8764_v44  ;;  %v3300_v54 = vsel %vm66_vm0, %v3268_v63, 0.0  ;;  %v1970_v3 = vsel %vm66_vm0, %v1912_v49, 0.0  ;;  %v1972_v40 = vsel %vm66_vm0, %v1913_v22, 0.0  ;;  %v13393_v22 = vld [vmem:[#allocation49_spill] sm:$0xff]  ;;  %v13395_v24 = vld [vmem:[#allocation52_spill] sm:$0xff] }
 0x3e5   :  { %v13387_v56 = vrot.slane %v13386_v10, %v8764_v44  ;;  %v3301_v17 = vadd.f32 %v3300_v54, %v3299_v19  ;;  %7901 = vmatprep.mubr.msk.f32.mxu1 %vm66_vm0, %v1980_v6  ;;  %v1969_v8 = vadd.f32 %v1968_v35, %v1967_v52  ;;  %v3273_v4 = vmul.f32 %v13390_v47, %v13389_v55  ;;  %v11391_v6 = vpop.f32.mrf.mxu1  ;;  %v11393_v52 = vpop.f32.mrf.mxu0 }
 0x3e6   :  { %v3271_v33 = vmul.f32 %v13385_v57, %v13384_v62  ;;  %v3274_v27 = vmul.f32 %v13392_v61, %v13391_v5  ;;  %v3302_v63 = vsel %vm66_vm0, %v3269_v11, 0.0  ;;  %8118 = vrcp.f32 %v2906_v14  ;;  %v13397_v14 = vld [vmem:[#allocation12_spill] sm:$0xff]  ;;  %v13398_v57 = vld [vmem:[#allocation17_spill] sm:$0xff]  ;;  %v13401_v5 = vld [vmem:[#allocation51_spill] sm:$0xff] }
 0x3e7   :  { %v3272_v43 = vmul.f32 %v13388_v53, %v13387_v56  ;;  %v3303_v49 = vadd.f32 %v3302_v63, %v3301_v17  ;;  %v13394_v26 = vrot.slane %v13393_v22, %v8764_v44  ;;  %v13396_v19 = vrot.slane %v13395_v24, %v8764_v44  ;;  %v8117_v10 = vpop.eup %8116  ;;  %v13399_v53 = vld [vmem:[#allocation56_spill] sm:$0xff]  ;;  %v13400_v17 = vld [vmem:[#allocation7_spill] sm:$0xff]  ;;  %v13407_v24 = vld [vmem:[#allocation57_spill] sm:$0xff] }
 0x3e8   :  { %v1971_v34 = vadd.f32 %v1970_v3, %v1969_v8  ;;  %v3304_v62 = vsel %vm66_vm0, %v3270_v46, 0.0  ;;  %v3306_v11 = vsel %vm66_vm0, %v3271_v33, 0.0  ;;  %v3277_v54 = vmul.f32 %v13398_v57, %v13397_v14  ;;  %v13403_v8 = vld [vmem:[#allocation8_spill] sm:$0xff]  ;;  %v13404_v61 = vld [vmem:[#allocation55_spill] sm:$0xff] }
 0x3e9   :  { %v3275_v25 = vmul.f32 %v10899_v42, %v13394_v26  ;;  %v3276_v35 = vmul.f32 %v10905_v29, %v13396_v19  ;;  %v3305_v56 = vadd.f32 %v3304_v62, %v3303_v49  ;;  %v3308_v42 = vsel %vm66_vm0, %v3272_v43, 0.0  ;;  %v13406_v63 = vld [vmem:[#allocation28_spill] sm:$0xff]  ;;  %v13408_v19 = vld [vmem:[#allocation30_spill] sm:$0xff] }
 0x3ea   :  { %v3278_v55 = vmul.f32 %v13400_v17, %v13399_v53  ;;  %v1973_v47 = vadd.f32 %v1972_v40, %v1971_v34  ;;  %v13402_v3 = vrot.slane %v13401_v5, %v8764_v44  ;;  %v13405_v33 = vrot.slane %v13404_v61, %v8764_v44  ;;  %v11415_v40 = vpop.f32.mrf.mxu1  ;;  %v11417_v34 = vpop.f32.mrf.mxu0  ;;  %v13409_v17 = vld [vmem:[#allocation13_spill] sm:$0xff] }
 0x3eb   :  { %v3314_v29 = vsel %vm66_vm0, %v3275_v25, 0.0  ;;  %v3315_v49 = vsel %vm66_vm0, %v3276_v35, 0.0  ;;  %v3307_v26 = vadd.f32 %v3306_v11, %v3305_v56  ;;  %v3310_v43 = vsel %vm66_vm0, %v3273_v4, 0.0  ;;  %v13411_v4 = vld [vmem:[#allocation19_spill] sm:$0xff] }
 0x3ec   :  { %v3279_v46 = vmul.f32 %v13403_v8, %v13402_v3  ;;  %v3280_v22 = vmul.f32 %v13406_v63, %v13405_v33  ;;  %v3281_v62 = vmul.f32 %v13408_v19, %v13407_v24  ;;  %v3316_v25 = vadd.f32 %v3315_v49, %v3314_v29  ;;  %v13412_v29 = vld [vmem:[#allocation59_spill] sm:$0xff]  ;;  %v11439_v49 = vpop.f32.mrf.mxu1  ;;  %v13416_v24 = vld [vmem:[#allocation58_spill] sm:$0xff]  ;;  %v13418_v19 = vld [vmem:[#allocation60_spill] sm:$0xff] }
 0x3ed   :  { %v1981_v14 = vmul.f32 %v8117_v10, %v1973_v47  ;;  %v3312_v57 = vsel %vm66_vm0, %v3274_v27, 0.0  ;;  %v3317_v53 = vsel %vm66_vm0, %v3277_v54, 0.0  ;;  %v13410_v5 = vrot.slane %v13409_v17, %v8764_v44  ;;  %v13414_v47 = vld [vmem:[#allocation63_spill] sm:$0xff] }
 0x3ee   :  { %v3309_v11 = vadd.f32 %v3308_v42, %v3307_v26  ;;  %v3282_v56 = vmul.f32 %v10970_v0, %v13411_v4  ;;  %v3318_v3 = vadd.f32 %v3317_v53, %v3316_v25  ;;  %v13413_v8 = vrot.slane %v13412_v29, %v8764_v44  ;;  %v13415_v26 = vld [vmem:[#allocation67_spill] sm:$0xff]  ;;  %v13420_v53 = vld [vmem:[#allocation64_spill] sm:$0xff]  ;;  %v13422_v4 = vld [vmem:[#allocation61_spill] sm:$0xff] }
 0x3ef   :  { %v3283_v35 = vmul.f32 %v11111_v7, %v13410_v5  ;;  %7902 = vmatmul.mubr.msk.f32.gmra.mxu1 %vm66_vm0, %v1981_v14  ;;  %v3319_v27 = vsel %vm66_vm0, %v3278_v55, 0.0  ;;  %v3321_v54 = vsel %vm66_vm0, %v3279_v46, 0.0  ;;  %v3323_v10 = vsel %vm66_vm0, %v3280_v22, 0.0  ;;  %v13424_v29 = vld [vmem:[#allocation65_spill] sm:$0xff] }
 0x3f0   :  { %v3284_v61 = vmul.f32 %v11118_v60, %v13413_v8  ;;  %v3285_v7 = vmul.f32 %v11123_v50, %v13414_v47  ;;  %v3311_v42 = vadd.f32 %v3310_v43, %v3309_v11  ;;  %v3320_v33 = vadd.f32 %v3319_v27, %v3318_v3  ;;  %v11441_v60 = vpop.f32.mrf.mxu0 }
 0x3f1   :  { %v3325_v0 = vsel %vm66_vm0, %v3281_v62, 0.0  ;;  %v3329_v63 = vsel %vm66_vm0, %v3283_v35, 0.0  ;;  %v3286_v55 = vmul.f32 %v11127_v39, %v13415_v26  ;;  %v13417_v46 = vrot.slane %v13416_v24, %v8764_v44  ;;  %v13421_v35 = vld [vmem:[#allocation68_spill] sm:$0xff] }
 0x3f2   :  { %v13419_v50 = vrot.slane %v13418_v19, %v8764_v44  ;;  %v3330_v62 = vsel %vm66_vm0, %v3284_v61, 0.0  ;;  %v3313_v25 = vadd.f32 %v3312_v57, %v3311_v42  ;;  %v3322_v14 = vadd.f32 %v3321_v54, %v3320_v33  ;;  %v11469_v54 = vpop.f32.mrf.mxu1  ;;  %v13426_v42 = vld [vmem:[#allocation72_spill] sm:$0xff] }
 0x3f3   :  { %v3287_v22 = vmul.f32 %v11131_v45, %v13417_v46  ;;  %v3289_v17 = vmul.f32 %v11142_v30, %v13420_v53  ;;  %v3331_v5 = vadd.f32 %v3330_v62, %v3329_v63  ;;  %v3290_v39 = vmul.f32 %v11148_v58, %v13421_v35  ;;  %v11471_v58 = vpop.f32.mrf.mxu0  ;;  %v11473_v47 = vpop.eup %8118  ;;  %v13428_v46 = vld [vmem:[#allocation62_spill] sm:$0xff]  ;;  %v13433_v35 = vld [vmem:[#allocation76_spill] sm:$0xff] }
 0x3f4   :  { %v3288_v43 = vmul.f32 %v11138_v36, %v13419_v50  ;;  %v3332_v11 = vsel %vm66_vm0, %v3285_v7, 0.0  ;;  %v13423_v45 = vrot.slane %v13422_v4, %v8764_v44  ;;  %v13425_v36 = vrot.slane %v13424_v29, %v8764_v44  ;;  %v13430_v62 = vld [vmem:[#allocation66_spill] sm:$0xff]  ;;  %v13434_v4 = vld [vmem:[#allocation137_spill] sm:$0xff] }
 0x3f5   :  { %v3363_v8 = vmul.f32 %v11006_v32, %v3313_v25  ;;  %v3324_v61 = vadd.f32 %v3323_v10, %v3322_v14  ;;  %v3327_v30 = vsel %vm66_vm0, %v3282_v56, 0.0  ;;  %v3333_v27 = vadd.f32 %v3332_v11, %v3331_v5  ;;  %v11495_v14 = vpop.f32.mrf.mxu1  ;;  %v11497_v53 = vpop.f32.mrf.mxu0 }
 0x3f6   :  { %v3291_v3 = vmul.f32 %v11244_v15, %v13423_v45  ;;  %v3292_v57 = vmul.f32 %v11251_v9, %v13425_v36  ;;  %v3334_v7 = vsel %vm66_vm0, %v3286_v55, 0.0  ;;  %v3336_v15 = vsel %vm66_vm0, %v3287_v22, 0.0  ;;  %v13427_v9 = vld [vmem:[#allocation75_spill] sm:$0xff] }
 0x3f7   :  { %v3293_v33 = vmul.f32 %v11259_v18, %v13426_v42  ;;  %v3294_v32 = vmul.f32 %v11271_v37, %v13427_v9  ;;  %7904 = vmatprep.mubr.msk.f32.mxu1 %vm66_vm0, %v3363_v8  ;;  %v3326_v56 = vadd.f32 %v3325_v0, %v3324_v61  ;;  %v3335_v10 = vadd.f32 %v3334_v7, %v3333_v27  ;;  %v13436_v8 = vld [vmem:[#allocation139_spill] sm:$0xff]  ;;  %v13439_v42 = vld [vmem:[#allocation140_spill] sm:$0xff] }
 0x3f8   :  { %v3338_v63 = vsel %vm66_vm0, %v3288_v43, 0.0  ;;  %v3344_v26 = vsel %vm66_vm0, %v3291_v3, 0.0  ;;  %v3340_v24 = vsel %vm66_vm0, %v3289_v17, 0.0  ;;  %v3342_v55 = vsel %vm66_vm0, %v3290_v39, 0.0  ;;  %v13432_v17 = vld [vmem:[#allocation74_spill] sm:$0xff] }
 0x3f9   :  { %v13429_v22 = vrot.slane %v13428_v46, %v8764_v44  ;;  %v3345_v19 = vsel %vm66_vm0, %v3292_v57, 0.0  ;;  %v3328_v37 = vadd.f32 %v3327_v30, %v3326_v56  ;;  %v3337_v50 = vadd.f32 %v3336_v15, %v3335_v10  ;;  %v13438_v15 = vld [vmem:[#allocation138_spill] sm:$0xff]  ;;  %v11522_v56 = vpop.f32.mrf.mxu1  ;;  %v11524_v10 = vpop.f32.mrf.mxu0 }
 0x3fa   :  { %v13431_v0 = vrot.slane %v13430_v62, %v8764_v44  ;;  %v3346_v25 = vadd.f32 %v3345_v19, %v3344_v26  ;;  %v3297_v5 = vmul.f32 %v11308_v23, %v13432_v17  ;;  %v3347_v39 = vsel %vm66_vm0, %v3293_v33, 0.0  ;;  %v13435_v23 = vld [vmem:[#allocation136_spill] sm:$0xff] }
 0x3fb   :  { %v3295_v18 = vmul.f32 %v11280_v16, %v13429_v22  ;;  %v3298_v16 = vmul.f32 %v11324_v21, %v13433_v35  ;;  %v3349_v11 = vsel %vm66_vm0, %v3294_v32, 0.0  ;;  %v3364_v45 = vmul.f32 %v13434_v4, %v3328_v37 }
 0x3fc   :  { %v3296_v43 = vmul.f32 %v11302_v48, %v13431_v0  ;;  %v3339_v3 = vadd.f32 %v3338_v63, %v3337_v50  ;;  %v3348_v29 = vadd.f32 %v3347_v39, %v3346_v25  ;;  %v4111_v48 = vsel %vm66_vm0, %v11291_v41, -inf  ;;  %v11540_v39 = vpop.f32.mrf.mxu1 }
 0x3fd   :  { %v3351_v36 = vsel %vm66_vm0, %v3295_v18, 0.0  ;;  %v4113_v57 = vsel %vm66_vm0, %v11255_v59, -inf  ;;  %v13437_v61 = vmax.f32 %v13435_v23, %v13436_v8  ;;  %v5496_v30 = vsel %vm66_vm0, %v11293_v51, -inf  ;;  %7905 = vmatmul.mubr.msk.f32.gmra.mxu1 %vm66_vm0, %v3364_v45 }
 0x3fe   :  { %v3341_v27 = vadd.f32 %v3340_v24, %v3339_v3  ;;  %v3350_v7 = vadd.f32 %v3349_v11, %v3348_v29  ;;  %v13440_v33 = vmax.f32 %v13438_v15, %v13439_v42  ;;  %v4115_v32 = vsel %vm66_vm0, %v11350_v1, -inf }
 0x3ff   :  { %v4112_v21 = vmax.f32 %v13437_v61, %v4111_v48  ;;  %v3353_v63 = vsel %vm66_vm0, %v3296_v43, 0.0  ;;  %v5498_v26 = vsel %vm66_vm0, %v11257_v28, -inf  ;;  %v5500_v24 = vsel %vm66_vm0, %v11352_v20, -inf }
 0x400   :  { %v5497_v9 = vmax.f32 %v13440_v33, %v5496_v30  ;;  %v3343_v22 = vadd.f32 %v3342_v55, %v3341_v27  ;;  %v3352_v18 = vadd.f32 %v3351_v36, %v3350_v7  ;;  %v3355_v19 = vsel %vm66_vm0, %v3297_v5, 0.0  ;;  %v11542_v5 = vpop.f32.mrf.mxu0  ;;  %v11563_v7 = vpop.f32.mrf.mxu1 }
 0x401   :  { %v4114_v46 = vmax.f32 %v4112_v21, %v4113_v57  ;;  %v3357_v50 = vsel %vm66_vm0, %v3298_v16, 0.0  ;;  %v4117_v62 = vsel %vm66_vm0, %v11320_v38, -inf  ;;  %v5502_v0 = vsel %vm66_vm0, %v11322_v13, -inf }
 0x402   :  { %v5499_v37 = vmax.f32 %v5497_v9, %v5498_v26  ;;  %v3365_v25 = vmul.f32 %v11295_v31, %v3343_v22  ;;  %v3354_v17 = vadd.f32 %v3353_v63, %v3352_v18  ;;  %v4119_v55 = vsel %vm66_vm0, %v11391_v6, -inf  ;;  %v11565_v15 = vpop.f32.mrf.mxu0  ;;  %v13441_v22 = vld [vmem:[#allocation32_spill] sm:$0xff] }
 0x403   :  { %v4116_v43 = vmax.f32 %v4114_v46, %v4115_v32  ;;  %v4121_v16 = vsel %vm66_vm0, %v11361_v2, -inf  ;;  %v5504_v4 = vsel %vm66_vm0, %v11393_v52, -inf  ;;  %v4123_v45 = vsel %vm66_vm0, %v11439_v49, -inf }
 0x404   :  { %v5501_v35 = vmax.f32 %v5499_v37, %v5500_v24  ;;  %7907 = vmatprep.mubr.msk.f32.mxu1 %vm66_vm0, %v3365_v25  ;;  %v3356_v31 = vadd.f32 %v3355_v19, %v3354_v17  ;;  %v5506_v3 = vsel %vm66_vm0, %v11363_v12, -inf  ;;  %v5508_v48 = vsel %vm66_vm0, %v11441_v60, -inf  ;;  %v13442_v19 = vld [vmem:[#allocation21_spill] sm:$0xff]  ;;  %v11589_v17 = vpop.f32.mrf.mxu1 }
 0x405   :  { %v4118_v11 = vmax.f32 %v4116_v43, %v4117_v62  ;;  %v4124_v57 = vsel %vm66_vm0, %v11415_v40, -inf  ;;  %v5509_v23 = vsel %vm66_vm0, %v11417_v34, -inf  ;;  %v4126_v8 = vsel %vm66_vm0, %v11495_v14, -inf }
 0x406   :  { %v5503_v29 = vmax.f32 %v5501_v35, %v5502_v0  ;;  %v3358_v61 = vadd.f32 %v3357_v50, %v3356_v31  ;;  %v4125_v30 = vmax.f32 %v4123_v45, %v4124_v57  ;;  %v4128_v27 = vsel %vm66_vm0, %v11469_v54, -inf  ;;  %v11591_v35 = vpop.f32.mrf.mxu0  ;;  %v13443_v31 = vld [vmem:[#allocation15_spill] sm:$0xff] }
 0x407   :  { %v4120_v36 = vmax.f32 %v4118_v11, %v4119_v55  ;;  %v5510_v33 = vmax.f32 %v5508_v48, %v5509_v23  ;;  %v5513_v9 = vsel %vm66_vm0, %v11471_v58, -inf  ;;  %v5511_v32 = vsel %vm66_vm0, %v11497_v53, -inf  ;;  %v13444_v48 = vld [vmem:[#allocation22_spill] sm:$0xff] }
 0x408   :  { %v5505_v21 = vmax.f32 %v5503_v29, %v5504_v4  ;;  %v3366_v63 = vmul.f32 %v11473_v47, %v3358_v61  ;;  %v4127_v46 = vmax.f32 %v4125_v30, %v4126_v8  ;;  %v11576_v24 = vsel %vm66_vm0, %v11522_v56, -inf  ;;  %v11605_v23 = vpop.f32.mrf.mxu0 }
 0x409   :  { %v4122_v42 = vmax.f32 %v4120_v36, %v4121_v16  ;;  %v5512_v43 = vmax.f32 %v5510_v33, %v5511_v32  ;;  %v11587_v25 = vsel %vm66_vm0, %v11524_v10, -inf }
 0x40a   :  { %v11572_v26 = vmax.f32 %v5505_v21, %v5506_v3  ;;  %7908 = vmatmul.mubr.msk.f32.gmra.mxu1 %vm66_vm0, %v3366_v63  ;;  %v4129_v29 = vmax.f32 %v4127_v46, %v4128_v27 }
 0x40b   :  { %v4168_v18 = vsub.f32 %v13441_v22, %v4122_v42  ;;  %v4169_v37 = vsub.f32 %v13442_v19, %v4122_v42  ;;  %v4170_v50 = vsub.f32 %v11291_v41, %v4122_v42  ;;  %v4171_v62 = vsub.f32 %v11255_v59, %v4122_v42  ;;  %v11621_v22 = vpop.f32.mrf.mxu0 }
 0x40c   :  { %v4172_v0 = vsub.f32 %v11350_v1, %v4122_v42  ;;  %v4173_v47 = vsub.f32 %v11320_v38, %v4122_v42  ;;  %v4174_v55 = vsub.f32 %v11391_v6, %v4122_v42  ;;  %v4175_v11 = vsub.f32 %v11361_v2, %v4122_v42  ;;  %v11603_v2 = vpop.f32.mrf.mxu1 }
 0x40d   :  { %v4200_v41 = vmul.f32 1.442695, %v4168_v18  ;;  %v4202_v16 = vmul.f32 1.442695, %v4169_v37  ;;  %v4204_v59 = vmul.f32 1.442695, %v4170_v50  ;;  %v5553_v3 = vsub.f32 %v13443_v31, %v11572_v26 }
 0x40e   :  { %v4206_v4 = vmul.f32 1.442695, %v4171_v62  ;;  %v4130_v38 = vsel %vm66_vm0, %v11540_v39, -inf  ;;  %v5515_v1 = vsel %vm66_vm0, %v11542_v5, -inf  ;;  %v4208_v45 = vmul.f32 1.442695, %v4172_v0  ;;  %v11619_v46 = vpop.f32.mrf.mxu1 }
 0x40f   :  { %8120 = vpow2.f32 %v4200_v41  ;;  %v4210_v6 = vmul.f32 1.442695, %v4173_v47  ;;  %v5554_v36 = vsub.f32 %v13444_v48, %v11572_v26  ;;  %v5514_v57 = vmax.f32 %v5512_v43, %v5513_v9 }
 0x410   :  { %8122 = vpow2.f32 %v4202_v16  ;;  %v4212_v8 = vmul.f32 1.442695, %v4174_v55  ;;  %v5555_v61 = vsub.f32 %v11293_v51, %v11572_v26  ;;  %v5556_v21 = vsub.f32 %v11257_v28, %v11572_v26  ;;  %v11633_v43 = vpop.f32.mrf.mxu1  ;;  %v11635_v55 = vpop.f32.mrf.mxu0 }
 0x411   :  { %8124 = vpow2.f32 %v4204_v59  ;;  %v4214_v30 = vmul.f32 1.442695, %v4175_v11  ;;  %v5557_v27 = vsub.f32 %v11352_v20, %v11572_v26  ;;  %v5558_v42 = vsub.f32 %v11322_v13, %v11572_v26 }
 0x412   :  { %8126 = vpow2.f32 %v4206_v4  ;;  %v5559_v33 = vsub.f32 %v11393_v52, %v11572_v26  ;;  %v5560_v9 = vsub.f32 %v11363_v12, %v11572_v26  ;;  %v5585_v32 = vmul.f32 1.442695, %v5553_v3  ;;  %v11671_v48 = vpop.f32.mrf.mxu0 }
 0x413   :  { %8128 = vpow2.f32 %v4208_v45  ;;  %v5587_v51 = vmul.f32 1.442695, %v5554_v36  ;;  %v4131_v63 = vmax.f32 %v4129_v29, %v4130_v38  ;;  %v5516_v28 = vmax.f32 %v5514_v57, %v5515_v1 }
 0x414   :  { %8130 = vpow2.f32 %v4210_v6  ;;  %v5589_v20 = vmul.f32 1.442695, %v5555_v61  ;;  %v5591_v18 = vmul.f32 1.442695, %v5556_v21  ;;  %v4134_v13 = vsel %vm66_vm0, %v11589_v17, -inf  ;;  %v11669_v6 = vpop.f32.mrf.mxu1 }
 0x415   :  { %8132 = vpow2.f32 %v4212_v8  ;;  %v5593_v52 = vmul.f32 1.442695, %v5557_v27  ;;  %v4133_v19 = vmax.f32 %v4131_v63, %v11576_v24  ;;  %v5518_v12 = vmax.f32 %v5516_v28, %v11587_v25 }
 0x416   :  { %8134 = vpow2.f32 %v4214_v30  ;;  %v5595_v26 = vmul.f32 1.442695, %v5558_v42  ;;  %v5597_v37 = vmul.f32 1.442695, %v5559_v33  ;;  %v5519_v50 = vsel %vm66_vm0, %v11591_v35, -inf  ;;  %v11705_v28 = vpop.f32.mrf.mxu1 }
 0x417   :  { %8136 = vpow2.f32 %v5585_v32  ;;  %v5599_v62 = vmul.f32 1.442695, %v5560_v9  ;;  %v4135_v0 = vmax.f32 %v4133_v19, %v4134_v13  ;;  %v11631_v47 = vsel %vm66_vm0, %v11619_v46, -inf }
 0x418   :  { %8138 = vpow2.f32 %v5587_v51  ;;  %v4136_v24 = vsel %vm66_vm0, %v11563_v7, -inf  ;;  %v5521_v25 = vsel %vm66_vm0, %v11565_v15, -inf  ;;  %v11643_v41 = vsel %vm66_vm0, %v11603_v2, -inf }
 0x419   :  { %8140 = vpow2.f32 %v5589_v20  ;;  %v11645_v16 = vmax.f32 %v4135_v0, %v4136_v24  ;;  %v5520_v59 = vmax.f32 %v5518_v12, %v5519_v50  ;;  %v11649_v11 = vsel %vm66_vm0, %v11605_v23, -inf  ;;  %v11707_v20 = vpop.f32.mrf.mxu0 }
 0x41a   :  { %8142 = vpow2.f32 %v5591_v18  ;;  %v4140_v4 = vmax.f32 %v11631_v47, %v11643_v41  ;;  %v11655_v38 = vsel %vm66_vm0, %v11621_v22, -inf  ;;  %v11659_v1 = vsel %vm66_vm0, %v11633_v43, -inf }
 0x41b   :  { %8144 = vpow2.f32 %v5593_v52  ;;  %v4176_v31 = vsub.f32 %v11439_v49, %v11645_v16  ;;  %v4177_v3 = vsub.f32 %v11415_v40, %v11645_v16  ;;  %v4178_v29 = vsub.f32 %v11495_v14, %v11645_v16 }
 0x41c   :  { %v11661_v45 = vpop.eup %8120  ;;  %8146 = vpow2.f32 %v5595_v26  ;;  %v4179_v8 = vsub.f32 %v11469_v54, %v11645_v16  ;;  %v11681_v49 = vsel %vm66_vm0, %v11635_v55, -inf  ;;  %v4180_v61 = vsub.f32 %v11540_v39, %v11645_v16 }
 0x41d   :  { %v11673_v36 = vpop.eup %8122  ;;  %v4264_v57 = vsel %vm66_vm0, %v11661_v45, 0.0  ;;  %8148 = vpow2.f32 %v5597_v37  ;;  %v11689_v21 = vmax.f32 %v5520_v59, %v5521_v25  ;;  %v4216_v42 = vmul.f32 1.442695, %v4176_v31  ;;  %v11731_v59 = vpop.f32.mrf.mxu1 }
 0x41e   :  { %v11683_v40 = vpop.eup %8124  ;;  %v4265_v14 = vsel %vm66_vm0, %v11673_v36, 0.0  ;;  %8150 = vpow2.f32 %v5599_v62  ;;  %v11697_v33 = vsel %vm66_vm0, %v11669_v6, -inf  ;;  %v4181_v39 = vsub.f32 %v11522_v56, %v11645_v16  ;;  %v11733_v31 = vpop.f32.mrf.mxu0 }
 0x41f   :  { %v11693_v27 = vpop.eup %8126  ;;  %v4266_v54 = vadd.f32 %v4265_v14, %v4264_v57  ;;  %v4267_v32 = vsel %vm66_vm0, %v11683_v40, 0.0  ;;  %v4218_v51 = vmul.f32 1.442695, %v4177_v3  ;;  %v4220_v63 = vmul.f32 1.442695, %v4178_v29 }
 0x420   :  { %v11699_v9 = vpop.eup %8128  ;;  %v4182_v52 = vsub.f32 %v11589_v17, %v11645_v16  ;;  %8152 = vpow2.f32 %v4216_v42  ;;  %v4222_v19 = vmul.f32 1.442695, %v4179_v8  ;;  %v4269_v26 = vsel %vm66_vm0, %v11693_v27, 0.0 }
 0x421   :  { %v11709_v18 = vpop.eup %8130  ;;  %v4268_v13 = vadd.f32 %v4267_v32, %v4266_v54  ;;  %v4183_v56 = vsub.f32 %v11563_v7, %v11645_v16  ;;  %8154 = vpow2.f32 %v4218_v51  ;;  %v4224_v37 = vmul.f32 1.442695, %v4180_v61 }
 0x422   :  { %v11713_v12 = vpop.eup %8132  ;;  %8156 = vpow2.f32 %v4220_v63  ;;  %v5561_v0 = vsub.f32 %v11441_v60, %v11689_v21  ;;  %v5526_v17 = vsel %vm66_vm0, %v11671_v48, -inf  ;;  %v4271_v25 = vsel %vm66_vm0, %v11699_v9, 0.0 }
 0x423   :  { %v11719_v50 = vpop.eup %8134  ;;  %v4270_v62 = vadd.f32 %v4269_v26, %v4268_v13  ;;  %v4273_v7 = vsel %vm66_vm0, %v11709_v18, 0.0  ;;  %8158 = vpow2.f32 %v4222_v19  ;;  %v4226_v16 = vmul.f32 1.442695, %v4181_v39 }
 0x424   :  { %v11725_v24 = vpop.eup %8136  ;;  %8160 = vpow2.f32 %v4224_v37  ;;  %v4228_v57 = vmul.f32 1.442695, %v4182_v52  ;;  %v4275_v14 = vsel %vm66_vm0, %v11713_v12, 0.0  ;;  %v4230_v54 = vmul.f32 1.442695, %v4183_v56  ;;  %v11761_v56 = vpop.f32.mrf.mxu1 }
 0x425   :  { %13445 = vst [vmem:[#allocation9_spill] sm:$0xff] %v11725_v24  ;;  %v11735_v3 = vpop.eup %8138  ;;  %v4272_v60 = vadd.f32 %v4271_v25, %v4270_v62  ;;  %v5649_v29 = vsel %vm66_vm0, %v11725_v24, 0.0  ;;  %v5562_v42 = vsub.f32 %v11417_v34, %v11689_v21  ;;  %v4277_v51 = vsel %vm66_vm0, %v11719_v50, 0.0  ;;  %v11763_v37 = vpop.f32.mrf.mxu0 }
 0x426   :  { %13446 = vst [vmem:[#allocation23_spill] sm:$0xff] %v11735_v3  ;;  %v11739_v8 = vpop.eup %8140  ;;  %v5650_v61 = vsel %vm66_vm0, %v11735_v3, 0.0  ;;  %v5563_v13 = vsub.f32 %v11497_v53, %v11689_v21  ;;  %8162 = vpow2.f32 %v4226_v16  ;;  %v5564_v26 = vsub.f32 %v11471_v58, %v11689_v21 }
 0x427   :  { %13447 = vst [vmem:[#allocation18_spill] sm:$0xff] %v11739_v8  ;;  %v11747_v32 = vpop.eup %8142  ;;  %v4274_v39 = vadd.f32 %v4273_v7, %v4272_v60  ;;  %v5651_v63 = vadd.f32 %v5650_v61, %v5649_v29  ;;  %v5652_v19 = vsel %vm66_vm0, %v11739_v8, 0.0  ;;  %v5565_v34 = vsub.f32 %v11542_v5, %v11689_v21 }
 0x428   :  { %13448 = vst [vmem:[#allocation6_spill] sm:$0xff] %v11747_v32  ;;  %v11753_v52 = vpop.eup %8144  ;;  %v5654_v7 = vsel %vm66_vm0, %v11747_v32, 0.0  ;;  %8164 = vpow2.f32 %v4228_v57  ;;  %v5566_v58 = vsub.f32 %v11524_v10, %v11689_v21  ;;  %v5601_v16 = vmul.f32 1.442695, %v5561_v0 }
 0x429   :  { %13449 = vst [vmem:[#allocation24_spill] sm:$0xff] %v11753_v52  ;;  %v11765_v62 = vpop.eup %8146  ;;  %v4276_v25 = vadd.f32 %v4275_v14, %v4274_v39  ;;  %v5653_v53 = vadd.f32 %v5652_v19, %v5651_v63  ;;  %8166 = vpow2.f32 %v4230_v54  ;;  %v5603_v5 = vmul.f32 1.442695, %v5562_v42  ;;  %v11785_v54 = vpop.f32.mrf.mxu1 }
 0x42a   :  { %13450 = vst [vmem:[#allocation25_spill] sm:$0xff] %v11765_v62  ;;  %v11769_v60 = vpop.eup %8148  ;;  %v5567_v61 = vsub.f32 %v11591_v35, %v11689_v21  ;;  %v5605_v30 = vmul.f32 1.442695, %v5563_v13  ;;  %v4142_v14 = vmax.f32 %v4140_v4, %v11697_v33  ;;  %v5656_v57 = vsel %vm66_vm0, %v11753_v52, 0.0  ;;  %v11787_v42 = vpop.f32.mrf.mxu0 }
 0x42b   :  { %13451 = vst [vmem:[#allocation33_spill] sm:$0xff] %v11769_v60  ;;  %v5655_v29 = vadd.f32 %v5654_v7, %v5653_v53  ;;  %v11779_v39 = vpop.eup %8150  ;;  %v5568_v10 = vsub.f32 %v11565_v15, %v11689_v21  ;;  %8168 = vpow2.f32 %v5601_v16  ;;  %v5607_v0 = vmul.f32 1.442695, %v5564_v26 }
 0x42c   :  { %13452 = vst [vmem:[#allocation26_spill] sm:$0xff] %v11779_v39  ;;  %v4278_v35 = vadd.f32 %v4277_v51, %v4276_v25  ;;  %v5658_v47 = vsel %vm66_vm0, %v11765_v62, 0.0  ;;  %v5660_v41 = vsel %vm66_vm0, %v11769_v60, 0.0  ;;  %8170 = vpow2.f32 %v5603_v5 }
 0x42d   :  { %v5657_v63 = vadd.f32 %v5656_v57, %v5655_v29  ;;  %v11793_v4 = vpop.eup %8152  ;;  %v5609_v33 = vmul.f32 1.442695, %v5565_v34  ;;  %v5611_v13 = vmul.f32 1.442695, %v5566_v58  ;;  %v13453_v15 = vmax.f32 %v11655_v38, %v11649_v11  ;;  %v11810_v38 = vpop.f32.mrf.mxu1 }
 0x42e   :  { %v11798_v19 = vpop.eup %8154  ;;  %v4279_v51 = vsel %vm66_vm0, %v11793_v4, 0.0  ;;  %8172 = vpow2.f32 %v5605_v30  ;;  %v4144_v25 = vmax.f32 %v4142_v14, %v11659_v1  ;;  %v4145_v34 = vsel %vm66_vm0, %v11731_v59, -inf }
 0x42f   :  { %v5527_v21 = vmax.f32 %v13453_v15, %v5526_v17  ;;  %v5659_v26 = vadd.f32 %v5658_v47, %v5657_v63  ;;  %v11803_v53 = vpop.eup %8156  ;;  %v4280_v7 = vsel %vm66_vm0, %v11798_v19, 0.0  ;;  %8174 = vpow2.f32 %v5607_v0  ;;  %v11812_v17 = vpop.f32.mrf.mxu0 }
 0x430   :  { %v11814_v58 = vpop.eup %8158  ;;  %v4281_v5 = vadd.f32 %v4280_v7, %v4279_v51  ;;  %v5613_v29 = vmul.f32 1.442695, %v5567_v61  ;;  %v4282_v57 = vsel %vm66_vm0, %v11803_v53, 0.0  ;;  %8176 = vpow2.f32 %v5609_v33 }
 0x431   :  { %v5529_v11 = vmax.f32 %v5527_v21, %v11681_v49  ;;  %v5661_v16 = vadd.f32 %v5660_v41, %v5659_v26  ;;  %v11818_v14 = vpop.eup %8160  ;;  %v4146_v0 = vmax.f32 %v4144_v25, %v4145_v34  ;;  %v5530_v49 = vsel %vm66_vm0, %v11733_v31, -inf  ;;  %v11830_v26 = vpop.f32.mrf.mxu1 }
 0x432   :  { %13455 = vst [vmem:[#allocation27_spill] sm:$0xff] %v11818_v14  ;;  %8178 = vrcp.f32 %v4278_v35  ;;  %v4283_v63 = vadd.f32 %v4282_v57, %v4281_v5  ;;  %v5615_v47 = vmul.f32 1.442695, %v5568_v10  ;;  %v4147_v15 = vsel %vm66_vm0, %v11705_v28, -inf  ;;  %v11832_v33 = vpop.f32.mrf.mxu0 }
 0x433   :  { %v5662_v41 = vsel %vm66_vm0, %v11779_v39, 0.0  ;;  %v4284_v61 = vsel %vm66_vm0, %v11814_v58, 0.0  ;;  %8180 = vpow2.f32 %v5611_v13  ;;  %v5531_v21 = vmax.f32 %v5529_v11, %v5530_v49  ;;  %v11834_v51 = vpop.eup %8162 }
 0x434   :  { %13456 = vst [vmem:[#allocation10_spill] sm:$0xff] %v11834_v51  ;;  %v5663_v35 = vadd.f32 %v5662_v41, %v5661_v16  ;;  %v4285_v25 = vadd.f32 %v4284_v61, %v4283_v63  ;;  %v4286_v10 = vsel %vm66_vm0, %v11818_v14, 0.0  ;;  %v5532_v7 = vsel %vm66_vm0, %v11707_v20, -inf }
 0x435   :  { %v11840_v34 = vpop.eup %8164  ;;  %8182 = vpow2.f32 %v5613_v29  ;;  %v4148_v5 = vmax.f32 %v4146_v0, %v4147_v15  ;;  %v4149_v13 = vsel %vm66_vm0, %v11785_v54, -inf  ;;  %v5533_v11 = vmax.f32 %v5531_v21, %v5532_v7  ;;  %v11858_v21 = vpop.f32.mrf.mxu1 }
 0x436   :  { %13457 = vst [vmem:[#allocation38_spill] sm:$0xff] %v11840_v34  ;;  %v11844_v57 = vpop.eup %8166  ;;  %v4287_v63 = vadd.f32 %v4286_v10, %v4285_v25  ;;  %8184 = vpow2.f32 %v5615_v47  ;;  %v5534_v41 = vsel %vm66_vm0, %v11787_v42, -inf  ;;  %v4288_v61 = vsel %vm66_vm0, %v11834_v51, 0.0  ;;  %v11860_v7 = vpop.f32.mrf.mxu0 }
 0x437   :  { %13458 = vst [vmem:[#allocation29_spill] sm:$0xff] %v11844_v57  ;;  %v4151_v29 = vsel %vm66_vm0, %v11761_v56, -inf  ;;  %v4150_v0 = vmax.f32 %v4148_v5, %v4149_v13  ;;  %v11856_v15 = vsel %vm66_vm0, %v11830_v26, -inf  ;;  %8186 = vrcp.f32 %v5663_v35 }
 0x438   :  { %v11862_v25 = vpop.eup %8168  ;;  %v4290_v47 = vsel %vm66_vm0, %v11840_v34, 0.0  ;;  %v11868_v10 = vsel %vm66_vm0, %v11810_v38, -inf  ;;  %v11872_v5 = vsel %vm66_vm0, %v11832_v33, -inf  ;;  %v4289_v13 = vadd.f32 %v4288_v61, %v4287_v63  ;;  %v11902_v62 = vpop.f32.mrf.mxu0 }
 0x439   :  { %13460 = vst [vmem:[#allocation31_spill] sm:$0xff] %v11862_v25  ;;  %v5664_v16 = vsel %vm66_vm0, %v11862_v25, 0.0  ;;  %v11876_v1 = vmax.f32 %v4150_v0, %v4151_v29  ;;  %v5535_v30 = vmax.f32 %v5533_v11, %v5534_v41  ;;  %v11878_v49 = vpop.eup %8170  ;;  %v4292_v35 = vsel %vm66_vm0, %v11844_v57, 0.0  ;;  %v11900_v25 = vpop.f32.mrf.mxu1 }
 0x43a   :  { %13461 = vst [vmem:[#allocation40_spill] sm:$0xff] %v11878_v49  ;;  %v5536_v39 = vsel %vm66_vm0, %v11763_v37, -inf  ;;  %v11886_v60 = vsel %vm66_vm0, %v11812_v17, -inf  ;;  %v5665_v11 = vsel %vm66_vm0, %v11878_v49, 0.0  ;;  %v11920_v3 = vsel %vm66_vm0, %v11860_v7, -inf }
 0x43b   :  { %v11890_v61 = vpop.eup %8172  ;;  %v4184_v41 = vsub.f32 %v11619_v46, %v11876_v1  ;;  %v4185_v29 = vsub.f32 %v11603_v2, %v11876_v1  ;;  %v5666_v63 = vadd.f32 %v5665_v11, %v5664_v16  ;;  %v4186_v32 = vsub.f32 %v11669_v6, %v11876_v1 }
 0x43c   :  { %13462 = vst [vmem:[#allocation41_spill] sm:$0xff] %v11890_v61  ;;  %v11904_v52 = vpop.eup %8174  ;;  %v4187_v49 = vsub.f32 %v11633_v43, %v11876_v1  ;;  %v11912_v46 = vsel %vm66_vm0, %v11858_v21, -inf  ;;  %v4291_v2 = vadd.f32 %v4290_v47, %v4289_v13  ;;  %v5667_v0 = vsel %vm66_vm0, %v11890_v61, 0.0 }
 0x43d   :  { %13463 = vst [vmem:[#allocation34_spill] sm:$0xff] %v11904_v52  ;;  %v11916_v8 = vmax.f32 %v5535_v30, %v5536_v39  ;;  %v11922_v16 = vpop.eup %8176  ;;  %v5668_v6 = vadd.f32 %v5667_v0, %v5666_v63  ;;  %v4188_v43 = vsub.f32 %v11731_v59, %v11876_v1  ;;  %v4156_v11 = vsel %vm66_vm0, %v11900_v25, -inf  ;;  %v11936_v63 = vpop.f32.mrf.mxu1 }
 0x43e   :  { %v5541_v47 = vsel %vm66_vm0, %v11902_v62, -inf  ;;  %v5669_v39 = vsel %vm66_vm0, %v11904_v52, 0.0  ;;  %v4189_v30 = vsub.f32 %v11705_v28, %v11876_v1  ;;  %v4232_v61 = vmul.f32 1.442695, %v4184_v41  ;;  %v11946_v41 = vpop.f32.mrf.mxu0 }
 0x43f   :  { %v11930_v13 = vpop.eup %8178  ;;  %v4234_v24 = vmul.f32 1.442695, %v4185_v29  ;;  %v5670_v59 = vadd.f32 %v5669_v39, %v5668_v6  ;;  %v4190_v57 = vsub.f32 %v11785_v54, %v11876_v1  ;;  %v4236_v34 = vmul.f32 1.442695, %v4186_v32 }
 0x440   :  { %13464 = vst [vmem:[#allocation36_spill] sm:$0xff] %v11930_v13  ;;  %v11938_v0 = vpop.eup %8180  ;;  %v4238_v51 = vmul.f32 1.442695, %v4187_v49  ;;  %v4293_v14 = vadd.f32 %v4292_v35, %v4291_v2  ;;  %v5671_v13 = vsel %vm66_vm0, %v11922_v16, 0.0  ;;  %8188 = vpow2.f32 %v4232_v61  ;;  %v11958_v61 = vpop.f32.mrf.mxu1 }
 0x441   :  { %v5569_v28 = vsub.f32 %v11621_v22, %v11916_v8  ;;  %v5672_v52 = vadd.f32 %v5671_v13, %v5670_v59  ;;  %v4191_v6 = vsub.f32 %v11761_v56, %v11876_v1  ;;  %8190 = vpow2.f32 %v4234_v24  ;;  %v11968_v39 = vpop.f32.mrf.mxu0 }
 0x442   :  { %v11948_v29 = vpop.eup %8182  ;;  %v4240_v54 = vmul.f32 1.442695, %v4188_v43  ;;  %v5673_v49 = vsel %vm66_vm0, %v11938_v0, 0.0  ;;  %8192 = vpow2.f32 %v4236_v34  ;;  %v4242_v35 = vmul.f32 1.442695, %v4189_v30  ;;  %v11976_v30 = vpop.f32.mrf.mxu1 }
 0x443   :  { %v11952_v32 = vpop.eup %8184  ;;  %v5570_v22 = vsub.f32 %v11605_v23, %v11916_v8  ;;  %v5674_v2 = vadd.f32 %v5673_v49, %v5672_v52  ;;  %8194 = vpow2.f32 %v4238_v51  ;;  %v4244_v13 = vmul.f32 1.442695, %v4190_v57 }
 0x444   :  { %v5571_v56 = vsub.f32 %v11671_v48, %v11916_v8  ;;  %v11962_v24 = vpop.eup %8186  ;;  %8196 = vrcp.f32 %v4293_v14  ;;  %v5675_v1 = vsel %vm66_vm0, %v11948_v29, 0.0  ;;  %v5572_v34 = vsub.f32 %v11635_v55, %v11916_v8 }
 0x445   :  { %v5617_v43 = vmul.f32 1.442695, %v5569_v28  ;;  %v5676_v23 = vadd.f32 %v5675_v1, %v5674_v2  ;;  %v5677_v52 = vsel %vm66_vm0, %v11952_v32, 0.0  ;;  %8198 = vpow2.f32 %v4240_v54 }
 0x446   :  { %v4246_v51 = vmul.f32 1.442695, %v4191_v6  ;;  %8200 = vpow2.f32 %v4242_v35  ;;  %v5573_v48 = vsub.f32 %v11733_v31, %v11916_v8  ;;  %v5574_v14 = vsub.f32 %v11707_v20, %v11916_v8  ;;  %v11988_v35 = vpop.f32.mrf.mxu0 }
 0x447   :  { %v5619_v57 = vmul.f32 1.442695, %v5570_v22  ;;  %8202 = vpow2.f32 %v4244_v13  ;;  %v5575_v55 = vsub.f32 %v11787_v42, %v11916_v8  ;;  %v5576_v59 = vsub.f32 %v11763_v37, %v11916_v8 }
 0x448   :  { %v5621_v28 = vmul.f32 1.442695, %v5571_v56  ;;  %8204 = vpow2.f32 %v5617_v43  ;;  %v5623_v6 = vmul.f32 1.442695, %v5572_v34  ;;  %v13465_v54 = vmax.f32 %v11856_v15, %v11868_v10  ;;  %v11996_v10 = vpop.f32.mrf.mxu1 }
 0x449   :  { %v13466_v20 = vmax.f32 %v11872_v5, %v11886_v60  ;;  %v5678_v22 = vadd.f32 %v5677_v52, %v5676_v23  ;;  %8206 = vpow2.f32 %v4246_v51  ;;  %v4160_v42 = vsel %vm66_vm0, %v11958_v61, -inf  ;;  %v13467_v60 = vld [vmem:[#allocation128_spill] sm:$0xff] }
 0x44a   :  { %v4157_v31 = vmax.f32 %v13465_v54, %v4156_v11  ;;  %v5545_v8 = vsel %vm66_vm0, %v11968_v39, -inf  ;;  %8208 = vpow2.f32 %v5619_v57  ;;  %v5625_v37 = vmul.f32 1.442695, %v5573_v48  ;;  %v13470_v54 = vld [vmem:[#allocation69_spill] sm:$0xff] }
 0x44b   :  { %v5542_v49 = vmax.f32 %v13466_v20, %v5541_v47  ;;  %v13468_v5 = vcombine.high %v13467_v60, %v13467_v60  ;;  %8210 = vpow2.f32 %v5621_v28  ;;  %v5627_v47 = vmul.f32 1.442695, %v5574_v14 }
 0x44c   :  { %v4159_v2 = vmax.f32 %v4157_v31, %v11912_v46  ;;  %v4162_v13 = vsel %vm66_vm0, %v11936_v63, -inf  ;;  %8212 = vpow2.f32 %v5623_v6  ;;  %v5629_v56 = vmul.f32 1.442695, %v5575_v55  ;;  %v12006_v46 = vpop.f32.mrf.mxu0 }
 0x44d   :  { %v5544_v15 = vmax.f32 %v5542_v49, %v11920_v3  ;;  %v12002_v11 = vrot.slane %v13468_v5, %v8764_v44  ;;  %v12008_v3 = vpop.eup %8188  ;;  %8214 = vrcp.f32 %v5678_v22  ;;  %v5631_v43 = vmul.f32 1.442695, %v5576_v59 }
 0x44e   :  { %v4161_v1 = vmax.f32 %v4159_v2, %v4160_v42  ;;  %v5547_v23 = vsel %vm66_vm0, %v11946_v41, -inf  ;;  %v4164_v52 = vsel %vm66_vm0, %v11996_v10, -inf  ;;  %v12014_v51 = vpop.eup %8190  ;;  %v4294_v48 = vsel %vm66_vm0, %v12008_v3, 0.0 }
 0x44f   :  { %13469 = vst [vmem:[#allocation45_spill] sm:$0xff] %v12002_v11  ;;  %v5546_v34 = vmax.f32 %v5544_v15, %v5545_v8  ;;  %8216 = vpow2.f32 %v5625_v37  ;;  %v4166_v14 = vsel %vm66_vm0, %v11976_v30, -inf  ;;  %v12020_v55 = vpop.eup %8192  ;;  %v4295_v59 = vsel %vm66_vm0, %v12014_v51, 0.0  ;;  %v13472_v15 = vld [vmem:[#allocation71_spill] sm:$0xff] }
 0x450   :  { %v4163_v57 = vmax.f32 %v4161_v1, %v4162_v13  ;;  %v5551_v28 = vsel %vm66_vm0, %v11988_v35, -inf  ;;  %v5549_v6 = vsel %vm66_vm0, %v12006_v46, -inf  ;;  %v13471_v31 = vrot.slane %v13470_v54, %v8764_v44  ;;  %v12032_v49 = vpop.eup %8194  ;;  %v13474_v1 = vld [vmem:[#allocation81_spill] sm:$0xff] }
 0x451   :  { %v4296_v22 = vadd.f32 %v4295_v59, %v4294_v48  ;;  %8218 = vpow2.f32 %v5627_v47  ;;  %v5548_v8 = vmax.f32 %v5546_v34, %v5547_v23  ;;  %v12034_v37 = vpop.eup %8196  ;;  %v4297_v2 = vsel %vm66_vm0, %v12020_v55, 0.0 }
 0x452   :  { %v4684_v20 = vmul.f32 %v11661_v45, %v13471_v31  ;;  %v4165_v42 = vmax.f32 %v4163_v57, %v4164_v52  ;;  %v13473_v5 = vrot.slane %v13472_v15, %v8764_v44  ;;  %v12044_v54 = vmul.f32 %v11683_v40, %v13474_v1  ;;  %v13475_v45 = vld [vmem:[#allocation83_spill] sm:$0xff]  ;;  %v12050_v47 = vpop.eup %8198  ;;  %v13476_v52 = vld [vmem:[#allocation70_spill] sm:$0xff]  ;;  %v13478_v31 = vld [vmem:[#allocation73_spill] sm:$0xff] }
 0x453   :  { %v12048_v48 = vmul.f32 %v11693_v27, %v13475_v45  ;;  %v4298_v34 = vadd.f32 %v4297_v2, %v4296_v22  ;;  %8220 = vpow2.f32 %v5629_v56  ;;  %v13477_v57 = vrot.slane %v13476_v52, %v8764_v44  ;;  %v13480_v56 = vld [vmem:[#allocation82_spill] sm:$0xff] }
 0x454   :  { %v4685_v13 = vmul.f32 %v11673_v36, %v13473_v5  ;;  %v4167_v23 = vmax.f32 %v4165_v42, %v4166_v14  ;;  %v12058_v36 = vpop.eup %8200  ;;  %v4299_v40 = vsel %vm66_vm0, %v12032_v49, 0.0  ;;  %8222 = vpow2.f32 %v5631_v43 }
 0x455   :  { %v12056_v59 = vmul.f32 %v11699_v9, %v13477_v57  ;;  %v13479_v27 = vrot.slane %v13478_v31, %v8764_v44  ;;  %v12070_v14 = vmul.f32 %v11713_v12, %v13480_v56  ;;  %v12072_v22 = vpop.eup %8202  ;;  %v4300_v9 = vadd.f32 %v4299_v40, %v4298_v34 }
 0x456   :  { %v4192_v42 = vsub.f32 %v11830_v26, %v4167_v23  ;;  %v4193_v2 = vsub.f32 %v11810_v38, %v4167_v23  ;;  %v5550_v5 = vmax.f32 %v5548_v8, %v5549_v6  ;;  %v12076_v1 = vpop.eup %8204  ;;  %v4301_v43 = vsel %vm66_vm0, %v12050_v47, 0.0 }
 0x457   :  { %v12066_v15 = vmul.f32 %v11709_v18, %v13479_v27  ;;  %v4194_v18 = vsub.f32 %v11900_v25, %v4167_v23  ;;  %v4195_v45 = vsub.f32 %v11858_v21, %v4167_v23  ;;  %v4716_v12 = vsel %vm66_vm0, %v4684_v20, 0.0  ;;  %v12083_v52 = vpop.eup %8206 }
 0x458   :  { %v4302_v57 = vadd.f32 %v4301_v43, %v4300_v9  ;;  %v4303_v26 = vsel %vm66_vm0, %v12058_v36, 0.0  ;;  %v5679_v38 = vsel %vm66_vm0, %v12076_v1, 0.0  ;;  %v4196_v6 = vsub.f32 %v11958_v61, %v4167_v23  ;;  %v12090_v8 = vpop.eup %8208 }
 0x459   :  { %v4197_v34 = vsub.f32 %v11936_v63, %v4167_v23  ;;  %v4248_v25 = vmul.f32 1.442695, %v4192_v42  ;;  %v4250_v40 = vmul.f32 1.442695, %v4193_v2  ;;  %v4252_v21 = vmul.f32 1.442695, %v4194_v18  ;;  %v12093_v31 = vpop.eup %8210 }
 0x45a   :  { %v5680_v20 = vsel %vm66_vm0, %v12090_v8, 0.0  ;;  %v4198_v27 = vsub.f32 %v11996_v10, %v4167_v23  ;;  %v4254_v56 = vmul.f32 1.442695, %v4195_v45  ;;  %v12098_v9 = vmax.f32 %v5550_v5, %v5551_v28  ;;  %v12100_v43 = vpop.eup %8212 }
 0x45b   :  { %v4304_v61 = vadd.f32 %v4303_v26, %v4302_v57  ;;  %v5681_v11 = vadd.f32 %v5680_v20, %v5679_v38  ;;  %v4199_v60 = vsub.f32 %v11976_v30, %v4167_v23  ;;  %8224 = vpow2.f32 %v4248_v25  ;;  %v12103_v63 = vpop.eup %8214 }
 0x45c   :  { %v5682_v42 = vsel %vm66_vm0, %v12093_v31, 0.0  ;;  %8226 = vpow2.f32 %v4250_v40  ;;  %v4256_v2 = vmul.f32 1.442695, %v4196_v6  ;;  %v4717_v18 = vsel %vm66_vm0, %v4685_v13, 0.0  ;;  %v12108_v10 = vpop.eup %8216 }
 0x45d   :  { %v4305_v28 = vsel %vm66_vm0, %v12072_v22, 0.0  ;;  %v5683_v5 = vadd.f32 %v5682_v42, %v5681_v11  ;;  %8228 = vpow2.f32 %v4252_v21  ;;  %v4258_v45 = vmul.f32 1.442695, %v4197_v34 }
 0x45e   :  { %v5684_v30 = vsel %vm66_vm0, %v12100_v43, 0.0  ;;  %8230 = vpow2.f32 %v4254_v56  ;;  %v4260_v23 = vmul.f32 1.442695, %v4198_v27  ;;  %v5577_v57 = vsub.f32 %v11832_v33, %v12098_v9  ;;  %v12116_v26 = vpop.eup %8218 }
 0x45f   :  { %v4306_v38 = vadd.f32 %v4305_v28, %v4304_v61  ;;  %v5685_v13 = vadd.f32 %v5684_v30, %v5683_v5  ;;  %v4262_v6 = vmul.f32 1.442695, %v4199_v60  ;;  %v5578_v25 = vsub.f32 %v11812_v17, %v12098_v9  ;;  %v13481_v30 = vld [vmem:[#allocation84_spill] sm:$0xff] }
 0x460   :  { %v5686_v11 = vsel %vm66_vm0, %v12108_v10, 0.0  ;;  %8232 = vpow2.f32 %v4256_v2  ;;  %v5579_v34 = vsub.f32 %v11902_v62, %v12098_v9  ;;  %v5580_v40 = vsub.f32 %v11860_v7, %v12098_v9  ;;  %v12126_v21 = vpop.eup %8220 }
 0x461   :  { %v5687_v33 = vadd.f32 %v5686_v11, %v5685_v13  ;;  %8234 = vpow2.f32 %v4258_v45  ;;  %v5581_v60 = vsub.f32 %v11968_v39, %v12098_v9  ;;  %v4718_v20 = vadd.f32 %v4717_v18, %v4716_v12  ;;  %v12130_v27 = vpop.eup %8222 }
 0x462   :  { %v4307_v17 = vsel %vm66_vm0, %v12083_v52, 0.0  ;;  %v5688_v56 = vsel %vm66_vm0, %v12116_v26, 0.0  ;;  %8236 = vpow2.f32 %v4260_v23  ;;  %v5633_v62 = vmul.f32 1.442695, %v5577_v57 }
 0x463   :  { %v5689_v61 = vadd.f32 %v5688_v56, %v5687_v33  ;;  %8238 = vpow2.f32 %v4262_v6  ;;  %v5635_v7 = vmul.f32 1.442695, %v5578_v25  ;;  %v5637_v42 = vmul.f32 1.442695, %v5579_v34  ;;  %v13482_v33 = vld [vmem:[#allocation16_spill] sm:$0xff] }
 0x464   :  { %v4308_v2 = vadd.f32 %v4307_v17, %v4306_v38  ;;  %v5582_v28 = vsub.f32 %v11946_v41, %v12098_v9  ;;  %8240 = vpow2.f32 %v5633_v62  ;;  %v5639_v39 = vmul.f32 1.442695, %v5580_v40  ;;  %v13484_v17 = vld [vmem:[#allocation89_spill] sm:$0xff] }
 0x465   :  { %v5583_v12 = vsub.f32 %v12006_v46, %v12098_v9  ;;  %8242 = vpow2.f32 %v5635_v7  ;;  %v5641_v18 = vmul.f32 1.442695, %v5581_v60  ;;  %v4719_v5 = vsel %vm66_vm0, %v12044_v54, 0.0 }
 0x466   :  { %v5690_v45 = vsel %vm66_vm0, %v12126_v21, 0.0  ;;  %8244 = vpow2.f32 %v5637_v42  ;;  %v4691_v23 = vmul.f32 %v11719_v50, %v13481_v30  ;;  %v4720_v57 = vadd.f32 %v4719_v5, %v4718_v20 }
 0x467   :  { %v5691_v38 = vadd.f32 %v5690_v45, %v5689_v61  ;;  %v5584_v41 = vsub.f32 %v11988_v35, %v12098_v9  ;;  %8246 = vpow2.f32 %v5639_v39  ;;  %v4721_v46 = vsel %vm66_vm0, %v12048_v48, 0.0  ;;  %v13487_v45 = vld [vmem:[#allocation92_spill] sm:$0xff] }
 0x468   :  { %v12150_v13 = vpop.eup %8224  ;;  %8248 = vrcp.f32 %v4308_v2  ;;  %v5692_v54 = vsel %vm66_vm0, %v12130_v27, 0.0  ;;  %v5643_v6 = vmul.f32 1.442695, %v5582_v28  ;;  %v4722_v25 = vadd.f32 %v4721_v46, %v4720_v57 }
 0x469   :  { %v12154_v11 = vpop.eup %8226  ;;  %v4309_v50 = vsel %vm66_vm0, %v12150_v13, 0.0  ;;  %8250 = vpow2.f32 %v5641_v18  ;;  %v5645_v34 = vmul.f32 1.442695, %v5583_v12  ;;  %v4723_v35 = vsel %vm66_vm0, %v12056_v59, 0.0  ;;  %v13486_v12 = vld [vmem:[#allocation91_spill] sm:$0xff] }
 0x46a   :  { %v12160_v9 = vpop.eup %8228  ;;  %v4310_v48 = vsel %vm66_vm0, %v12154_v11, 0.0  ;;  %v4724_v40 = vadd.f32 %v4723_v35, %v4722_v25  ;;  %v13483_v60 = vrot.slane %v13482_v33, %v8764_v44  ;;  %v13485_v56 = vrot.slane %v13484_v17, %v8764_v44  ;;  %v13488_v25 = vld [vmem:[#allocation88_spill] sm:$0xff] }
 0x46b   :  { %v12172_v61 = vpop.eup %8230  ;;  %v5693_v7 = vadd.f32 %v5692_v54, %v5691_v38  ;;  %v4311_v59 = vadd.f32 %v4310_v48, %v4309_v50  ;;  %v5647_v42 = vmul.f32 1.442695, %v5584_v41  ;;  %v4725_v2 = vsel %vm66_vm0, %v12066_v15, 0.0  ;;  %v13490_v50 = vld [vmem:[#allocation27_spill] sm:$0xff] }
 0x46c   :  { %v4692_v20 = vmul.f32 %v11793_v4, %v13483_v60  ;;  %v4693_v62 = vmul.f32 %v11798_v19, %v13485_v56  ;;  %v4312_v28 = vsel %vm66_vm0, %v12160_v9, 0.0  ;;  %8252 = vpow2.f32 %v5643_v6  ;;  %v13493_v56 = vld [vmem:[#allocation10_spill] sm:$0xff] }
 0x46d   :  { %v4726_v39 = vadd.f32 %v4725_v2, %v4724_v40  ;;  %v4694_v4 = vmul.f32 %v11803_v53, %v13486_v12  ;;  %v12180_v18 = vpop.eup %8232  ;;  %v4313_v5 = vadd.f32 %v4312_v28, %v4311_v59  ;;  %8254 = vpow2.f32 %v5645_v34 }
 0x46e   :  { %v4727_v19 = vsel %vm66_vm0, %v12070_v14, 0.0  ;;  %v4695_v30 = vmul.f32 %v11814_v58, %v13487_v45  ;;  %v12186_v57 = vpop.eup %8234  ;;  %v4314_v15 = vsel %vm66_vm0, %v12172_v61, 0.0  ;;  %v4731_v41 = vsel %vm66_vm0, %v4692_v20, 0.0 }
 0x46f   :  { %v4728_v38 = vadd.f32 %v4727_v19, %v4726_v39  ;;  %v4732_v53 = vsel %vm66_vm0, %v4693_v62, 0.0  ;;  %v12192_v46 = vpop.eup %8236  ;;  %v4315_v54 = vadd.f32 %v4314_v15, %v4313_v5  ;;  %v4729_v6 = vsel %vm66_vm0, %v4691_v23, 0.0  ;;  %v13491_v23 = vld [vmem:[#allocation90_spill] sm:$0xff]  ;;  %v13494_v39 = vld [vmem:[#allocation36_spill] sm:$0xff]  ;;  %v13495_v15 = vld [vmem:[#allocation93_spill] sm:$0xff] }
 0x470   :  { %v13489_v14 = vrot.slane %v13488_v25, %v8764_v44  ;;  %v4733_v34 = vadd.f32 %v4732_v53, %v4731_v41  ;;  %v12199_v35 = vpop.eup %8238  ;;  %v4316_v48 = vsel %vm66_vm0, %v12180_v18, 0.0  ;;  %8256 = vpow2.f32 %v5647_v42  ;;  %v13498_v25 = vld [vmem:[#allocation38_spill] sm:$0xff] }
 0x471   :  { %v4730_v40 = vadd.f32 %v4729_v6, %v4728_v38  ;;  %v4734_v33 = vsel %vm66_vm0, %v4694_v4, 0.0  ;;  %v12204_v60 = vpop.eup %8240  ;;  %8258 = vrcp.f32 %v5693_v7  ;;  %v4317_v20 = vadd.f32 %v4316_v48, %v4315_v54  ;;  %v13497_v6 = vld [vmem:[#allocation94_spill] sm:$0xff] }
 0x472   :  { %v4696_v58 = vmul.f32 %v13490_v50, %v13489_v14  ;;  %v13492_v17 = vrot.slane %v13491_v23, %v8764_v44  ;;  %v4735_v59 = vadd.f32 %v4734_v33, %v4733_v34  ;;  %v12210_v2 = vpop.eup %8242  ;;  %v4318_v28 = vsel %vm66_vm0, %v12186_v57, 0.0  ;;  %v13499_v50 = vld [vmem:[#allocation97_spill] sm:$0xff] }
 0x473   :  { %v5694_v42 = vsel %vm66_vm0, %v12204_v60, 0.0  ;;  %v4780_v12 = vmul.f32 %v13494_v39, %v4730_v40  ;;  %v4736_v4 = vsel %vm66_vm0, %v4695_v30, 0.0  ;;  %v12218_v7 = vpop.eup %8244  ;;  %v4319_v5 = vadd.f32 %v4318_v28, %v4317_v20  ;;  %v13501_v20 = vld [vmem:[#allocation95_spill] sm:$0xff]  ;;  %v13502_v23 = vld [vmem:[#allocation29_spill] sm:$0xff] }
 0x474   :  { %v4697_v62 = vmul.f32 %v13493_v56, %v13492_v17  ;;  %v5695_v19 = vsel %vm66_vm0, %v12210_v2, 0.0  ;;  %v4737_v45 = vadd.f32 %v4736_v4, %v4735_v59  ;;  %v13496_v38 = vrot.slane %v13495_v15, %v8764_v44  ;;  %v12226_v53 = vpop.eup %8246  ;;  %v13503_v39 = vld [vmem:[#allocation99_spill] sm:$0xff] }
 0x475   :  { %v5696_v54 = vadd.f32 %v5695_v19, %v5694_v42  ;;  %7910 = vmatprep.mubr.msk.f32.mxu1 %vm66_vm0, %v4780_v12  ;;  %v4698_v30 = vmul.f32 %v13498_v25, %v13497_v6  ;;  %v4738_v14 = vsel %vm66_vm0, %v4696_v58, 0.0  ;;  %v13500_v34 = vrot.slane %v13499_v50, %v8764_v44  ;;  %v12236_v40 = vpop.eup %8248  ;;  %v13504_v6 = vld [vmem:[#allocation100_spill] sm:$0xff] }
 0x476   :  { %v4700_v41 = vmul.f32 %v12008_v3, %v13496_v38  ;;  %v4320_v3 = vsel %vm66_vm0, %v12192_v46, 0.0  ;;  %v5697_v33 = vsel %vm66_vm0, %v12218_v7, 0.0  ;;  %v4699_v17 = vmul.f32 %v13502_v23, %v13501_v20  ;;  %v12244_v59 = vpop.eup %8250  ;;  %v13507_v23 = vld [vmem:[#allocation98_spill] sm:$0xff] }
 0x477   :  { %v4701_v48 = vmul.f32 %v12014_v51, %v13500_v34  ;;  %v4739_v56 = vadd.f32 %v4738_v14, %v4737_v45  ;;  %v4321_v58 = vadd.f32 %v4320_v3, %v4319_v5  ;;  %v5698_v28 = vadd.f32 %v5697_v33, %v5696_v54  ;;  %v13505_v33 = vld [vmem:[#allocation96_spill] sm:$0xff] }
 0x478   :  { %v4740_v42 = vsel %vm66_vm0, %v4697_v62, 0.0  ;;  %v4702_v51 = vmul.f32 %v12020_v55, %v13503_v39  ;;  %v4322_v12 = vsel %vm66_vm0, %v12199_v35, 0.0  ;;  %v5699_v4 = vsel %vm66_vm0, %v12226_v53, 0.0 }
 0x479   :  { %v4741_v19 = vadd.f32 %v4740_v42, %v4739_v56  ;;  %v4746_v15 = vsel %vm66_vm0, %v4700_v41, 0.0  ;;  %v5700_v38 = vadd.f32 %v5699_v4, %v5698_v28  ;;  %v4742_v45 = vsel %vm66_vm0, %v4698_v30, 0.0  ;;  %v12258_v54 = vpop.eup %8252  ;;  %v13509_v42 = vld [vmem:[#allocation101_spill] sm:$0xff]  ;;  %v13510_v4 = vld [vmem:[#allocation20_spill] sm:$0xff] }
 0x47a   :  { %v4703_v5 = vmul.f32 %v12032_v49, %v13504_v6  ;;  %v4747_v62 = vsel %vm66_vm0, %v4701_v48, 0.0  ;;  %v5701_v55 = vsel %vm66_vm0, %v12244_v59, 0.0  ;;  %v4744_v14 = vsel %vm66_vm0, %v4699_v17, 0.0  ;;  %v12263_v34 = vpop.eup %8254 }
 0x47b   :  { %v4743_v25 = vadd.f32 %v4742_v45, %v4741_v19  ;;  %v4748_v50 = vadd.f32 %v4747_v62, %v4746_v15  ;;  %v4323_v41 = vadd.f32 %v4322_v12, %v4321_v58  ;;  %v5702_v3 = vadd.f32 %v5701_v55, %v5700_v38  ;;  %v13512_v19 = vld [vmem:[#allocation104_spill] sm:$0xff]  ;;  %v13514_v62 = vld [vmem:[#allocation109_spill] sm:$0xff] }
 0x47c   :  { %v13506_v30 = vrot.slane %v13505_v33, %v8764_v44  ;;  %v4749_v48 = vsel %vm66_vm0, %v4702_v51, 0.0  ;;  %v13508_v56 = vrot.slane %v13507_v23, %v8764_v44  ;;  %v4706_v17 = vmul.f32 %v12072_v22, %v13509_v42 }
 0x47d   :  { %v4745_v20 = vadd.f32 %v4744_v14, %v4743_v25  ;;  %v4750_v39 = vadd.f32 %v4749_v48, %v4748_v50  ;;  %v5703_v58 = vsel %vm66_vm0, %v12258_v54, 0.0  ;;  %v4751_v12 = vsel %vm66_vm0, %v4703_v5, 0.0  ;;  %v13515_v25 = vld [vmem:[#allocation102_spill] sm:$0xff]  ;;  %v13517_v48 = vld [vmem:[#allocation103_spill] sm:$0xff] }
 0x47e   :  { %v4704_v49 = vmul.f32 %v12050_v47, %v13506_v30  ;;  %v4705_v28 = vmul.f32 %v12058_v36, %v13508_v56  ;;  %v13511_v47 = vrot.slane %v13510_v4, %v8764_v44  ;;  %v13513_v15 = vrot.slane %v13512_v19, %v8764_v44  ;;  %v12287_v36 = vpop.eup %8256  ;;  %v13521_v4 = vld [vmem:[#allocation112_spill] sm:$0xff] }
 0x47f   :  { %v5704_v45 = vadd.f32 %v5703_v58, %v5702_v3  ;;  %v4781_v22 = vmul.f32 %v12034_v37, %v4745_v20  ;;  %v4752_v6 = vadd.f32 %v4751_v12, %v4750_v39  ;;  %v4710_v55 = vmul.f32 %v12160_v9, %v13514_v62  ;;  %v12292_v5 = vpop.eup %8258  ;;  %v13516_v3 = vld [vmem:[#allocation110_spill] sm:$0xff]  ;;  %v13519_v39 = vld [vmem:[#allocation105_spill] sm:$0xff] }
 0x480   :  { %v4708_v51 = vmul.f32 %v12150_v13, %v13511_v47  ;;  %v4709_v38 = vmul.f32 %v12154_v11, %v13513_v15  ;;  %8260 = vrcp.f32 %v4323_v41  ;;  %v5705_v13 = vsel %vm66_vm0, %v12263_v34, 0.0 }
 0x481   :  { %v4707_v14 = vmul.f32 %v12083_v52, %v13515_v25  ;;  %v4753_v11 = vsel %vm66_vm0, %v4704_v49, 0.0  ;;  %7911 = vmatmul.mubr.msk.f32.gmra.mxu1 %vm66_vm0, %v4781_v22  ;;  %v4711_v37 = vmul.f32 %v12172_v61, %v13516_v3  ;;  %v5707_v41 = vsel %vm66_vm0, %v12287_v36, 0.0 }
 0x482   :  { %v4754_v50 = vadd.f32 %v4753_v11, %v4752_v6  ;;  %v4761_v33 = vsel %vm66_vm0, %v4708_v51, 0.0  ;;  %v4762_v9 = vsel %vm66_vm0, %v4709_v38, 0.0  ;;  %v4755_v30 = vsel %vm66_vm0, %v4705_v28, 0.0  ;;  %v13522_v51 = vld [vmem:[#allocation77_spill] sm:$0xff]  ;;  %v13527_v6 = vld [vmem:[#allocation23_spill] sm:$0xff] }
 0x483   :  { %v13518_v52 = vrot.slane %v13517_v48, %v8764_v44  ;;  %v4763_v20 = vadd.f32 %v4762_v9, %v4761_v33  ;;  %v5706_v23 = vadd.f32 %v5705_v13, %v5704_v45  ;;  %v4757_v42 = vsel %vm66_vm0, %v4706_v17, 0.0  ;;  %v13525_v17 = vld [vmem:[#allocation79_spill] sm:$0xff]  ;;  %v13529_v13 = vld [vmem:[#allocation18_spill] sm:$0xff]  ;;  %v13531_v9 = vld [vmem:[#allocation85_spill] sm:$0xff] }
 0x484   :  { %v4756_v56 = vadd.f32 %v4755_v30, %v4754_v50  ;;  %v4764_v61 = vsel %vm66_vm0, %v4710_v55, 0.0  ;;  %v13520_v58 = vrot.slane %v13519_v39, %v8764_v44  ;;  %v4714_v28 = vmul.f32 %v12192_v46, %v13521_v4  ;;  %v13528_v55 = vld [vmem:[#allocation14_spill] sm:$0xff]  ;;  %v13530_v46 = vld [vmem:[#allocation113_spill] sm:$0xff] }
 0x485   :  { %v4712_v49 = vmul.f32 %v12180_v18, %v13518_v52  ;;  %v4765_v47 = vadd.f32 %v4764_v61, %v4763_v20  ;;  %v13523_v19 = vrot.slane %v13522_v51, %v8764_v44  ;;  %v13524_v18 = vld [vmem:[#allocation9_spill] sm:$0xff]  ;;  %v4766_v45 = vsel %vm66_vm0, %v4711_v37, 0.0  ;;  %v13532_v30 = vld [vmem:[#allocation6_spill] sm:$0xff] }
 0x486   :  { %v4713_v12 = vmul.f32 %v12186_v57, %v13520_v58  ;;  %v4758_v38 = vadd.f32 %v4757_v42, %v4756_v56  ;;  %v13526_v22 = vrot.slane %v13525_v17, %v8764_v44  ;;  %v6071_v57 = vmul.f32 %v13529_v13, %v13528_v55  ;;  %v13533_v39 = vld [vmem:[#allocation78_spill] sm:$0xff]  ;;  %v13535_v58 = vld [vmem:[#allocation24_spill] sm:$0xff]  ;;  %v13543_v17 = vld [vmem:[#allocation33_spill] sm:$0xff] }
 0x487   :  { %v6069_v15 = vmul.f32 %v13524_v18, %v13523_v19  ;;  %v4759_v25 = vsel %vm66_vm0, %v4707_v14, 0.0  ;;  %v4715_v11 = vmul.f32 %v12199_v35, %v13530_v46  ;;  %v4767_v50 = vadd.f32 %v4766_v45, %v4765_v47  ;;  %v13536_v19 = vld [vmem:[#allocation80_spill] sm:$0xff]  ;;  %v13548_v46 = vld [vmem:[#allocation41_spill] sm:$0xff] }
 0x488   :  { %v6070_v62 = vmul.f32 %v13527_v6, %v13526_v22  ;;  %v4768_v3 = vsel %vm66_vm0, %v4712_v49, 0.0  ;;  %v4760_v33 = vadd.f32 %v4759_v25, %v4758_v38  ;;  %v6072_v37 = vmul.f32 %v13532_v30, %v13531_v9  ;;  %v13546_v13 = vld [vmem:[#allocation40_spill] sm:$0xff]  ;;  %v13549_v9 = vld [vmem:[#allocation87_spill] sm:$0xff]  ;;  %v13550_v30 = vld [vmem:[#allocation26_spill] sm:$0xff] }
 0x489   :  { %v6101_v48 = vsel %vm66_vm0, %v6069_v15, 0.0  ;;  %v5708_v20 = vadd.f32 %v5707_v41, %v5706_v23  ;;  %v4769_v56 = vadd.f32 %v4768_v3, %v4767_v50  ;;  %v4770_v42 = vsel %vm66_vm0, %v4713_v12, 0.0  ;;  %v13538_v41 = vld [vmem:[#allocation25_spill] sm:$0xff]  ;;  %v13539_v12 = vld [vmem:[#allocation106_spill] sm:$0xff]  ;;  %v13547_v25 = vld [vmem:[#allocation116_spill] sm:$0xff] }
 0x48a   :  { %v6102_v52 = vsel %vm66_vm0, %v6070_v62, 0.0  ;;  %v4782_v14 = vmul.f32 %v12236_v40, %v4760_v33  ;;  %v4772_v35 = vsel %vm66_vm0, %v4714_v28, 0.0  ;;  %v13534_v49 = vrot.slane %v13533_v39, %v8764_v44  ;;  %v13541_v40 = vld [vmem:[#allocation31_spill] sm:$0xff]  ;;  %v13542_v28 = vld [vmem:[#allocation86_spill] sm:$0xff]  ;;  %v13544_v62 = vld [vmem:[#allocation108_spill] sm:$0xff] }
 0x48b   :  { %v6103_v61 = vadd.f32 %v6102_v52, %v6101_v48  ;;  %v6104_v47 = vsel %vm66_vm0, %v6071_v57, 0.0  ;;  %v4771_v51 = vadd.f32 %v4770_v42, %v4769_v56  ;;  %v13537_v18 = vrot.slane %v13536_v19, %v8764_v44  ;;  %v13553_v19 = vld [vmem:[#allocation107_spill] sm:$0xff] }
 0x48c   :  { %v6073_v4 = vmul.f32 %v13535_v58, %v13534_v49  ;;  %v13540_v38 = vrot.slane %v13539_v12, %v8764_v44  ;;  %7913 = vmatprep.mubr.msk.f32.mxu1 %vm66_vm0, %v4782_v14  ;;  %v6075_v22 = vmul.f32 %v13543_v17, %v13542_v28  ;;  %v6106_v6 = vsel %vm66_vm0, %v6072_v37, 0.0  ;;  %v13552_v37 = vld [vmem:[#allocation34_spill] sm:$0xff] }
 0x48d   :  { %v6074_v23 = vmul.f32 %v13538_v41, %v13537_v18  ;;  %v6105_v15 = vadd.f32 %v6104_v47, %v6103_v61  ;;  %v13545_v55 = vrot.slane %v13544_v62, %v8764_v44  ;;  %v6079_v50 = vmul.f32 %v13548_v46, %v13547_v25  ;;  %v8261_v56 = vpop.eup %8260  ;;  %v13551_v61 = vld [vmem:[#allocation120_spill] sm:$0xff]  ;;  %v13557_v17 = vld [vmem:[#allocation114_spill] sm:$0xff] }
 0x48e   :  { %v6077_v45 = vmul.f32 %v13541_v40, %v13540_v38  ;;  %v4773_v3 = vadd.f32 %v4772_v35, %v4771_v51  ;;  %v4774_v33 = vsel %vm66_vm0, %v4715_v11, 0.0  ;;  %v6076_v48 = vmul.f32 %v13550_v30, %v13549_v9 }
 0x48f   :  { %v6078_v57 = vmul.f32 %v13546_v13, %v13545_v55  ;;  %v6107_v52 = vadd.f32 %v6106_v6, %v6105_v15  ;;  %v6108_v42 = vsel %vm66_vm0, %v6073_v4, 0.0  ;;  %v6080_v14 = vmul.f32 %v13552_v37, %v13551_v61  ;;  %v13555_v4 = vld [vmem:[#allocation111_spill] sm:$0xff]  ;;  %v13559_v6 = vld [vmem:[#allocation118_spill] sm:$0xff]  ;;  %v13560_v55 = vld [vmem:[#allocation117_spill] sm:$0xff] }
 0x490   :  { %v6116_v39 = vsel %vm66_vm0, %v6077_v45, 0.0  ;;  %v4775_v58 = vadd.f32 %v4774_v33, %v4773_v3  ;;  %v6110_v35 = vsel %vm66_vm0, %v6074_v23, 0.0  ;;  %v6112_v11 = vsel %vm66_vm0, %v6075_v22, 0.0  ;;  %v13565_v61 = vld [vmem:[#allocation115_spill] sm:$0xff] }
 0x491   :  { %v6117_v49 = vsel %vm66_vm0, %v6078_v57, 0.0  ;;  %v6109_v47 = vadd.f32 %v6108_v42, %v6107_v52  ;;  %v13554_v18 = vrot.slane %v13553_v19, %v8764_v44  ;;  %v13556_v15 = vrot.slane %v13555_v4, %v8764_v44  ;;  %v13562_v57 = vld [vmem:[#allocation122_spill] sm:$0xff]  ;;  %v13564_v52 = vld [vmem:[#allocation121_spill] sm:$0xff] }
 0x492   :  { %v6118_v51 = vadd.f32 %v6117_v49, %v6116_v39  ;;  %v6119_v38 = vsel %vm66_vm0, %v6079_v50, 0.0  ;;  %v4783_v40 = vmul.f32 %v8261_v56, %v4775_v58  ;;  %v13558_v23 = vrot.slane %v13557_v17, %v8764_v44 }
 0x493   :  { %v6081_v41 = vmul.f32 %v11922_v16, %v13554_v18  ;;  %v6082_v12 = vmul.f32 %v11938_v0, %v13556_v15  ;;  %v6111_v45 = vadd.f32 %v6110_v35, %v6109_v47  ;;  %v6083_v62 = vmul.f32 %v11948_v29, %v13559_v6  ;;  %v13563_v29 = vld [vmem:[#allocation124_spill] sm:$0xff]  ;;  %v13567_v47 = vld [vmem:[#allocation123_spill] sm:$0xff] }
 0x494   :  { %v6120_v28 = vadd.f32 %v6119_v38, %v6118_v51  ;;  %v6085_v22 = vmul.f32 %v12076_v1, %v13558_v23  ;;  %v6121_v16 = vsel %vm66_vm0, %v6080_v14, 0.0  ;;  %v13561_v13 = vrot.slane %v13560_v55, %v8764_v44  ;;  %7914 = vmatmul.mubr.msk.f32.gmra.mxu1 %vm66_vm0, %v4783_v40  ;;  %v13569_v51 = vld [vmem:[#allocation119_spill] sm:$0xff]  ;;  %v13574_v38 = vld [vmem:[#allocation125_spill] sm:$0xff]  ;;  %v13577_v55 = vld [vmem:[#allocation126_spill] sm:$0xff] }
 0x495   :  { %v6087_v25 = vmul.f32 %v12093_v31, %v13562_v57  ;;  %8262 = vrcp.f32 %v5708_v20  ;;  %v6113_v46 = vadd.f32 %v6112_v11, %v6111_v45  ;;  %v6114_v50 = vsel %vm66_vm0, %v6076_v48, 0.0 }
 0x496   :  { %v6086_v0 = vmul.f32 %v12090_v8, %v13561_v13  ;;  %v6122_v1 = vadd.f32 %v6121_v16, %v6120_v28  ;;  %v6123_v3 = vsel %vm66_vm0, %v6081_v41, 0.0  ;;  %v6088_v33 = vmul.f32 %v12100_v43, %v13563_v29  ;;  %v13571_v41 = vld [vmem:[#allocation128_spill] sm:$0xff]  ;;  %v13575_v28 = vld [vmem:[#allocation45_spill] sm:$0xff] }
 0x497   :  { %v6131_v9 = vsel %vm66_vm0, %v6085_v22, 0.0  ;;  %v6115_v8 = vadd.f32 %v6114_v50, %v6113_v46  ;;  %v6084_v31 = vmul.f32 %v11952_v32, %v13564_v52  ;;  %v6125_v42 = vsel %vm66_vm0, %v6082_v12, 0.0 }
 0x498   :  { %v6132_v30 = vsel %vm66_vm0, %v6086_v0, 0.0  ;;  %v6124_v20 = vadd.f32 %v6123_v3, %v6122_v1  ;;  %v6127_v48 = vsel %vm66_vm0, %v6083_v62, 0.0  ;;  %v13566_v37 = vrot.slane %v13565_v61, %v8764_v44  ;;  %v13578_v0 = vld [vmem:[#allocation127_spill] sm:$0xff] }
 0x499   :  { %v6133_v56 = vadd.f32 %v6132_v30, %v6131_v9  ;;  %v6134_v43 = vsel %vm66_vm0, %v6087_v25, 0.0  ;;  %v6165_v39 = vmul.f32 %v11962_v24, %v6115_v8  ;;  %v13568_v32 = vrot.slane %v13567_v47, %v8764_v44  ;;  %v13573_v24 = vld [vmem:[#allocation130_spill] sm:$0xff] }
 0x49a   :  { %v6089_v14 = vmul.f32 %v12108_v10, %v13566_v37  ;;  %v6126_v49 = vadd.f32 %v6125_v42, %v6124_v20  ;;  %v13570_v11 = vrot.slane %v13569_v51, %v8764_v44  ;;  %v6136_v18 = vsel %vm66_vm0, %v6088_v33, 0.0  ;;  %v7900_v37 = vpop.f32.mrf.mxu1 }
 0x49b   :  { %v6135_v58 = vadd.f32 %v6134_v43, %v6133_v56  ;;  %v6093_v35 = vmul.f32 %v12204_v60, %v13568_v32  ;;  %v13572_v10 = vrot.slane %v13571_v41, %v8764_v44  ;;  %v6095_v15 = vmul.f32 %v12218_v7, %v13573_v24  ;;  %7916 = vmatprep.mubr.msk.f32.mxu1 %vm66_vm0, %v6165_v39  ;;  %v13576_v7 = vld [vmem:[#allocation129_spill] sm:$0xff] }
 0x49c   :  { %v6090_v19 = vmul.f32 %v12116_v26, %v13570_v11  ;;  %v6128_v12 = vadd.f32 %v6127_v48, %v6126_v49  ;;  %v6129_v60 = vsel %vm66_vm0, %v6084_v31, 0.0  ;;  %v6091_v40 = vmul.f32 %v12126_v21, %v13574_v38  ;;  %v6291_v47 = vpop.f32.mrf.mxu1  ;;  %v8299_v38 = vld [vmem:[%s13031_s0 + $0x10] sm:$0xff] }
 0x49d   :  { %v6094_v4 = vmul.f32 %v12210_v2, %v13572_v10  ;;  %v6137_v45 = vadd.f32 %v6136_v18, %v6135_v58  ;;  %v6138_v26 = vsel %vm66_vm0, %v6089_v14, 0.0  ;;  %v6096_v17 = vmul.f32 %v12226_v53, %v13575_v28  ;;  %v12468_v14 = vld [vmem:[%s13036_s5] ss:$0 sm:$0xff] }
 0x49e   :  { %v6146_v23 = vsel %vm66_vm0, %v6093_v35, 0.0  ;;  %v6028_v22 = vrot.slane %v13576_v7, %v8764_v44  ;;  %v6130_v6 = vadd.f32 %v6129_v60, %v6128_v12  ;;  %v6092_v13 = vmul.f32 %v12130_v27, %v13577_v55  ;;  %v8297_v35 = vld [vmem:[%s13031_s0] sm:$0xff]  ;;  %v8298_v12 = vld [vmem:[%s13031_s0 + $0x18] sm:$0xff] }
 0x49f   :  { %v6147_v2 = vsel %vm66_vm0, %v6094_v4, 0.0  ;;  %v6139_v62 = vadd.f32 %v6138_v26, %v6137_v45  ;;  %v6140_v21 = vsel %vm66_vm0, %v6090_v19, 0.0  ;;  %v13579_v57 = vrot.slane %v13578_v0, %v8764_v44 }
 0x4a0   :  { %v6148_v16 = vadd.f32 %v6147_v2, %v6146_v23  ;;  %v6149_v25 = vsel %vm66_vm0, %v6095_v15, 0.0  ;;  %v6166_v46 = vmul.f32 %v12103_v63, %v6130_v6  ;;  %v13580_v3 = vcombine.high %v13578_v0, %v13578_v0  ;;  %v8300_v2 = vld [vmem:[%s13031_s0 + $0x28] sm:$0xff] }
 0x4a1   :  { %v6097_v53 = vmul.f32 %v12244_v59, %v13579_v57  ;;  %v6141_v50 = vadd.f32 %v6140_v21, %v6139_v62  ;;  %v6142_v27 = vsel %vm66_vm0, %v6091_v40, 0.0  ;;  %v6098_v33 = vmul.f32 %v12258_v54, %v6028_v22  ;;  %v8301_v62 = vld [vmem:[%s13031_s0 + $0x20] sm:$0xff]  ;;  %v8302_v57 = vld [vmem:[%s13031_s0 + $0x38] sm:$0xff] }
 0x4a2   :  { %v6150_v1 = vadd.f32 %v6149_v25, %v6148_v16  ;;  %v6032_v29 = vrot.slane %v13580_v3, %v8764_v44  ;;  %v6151_v9 = vsel %vm66_vm0, %v6096_v17, 0.0  ;;  %7917 = vmatmul.mubr.msk.f32.gmra.mxu1 %vm66_vm0, %v6166_v46  ;;  %v8263_v8 = vpop.eup %8262  ;;  %v13581_v63 = vcombine.high %v13576_v7, %v13576_v7 }
 0x4a3   :  { %v6143_v59 = vadd.f32 %v6142_v27, %v6141_v50  ;;  %v6144_v31 = vsel %vm66_vm0, %v6092_v13, 0.0  ;;  %v6153_v56 = vsel %vm66_vm0, %v6097_v53, 0.0  ;;  %v6155_v61 = vsel %vm66_vm0, %v6098_v33, 0.0  ;;  %v8303_v50 = vld [vmem:[%s13031_s0 + $0x30] sm:$0xff] }
 0x4a4   :  { %v6152_v30 = vadd.f32 %v6151_v9, %v6150_v1  ;;  %v6036_v52 = vrot.slane %v13581_v63, %v8764_v44  ;;  %v6099_v20 = vmul.f32 %v12263_v34, %v6032_v29  ;;  %v8296_v34 = vld [vmem:[%s13031_s0 + $0x8] sm:$0xff]  ;;  %v13582_v4 = vmov 0.0   ;;  %v8305_v63 = vld [vmem:[%s13031_s0 + $0x40] sm:$0xff] }
 0x4a5   :  { %v6145_v42 = vadd.f32 %v6144_v31, %v6143_v59  ;;  %v6371_v49 = vadd.f32 %v8296_v34, %v7900_v37  ;;  %v8304_v9 = vld [vmem:[%s13031_s0 + $0x48] sm:$0xff] }
 0x4a6   :  { %v6154_v54 = vadd.f32 %v6153_v56, %v6152_v30  ;;  %v6100_v48 = vmul.f32 %v12287_v36, %v6036_v52  ;;  %v6157_v58 = vsel %vm66_vm0, %v6099_v20, 0.0 }
 0x4a7   :  { %v6167_v43 = vmul.f32 %v12292_v5, %v6145_v42  ;;  %v12477_v32 = vadd.f32 %v12468_v14, %v6371_v49  ;;  %v6370_v5 = vadd.f32 %v8297_v35, %v6291_v47 }
 0x4a8   :  { %v6156_v39 = vadd.f32 %v6155_v61, %v6154_v54  ;;  %v6159_v51 = vsel %vm66_vm0, %v6100_v48, 0.0  ;;  %v8306_v54 = vld [vmem:[%s13031_s0 + $0x58] sm:$0xff] }
 0x4a9   :  { %7919 = vmatprep.mubr.msk.f32.mxu1 %vm66_vm0, %v6167_v43  ;;  %v12484_v19 = vadd.f32 %v12468_v14, %v6370_v5  ;;  %v6414_v18 = vsel %vm66_vm0, %v12477_v32, 0.0  ;;  %v8307_v43 = vld [vmem:[%s13031_s0 + $0x50] sm:$0xff]  ;;  %v8308_v5 = vld [vmem:[%s13031_s0 + $0x68] sm:$0xff] }
 0x4aa   :  { %v6158_v36 = vadd.f32 %v6157_v58, %v6156_v39  ;;  %6415 = vadd.xlane.f32.xlu1 %v6414_v18 }
 0x4ab   :  { %v6411_v10 = vsel %vm66_vm0, %v12484_v19, 0.0 }
 0x4ac   :  { %v6160_v11 = vadd.f32 %v6159_v51, %v6158_v36  ;;  %6412 = vadd.xlane.f32.xlu0 %v6411_v10 }
 0x4ae   :  { %v6168_v41 = vmul.f32 %v8263_v8, %v6160_v11 }
 0x4af   :  { %v7903_v24 = vpop.f32.mrf.mxu1 }
 0x4b0   :  { %7920 = vmatmul.mubr.msk.f32.gmra.mxu1 %vm66_vm0, %v6168_v41  ;;  %v6373_v60 = vadd.f32 %v8298_v12, %v7903_v24  ;;  %v8309_v41 = vld [vmem:[%s13031_s0 + $0x60] sm:$0xff] }
 0x4b1   :  { %6803 = vmatprep.mubr.f32.mxu1 %v13582_v4  ;;  %v6301_v15 = vpop.f32.mrf.mxu1 }
 0x4b2   :  { %v6372_v40 = vadd.f32 %v8299_v38, %v6301_v15  ;;  %v12502_v26 = vadd.f32 %v12468_v14, %v6373_v60 }
 0x4b4   :  { %v12499_v45 = vadd.f32 %v12468_v14, %v6372_v40  ;;  %v6420_v17 = vsel %vm66_vm0, %v12502_v26, 0.0 }
 0x4b6   :  { %v6417_v28 = vsel %vm66_vm0, %v12499_v45, 0.0 }
 0x4b7   :  { %6418 = vadd.xlane.f32.xlu0 %v6417_v28 }
 0x4bb   :  { %6421 = vadd.xlane.f32.xlu0 %v6420_v17 }
 0x4bd   :  { %v7906_v23 = vpop.f32.mrf.mxu1 }
 0x4be   :  { %v6375_v7 = vadd.f32 %v8300_v2, %v7906_v23 }
 0x4bf   :  { %v6311_v22 = vpop.f32.mrf.mxu1 }
 0x4c0   :  { %v12512_v6 = vadd.f32 %v12468_v14, %v6375_v7  ;;  %v6374_v16 = vadd.f32 %v8301_v62, %v6311_v22  ;;  %v8310_v62 = vld [vmem:[%s13031_s0 + $0x78] sm:$0xff] }
 0x4c2   :  { %v12518_v55 = vadd.f32 %v12468_v14, %v6374_v16  ;;  %v6426_v13 = vsel %vm66_vm0, %v12512_v6, 0.0 }
 0x4c3   :  { %6427 = vadd.xlane.f32.xlu1 %v6426_v13 }
 0x4c4   :  { %v6423_v21 = vsel %vm66_vm0, %v12518_v55, 0.0 }
 0x4c5   :  { %6424 = vadd.xlane.f32.xlu0 %v6423_v21 }
 0x4ca   :  { %v7909_v0 = vpop.f32.mrf.mxu1 }
 0x4cb   :  { %v6377_v53 = vadd.f32 %v8302_v57, %v7909_v0  ;;  %v8311_v57 = vld [vmem:[%s13031_s0 + $0x70] sm:$0xff] }
 0x4cc   :  { %v6321_v25 = vpop.f32.mrf.mxu1 }
 0x4cd   :  { %v12528_v46 = vadd.f32 %v12468_v14, %v6377_v53  ;;  %v6376_v1 = vadd.f32 %v8303_v50, %v6321_v25 }
 0x4cf   :  { %v12534_v3 = vadd.f32 %v12468_v14, %v6376_v1  ;;  %v6432_v29 = vsel %vm66_vm0, %v12528_v46, 0.0 }
 0x4d0   :  { %6433 = vadd.xlane.f32.xlu1 %v6432_v29 }
 0x4d1   :  { %v6429_v27 = vsel %vm66_vm0, %v12534_v3, 0.0 }
 0x4d2   :  { %6430 = vadd.xlane.f32.xlu0 %v6429_v27 }
 0x533   :  { %v6416_v24 = vpop.xlane.xlu1 %6415 }
 0x534   :  { %v6460_v40 = vmul.f32 0.015625, %v6416_v24 }
 0x535   :  { %v6413_v47 = vpop.xlane.xlu0 %6412 }
 0x536   :  { %v6459_v28 = vmul.f32 0.015625, %v6413_v47  ;;  %v12589_v2 = vsub.f32 %v12477_v32, %v6460_v40  ;;  %v6676_v40 = vld [vmem:[%s13037_s6 + $0x68] sm:$0xff] }
 0x538   :  { %v12595_v13 = vsub.f32 %v12484_v19, %v6459_v28  ;;  %v6492_v1 = vmul.f32 %v12589_v2, %v12589_v2  ;;  %v6675_v28 = vld [vmem:[%s13037_s6 + $0x60] sm:$0xff] }
 0x540   :  { %v6419_v35 = vpop.xlane.xlu0 %6418 }
 0x541   :  { %v7912_v33 = vpop.f32.mrf.mxu1  ;;  %v6461_v25 = vmul.f32 0.015625, %v6419_v35 }
 0x542   :  { %v6379_v59 = vadd.f32 %v8304_v9, %v7912_v33 }
 0x543   :  { %v6331_v30 = vpop.f32.mrf.mxu1 }
 0x544   :  { %v12544_v8 = vadd.f32 %v12468_v14, %v6379_v59  ;;  %v6378_v52 = vadd.f32 %v8305_v63, %v6331_v30  ;;  %v6422_v60 = vpop.xlane.xlu0 %6421  ;;  %v12614_v63 = vsub.f32 %v12499_v45, %v6461_v25  ;;  %v6665_v25 = vld [vmem:[%s13037_s6 + $0x10] sm:$0xff] }
 0x545   :  { %v6462_v23 = vmul.f32 0.015625, %v6422_v60  ;;  %v6678_v60 = vld [vmem:[%s13037_s6 + $0x78] sm:$0xff] }
 0x546   :  { %v12550_v31 = vadd.f32 %v12468_v14, %v6378_v52  ;;  %v6438_v20 = vsel %vm66_vm0, %v12544_v8, 0.0  ;;  %6755 = vmatprep.subr.mxu1 %v6678_v60 }
 0x547   :  { %6439 = vadd.xlane.f32.xlu1 %v6438_v20  ;;  %v12604_v50 = vsub.f32 %v12502_v26, %v6462_v23  ;;  %v6491_v20 = vmul.f32 %v12595_v13, %v12595_v13  ;;  %v6673_v23 = vld [vmem:[%s13037_s6 + $0x50] sm:$0xff] }
 0x548   :  { %v6435_v56 = vsel %vm66_vm0, %v12550_v31, 0.0 }
 0x549   :  { %6436 = vadd.xlane.f32.xlu0 %v6435_v56  ;;  %v6510_v56 = vsel %vm66_vm0, %v6492_v1, 0.0  ;;  %v6664_v1 = vld [vmem:[%s13037_s6 + $0x8] sm:$0xff] }
 0x54c   :  { %v6428_v17 = vpop.xlane.xlu1 %6427 }
 0x54d   :  { %v6464_v27 = vmul.f32 0.015625, %v6428_v17  ;;  %v6674_v17 = vld [vmem:[%s13037_s6 + $0x58] sm:$0xff] }
 0x54e   :  { %v6425_v22 = vpop.xlane.xlu0 %6424 }
 0x54f   :  { %v6463_v9 = vmul.f32 0.015625, %v6425_v22  ;;  %v6671_v22 = vld [vmem:[%s13037_s6 + $0x40] sm:$0xff] }
 0x554   :  { %v7915_v42 = vpop.f32.mrf.mxu1 }
 0x555   :  { %v6381_v48 = vadd.f32 %v8306_v54, %v7915_v42  ;;  %v12624_v42 = vsub.f32 %v12512_v6, %v6464_v27  ;;  %v6663_v27 = vld [vmem:[%s13037_s6] sm:$0xff] }
 0x556   :  { %v6341_v61 = vpop.f32.mrf.mxu1 }
 0x557   :  { %v12560_v37 = vadd.f32 %v12468_v14, %v6381_v48  ;;  %v6380_v39 = vadd.f32 %v8307_v43, %v6341_v61  ;;  %v12627_v48 = vsub.f32 %v12518_v55, %v6463_v9  ;;  %v6507_v43 = vsel %vm66_vm0, %v6491_v20, 0.0 }
 0x559   :  { %v12566_v34 = vadd.f32 %v12468_v14, %v6380_v39  ;;  %v6444_v49 = vsel %vm66_vm0, %v12560_v37, 0.0  ;;  %v6434_v59 = vpop.xlane.xlu1 %6433  ;;  %v6495_v35 = vmul.f32 %v12627_v48, %v12627_v48 }
 0x55a   :  { %6445 = vadd.xlane.f32.xlu1 %v6444_v49  ;;  %v6466_v54 = vmul.f32 0.015625, %v6434_v59  ;;  %v6493_v49 = vmul.f32 %v12614_v63, %v12614_v63 }
 0x55b   :  { %v6441_v58 = vsel %vm66_vm0, %v12566_v34, 0.0  ;;  %v6431_v30 = vpop.xlane.xlu0 %6430 }
 0x55c   :  { %6442 = vadd.xlane.f32.xlu0 %v6441_v58  ;;  %v6465_v61 = vmul.f32 0.015625, %v6431_v30  ;;  %v12634_v58 = vsub.f32 %v12528_v46, %v6466_v54 }
 0x55e   :  { %v12637_v47 = vsub.f32 %v12534_v3, %v6465_v61 }
 0x562   :  { %v7918_v36 = vpop.f32.mrf.mxu1 }
 0x563   :  { %v6383_v51 = vadd.f32 %v8308_v5, %v7918_v36  ;;  %v6496_v36 = vmul.f32 %v12624_v42, %v12624_v42  ;;  %v6513_v5 = vsel %vm66_vm0, %v6493_v49, 0.0 }
 0x564   :  { %v6351_v11 = vpop.f32.mrf.mxu1 }
 0x565   :  { %v12576_v18 = vadd.f32 %v12468_v14, %v6383_v51  ;;  %v6382_v10 = vadd.f32 %v8309_v41, %v6351_v11  ;;  %v6522_v51 = vsel %vm66_vm0, %v6496_v36, 0.0  ;;  %v6519_v11 = vsel %vm66_vm0, %v6495_v35, 0.0 }
 0x566   :  { %v6498_v41 = vmul.f32 %v12634_v58, %v12634_v58 }
 0x567   :  { %v12582_v15 = vadd.f32 %v12468_v14, %v6382_v10  ;;  %v6450_v12 = vsel %vm66_vm0, %v12576_v18, 0.0  ;;  %v6497_v10 = vmul.f32 %v12637_v47, %v12637_v47 }
 0x568   :  { %6451 = vadd.xlane.f32.xlu1 %v6450_v12  ;;  %v6528_v24 = vsel %vm66_vm0, %v6498_v41, 0.0 }
 0x569   :  { %v6447_v38 = vsel %vm66_vm0, %v12582_v15, 0.0  ;;  %v6525_v12 = vsel %vm66_vm0, %v6497_v10, 0.0 }
 0x56a   :  { %6448 = vadd.xlane.f32.xlu0 %v6447_v38  ;;  %v6677_v38 = vld [vmem:[%s13037_s6 + $0x70] sm:$0xff] }
 0x56b   :  { %6756 = vmatpush1.msra.mxu1 %v6677_v38 }
 0x56c   :  { %6757 = vmatprep.subr.mxu1 %v6676_v40 }
 0x56d   :  { %6758 = vmatpush1.msra.mxu1 %v6675_v28 }
 0x56e   :  { %6759 = vmatprep.subr.mxu1 %v6674_v17 }
 0x56f   :  { %6760 = vmatpush1.msra.mxu1 %v6673_v23 }
 0x570   :  { %v7921_v7 = vpop.f32.mrf.mxu1 }
 0x571   :  { %v6385_v16 = vadd.f32 %v8310_v62, %v7921_v7  ;;  %v6672_v7 = vld [vmem:[%s13037_s6 + $0x48] sm:$0xff]  ;;  %v6670_v62 = vld [vmem:[%s13037_s6 + $0x38] sm:$0xff] }
 0x572   :  { %v6361_v21 = vpop.f32.mrf.mxu1  ;;  %6761 = vmatprep.subr.mxu1 %v6672_v7 }
 0x573   :  { %v12598_v0 = vadd.f32 %v12468_v14, %v6385_v16  ;;  %v6384_v53 = vadd.f32 %v8311_v57, %v6361_v21  ;;  %v6669_v16 = vld [vmem:[%s13037_s6 + $0x30] sm:$0xff]  ;;  %6762 = vmatpush1.msra.mxu1 %v6671_v22  ;;  %v6668_v21 = vld [vmem:[%s13037_s6 + $0x28] sm:$0xff]  ;;  %v6667_v57 = vld [vmem:[%s13037_s6 + $0x20] sm:$0xff] }
 0x574   :  { %6763 = vmatprep.subr.mxu1 %v6670_v62 }
 0x575   :  { %v12609_v29 = vadd.f32 %v12468_v14, %v6384_v53  ;;  %v6456_v33 = vsel %vm66_vm0, %v12598_v0, 0.0  ;;  %v6494_v14 = vmul.f32 %v12604_v50, %v12604_v50  ;;  %6764 = vmatpush1.msra.mxu1 %v6669_v16  ;;  %v6666_v53 = vld [vmem:[%s13037_s6 + $0x18] sm:$0xff] }
 0x576   :  { %6457 = vadd.xlane.f32.xlu1 %v6456_v33  ;;  %6765 = vmatprep.subr.mxu1 %v6668_v21 }
 0x577   :  { %v6453_v52 = vsel %vm66_vm0, %v12609_v29, 0.0  ;;  %v6516_v39 = vsel %vm66_vm0, %v6494_v14, 0.0  ;;  %6766 = vmatpush1.msra.mxu1 %v6667_v57 }
 0x578   :  { %6454 = vadd.xlane.f32.xlu0 %v6453_v52  ;;  %6767 = vmatprep.subr.mxu1 %v6666_v53 }
 0x579   :  { %6768 = vmatpush1.msra.mxu1 %v6665_v25 }
 0x57a   :  { %6511 = vadd.xlane.f32.xlu1 %v6510_v56  ;;  %6769 = vmatprep.subr.mxu1 %v6664_v1 }
 0x57b   :  { %6770 = vmatpush1.msra.mxu1 %v6663_v27 }
 0x57c   :  { %6508 = vadd.xlane.f32.xlu0 %v6507_v43 }
 0x57e   :  { %6517 = vadd.xlane.f32.xlu1 %v6516_v39 }
 0x580   :  { %6514 = vadd.xlane.f32.xlu0 %v6513_v5 }
 0x582   :  { %6523 = vadd.xlane.f32.xlu1 %v6522_v51 }
 0x584   :  { %6520 = vadd.xlane.f32.xlu0 %v6519_v11 }
 0x586   :  { %6529 = vadd.xlane.f32.xlu1 %v6528_v24 }
 0x588   :  { %6526 = vadd.xlane.f32.xlu0 %v6525_v12 }
 0x5d0   :  { %v6440_v33 = vpop.xlane.xlu1 %6439 }
 0x5d1   :  { %v6468_v9 = vmul.f32 0.015625, %v6440_v33 }
 0x5d2   :  { %v6437_v59 = vpop.xlane.xlu0 %6436 }
 0x5d3   :  { %v12701_v30 = vsub.f32 %v12544_v8, %v6468_v9  ;;  %v6467_v52 = vmul.f32 0.015625, %v6437_v59 }
 0x5d5   :  { %v12704_v20 = vsub.f32 %v12550_v31, %v6467_v52  ;;  %v6500_v14 = vmul.f32 %v12701_v30, %v12701_v30 }
 0x5d7   :  { %v6534_v56 = vsel %vm66_vm0, %v6500_v14, 0.0  ;;  %v6499_v54 = vmul.f32 %v12704_v20, %v12704_v20 }
 0x5d8   :  { %6535 = vadd.xlane.f32.xlu1 %v6534_v56 }
 0x5d9   :  { %v6531_v61 = vsel %vm66_vm0, %v6499_v54, 0.0 }
 0x5da   :  { %6532 = vadd.xlane.f32.xlu0 %v6531_v61 }
 0x5e3   :  { %v6446_v43 = vpop.xlane.xlu1 %6445 }
 0x5e4   :  { %v6470_v39 = vmul.f32 0.015625, %v6446_v43 }
 0x5e5   :  { %v6443_v49 = vpop.xlane.xlu0 %6442 }
 0x5e6   :  { %v12713_v36 = vsub.f32 %v12560_v37, %v6470_v39  ;;  %v6469_v35 = vmul.f32 0.015625, %v6443_v49 }
 0x5e8   :  { %v12716_v5 = vsub.f32 %v12566_v34, %v6469_v35  ;;  %v6502_v51 = vmul.f32 %v12713_v36, %v12713_v36 }
 0x5ea   :  { %v6540_v11 = vsel %vm66_vm0, %v6502_v51, 0.0  ;;  %v6501_v41 = vmul.f32 %v12716_v5, %v12716_v5 }
 0x5eb   :  { %6541 = vadd.xlane.f32.xlu1 %v6540_v11 }
 0x5ec   :  { %v6537_v10 = vsel %vm66_vm0, %v6501_v41, 0.0 }
 0x5ed   :  { %6538 = vadd.xlane.f32.xlu0 %v6537_v10 }
 0x5f1   :  { %v6452_v24 = vpop.xlane.xlu1 %6451 }
 0x5f2   :  { %v6472_v12 = vmul.f32 0.015625, %v6452_v24 }
 0x5f3   :  { %v6449_v60 = vpop.xlane.xlu0 %6448 }
 0x5f4   :  { %v12725_v38 = vsub.f32 %v12576_v18, %v6472_v12  ;;  %v6471_v40 = vmul.f32 0.015625, %v6449_v60 }
 0x5f6   :  { %v12728_v28 = vsub.f32 %v12582_v15, %v6471_v40  ;;  %v6504_v17 = vmul.f32 %v12725_v38, %v12725_v38 }
 0x5f8   :  { %v6546_v23 = vsel %vm66_vm0, %v6504_v17, 0.0  ;;  %v6503_v7 = vmul.f32 %v12728_v28, %v12728_v28 }
 0x5f9   :  { %6547 = vadd.xlane.f32.xlu1 %v6546_v23 }
 0x5fa   :  { %v6543_v22 = vsel %vm66_vm0, %v6503_v7, 0.0 }
 0x5fb   :  { %6544 = vadd.xlane.f32.xlu0 %v6543_v22 }
 0x5ff   :  { %v6458_v62 = vpop.xlane.xlu1 %6457 }
 0x600   :  { %v6474_v16 = vmul.f32 0.015625, %v6458_v62 }
 0x601   :  { %v6455_v21 = vpop.xlane.xlu0 %6454 }
 0x602   :  { %v12737_v57 = vsub.f32 %v12598_v0, %v6474_v16  ;;  %v6473_v53 = vmul.f32 0.015625, %v6455_v21 }
 0x603   :  { %v6512_v25 = vpop.xlane.xlu1 %6511 }
 0x604   :  { %v12740_v1 = vsub.f32 %v12609_v29, %v6473_v53  ;;  %v6556_v27 = vmul.f32 0.015625, %v6512_v25  ;;  %v6506_v33 = vmul.f32 %v12737_v57, %v12737_v57 }
 0x605   :  { %v6509_v9 = vpop.xlane.xlu0 %6508 }
 0x606   :  { %v6572_v59 = vadd.f32 1e-05, %v6556_v27  ;;  %v6555_v52 = vmul.f32 0.015625, %v6509_v9  ;;  %v6552_v14 = vsel %vm66_vm0, %v6506_v33, 0.0  ;;  %v6505_v56 = vmul.f32 %v12740_v1, %v12740_v1  ;;  %v12753_v27 = vld [vmem:[%s13043_s12] ss:$0 sm:$0xff] }
 0x607   :  { %6553 = vadd.xlane.f32.xlu1 %v6552_v14  ;;  %v6518_v54 = vpop.xlane.xlu1 %6517 }
 0x608   :  { %8264 = vrsqrt.f32 %v6572_v59  ;;  %v6571_v61 = vadd.f32 1e-05, %v6555_v52  ;;  %v6558_v43 = vmul.f32 0.015625, %v6518_v54  ;;  %v6549_v39 = vsel %vm66_vm0, %v6505_v56, 0.0  ;;  %v12759_v52 = vld [vmem:[%s13044_s13] ss:$0 sm:$0xff] }
 0x609   :  { %6550 = vadd.xlane.f32.xlu0 %v6549_v39  ;;  %v6515_v49 = vpop.xlane.xlu0 %6514 }
 0x60a   :  { %8266 = vrsqrt.f32 %v6571_v61  ;;  %v6557_v35 = vmul.f32 0.015625, %v6515_v49  ;;  %v6574_v51 = vadd.f32 1e-05, %v6558_v43 }
 0x60b   :  { %v6524_v41 = vpop.xlane.xlu1 %6523 }
 0x60c   :  { %v6573_v11 = vadd.f32 1e-05, %v6557_v35  ;;  %v6560_v12 = vmul.f32 0.015625, %v6524_v41 }
 0x60d   :  { %v6521_v10 = vpop.xlane.xlu0 %6520 }
 0x60e   :  { %8268 = vrsqrt.f32 %v6573_v11  ;;  %v6559_v24 = vmul.f32 0.015625, %v6521_v10  ;;  %v6576_v17 = vadd.f32 1e-05, %v6560_v12 }
 0x60f   :  { %8270 = vrsqrt.f32 %v6574_v51  ;;  %v6530_v23 = vpop.xlane.xlu1 %6529 }
 0x610   :  { %v6575_v60 = vadd.f32 1e-05, %v6559_v24  ;;  %v6562_v16 = vmul.f32 0.015625, %v6530_v23 }
 0x611   :  { %v6527_v40 = vpop.xlane.xlu0 %6526 }
 0x612   :  { %8272 = vrsqrt.f32 %v6575_v60  ;;  %v6561_v7 = vmul.f32 0.015625, %v6527_v40  ;;  %v6578_v59 = vadd.f32 1e-05, %v6562_v16  ;;  %v6947_v40 = vld [vmem:[%s13039_s8 + $0x78] sm:$0xff]  ;;  %v6945_v16 = vld [vmem:[%s13039_s8 + $0x68] sm:$0xff] }
 0x613   :  { %8274 = vrsqrt.f32 %v6576_v17  ;;  %v6962_v17 = vld [vmem:[%s13039_s8 + $0xf0] sm:$0xff] }
 0x614   :  { %v6577_v53 = vadd.f32 1e-05, %v6561_v7 }
 0x615   :  { %v8265_v22 = vpop.eup %8264 }
 0x616   :  { %v6604_v25 = vmul.f32 %v8265_v22, %v12589_v2  ;;  %8276 = vrsqrt.f32 %v6577_v53  ;;  %v6946_v22 = vld [vmem:[%s13039_s8 + $0x70] sm:$0xff] }
 0x617   :  { %v8267_v62 = vpop.eup %8266  ;;  %8278 = vrsqrt.f32 %v6578_v59  ;;  %v6958_v59 = vld [vmem:[%s13039_s8 + $0xd0] sm:$0xff] }
 0x618   :  { %v6603_v21 = vmul.f32 %v8267_v62, %v12595_v13  ;;  %v6626_v14 = vmul.f32 %v12753_v27, %v6604_v25  ;;  %v6961_v62 = vld [vmem:[%s13039_s8 + $0xe8] sm:$0xff]  ;;  %v6944_v25 = vld [vmem:[%s13039_s8 + $0x60] sm:$0xff] }
 0x61a   :  { %v6625_v33 = vmul.f32 %v12753_v27, %v6603_v21  ;;  %v6648_v54 = vadd.f32 %v12759_v52, %v6626_v14  ;;  %v6942_v14 = vld [vmem:[%s13039_s8 + $0x50] sm:$0xff] }
 0x61b   :  { %v8269_v9 = vpop.eup %8268 }
 0x61c   :  { %v6647_v13 = vadd.f32 %v12759_v52, %v6625_v33  ;;  %v6605_v2 = vmul.f32 %v8269_v9, %v12614_v63  ;;  %v8271_v56 = vpop.eup %8270  ;;  %v6959_v33 = vld [vmem:[%s13039_s8 + $0xd8] sm:$0xff] }
 0x61d   :  { %v6606_v43 = vmul.f32 %v8271_v56, %v12604_v50  ;;  %v6943_v9 = vld [vmem:[%s13039_s8 + $0x58] sm:$0xff]  ;;  %v6941_v56 = vld [vmem:[%s13039_s8 + $0x48] sm:$0xff] }
 0x61e   :  { %7345 = vmatmul.mubr.msk.f32.vlgmr.msra.gmra.mxu1 %vm66_vm0, %v6647_v13  ;;  %v6627_v61 = vmul.f32 %v12753_v27, %v6605_v2  ;;  %v6957_v2 = vld [vmem:[%s13039_s8 + $0xc8] sm:$0xff] }
 0x61f   :  { %6809 = vmatprep.mubr.f32.mxu1 %v13582_v4  ;;  %v8273_v39 = vpop.eup %8272  ;;  %v6628_v63 = vmul.f32 %v12753_v27, %v6606_v43  ;;  %v6955_v43 = vld [vmem:[%s13039_s8 + $0xb8] sm:$0xff] }
 0x620   :  { %v6649_v49 = vadd.f32 %v12759_v52, %v6627_v61  ;;  %v6607_v35 = vmul.f32 %v8273_v39, %v12627_v48  ;;  %v8275_v51 = vpop.eup %8274  ;;  %v6940_v61 = vld [vmem:[%s13039_s8 + $0x40] sm:$0xff]  ;;  %v6939_v39 = vld [vmem:[%s13039_s8 + $0x38] sm:$0xff] }
 0x621   :  { %v6650_v11 = vadd.f32 %v12759_v52, %v6628_v63  ;;  %v6608_v41 = vmul.f32 %v8275_v51, %v12624_v42  ;;  %v6963_v42 = vld [vmem:[%s13039_s8 + $0xf8] sm:$0xff]  ;;  %v6938_v63 = vld [vmem:[%s13039_s8 + $0x30] sm:$0xff]  ;;  %v6937_v51 = vld [vmem:[%s13039_s8 + $0x28] sm:$0xff] }
 0x622   :  { %7346 = vmatmul.mubr.msk.f32.gmra.mxu1 %vm66_vm0, %v6648_v54  ;;  %v6629_v50 = vmul.f32 %v12753_v27, %v6607_v35  ;;  %7546 = vmatprep.subr.mxu0 %v6963_v42  ;;  %v6956_v54 = vld [vmem:[%s13039_s8 + $0xc0] sm:$0xff]  ;;  %v6953_v35 = vld [vmem:[%s13039_s8 + $0xa8] sm:$0xff] }
 0x623   :  { %6815 = vmatprep.mubr.f32.mxu1 %v13582_v4  ;;  %v8277_v10 = vpop.eup %8276  ;;  %v6630_v48 = vmul.f32 %v12753_v27, %v6608_v41  ;;  %7547 = vmatpush3.msra.mxu0 %v6947_v40  ;;  %v6951_v41 = vld [vmem:[%s13039_s8 + $0x98] sm:$0xff]  ;;  %v6948_v40 = vld [vmem:[%s13039_s8 + $0x80] sm:$0xff] }
 0x624   :  { %v6651_v24 = vadd.f32 %v12759_v52, %v6629_v50  ;;  %v6609_v12 = vmul.f32 %v8277_v10, %v12637_v47  ;;  %v8279_v60 = vpop.eup %8278  ;;  %7548 = vmatprep.subr.mxu0 %v6962_v17  ;;  %v6936_v50 = vld [vmem:[%s13039_s8 + $0x20] sm:$0xff]  ;;  %v6935_v10 = vld [vmem:[%s13039_s8 + $0x18] sm:$0xff] }
 0x625   :  { %v6652_v23 = vadd.f32 %v12759_v52, %v6630_v48  ;;  %v6610_v7 = vmul.f32 %v8279_v60, %v12634_v58  ;;  %7549 = vmatpush3.msra.mxu0 %v6946_v22  ;;  %v6960_v58 = vld [vmem:[%s13039_s8 + $0xe0] sm:$0xff]  ;;  %v6934_v48 = vld [vmem:[%s13039_s8 + $0x10] sm:$0xff]  ;;  %v6933_v60 = vld [vmem:[%s13039_s8 + $0x8] sm:$0xff] }
 0x626   :  { %7347 = vmatmul.mubr.msk.f32.gmra.mxu1 %vm66_vm0, %v6649_v49  ;;  %v6631_v47 = vmul.f32 %v12753_v27, %v6609_v12  ;;  %7550 = vmatprep.subr.mxu0 %v6961_v62  ;;  %v6954_v49 = vld [vmem:[%s13039_s8 + $0xb0] sm:$0xff]  ;;  %v6949_v12 = vld [vmem:[%s13039_s8 + $0x88] sm:$0xff]  ;;  %v6932_v17 = vld [vmem:[%s13039_s8] sm:$0xff] }
 0x627   :  { %6821 = vmatprep.mubr.f32.mxu1 %v13582_v4  ;;  %v6632_v53 = vmul.f32 %v12753_v27, %v6610_v7  ;;  %7551 = vmatpush3.msra.mxu0 %v6945_v16 }
 0x628   :  { %v6653_v21 = vadd.f32 %v12759_v52, %v6631_v47  ;;  %7552 = vmatprep.subr.mxu0 %v6960_v58 }
 0x629   :  { %7553 = vmatpush3.msra.mxu0 %v6944_v25  ;;  %v6654_v13 = vadd.f32 %v12759_v52, %v6632_v53 }
 0x62a   :  { %7348 = vmatmul.mubr.msk.f32.gmra.mxu1 %vm66_vm0, %v6650_v11  ;;  %7554 = vmatprep.subr.mxu0 %v6959_v33  ;;  %v6952_v11 = vld [vmem:[%s13039_s8 + $0xa0] sm:$0xff] }
 0x62b   :  { %6827 = vmatprep.mubr.f32.mxu1 %v13582_v4  ;;  %7555 = vmatpush3.msra.mxu0 %v6943_v9 }
 0x62c   :  { %7556 = vmatprep.subr.mxu0 %v6958_v59 }
 0x62d   :  { %7557 = vmatpush3.msra.mxu0 %v6942_v14 }
 0x62e   :  { %7349 = vmatmul.mubr.msk.f32.gmra.mxu1 %vm66_vm0, %v6651_v24  ;;  %7558 = vmatprep.subr.mxu0 %v6957_v2  ;;  %v6950_v24 = vld [vmem:[%s13039_s8 + $0x90] sm:$0xff] }
 0x62f   :  { %6833 = vmatprep.mubr.f32.mxu1 %v13582_v4  ;;  %7559 = vmatpush3.msra.mxu0 %v6941_v56 }
 0x630   :  { %7560 = vmatprep.subr.mxu0 %v6956_v54 }
 0x631   :  { %7561 = vmatpush3.msra.mxu0 %v6940_v61 }
 0x632   :  { %7350 = vmatmul.mubr.msk.f32.gmra.mxu1 %vm66_vm0, %v6652_v23  ;;  %7562 = vmatprep.subr.mxu0 %v6955_v43 }
 0x633   :  { %6839 = vmatprep.mubr.f32.mxu1 %v13582_v4  ;;  %7563 = vmatpush3.msra.mxu0 %v6939_v39 }
 0x634   :  { %7564 = vmatprep.subr.mxu0 %v6954_v49 }
 0x635   :  { %7565 = vmatpush3.msra.mxu0 %v6938_v63 }
 0x636   :  { %7351 = vmatmul.mubr.msk.f32.gmra.mxu1 %vm66_vm0, %v6653_v21  ;;  %7566 = vmatprep.subr.mxu0 %v6953_v35 }
 0x637   :  { %6845 = vmatprep.mubr.f32.mxu1 %v13582_v4  ;;  %7567 = vmatpush3.msra.mxu0 %v6937_v51 }
 0x638   :  { %7568 = vmatprep.subr.mxu0 %v6952_v11 }
 0x639   :  { %7569 = vmatpush3.msra.mxu0 %v6936_v50 }
 0x63a   :  { %7352 = vmatmul.mubr.msk.f32.gmra.mxu1 %vm66_vm0, %v6654_v13  ;;  %7570 = vmatprep.subr.mxu0 %v6951_v41 }
 0x63b   :  { %6851 = vmatprep.mubr.f32.mxu1 %v13582_v4  ;;  %7571 = vmatpush3.msra.mxu0 %v6935_v10 }
 0x63c   :  { %7572 = vmatprep.subr.mxu0 %v6950_v24 }
 0x63d   :  { %7573 = vmatpush3.msra.mxu0 %v6934_v48 }
 0x63e   :  { %7574 = vmatprep.subr.mxu0 %v6949_v12 }
 0x63f   :  { %7575 = vmatpush3.msra.mxu0 %v6933_v60 }
 0x640   :  { %7576 = vmatprep.subr.mxu0 %v6948_v40 }
 0x641   :  { %7577 = vmatpush3.msra.mxu0 %v6932_v17 }
 0x661   :  { %v6536_v42 = vpop.xlane.xlu1 %6535 }
 0x662   :  { %v6564_v23 = vmul.f32 0.015625, %v6536_v42 }
 0x663   :  { %v6533_v47 = vpop.xlane.xlu0 %6532 }
 0x664   :  { %v6580_v7 = vadd.f32 1e-05, %v6564_v23  ;;  %v6563_v22 = vmul.f32 0.015625, %v6533_v47 }
 0x666   :  { %8280 = vrsqrt.f32 %v6580_v7  ;;  %v6579_v62 = vadd.f32 1e-05, %v6563_v22 }
 0x668   :  { %8282 = vrsqrt.f32 %v6579_v62 }
 0x673   :  { %v8281_v58 = vpop.eup %8280 }
 0x674   :  { %v6542_v16 = vpop.xlane.xlu1 %6541  ;;  %v6612_v13 = vmul.f32 %v8281_v58, %v12701_v30 }
 0x675   :  { %v6566_v21 = vmul.f32 0.015625, %v6542_v16  ;;  %v8283_v25 = vpop.eup %8282 }
 0x676   :  { %v6539_v53 = vpop.xlane.xlu0 %6538  ;;  %v6611_v59 = vmul.f32 %v8283_v25, %v12704_v20  ;;  %v6634_v54 = vmul.f32 %v12753_v27, %v6612_v13  ;;  %v13583_v13 = vld [vmem:[#allocation5_spill] sm:$0xff] }
 0x677   :  { %v6582_v33 = vadd.f32 1e-05, %v6566_v21  ;;  %v6565_v9 = vmul.f32 0.015625, %v6539_v53 }
 0x678   :  { %v6633_v2 = vmul.f32 %v12753_v27, %v6611_v59  ;;  %v6656_v61 = vadd.f32 %v12759_v52, %v6634_v54 }
 0x679   :  { %8284 = vrsqrt.f32 %v6582_v33  ;;  %v6581_v14 = vadd.f32 1e-05, %v6565_v9 }
 0x67a   :  { %v6655_v56 = vadd.f32 %v12759_v52, %v6633_v2 }
 0x67b   :  { %8286 = vrsqrt.f32 %v6581_v14  ;;  %v13584_v14 = vsub.s32 1, %v13583_v13 }
 0x67c   :  { %7353 = vmatmul.mubr.msk.f32.gmra.mxu1 %vm66_vm0, %v6655_v56 }
 0x67d   :  { %6857 = vmatprep.mubr.f32.mxu1 %v13582_v4 }
 0x680   :  { %7354 = vmatmul.mubr.msk.f32.gmra.mxu1 %vm66_vm0, %v6656_v61 }
 0x681   :  { %6863 = vmatprep.mubr.f32.mxu1 %v13582_v4 }
 0x682   :  { %v6548_v43 = vpop.xlane.xlu1 %6547 }
 0x683   :  { %v6568_v39 = vmul.f32 0.015625, %v6548_v43 }
 0x684   :  { %v6545_v30 = vpop.xlane.xlu0 %6544 }
 0x685   :  { %v6584_v20 = vadd.f32 1e-05, %v6568_v39  ;;  %v6567_v49 = vmul.f32 0.015625, %v6545_v30 }
 0x686   :  { %v8285_v35 = vpop.eup %8284 }
 0x687   :  { %8288 = vrsqrt.f32 %v6584_v20  ;;  %v6583_v63 = vadd.f32 1e-05, %v6567_v49  ;;  %v6614_v50 = vmul.f32 %v8285_v35, %v12713_v36 }
 0x688   :  { %v8287_v51 = vpop.eup %8286 }
 0x689   :  { %8290 = vrsqrt.f32 %v6583_v63  ;;  %v6613_v11 = vmul.f32 %v8287_v51, %v12716_v5  ;;  %v6636_v12 = vmul.f32 %v12753_v27, %v6614_v50 }
 0x68b   :  { %v6635_v41 = vmul.f32 %v12753_v27, %v6613_v11  ;;  %v6658_v5 = vadd.f32 %v12759_v52, %v6636_v12 }
 0x68d   :  { %v6657_v48 = vadd.f32 %v12759_v52, %v6635_v41 }
 0x68f   :  { %7355 = vmatmul.mubr.msk.f32.gmra.mxu1 %vm66_vm0, %v6657_v48 }
 0x690   :  { %v6554_v10 = vpop.xlane.xlu1 %6553  ;;  %6869 = vmatprep.mubr.f32.mxu1 %v13582_v4 }
 0x691   :  { %v6570_v24 = vmul.f32 0.015625, %v6554_v10 }
 0x692   :  { %v6551_v60 = vpop.xlane.xlu0 %6550 }
 0x693   :  { %v6586_v42 = vadd.f32 1e-05, %v6570_v24  ;;  %v6569_v40 = vmul.f32 0.015625, %v6551_v60  ;;  %7356 = vmatmul.mubr.msk.f32.gmra.mxu1 %vm66_vm0, %v6658_v5 }
 0x694   :  { %v8289_v36 = vpop.eup %8288  ;;  %6875 = vmatprep.mubr.f32.mxu1 %v13582_v4 }
 0x695   :  { %8292 = vrsqrt.f32 %v6586_v42  ;;  %v6585_v17 = vadd.f32 1e-05, %v6569_v40  ;;  %v6616_v47 = vmul.f32 %v8289_v36, %v12725_v38 }
 0x696   :  { %v8291_v23 = vpop.eup %8290 }
 0x697   :  { %8294 = vrsqrt.f32 %v6585_v17  ;;  %v6615_v7 = vmul.f32 %v8291_v23, %v12728_v28  ;;  %v6638_v16 = vmul.f32 %v12753_v27, %v6616_v47 }
 0x699   :  { %v6637_v22 = vmul.f32 %v12753_v27, %v6615_v7  ;;  %v6660_v58 = vadd.f32 %v12759_v52, %v6638_v16 }
 0x69b   :  { %v6659_v62 = vadd.f32 %v12759_v52, %v6637_v22 }
 0x69d   :  { %7357 = vmatmul.mubr.msk.f32.gmra.mxu1 %vm66_vm0, %v6659_v62 }
 0x69e   :  { %6881 = vmatprep.mubr.f32.mxu1 %v13582_v4 }
 0x6a1   :  { %7358 = vmatmul.mubr.msk.f32.gmra.mxu1 %vm66_vm0, %v6660_v58 }
 0x6a2   :  { %v8293_v21 = vpop.eup %8292  ;;  %6887 = vmatprep.mubr.f32.mxu1 %v13582_v4 }
 0x6a3   :  { %v6618_v38 = vmul.f32 %v8293_v21, %v12737_v57  ;;  %v6679_v57 = vld [vmem:[%s13038_s7] sm:$0x3] }
 0x6a4   :  { %v8295_v53 = vpop.eup %8294  ;;  %v12941_v2 = vrot.slane %v6679_v57, %v13584_v14 }
 0x6a5   :  { %v6617_v28 = vmul.f32 %v8295_v53, %v12740_v1  ;;  %v6640_v9 = vmul.f32 %v12753_v27, %v6618_v38  ;;  %v12937_v1 = vrot.slane %v6679_v57, %v8764_v44 }
 0x6a7   :  { %v6639_v25 = vmul.f32 %v12753_v27, %v6617_v28  ;;  %v6662_v59 = vadd.f32 %v12759_v52, %v6640_v9 }
 0x6a9   :  { %v6661_v33 = vadd.f32 %v12759_v52, %v6639_v25 }
 0x6ab   :  { %7359 = vmatmul.mubr.msk.f32.gmra.mxu1 %vm66_vm0, %v6661_v33 }
 0x6ac   :  { %6893 = vmatprep.mubr.f32.mxu1 %v13582_v4 }
 0x6af   :  { %7360 = vmatmul.mubr.msk.f32.gmra.mxu1 %vm66_vm0, %v6662_v59 }
 0x6de   :  { %v6805_v27 = vpop.f32.mrf.mxu1 }
 0x6df   :  { %v6806_v56 = vadd.f32 %v6805_v27, %v12937_v1 }
 0x6e0   :  { %v6807_v54 = vpop.f32.mrf.mxu1 }
 0x6e1   :  { %v6808_v4 = vadd.f32 %v6807_v54, %v12941_v2  ;;  %v6900_v43 = vmax.f32 %v6806_v56, 0.0 }
 0x6e2   :  { %v6811_v52 = vpop.f32.mrf.mxu1 }
 0x6e3   :  { %v6901_v61 = vmax.f32 %v6808_v4, 0.0  ;;  %v6812_v39 = vadd.f32 %v6811_v52, %v12937_v1 }
 0x6e4   :  { %v6813_v30 = vpop.f32.mrf.mxu1 }
 0x6e5   :  { %v6814_v20 = vadd.f32 %v6813_v30, %v12941_v2  ;;  %7028 = vmatprep.mubr.f32.mxu0 %v6901_v61  ;;  %v6902_v63 = vmax.f32 %v6812_v39, 0.0 }
 0x6e6   :  { %v6817_v44 = vpop.f32.mrf.mxu1  ;;  %7029 = vmatmul.mubr.f32.vlgmr.msra.gmra.mxu0 %v6900_v43 }
 0x6e7   :  { %v6903_v49 = vmax.f32 %v6814_v20, 0.0  ;;  %v6818_v35 = vadd.f32 %v6817_v44, %v12937_v1 }
 0x6e8   :  { %v6819_v51 = vpop.f32.mrf.mxu1 }
 0x6e9   :  { %v6820_v11 = vadd.f32 %v6819_v51, %v12941_v2  ;;  %7033 = vmatprep.mubr.f32.mxu0 %v6903_v49  ;;  %v6904_v10 = vmax.f32 %v6818_v35, 0.0 }
 0x6ea   :  { %v6823_v50 = vpop.f32.mrf.mxu1  ;;  %7034 = vmatmul.mubr.f32.gmra.mxu0 %v6902_v63 }
 0x6eb   :  { %v6905_v41 = vmax.f32 %v6820_v11, 0.0  ;;  %v6824_v24 = vadd.f32 %v6823_v50, %v12937_v1 }
 0x6ec   :  { %v6825_v48 = vpop.f32.mrf.mxu1 }
 0x6ed   :  { %v6826_v12 = vadd.f32 %v6825_v48, %v12941_v2  ;;  %7038 = vmatprep.mubr.f32.mxu0 %v6905_v41  ;;  %v6906_v40 = vmax.f32 %v6824_v24, 0.0 }
 0x6ee   :  { %v6829_v60 = vpop.f32.mrf.mxu1  ;;  %7039 = vmatmul.mubr.f32.gmra.mxu0 %v6904_v10 }
 0x6ef   :  { %v6907_v42 = vmax.f32 %v6826_v12, 0.0  ;;  %v6830_v17 = vadd.f32 %v6829_v60, %v12937_v1 }
 0x6f0   :  { %v6831_v5 = vpop.f32.mrf.mxu1 }
 0x6f1   :  { %v6832_v36 = vadd.f32 %v6831_v5, %v12941_v2  ;;  %7043 = vmatprep.mubr.f32.mxu0 %v6907_v42  ;;  %v6908_v7 = vmax.f32 %v6830_v17, 0.0 }
 0x6f2   :  { %v6835_v23 = vpop.f32.mrf.mxu1  ;;  %7044 = vmatmul.mubr.f32.gmra.mxu0 %v6906_v40 }
 0x6f3   :  { %v6909_v47 = vmax.f32 %v6832_v36, 0.0  ;;  %v6836_v22 = vadd.f32 %v6835_v23, %v12937_v1 }
 0x6f4   :  { %v6837_v62 = vpop.f32.mrf.mxu1 }
 0x6f5   :  { %v6838_v16 = vadd.f32 %v6837_v62, %v12941_v2  ;;  %7048 = vmatprep.mubr.f32.mxu0 %v6909_v47  ;;  %v6910_v53 = vmax.f32 %v6836_v22, 0.0 }
 0x6f6   :  { %v6841_v58 = vpop.f32.mrf.mxu1  ;;  %7049 = vmatmul.mubr.f32.gmra.mxu0 %v6908_v7 }
 0x6f7   :  { %v6911_v21 = vmax.f32 %v6838_v16, 0.0  ;;  %v6842_v38 = vadd.f32 %v6841_v58, %v12937_v1 }
 0x6f8   :  { %v6843_v28 = vpop.f32.mrf.mxu1 }
 0x6f9   :  { %v6844_v25 = vadd.f32 %v6843_v28, %v12941_v2  ;;  %7053 = vmatprep.mubr.f32.mxu0 %v6911_v21  ;;  %v6912_v59 = vmax.f32 %v6842_v38, 0.0 }
 0x6fa   :  { %v6847_v33 = vpop.f32.mrf.mxu1  ;;  %7054 = vmatmul.mubr.f32.gmra.mxu0 %v6910_v53 }
 0x6fb   :  { %v6913_v9 = vmax.f32 %v6844_v25, 0.0  ;;  %v6848_v57 = vadd.f32 %v6847_v33, %v12937_v1 }
 0x6fc   :  { %v6849_v13 = vpop.f32.mrf.mxu1 }
 0x6fd   :  { %v6850_v14 = vadd.f32 %v6849_v13, %v12941_v2  ;;  %7058 = vmatprep.mubr.f32.mxu0 %v6913_v9  ;;  %v6914_v56 = vmax.f32 %v6848_v57, 0.0 }
 0x6fe   :  { %7059 = vmatmul.mubr.f32.gmra.mxu0 %v6912_v59 }
 0x6ff   :  { %v6915_v27 = vmax.f32 %v6850_v14, 0.0 }
 0x701   :  { %7063 = vmatprep.mubr.f32.mxu0 %v6915_v27 }
 0x702   :  { %7064 = vmatmul.mubr.f32.gmra.mxu0 %v6914_v56 }
 0x73c   :  { %v6853_v54 = vpop.f32.mrf.mxu1 }
 0x73d   :  { %v6854_v4 = vadd.f32 %v6853_v54, %v12937_v1 }
 0x73e   :  { %v6855_v52 = vpop.f32.mrf.mxu1 }
 0x73f   :  { %v6856_v61 = vadd.f32 %v6855_v52, %v12941_v2  ;;  %v6916_v30 = vmax.f32 %v6854_v4, 0.0 }
 0x740   :  { %v6859_v43 = vpop.f32.mrf.mxu1 }
 0x741   :  { %v6917_v39 = vmax.f32 %v6856_v61, 0.0  ;;  %v6860_v20 = vadd.f32 %v6859_v43, %v12937_v1 }
 0x742   :  { %v6861_v44 = vpop.f32.mrf.mxu1 }
 0x743   :  { %v6862_v49 = vadd.f32 %v6861_v44, %v12941_v2  ;;  %7068 = vmatprep.mubr.f32.mxu0 %v6917_v39  ;;  %v6918_v35 = vmax.f32 %v6860_v20, 0.0  ;;  %v12978_v39 = vld [vmem:[%s13040_s9] ss:$0 sm:$0xff]  ;;  %s8337_s9 = smov [#allocation2]  }
 0x744   :  { %7069 = vmatmul.mubr.f32.gmra.mxu0 %v6916_v30  ;;  %s7169_s15 = sshll.u32 %s8337_s9, 4  ;;  %s7170_s15 = int_to_ptr.vmem [resolvable:$true] %s7169_s15 }
 0x745   :  { %v6919_v63 = vmax.f32 %v6862_v49, 0.0  ;;  %s8312_s10 = scalar_lea.vmem %s7170_s15, 2048  ;;  %p8317_p1 = scmp.lt.s32.totalorder %s7170_s15, %s7170_s15 }
 0x746   :  { %p8313_p0 = scmp.ne.s32.totalorder %s7170_s15, %s8312_s10  ;;  %p8318_p2 = scmp.lt.s32.totalorder %s8312_s10, %s8312_s10 }
 0x747   :  { %7073 = vmatprep.mubr.f32.mxu0 %v6919_v63 }
 0x748   :  { %7074 = vmatmul.mubr.f32.gmra.mxu0 %v6918_v35  ;;  %p8319_p3 = por %p8318_p2, %p8317_p1 }
 0x74a   :  { %p8320_p4 = pnand %p8319_p3, %p8313_p0 }
 0x74f   :  { %v6865_v51 = vpop.f32.mrf.mxu1 }
 0x750   :  { %v6866_v11 = vadd.f32 %v6865_v51, %v12937_v1 }
 0x751   :  { %v6867_v50 = vpop.f32.mrf.mxu1 }
 0x752   :  { %v6868_v41 = vadd.f32 %v6867_v50, %v12941_v2  ;;  %v6920_v48 = vmax.f32 %v6866_v11, 0.0 }
 0x753   :  { %v6871_v10 = vpop.f32.mrf.mxu1 }
 0x754   :  { %v6921_v24 = vmax.f32 %v6868_v41, 0.0  ;;  %v6872_v12 = vadd.f32 %v6871_v10, %v12937_v1 }
 0x755   :  { %v6873_v60 = vpop.f32.mrf.mxu1 }
 0x756   :  { %v6874_v42 = vadd.f32 %v6873_v60, %v12941_v2  ;;  %7078 = vmatprep.mubr.f32.mxu0 %v6921_v24  ;;  %v6922_v17 = vmax.f32 %v6872_v12, 0.0 }
 0x757   :  { %7079 = vmatmul.mubr.f32.gmra.mxu0 %v6920_v48 }
 0x758   :  { %v6923_v40 = vmax.f32 %v6874_v42, 0.0 }
 0x75a   :  { %7083 = vmatprep.mubr.f32.mxu0 %v6923_v40 }
 0x75b   :  { %7084 = vmatmul.mubr.f32.gmra.mxu0 %v6922_v17 }
 0x75d   :  { %v6877_v5 = vpop.f32.mrf.mxu1 }
 0x75e   :  { %v6878_v36 = vadd.f32 %v6877_v5, %v12937_v1 }
 0x75f   :  { %v6879_v23 = vpop.f32.mrf.mxu1 }
 0x760   :  { %v6880_v47 = vadd.f32 %v6879_v23, %v12941_v2  ;;  %v6924_v62 = vmax.f32 %v6878_v36, 0.0 }
 0x761   :  { %v6883_v7 = vpop.f32.mrf.mxu1 }
 0x762   :  { %v6925_v22 = vmax.f32 %v6880_v47, 0.0  ;;  %v6884_v16 = vadd.f32 %v6883_v7, %v12937_v1 }
 0x763   :  { %v6885_v58 = vpop.f32.mrf.mxu1 }
 0x764   :  { %v6886_v21 = vadd.f32 %v6885_v58, %v12941_v2  ;;  %7088 = vmatprep.mubr.f32.mxu0 %v6925_v22  ;;  %v6926_v38 = vmax.f32 %v6884_v16, 0.0 }
 0x765   :  { %7089 = vmatmul.mubr.f32.gmra.mxu0 %v6924_v62 }
 0x766   :  { %v6927_v53 = vmax.f32 %v6886_v21, 0.0 }
 0x768   :  { %7093 = vmatprep.mubr.f32.mxu0 %v6927_v53 }
 0x769   :  { %7094 = vmatmul.mubr.f32.gmra.mxu0 %v6926_v38 }
 0x76b   :  { %v6889_v28 = vpop.f32.mrf.mxu1 }
 0x76c   :  { %v6890_v25 = vadd.f32 %v6889_v28, %v12937_v1 }
 0x76d   :  { %v6891_v33 = vpop.f32.mrf.mxu1 }
 0x76e   :  { %v6892_v9 = vadd.f32 %v6891_v33, %v12941_v2  ;;  %v6928_v13 = vmax.f32 %v6890_v25, 0.0 }
 0x76f   :  { %v6895_v59 = vpop.f32.mrf.mxu1 }
 0x770   :  { %v6929_v57 = vmax.f32 %v6892_v9, 0.0  ;;  %v6896_v14 = vadd.f32 %v6895_v59, %v12937_v1 }
 0x771   :  { %v6897_v27 = vpop.f32.mrf.mxu1 }
 0x772   :  { %v6898_v56 = vadd.f32 %v6897_v27, %v12941_v2  ;;  %7098 = vmatprep.mubr.f32.mxu0 %v6929_v57  ;;  %v6930_v4 = vmax.f32 %v6896_v14, 0.0 }
 0x773   :  { %7099 = vmatmul.mubr.f32.gmra.mxu0 %v6928_v13 }
 0x774   :  { %v6931_v54 = vmax.f32 %v6898_v56, 0.0 }
 0x776   :  { %7103 = vmatprep.mubr.f32.mxu0 %v6931_v54 }
 0x777   :  { %7104 = vmatmul.mubr.f32.gmra.mxu0 %v6930_v4 }
 0x7a6   :  { %v7578_v52 = vpop.f32.mrf.mxu0 }
 0x7a8   :  { %v7579_v61 = vpop.f32.mrf.mxu0 }
 0x7a9   :  { %v7580_v43 = vadd.f32 %v7579_v61, %v7578_v52 }
 0x7aa   :  { %v7581_v30 = vpop.f32.mrf.mxu0 }
 0x7ab   :  { %v7109_v1 = vadd.f32 %v7580_v43, %v12484_v19 }
 0x7ac   :  { %v7582_v20 = vpop.f32.mrf.mxu0 }
 0x7ad   :  { %v7132_v2 = vadd.f32 %v12978_v39, %v7109_v1  ;;  %v7583_v44 = vadd.f32 %v7582_v20, %v7581_v30 }
 0x7ae   :  { %v7584_v49 = vpop.f32.mrf.mxu0 }
 0x7af   :  { %7148 = vst.msk [vmem:[#allocation2] sm:$0xff] %vm66_vm0, %v7132_v2  ;;  %v7110_v63 = vadd.f32 %v7583_v44, %v12477_v32 }
 0x7b0   :  { %v7585_v35 = vpop.f32.mrf.mxu0 }
 0x7b1   :  { %v7133_v51 = vadd.f32 %v12978_v39, %v7110_v63  ;;  %v7586_v11 = vadd.f32 %v7585_v35, %v7584_v49 }
 0x7b2   :  { %v7587_v50 = vpop.f32.mrf.mxu0 }
 0x7b3   :  { %7149 = vst.msk [vmem:[#allocation2 + $0x8] sm:$0xff] %vm66_vm0, %v7133_v51  ;;  %v7111_v41 = vadd.f32 %v7586_v11, %v12499_v45 }
 0x7b4   :  { %v7588_v10 = vpop.f32.mrf.mxu0 }
 0x7b5   :  { %v7134_v19 = vadd.f32 %v12978_v39, %v7111_v41  ;;  %v7589_v24 = vadd.f32 %v7588_v10, %v7587_v50 }
 0x7b6   :  { %v7590_v48 = vpop.f32.mrf.mxu0 }
 0x7b7   :  { %7150 = vst.msk [vmem:[#allocation2 + $0x10] sm:$0xff] %vm66_vm0, %v7134_v19  ;;  %v7112_v12 = vadd.f32 %v7589_v24, %v12502_v26 }
 0x7b8   :  { %v7591_v60 = vpop.f32.mrf.mxu0 }
 0x7b9   :  { %v7135_v32 = vadd.f32 %v12978_v39, %v7112_v12  ;;  %v7592_v42 = vadd.f32 %v7591_v60, %v7590_v48 }
 0x7ba   :  { %v7593_v40 = vpop.f32.mrf.mxu0 }
 0x7bb   :  { %7151 = vst.msk [vmem:[#allocation2 + $0x18] sm:$0xff] %vm66_vm0, %v7135_v32  ;;  %v7113_v17 = vadd.f32 %v7592_v42, %v12518_v55 }
 0x7bc   :  { %v7594_v5 = vpop.f32.mrf.mxu0 }
 0x7bd   :  { %v7136_v45 = vadd.f32 %v12978_v39, %v7113_v17  ;;  %v7595_v36 = vadd.f32 %v7594_v5, %v7593_v40 }
 0x7be   :  { %v7596_v23 = vpop.f32.mrf.mxu0 }
 0x7bf   :  { %7152 = vst.msk [vmem:[#allocation2 + $0x20] sm:$0xff] %vm66_vm0, %v7136_v45  ;;  %v7114_v47 = vadd.f32 %v7595_v36, %v12512_v6 }
 0x7c0   :  { %v7597_v7 = vpop.f32.mrf.mxu0 }
 0x7c1   :  { %v7137_v26 = vadd.f32 %v12978_v39, %v7114_v47  ;;  %v7598_v22 = vadd.f32 %v7597_v7, %v7596_v23 }
 0x7c2   :  { %v7599_v62 = vpop.f32.mrf.mxu0 }
 0x7c3   :  { %7153 = vst.msk [vmem:[#allocation2 + $0x28] sm:$0xff] %vm66_vm0, %v7137_v26  ;;  %v7115_v16 = vadd.f32 %v7598_v22, %v12534_v3 }
 0x7c4   :  { %v7600_v58 = vpop.f32.mrf.mxu0 }
 0x7c5   :  { %v7138_v55 = vadd.f32 %v12978_v39, %v7115_v16  ;;  %v7601_v21 = vadd.f32 %v7600_v58, %v7599_v62 }
 0x7c7   :  { %7154 = vst.msk [vmem:[#allocation2 + $0x30] sm:$0xff] %vm66_vm0, %v7138_v55  ;;  %v7116_v53 = vadd.f32 %v7601_v21, %v12528_v46 }
 0x7c9   :  { %v7139_v38 = vadd.f32 %v12978_v39, %v7116_v53 }
 0x7cb   :  { %7155 = vst.msk [vmem:[#allocation2 + $0x38] sm:$0xff] %vm66_vm0, %v7139_v38 }
 0x804   :  { %v7602_v6 = vpop.f32.mrf.mxu0 }
 0x806   :  { %v7603_v28 = vpop.f32.mrf.mxu0 }
 0x807   :  { %v7604_v25 = vadd.f32 %v7603_v28, %v7602_v6 }
 0x808   :  { %v7605_v33 = vpop.f32.mrf.mxu0 }
 0x809   :  { %v7117_v9 = vadd.f32 %v7604_v25, %v12550_v31 }
 0x80a   :  { %v7606_v59 = vpop.f32.mrf.mxu0 }
 0x80b   :  { %v7140_v3 = vadd.f32 %v12978_v39, %v7117_v9  ;;  %v7607_v57 = vadd.f32 %v7606_v59, %v7605_v33 }
 0x80d   :  { %7156 = vst.msk [vmem:[#allocation2 + $0x40] sm:$0xff] %vm66_vm0, %v7140_v3  ;;  %v7118_v13 = vadd.f32 %v7607_v57, %v12544_v8 }
 0x80f   :  { %v7141_v46 = vadd.f32 %v12978_v39, %v7118_v13 }
 0x811   :  { %7157 = vst.msk [vmem:[#allocation2 + $0x48] sm:$0xff] %vm66_vm0, %v7141_v46 }
 0x817   :  { %v7608_v14 = vpop.f32.mrf.mxu0 }
 0x819   :  { %v7609_v27 = vpop.f32.mrf.mxu0 }
 0x81a   :  { %v7610_v56 = vadd.f32 %v7609_v27, %v7608_v14 }
 0x81b   :  { %v7611_v54 = vpop.f32.mrf.mxu0 }
 0x81c   :  { %v7119_v4 = vadd.f32 %v7610_v56, %v12566_v34 }
 0x81d   :  { %v7612_v52 = vpop.f32.mrf.mxu0 }
 0x81e   :  { %v7142_v31 = vadd.f32 %v12978_v39, %v7119_v4  ;;  %v7613_v61 = vadd.f32 %v7612_v52, %v7611_v54 }
 0x820   :  { %7158 = vst.msk [vmem:[#allocation2 + $0x50] sm:$0xff] %vm66_vm0, %v7142_v31  ;;  %v7120_v43 = vadd.f32 %v7613_v61, %v12560_v37 }
 0x822   :  { %v7143_v8 = vadd.f32 %v12978_v39, %v7120_v43 }
 0x824   :  { %7159 = vst.msk [vmem:[#allocation2 + $0x58] sm:$0xff] %vm66_vm0, %v7143_v8 }
 0x825   :  { %v7614_v30 = vpop.f32.mrf.mxu0 }
 0x827   :  { %v7615_v1 = vpop.f32.mrf.mxu0 }
 0x828   :  { %v7616_v20 = vadd.f32 %v7615_v1, %v7614_v30 }
 0x829   :  { %v7617_v2 = vpop.f32.mrf.mxu0 }
 0x82a   :  { %v7121_v44 = vadd.f32 %v7616_v20, %v12582_v15 }
 0x82b   :  { %v7618_v49 = vpop.f32.mrf.mxu0 }
 0x82c   :  { %v7144_v34 = vadd.f32 %v12978_v39, %v7121_v44  ;;  %v7619_v63 = vadd.f32 %v7618_v49, %v7617_v2 }
 0x82e   :  { %7160 = vst.msk [vmem:[#allocation2 + $0x60] sm:$0xff] %vm66_vm0, %v7144_v34  ;;  %v7122_v35 = vadd.f32 %v7619_v63, %v12576_v18 }
 0x830   :  { %v7145_v37 = vadd.f32 %v12978_v39, %v7122_v35 }
 0x832   :  { %7161 = vst.msk [vmem:[#allocation2 + $0x68] sm:$0xff] %vm66_vm0, %v7145_v37 }
 0x833   :  { %v7620_v51 = vpop.f32.mrf.mxu0 }
 0x835   :  { %v7621_v11 = vpop.f32.mrf.mxu0 }
 0x836   :  { %v7622_v50 = vadd.f32 %v7621_v11, %v7620_v51 }
 0x837   :  { %v7623_v41 = vpop.f32.mrf.mxu0 }
 0x838   :  { %v7123_v10 = vadd.f32 %v7622_v50, %v12609_v29 }
 0x839   :  { %v7624_v19 = vpop.f32.mrf.mxu0 }
 0x83a   :  { %v7146_v15 = vadd.f32 %v12978_v39, %v7123_v10  ;;  %v7625_v24 = vadd.f32 %v7624_v19, %v7623_v41 }
 0x83c   :  { %7162 = vst.msk [vmem:[#allocation2 + $0x70] sm:$0xff] %vm66_vm0, %v7146_v15  ;;  %v7124_v18 = vadd.f32 %v7625_v24, %v12598_v0 }
 0x83e   :  { %v7147_v48 = vadd.f32 %v12978_v39, %v7124_v18 }
 0x840   :  { %7163 = vst.msk [vmem:[#allocation2 + $0x78] sm:$0xff] %vm66_vm0, %v7147_v48 }
 0x841   :  { %8323 = shalt.err (!%p8320_p4)
}
 0x842   :  { %s8338_s11 = smov 128   ;;  %s8339_s0 = smov 8  }
 0x843   :  { %7175 = dma.vmem_to_hbm [thread:$0]  %s7170_s15, 2048, %s13045_s14, [#allocation3], %s8338_s11, %s8338_s11, %s8339_s0  }
 0x844   :  { %8332 = dma.done.wait [#allocation3], 2048  }
 0x845   :  { %8333 = vsyncadd [#allocation3], 4294965248 }
 0x846   :  { %7179 = vsyncpa [#allocation3], 1 }

</bundles_post_ra>
